<compile_context>
chip_gen: v7x
topology: tpu7x:2x2x1
jax: 0.10.0
libtpu: 0.0.40
codegen_flags: <defaults>
</compile_context>

<pallas_src>
import jax
import jax.numpy as jnp
from jax.experimental import pallas as pl
from jax.experimental.pallas import tpu as pltpu

F32 = jnp.float32
BF16 = jnp.bfloat16
LN_EPS = 1e-5


def _round_up(a, b):
    return (a + b - 1) // b * b


# ----------------------------------------------------------------------------
# Per-generation VMEM budget / default row tile
# ----------------------------------------------------------------------------
def _tpu_budget():
    vmem_bytes = 64 << 20          # conservative default (v7x physical / TC)
    try:
        info = pltpu.get_tpu_info()
        v = getattr(info, "vmem_capacity_bytes", None)
        if v:
            vmem_bytes = int(v)
    except Exception:
        pass
    # Leave headroom for compiler-internal scratch.
    vmem_limit = min(int(vmem_bytes * 3 // 4), 100 << 20)
    default_tile = 512 if vmem_bytes >= (96 << 20) else 256
    return default_tile, vmem_limit


_DEFAULT_ROW_TILE, _VMEM_LIMIT = _tpu_budget()


def _choose_row_tile(m, in_row_bytes, out_row_bytes, work_f32_cols,
                     const_bytes, row_tile):
    """Largest row tile whose VMEM footprint fits the per-chip budget."""
    budget = max(_VMEM_LIMIT - const_bytes - (4 << 20), 2 << 20)
    # 2x for the double-buffered row-tiled input/output, plus f32 working set.
    per_row = 2 * (in_row_bytes + out_row_bytes) + 4 * work_f32_cols
    tm = min(row_tile, _round_up(m, 8))
    tm = max(_round_up(tm, 8), 8)
    while tm > 8 and tm * per_row > budget:
        tm = max(_round_up(tm // 2, 8), 8)
    return tm


# ----------------------------------------------------------------------------
# In-kernel math helpers (f32, VPU/EUP only -> safe Mosaic lowering)
# ----------------------------------------------------------------------------
def _erf_approx(x):
    """Abramowitz & Stegun 7.1.26 erf approximation, |error| < 1.5e-7."""
    a = jnp.abs(x)
    t = pl.reciprocal(1.0 + 0.3275911 * a, approx=True)   # EUP, not VALU divide
    poly = t * (0.254829592
                + t * (-0.284496736
                       + t * (1.421413741
                              + t * (-1.453152027 + t * 1.061405429))))
    e = 1.0 - poly * jnp.exp(-a * a)
    return jnp.where(x < 0, -e, e)


def _gelu_erf(y):
    """Erf-based GELU (PyTorch nn.GELU default)."""
    return 0.5 * y * (1.0 + _erf_approx(y * 0.7071067811865476))


def _layernorm_f32(x, g, b):
    """Single-pass LayerNorm: mean and mean-of-squares reduced independently."""
    mu = jnp.mean(x, axis=-1, keepdims=True)
    ms = jnp.mean(x * x, axis=-1, keepdims=True)
    inv = jax.lax.rsqrt(ms - mu * mu + LN_EPS)
    return (x - mu) * inv * g + b


# ----------------------------------------------------------------------------
# Kernels
# ----------------------------------------------------------------------------
def _layernorm_kernel(x_ref, g_ref, b_ref, o_ref):
    """Standalone PreNorm norm: LayerNorm over the (lane) feature axis."""
    x = x_ref[...].astype(jnp.float32)
    o_ref[...] = _layernorm_f32(x, g_ref[...], b_ref[...]).astype(o_ref.dtype)


def _make_linear_kernel(act):
    """y = act(x @ W + b); bf16 MXU operands, f32 accumulation, f32 epilogue."""
    def kernel(x_ref, w_ref, b_ref, o_ref):
        y = jnp.dot(x_ref[...].astype(BF16), w_ref[...],
                    preferred_element_type=jnp.float32)
        y = y + b_ref[...]
        if act == "gelu":
            y = _gelu_erf(y)
        o_ref[...] = y.astype(o_ref.dtype)
    return kernel


_linear_none = _make_linear_kernel("none")
_linear_gelu = _make_linear_kernel("gelu")


def _prenorm_ff_kernel(x_ref, g_ref, b_ref, w1_ref, b1_ref, w2_ref, b2_ref, o_ref):
    """Fully fused PreNorm(FeedForward): LN -> Linear -> GELU(erf) -> Linear.

    LN / GELU run in f32 on the VMEM-resident tile; both matmuls use bf16
    operands with f32 accumulation.  One pallas_call per row tile.
    """
    x = x_ref[...].astype(jnp.float32)
    xn = _layernorm_f32(x, g_ref[...], b_ref[...])
    h = jnp.dot(xn.astype(BF16), w1_ref[...], preferred_element_type=jnp.float32)
    h = _gelu_erf(h + b1_ref[...])
    y = jnp.dot(h.astype(BF16), w2_ref[...], preferred_element_type=jnp.float32)
    o_ref[...] = (y + b2_ref[...]).astype(o_ref.dtype)


# ----------------------------------------------------------------------------
# Row-tiled pallas_call wrapper
# ----------------------------------------------------------------------------
def _const_spec(shape, single_buffer):
    ndim = len(shape)
    index_map = lambda i, _n=ndim: (0,) * _n
    if single_buffer:
        # Constant index_map -> DMA only once; single-buffer to halve its VMEM.
        return pl.BlockSpec(shape, index_map, pipeline_mode=pl.Buffered(1))
    return pl.BlockSpec(shape, index_map)


def _call_rowtiled(kernel, x2d, const_args, out_dim, out_dtype=F32,
                   work_f32_cols=None, row_tile=None):
    """Run `kernel(x_tile, *consts, out_tile)` tiled over the row axis.

    x2d: (M, Din) in its native dtype (upcast happens inside the kernel).
    The feature axis stays whole (lane-dense when a multiple of 128);
    constants (weights / scale / bias) are whole-array blocks resident across
    grid steps.  The row axis is "parallel" (megacore) and the last block is
    masked automatically (no host-side pad/slice).
    """
    M, Din = x2d.shape
    if row_tile is None:
        row_tile = _DEFAULT_ROW_TILE
    if work_f32_cols is None:
        work_f32_cols = Din + out_dim

    const_bytes = int(sum(int(c.size) * c.dtype.itemsize for c in const_args))
    in_row_bytes = Din * x2d.dtype.itemsize
    out_row_bytes = out_dim * jnp.dtype(out_dtype).itemsize
    TM = _choose_row_tile(M, in_row_bytes, out_row_bytes, work_f32_cols,
                          const_bytes, row_tile)

    def _run(single_buffer_consts):
        in_specs = [pl.BlockSpec((TM, Din), lambda i: (i, 0))]
        in_specs += [_const_spec(tuple(c.shape), single_buffer_consts)
                     for c in const_args]
        return pl.pallas_call(
            kernel,
            out_shape=jax.ShapeDtypeStruct((M, out_dim), out_dtype),
            grid=(pl.cdiv(M, TM),),
            in_specs=in_specs,
            out_specs=pl.BlockSpec((TM, out_dim), lambda i: (i, 0)),
            compiler_params=pltpu.CompilerParams(
                dimension_semantics=("parallel",),
                vmem_limit_bytes=_VMEM_LIMIT),
        )(x2d, *const_args)

    try:
        return _run(True)
    except Exception:
        # Older jax/libtpu builds may reject Buffered(1); fall back to default
        # double-buffered constant specs (correctness identical).
        return _run(False)


# ----------------------------------------------------------------------------
# Python wrappers (building blocks)
# ----------------------------------------------------------------------------
def layer_norm(x2d, gamma, beta, out_dtype=F32, row_tile=None):
    D = x2d.shape[-1]
    return _call_rowtiled(
        _layernorm_kernel, x2d,
        (gamma.reshape(1, D).astype(F32), beta.reshape(1, D).astype(F32)),
        D, out_dtype=out_dtype, work_f32_cols=2 * D, row_tile=row_tile)


def linear(x2d, w_io, bias, act="none", out_dtype=F32, row_tile=None):
    """PyTorch Linear with weights pre-stored as (in, out) bf16."""
    Din, Dout = w_io.shape
    kern = _linear_gelu if act == "gelu" else _linear_none
    return _call_rowtiled(
        kern, x2d, (w_io, bias.reshape(1, Dout).astype(F32)),
        Dout, out_dtype=out_dtype, work_f32_cols=Din + 2 * Dout,
        row_tile=row_tile)


# ----------------------------------------------------------------------------
# Modules (mirroring the PyTorch classes, eval mode: Dropout == identity)
# ----------------------------------------------------------------------------
class FeedForward:
    """The `fn` PreNorm wraps in adv_vits: Linear -> GELU -> Linear.

    Weights stored pre-transposed (in, out) and pre-cast to bf16 once.
    """
    def __init__(self, dim, hidden_dim, key):
        k1, k2 = jax.random.split(key)
        self.w1 = (0.02 * jax.random.normal(k1, (dim, hidden_dim), F32)).astype(BF16)
        self.b1 = jnp.zeros((hidden_dim,), F32)
        self.w2 = (0.02 * jax.random.normal(k2, (hidden_dim, dim), F32)).astype(BF16)
        self.b2 = jnp.zeros((dim,), F32)

    def __call__(self, x):
        D = x.shape[-1]
        # Hidden activation written back in bf16 (the second matmul consumes
        # bf16 anyway) -> halves the dominant HBM traffic on this path.
        h = linear(x.reshape(-1, D), self.w1, self.b1, act="gelu", out_dtype=BF16)
        return linear(h, self.w2, self.b2, out_dtype=x.dtype).reshape(x.shape)


class PreNorm:
    """PreNorm(dim, fn): y = fn(LayerNorm(x), **kwargs).

    If `fn` is the FeedForward above (the adv_vits use case), the whole
    PreNorm sub-block runs as a single fused Pallas kernel per row tile.
    Otherwise the tiled LayerNorm kernel runs and `fn` is called on its output
    (exact reference semantics for arbitrary fn).
    """
    def __init__(self, dim, fn):
        self.dim = dim
        self.fn = fn
        self.gamma = jnp.ones((dim,), F32)   # nn.LayerNorm affine defaults
        self.beta = jnp.zeros((dim,), F32)

    def __call__(self, x, fused=True, out_dtype=None, **kwargs):
        D = x.shape[-1]
        if fused and isinstance(self.fn, FeedForward) and not kwargs:
            ff = self.fn
            H = ff.w1.shape[1]
            odt = x.dtype if out_dtype is None else out_dtype
            out = _call_rowtiled(
                _prenorm_ff_kernel, x.reshape(-1, D),
                (self.gamma.reshape(1, D).astype(F32),
                 self.beta.reshape(1, D).astype(F32),
                 ff.w1, ff.b1.reshape(1, H).astype(F32),
                 ff.w2, ff.b2.reshape(1, D).astype(F32)),
                out_dim=D, out_dtype=odt,
                work_f32_cols=2 * D + H)
            return out.reshape(x.shape)
        # generic path: tiled Pallas LayerNorm, then arbitrary fn
        y = layer_norm(x.reshape(-1, D), self.gamma, self.beta).reshape(x.shape)
        return self.fn(y, **kwargs)


# ----------------------------------------------------------------------------
# Pure-JAX reference (PyTorch semantics: f32, erf GELU, LayerNorm eps=1e-5)
# ----------------------------------------------------------------------------
def _reference(x, gamma, beta, ff):
    mu = jnp.mean(x, axis=-1, keepdims=True)
    var = jnp.mean(jnp.square(x - mu), axis=-1, keepdims=True)
    xn = (x - mu) * jax.lax.rsqrt(var + LN_EPS) * gamma + beta
    h = jax.nn.gelu(xn @ ff.w1.astype(F32) + ff.b1, approximate=False)
    return h @ ff.w2.astype(F32) + ff.b2


if __name__ == "__main__":
    key = jax.random.PRNGKey(0)
    kx, kff, kg, kb, kb1, kb2 = jax.random.split(key, 6)

    # Small but lane-dense shapes: feature dims are multiples of 128 so every
    # kernel output is a dense 128-lane slab; M = B*N = 512 rows.
    B, N, dim, hidden = 2, 256, 128, 256
    x = jax.random.normal(kx, (B, N, dim), F32)

    ff = FeedForward(dim, hidden, kff)
    ff.b1 = 0.01 * jax.random.normal(kb1, (hidden,), F32)
    ff.b2 = 0.01 * jax.random.normal(kb2, (dim,), F32)

    block = PreNorm(dim, ff)
    block.gamma = 1.0 + 0.1 * jax.random.normal(kg, (dim,), F32)
    block.beta = 0.05 * jax.random.normal(kb, (dim,), F32)

    # Fused single-kernel PreNorm + FeedForward path.
    out_fused = block(x)
    jax.block_until_ready(out_fused)

    # Generic path: standalone tiled LayerNorm kernel + Pallas fn.
    out_generic = block(x, fused=False)
    jax.block_until_ready(out_generic)

    # Standalone LayerNorm kernel check (exact PreNorm.norm semantics).
    ln_k = layer_norm(x.reshape(-1, dim), block.gamma, block.beta).reshape(x.shape)
    mu = jnp.mean(x, axis=-1, keepdims=True)
    var = jnp.mean(jnp.square(x - mu), axis=-1, keepdims=True)
    ln_r = (x - mu) * jax.lax.rsqrt(var + LN_EPS) * block.gamma + block.beta

    ref = _reference(x, block.gamma, block.beta, ff)

    assert out_fused.shape == (B, N, dim)
    assert out_generic.shape == (B, N, dim)
    err_ln = float(jnp.max(jnp.abs(ln_k - ln_r)))
    err_f = float(jnp.max(jnp.abs(out_fused.astype(F32) - ref)))
    err_g = float(jnp.max(jnp.abs(out_generic.astype(F32) - ref)))
    assert err_ln < 1e-3, ("layernorm mismatch", err_ln)
    assert err_f < 2e-2 and err_g < 2e-2, ("prenorm mismatch", err_f, err_g)

    print("KERNEL_OK")
</pallas_src>

<mosaic_0001>
module attributes {stable_mosaic.version = 11 : i64} {
  func.func @_prenorm_ff_kernel(%arg0: i32, %arg1: memref<256x128xf32, #tpu.memory_space<vmem>>, %arg2: memref<1x128xf32, #tpu.memory_space<vmem>>, %arg3: memref<1x128xf32, #tpu.memory_space<vmem>>, %arg4: memref<128x256xbf16, #tpu.memory_space<vmem>>, %arg5: memref<1x256xf32, #tpu.memory_space<vmem>>, %arg6: memref<256x128xbf16, #tpu.memory_space<vmem>>, %arg7: memref<1x128xf32, #tpu.memory_space<vmem>>, %arg8: memref<256x128xf32, #tpu.memory_space<vmem>>) attributes {dimension_semantics = [#tpu.dimension_semantics<parallel>], iteration_bounds = array<i64: 2>, scalar_prefetch = 0 : i64, scratch_operands = 0 : i64, tpu.core_type = #tpu.core_type<tc>, window_params = [{transform_indices = @transform_0, window_bounds = array<i64: 256, 128>}, {pipeline_mode = #tpu.pipeline_mode<synchronous>, transform_indices = @transform_1, window_bounds = array<i64: 1, 128>}, {pipeline_mode = #tpu.pipeline_mode<synchronous>, transform_indices = @transform_2, window_bounds = array<i64: 1, 128>}, {pipeline_mode = #tpu.pipeline_mode<synchronous>, transform_indices = @transform_3, window_bounds = array<i64: 128, 256>}, {pipeline_mode = #tpu.pipeline_mode<synchronous>, transform_indices = @transform_4, window_bounds = array<i64: 1, 256>}, {pipeline_mode = #tpu.pipeline_mode<synchronous>, transform_indices = @transform_5, window_bounds = array<i64: 256, 128>}, {pipeline_mode = #tpu.pipeline_mode<synchronous>, transform_indices = @transform_6, window_bounds = array<i64: 1, 128>}, {transform_indices = @transform_7, window_bounds = array<i64: 256, 128>}]} {
    %c0 = arith.constant 0 : index
    %c0_0 = arith.constant 0 : index
    %0 = vector.load %arg1[%c0, %c0_0] : memref<256x128xf32, #tpu.memory_space<vmem>>, vector<256x128xf32>
    %c0_1 = arith.constant 0 : index
    %c0_2 = arith.constant 0 : index
    %1 = vector.load %arg2[%c0_1, %c0_2] : memref<1x128xf32, #tpu.memory_space<vmem>>, vector<1x128xf32>
    %c0_3 = arith.constant 0 : index
    %c0_4 = arith.constant 0 : index
    %2 = vector.load %arg3[%c0_3, %c0_4] : memref<1x128xf32, #tpu.memory_space<vmem>>, vector<1x128xf32>
    %cst = arith.constant dense<0.000000e+00> : vector<256xf32>
    %3 = vector.multi_reduction <add>, %0, %cst [1] : vector<256x128xf32> to vector<256xf32>
    %4 = vector.shape_cast %3 : vector<256xf32> to vector<256x1xf32>
    %cst_5 = arith.constant 1.280000e+02 : f32
    %5 = vector.broadcast %cst_5 : f32 to vector<256x1xf32>
    %6 = arith.divf %4, %5 : vector<256x1xf32>
    %7 = arith.mulf %0, %0 : vector<256x128xf32>
    %cst_6 = arith.constant dense<0.000000e+00> : vector<256xf32>
    %8 = vector.multi_reduction <add>, %7, %cst_6 [1] : vector<256x128xf32> to vector<256xf32>
    %9 = vector.shape_cast %8 : vector<256xf32> to vector<256x1xf32>
    %cst_7 = arith.constant 1.280000e+02 : f32
    %10 = vector.broadcast %cst_7 : f32 to vector<256x1xf32>
    %11 = arith.divf %9, %10 : vector<256x1xf32>
    %12 = arith.mulf %6, %6 : vector<256x1xf32>
    %13 = arith.subf %11, %12 : vector<256x1xf32>
    %cst_8 = arith.constant 9.99999974E-6 : f32
    %14 = vector.broadcast %cst_8 : f32 to vector<256x1xf32>
    %15 = arith.addf %13, %14 : vector<256x1xf32>
    %16 = math.rsqrt %15 : vector<256x1xf32>
    %17 = vector.broadcast %6 : vector<256x1xf32> to vector<256x128xf32>
    %18 = arith.subf %0, %17 : vector<256x128xf32>
    %19 = vector.broadcast %16 : vector<256x1xf32> to vector<256x128xf32>
    %20 = arith.mulf %18, %19 : vector<256x128xf32>
    %21 = vector.broadcast %1 : vector<1x128xf32> to vector<256x128xf32>
    %22 = arith.mulf %20, %21 : vector<256x128xf32>
    %23 = vector.broadcast %2 : vector<1x128xf32> to vector<256x128xf32>
    %24 = arith.addf %22, %23 : vector<256x128xf32>
    %25 = arith.truncf %24 : vector<256x128xf32> to vector<256x128xbf16>
    %c0_9 = arith.constant 0 : index
    %c0_10 = arith.constant 0 : index
    %26 = vector.load %arg4[%c0_9, %c0_10] : memref<128x256xbf16, #tpu.memory_space<vmem>>, vector<128x256xbf16>
    %cst_11 = arith.constant dense<0.000000e+00> : vector<256x256xf32>
    %27 = tpu.matmul %25, %26, %cst_11 {dimension_numbers = #tpu.dot_dimension_numbers<[1], [0], [0], [1], [0, 0, 1, 1], [], []>} : vector<256x128xbf16>, vector<128x256xbf16>, vector<256x256xf32> -> vector<256x256xf32>
    %c0_12 = arith.constant 0 : index
    %c0_13 = arith.constant 0 : index
    %28 = vector.load %arg5[%c0_12, %c0_13] : memref<1x256xf32, #tpu.memory_space<vmem>>, vector<1x256xf32>
    %29 = vector.broadcast %28 : vector<1x256xf32> to vector<256x256xf32>
    %30 = arith.addf %27, %29 : vector<256x256xf32>
    %cst_14 = arith.constant 5.000000e-01 : f32
    %31 = vector.broadcast %cst_14 : f32 to vector<256x256xf32>
    %32 = arith.mulf %31, %30 : vector<256x256xf32>
    %cst_15 = arith.constant 0.707106769 : f32
    %33 = vector.broadcast %cst_15 : f32 to vector<256x256xf32>
    %34 = arith.mulf %30, %33 : vector<256x256xf32>
    %35 = math.absf %34 : vector<256x256xf32>
    %cst_16 = arith.constant 0.327591091 : f32
    %36 = vector.broadcast %cst_16 : f32 to vector<256x256xf32>
    %37 = arith.mulf %36, %35 : vector<256x256xf32>
    %cst_17 = arith.constant 1.000000e+00 : f32
    %38 = vector.broadcast %cst_17 : f32 to vector<256x256xf32>
    %39 = arith.addf %38, %37 : vector<256x256xf32>
    %40 = tpu.reciprocal %39 {approx = true} : vector<256x256xf32> -> vector<256x256xf32>
    %cst_18 = arith.constant 1.06140542 : f32
    %41 = vector.broadcast %cst_18 : f32 to vector<256x256xf32>
    %42 = arith.mulf %40, %41 : vector<256x256xf32>
    %cst_19 = arith.constant -1.45315206 : f32
    %43 = vector.broadcast %cst_19 : f32 to vector<256x256xf32>
    %44 = arith.addf %43, %42 : vector<256x256xf32>
    %45 = arith.mulf %40, %44 : vector<256x256xf32>
    %cst_20 = arith.constant 1.42141378 : f32
    %46 = vector.broadcast %cst_20 : f32 to vector<256x256xf32>
    %47 = arith.addf %46, %45 : vector<256x256xf32>
    %48 = arith.mulf %40, %47 : vector<256x256xf32>
    %cst_21 = arith.constant -0.284496725 : f32
    %49 = vector.broadcast %cst_21 : f32 to vector<256x256xf32>
    %50 = arith.addf %49, %48 : vector<256x256xf32>
    %51 = arith.mulf %40, %50 : vector<256x256xf32>
    %cst_22 = arith.constant 0.254829586 : f32
    %52 = vector.broadcast %cst_22 : f32 to vector<256x256xf32>
    %53 = arith.addf %52, %51 : vector<256x256xf32>
    %54 = arith.mulf %40, %53 : vector<256x256xf32>
    %cst_23 = arith.constant 0.000000e+00 : f32
    %55 = vector.broadcast %cst_23 : f32 to vector<256x256xf32>
    %56 = arith.subf %55, %35 : vector<256x256xf32>
    %57 = arith.mulf %56, %35 : vector<256x256xf32>
    %58 = math.exp %57 : vector<256x256xf32>
    %59 = arith.mulf %54, %58 : vector<256x256xf32>
    %cst_24 = arith.constant 1.000000e+00 : f32
    %60 = vector.broadcast %cst_24 : f32 to vector<256x256xf32>
    %61 = arith.subf %60, %59 : vector<256x256xf32>
    %cst_25 = arith.constant 0.000000e+00 : f32
    %62 = vector.broadcast %cst_25 : f32 to vector<256x256xf32>
    %63 = arith.cmpf olt, %34, %62 : vector<256x256xf32>
    %cst_26 = arith.constant 0.000000e+00 : f32
    %64 = vector.broadcast %cst_26 : f32 to vector<256x256xf32>
    %65 = arith.subf %64, %61 : vector<256x256xf32>
    %66 = arith.select %63, %65, %61 : vector<256x256xi1>, vector<256x256xf32>
    %cst_27 = arith.constant 1.000000e+00 : f32
    %67 = vector.broadcast %cst_27 : f32 to vector<256x256xf32>
    %68 = arith.addf %67, %66 : vector<256x256xf32>
    %69 = arith.mulf %32, %68 : vector<256x256xf32>
    %70 = arith.truncf %69 : vector<256x256xf32> to vector<256x256xbf16>
    %c0_28 = arith.constant 0 : index
    %c0_29 = arith.constant 0 : index
    %71 = vector.load %arg6[%c0_28, %c0_29] : memref<256x128xbf16, #tpu.memory_space<vmem>>, vector<256x128xbf16>
    %cst_30 = arith.constant dense<0.000000e+00> : vector<256x128xf32>
    %72 = tpu.matmul %70, %71, %cst_30 {dimension_numbers = #tpu.dot_dimension_numbers<[1], [0], [0], [1], [0, 0, 1, 1], [], []>} : vector<256x256xbf16>, vector<256x128xbf16>, vector<256x128xf32> -> vector<256x128xf32>
    %c0_31 = arith.constant 0 : index
    %c0_32 = arith.constant 0 : index
    %73 = vector.load %arg7[%c0_31, %c0_32] : memref<1x128xf32, #tpu.memory_space<vmem>>, vector<1x128xf32>
    %74 = vector.broadcast %73 : vector<1x128xf32> to vector<256x128xf32>
    %75 = arith.addf %72, %74 : vector<256x128xf32>
    %c0_33 = arith.constant 0 : index
    %c0_34 = arith.constant 0 : index
    %76 = vector.load %arg8[%c0_33, %c0_34] : memref<256x128xf32, #tpu.memory_space<vmem>>, vector<256x128xf32>
    tpu.vector_store %arg8[%c0_33, %c0_34], %75 {strides = array<i32>} : memref<256x128xf32, #tpu.memory_space<vmem>>, vector<256x128xf32>,
    return
  }
  func.func @transform_0(%arg0: i32) -> (i32, i32) {
    %c0_i32 = arith.constant 0 : i32
    %c0_i32_0 = arith.constant 0 : i32
    return %arg0, %c0_i32 : i32, i32
  }
  func.func @transform_1(%arg0: i32) -> (i32, i32) {
    %c0_i32 = arith.constant 0 : i32
    %c0_i32_0 = arith.constant 0 : i32
    %c0_i32_1 = arith.constant 0 : i32
    return %c0_i32, %c0_i32_0 : i32, i32
  }
  func.func @transform_2(%arg0: i32) -> (i32, i32) {
    %c0_i32 = arith.constant 0 : i32
    %c0_i32_0 = arith.constant 0 : i32
    %c0_i32_1 = arith.constant 0 : i32
    return %c0_i32, %c0_i32_0 : i32, i32
  }
  func.func @transform_3(%arg0: i32) -> (i32, i32) {
    %c0_i32 = arith.constant 0 : i32
    %c0_i32_0 = arith.constant 0 : i32
    %c0_i32_1 = arith.constant 0 : i32
    return %c0_i32, %c0_i32_0 : i32, i32
  }
  func.func @transform_4(%arg0: i32) -> (i32, i32) {
    %c0_i32 = arith.constant 0 : i32
    %c0_i32_0 = arith.constant 0 : i32
    %c0_i32_1 = arith.constant 0 : i32
    return %c0_i32, %c0_i32_0 : i32, i32
  }
  func.func @transform_5(%arg0: i32) -> (i32, i32) {
    %c0_i32 = arith.constant 0 : i32
    %c0_i32_0 = arith.constant 0 : i32
    %c0_i32_1 = arith.constant 0 : i32
    return %c0_i32, %c0_i32_0 : i32, i32
  }
  func.func @transform_6(%arg0: i32) -> (i32, i32) {
    %c0_i32 = arith.constant 0 : i32
    %c0_i32_0 = arith.constant 0 : i32
    %c0_i32_1 = arith.constant 0 : i32
    return %c0_i32, %c0_i32_0 : i32, i32
  }
  func.func @transform_7(%arg0: i32) -> (i32, i32) {
    %c0_i32 = arith.constant 0 : i32
    %c0_i32_0 = arith.constant 0 : i32
    return %arg0, %c0_i32 : i32, i32
  }
}

module attributes {stable_mosaic.version = 11 : i64} {
  func.func @_prenorm_ff_kernel(%arg0: i32, %arg1: memref<256x128xf32, #tpu.memory_space<vmem>>, %arg2: memref<1x128xf32, #tpu.memory_space<vmem>>, %arg3: memref<1x128xf32, #tpu.memory_space<vmem>>, %arg4: memref<128x256xbf16, #tpu.memory_space<vmem>>, %arg5: memref<1x256xf32, #tpu.memory_space<vmem>>, %arg6: memref<256x128xbf16, #tpu.memory_space<vmem>>, %arg7: memref<1x128xf32, #tpu.memory_space<vmem>>, %arg8: memref<256x128xf32, #tpu.memory_space<vmem>>) attributes {dimension_semantics = [#tpu.dimension_semantics<parallel>], iteration_bounds = array<i64: 2>, scalar_prefetch = 0 : i64, scratch_operands = 0 : i64, tpu.core_type = #tpu.core_type<tc>, window_params = [{transform_indices = @transform_0, window_bounds = array<i64: 256, 128>}, {pipeline_mode = #tpu.pipeline_mode<synchronous>, transform_indices = @transform_1, window_bounds = array<i64: 1, 128>}, {pipeline_mode = #tpu.pipeline_mode<synchronous>, transform_indices = @transform_2, window_bounds = array<i64: 1, 128>}, {pipeline_mode = #tpu.pipeline_mode<synchronous>, transform_indices = @transform_3, window_bounds = array<i64: 128, 256>}, {pipeline_mode = #tpu.pipeline_mode<synchronous>, transform_indices = @transform_4, window_bounds = array<i64: 1, 256>}, {pipeline_mode = #tpu.pipeline_mode<synchronous>, transform_indices = @transform_5, window_bounds = array<i64: 256, 128>}, {pipeline_mode = #tpu.pipeline_mode<synchronous>, transform_indices = @transform_6, window_bounds = array<i64: 1, 128>}, {transform_indices = @transform_7, window_bounds = array<i64: 256, 128>}]} {
    %c0 = arith.constant 0 : index
    %c0_0 = arith.constant 0 : index
    %0 = vector.load %arg1[%c0, %c0_0] : memref<256x128xf32, #tpu.memory_space<vmem>>, vector<256x128xf32>
    %c0_1 = arith.constant 0 : index
    %c0_2 = arith.constant 0 : index
    %1 = vector.load %arg2[%c0_1, %c0_2] : memref<1x128xf32, #tpu.memory_space<vmem>>, vector<1x128xf32>
    %c0_3 = arith.constant 0 : index
    %c0_4 = arith.constant 0 : index
    %2 = vector.load %arg3[%c0_3, %c0_4] : memref<1x128xf32, #tpu.memory_space<vmem>>, vector<1x128xf32>
    %cst = arith.constant dense<0.000000e+00> : vector<256xf32>
    %3 = vector.multi_reduction <add>, %0, %cst [1] : vector<256x128xf32> to vector<256xf32>
    %4 = vector.shape_cast %3 : vector<256xf32> to vector<256x1xf32>
    %cst_5 = arith.constant 1.280000e+02 : f32
    %5 = vector.broadcast %cst_5 : f32 to vector<256x1xf32>
    %6 = arith.divf %4, %5 : vector<256x1xf32>
    %7 = arith.mulf %0, %0 : vector<256x128xf32>
    %cst_6 = arith.constant dense<0.000000e+00> : vector<256xf32>
    %8 = vector.multi_reduction <add>, %7, %cst_6 [1] : vector<256x128xf32> to vector<256xf32>
    %9 = vector.shape_cast %8 : vector<256xf32> to vector<256x1xf32>
    %cst_7 = arith.constant 1.280000e+02 : f32
    %10 = vector.broadcast %cst_7 : f32 to vector<256x1xf32>
    %11 = arith.divf %9, %10 : vector<256x1xf32>
    %12 = arith.mulf %6, %6 : vector<256x1xf32>
    %13 = arith.subf %11, %12 : vector<256x1xf32>
    %cst_8 = arith.constant 9.99999974E-6 : f32
    %14 = vector.broadcast %cst_8 : f32 to vector<256x1xf32>
    %15 = arith.addf %13, %14 : vector<256x1xf32>
    %16 = math.rsqrt %15 : vector<256x1xf32>
    %17 = vector.broadcast %6 : vector<256x1xf32> to vector<256x128xf32>
    %18 = arith.subf %0, %17 : vector<256x128xf32>
    %19 = vector.broadcast %16 : vector<256x1xf32> to vector<256x128xf32>
    %20 = arith.mulf %18, %19 : vector<256x128xf32>
    %21 = vector.broadcast %1 : vector<1x128xf32> to vector<256x128xf32>
    %22 = arith.mulf %20, %21 : vector<256x128xf32>
    %23 = vector.broadcast %2 : vector<1x128xf32> to vector<256x128xf32>
    %24 = arith.addf %22, %23 : vector<256x128xf32>
    %25 = arith.truncf %24 : vector<256x128xf32> to vector<256x128xbf16>
    %c0_9 = arith.constant 0 : index
    %c0_10 = arith.constant 0 : index
    %26 = vector.load %arg4[%c0_9, %c0_10] : memref<128x256xbf16, #tpu.memory_space<vmem>>, vector<128x256xbf16>
    %cst_11 = arith.constant dense<0.000000e+00> : vector<256x256xf32>
    %27 = tpu.matmul %25, %26, %cst_11 {dimension_numbers = #tpu.dot_dimension_numbers<[1], [0], [0], [1], [0, 0, 1, 1], [], []>} : vector<256x128xbf16>, vector<128x256xbf16>, vector<256x256xf32> -> vector<256x256xf32>
    %c0_12 = arith.constant 0 : index
    %c0_13 = arith.constant 0 : index
    %28 = vector.load %arg5[%c0_12, %c0_13] : memref<1x256xf32, #tpu.memory_space<vmem>>, vector<1x256xf32>
    %29 = vector.broadcast %28 : vector<1x256xf32> to vector<256x256xf32>
    %30 = arith.addf %27, %29 : vector<256x256xf32>
    %cst_14 = arith.constant 5.000000e-01 : f32
    %31 = vector.broadcast %cst_14 : f32 to vector<256x256xf32>
    %32 = arith.mulf %31, %30 : vector<256x256xf32>
    %cst_15 = arith.constant 0.707106769 : f32
    %33 = vector.broadcast %cst_15 : f32 to vector<256x256xf32>
    %34 = arith.mulf %30, %33 : vector<256x256xf32>
    %35 = math.absf %34 : vector<256x256xf32>
    %cst_16 = arith.constant 0.327591091 : f32
    %36 = vector.broadcast %cst_16 : f32 to vector<256x256xf32>
    %37 = arith.mulf %36, %35 : vector<256x256xf32>
    %cst_17 = arith.constant 1.000000e+00 : f32
    %38 = vector.broadcast %cst_17 : f32 to vector<256x256xf32>
    %39 = arith.addf %38, %37 : vector<256x256xf32>
    %40 = tpu.reciprocal %39 {approx = true} : vector<256x256xf32> -> vector<256x256xf32>
    %cst_18 = arith.constant 1.06140542 : f32
    %41 = vector.broadcast %cst_18 : f32 to vector<256x256xf32>
    %42 = arith.mulf %40, %41 : vector<256x256xf32>
    %cst_19 = arith.constant -1.45315206 : f32
    %43 = vector.broadcast %cst_19 : f32 to vector<256x256xf32>
    %44 = arith.addf %43, %42 : vector<256x256xf32>
    %45 = arith.mulf %40, %44 : vector<256x256xf32>
    %cst_20 = arith.constant 1.42141378 : f32
    %46 = vector.broadcast %cst_20 : f32 to vector<256x256xf32>
    %47 = arith.addf %46, %45 : vector<256x256xf32>
    %48 = arith.mulf %40, %47 : vector<256x256xf32>
    %cst_21 = arith.constant -0.284496725 : f32
    %49 = vector.broadcast %cst_21 : f32 to vector<256x256xf32>
    %50 = arith.addf %49, %48 : vector<256x256xf32>
    %51 = arith.mulf %40, %50 : vector<256x256xf32>
    %cst_22 = arith.constant 0.254829586 : f32
    %52 = vector.broadcast %cst_22 : f32 to vector<256x256xf32>
    %53 = arith.addf %52, %51 : vector<256x256xf32>
    %54 = arith.mulf %40, %53 : vector<256x256xf32>
    %cst_23 = arith.constant 0.000000e+00 : f32
    %55 = vector.broadcast %cst_23 : f32 to vector<256x256xf32>
    %56 = arith.subf %55, %35 : vector<256x256xf32>
    %57 = arith.mulf %56, %35 : vector<256x256xf32>
    %58 = math.exp %57 : vector<256x256xf32>
    %59 = arith.mulf %54, %58 : vector<256x256xf32>
    %cst_24 = arith.constant 1.000000e+00 : f32
    %60 = vector.broadcast %cst_24 : f32 to vector<256x256xf32>
    %61 = arith.subf %60, %59 : vector<256x256xf32>
    %cst_25 = arith.constant 0.000000e+00 : f32
    %62 = vector.broadcast %cst_25 : f32 to vector<256x256xf32>
    %63 = arith.cmpf olt, %34, %62 : vector<256x256xf32>
    %cst_26 = arith.constant 0.000000e+00 : f32
    %64 = vector.broadcast %cst_26 : f32 to vector<256x256xf32>
    %65 = arith.subf %64, %61 : vector<256x256xf32>
    %66 = arith.select %63, %65, %61 : vector<256x256xi1>, vector<256x256xf32>
    %cst_27 = arith.constant 1.000000e+00 : f32
    %67 = vector.broadcast %cst_27 : f32 to vector<256x256xf32>
    %68 = arith.addf %67, %66 : vector<256x256xf32>
    %69 = arith.mulf %32, %68 : vector<256x256xf32>
    %70 = arith.truncf %69 : vector<256x256xf32> to vector<256x256xbf16>
    %c0_28 = arith.constant 0 : index
    %c0_29 = arith.constant 0 : index
    %71 = vector.load %arg6[%c0_28, %c0_29] : memref<256x128xbf16, #tpu.memory_space<vmem>>, vector<256x128xbf16>
    %cst_30 = arith.constant dense<0.000000e+00> : vector<256x128xf32>
    %72 = tpu.matmul %70, %71, %cst_30 {dimension_numbers = #tpu.dot_dimension_numbers<[1], [0], [0], [1], [0, 0, 1, 1], [], []>} : vector<256x256xbf16>, vector<256x128xbf16>, vector<256x128xf32> -> vector<256x128xf32>
    %c0_31 = arith.constant 0 : index
    %c0_32 = arith.constant 0 : index
    %73 = vector.load %arg7[%c0_31, %c0_32] : memref<1x128xf32, #tpu.memory_space<vmem>>, vector<1x128xf32>
    %74 = vector.broadcast %73 : vector<1x128xf32> to vector<256x128xf32>
    %75 = arith.addf %72, %74 : vector<256x128xf32>
    %c0_33 = arith.constant 0 : index
    %c0_34 = arith.constant 0 : index
    %76 = vector.load %arg8[%c0_33, %c0_34] : memref<256x128xf32, #tpu.memory_space<vmem>>, vector<256x128xf32>
    tpu.vector_store %arg8[%c0_33, %c0_34], %75 {strides = array<i32>} : memref<256x128xf32, #tpu.memory_space<vmem>>, vector<256x128xf32>,
    return
  }
  func.func @transform_0(%arg0: i32) -> (i32, i32) {
    %c0_i32 = arith.constant 0 : i32
    %c0_i32_0 = arith.constant 0 : i32
    return %arg0, %c0_i32 : i32, i32
  }
  func.func @transform_1(%arg0: i32) -> (i32, i32) {
    %c0_i32 = arith.constant 0 : i32
    %c0_i32_0 = arith.constant 0 : i32
    %c0_i32_1 = arith.constant 0 : i32
    return %c0_i32, %c0_i32_0 : i32, i32
  }
  func.func @transform_2(%arg0: i32) -> (i32, i32) {
    %c0_i32 = arith.constant 0 : i32
    %c0_i32_0 = arith.constant 0 : i32
    %c0_i32_1 = arith.constant 0 : i32
    return %c0_i32, %c0_i32_0 : i32, i32
  }
  func.func @transform_3(%arg0: i32) -> (i32, i32) {
    %c0_i32 = arith.constant 0 : i32
    %c0_i32_0 = arith.constant 0 : i32
    %c0_i32_1 = arith.constant 0 : i32
    return %c0_i32, %c0_i32_0 : i32, i32
  }
  func.func @transform_4(%arg0: i32) -> (i32, i32) {
    %c0_i32 = arith.constant 0 : i32
    %c0_i32_0 = arith.constant 0 : i32
    %c0_i32_1 = arith.constant 0 : i32
    return %c0_i32, %c0_i32_0 : i32, i32
  }
  func.func @transform_5(%arg0: i32) -> (i32, i32) {
    %c0_i32 = arith.constant 0 : i32
    %c0_i32_0 = arith.constant 0 : i32
    %c0_i32_1 = arith.constant 0 : i32
    return %c0_i32, %c0_i32_0 : i32, i32
  }
  func.func @transform_6(%arg0: i32) -> (i32, i32) {
    %c0_i32 = arith.constant 0 : i32
    %c0_i32_0 = arith.constant 0 : i32
    %c0_i32_1 = arith.constant 0 : i32
    return %c0_i32, %c0_i32_0 : i32, i32
  }
  func.func @transform_7(%arg0: i32) -> (i32, i32) {
    %c0_i32 = arith.constant 0 : i32
    %c0_i32_0 = arith.constant 0 : i32
    return %arg0, %c0_i32 : i32, i32
  }
}

</mosaic_0001>

<bundles_post_ra>
// kernel: tpu_custom_call.1
= control target key start
LH: loop header
LB: loop body
LE: loop exit
PB: predicated region body
PF: predicated region fallthrough
CT: control target
= control target key end

     0   :  { %12 = vsyncpa [#allocation3], 0  ;;  %s6867_s0 = inlined_call_operand.hbm [shape: f32[512,128], index: 0, kind: input, shape index: {}]   ;;  %s6868_s1 = inlined_call_operand.vmem [shape: f32[1,128], index: 1, kind: input, shape index: {}]   ;;  %s6869_s2 = inlined_call_operand.vmem [shape: f32[1,128], index: 2, kind: input, shape index: {}]   ;;  %s6870_s3 = inlined_call_operand.hbm [shape: bf16[128,256], index: 3, kind: input, shape index: {}]   ;;  %s6871_s4 = inlined_call_operand.vmem [shape: f32[1,256], index: 4, kind: input, shape index: {}]   ;;  %s6872_s5 = inlined_call_operand.hbm [shape: bf16[256,128], index: 5, kind: input, shape index: {}]   ;;  %s6873_s6 = inlined_call_operand.vmem [shape: f32[1,128], index: 6, kind: input, shape index: {}]   ;;  %s6874_s7 = inlined_call_operand.hbm [shape: f32[512,128], index: 7, kind: output, shape index: {}]  }
   0x1   :  { %14 = vsyncpa [#allocation3 + $0x1], 0 }
   0x2   :  { %15 = vsyncpa [#allocation6], 0 }
   0x3   :  { %16 = vsyncpa [#allocation4], 0 }
   0x4   :  { %18 = vsyncpa [#allocation4 + $0x1], 0  ;;  %s4113_s24 = smov 0   ;;  %s4115_s25 = smov 0  }
   0x5   :  { %s4117_s26 = smov 0   ;;  %s4119_s27 = smov 0  }
   0x6 LB: > { %s4134_s28 = sadd.s32 4294967295, %s4060_s27   ;;  %s3303_s29 = sadd.s32 4294967294, %s4060_s27   ;;  %s4060_s27 = sphi %s4119_s27, %s7071_s27   ;;  %s4056_s26 = sphi %s4117_s26, %s7070_s26   ;;  %s4052_s25 = sphi %s4115_s25, %s7069_s25   ;;  %s4048_s24 = sphi %s4113_s24, %s7068_s24  }
   0x7   : > { %p44_p0 = scmp.ne.s32.totalorder %s4052_s25, %s4048_s24  ;;  %p6875_p1 = scmp.eq.s32.totalorder %s4134_s28, 0 }
   0x8   : > { %p200_p3 = scmp.eq.s32.totalorder %s3303_s29, 1  ;;  %p3304_p5 = scmp.ge.s32.totalorder %s4060_s27, 1 }
   0x9   : > { %p4143_p4 = por %p6875_p1, %p44_p0  ;;  %p207_p7 = scmp.lt.s32.totalorder %s4060_s27, 3 }
   0xa   : > { %p4148_p6 = por %p200_p3, %p44_p0  ;;  %s4062_s10 = smov [#allocation5]  }
   0xb   : > { %s6895_s30 = scalar_select %p4143_p4, 1, 0 }
   0xc   : > { %s6896_s8 = scalar_select %p4148_p6, 1, 0 }
   0xd   : > { %p4153_p8 = pnand %p3304_p5, %p207_p7  ;;  %s225_s11 = sshll.u32 %s4062_s10, 4  ;;  %s4157_s11 = int_to_ptr.vmem [resolvable:$true] %s225_s11 }
   0xe   : > { %s4063_s13 = smov [#allocation7]   ;;  %s3904_s17 = scalar_lea.hbm %s6870_s3, 2048 }
   0xf   : > { %p3482_p9 = pneg %p4153_p8  ;;  %s241_s14 = sshll.u32 %s4063_s13, 4  ;;  %s4168_s14 = int_to_ptr.vmem [resolvable:$true] %s241_s14 }
  0x10   : > { %p3905_p12 = scmp.ne.s32.totalorder %s6870_s3, %s3904_s17  ;;  %p3911_p5 = scmp.lt.u32.totalorder %s3904_s17, %s6870_s3 }
  0x11   : > { %p4164_p11 = pnand %p3482_p9, %p6875_p1 }
  0x13   : > { %p3906_p13 = pneg %p4164_p11 }
  0x15   : > { %p3907_p0 = pnand %p3906_p13, %p3905_p12 }
  0x17   : > { %p3908_p3 = pneg %p3907_p0 }
  0x19   : > { %p3913_p7 = pnand %p3911_p5, %p3908_p3 }
  0x1b   : > { %3916 = shalt.err (!%p3913_p7)
}
  0x1c   : > { %s3917_s22 = scalar_lea.vmem %s4157_s11, 2048  ;;  %p3925_p2 = scmp.lt.s32.totalorder %s4157_s11, %s4157_s11 }
  0x1d   : > { %p3918_p9 = scmp.ne.s32.totalorder %s4157_s11, %s3917_s22  ;;  %p3926_p12 = scmp.lt.s32.totalorder %s3917_s22, %s3917_s22 }
  0x1f   : > { %p3920_p10 = pnand %p3918_p9, %p3906_p13  ;;  %p3927_p0 = por %p3926_p12, %p3925_p2 }
  0x21   : > { %p3921_p1 = pneg %p3920_p10 }
  0x23   : > { %p3928_p6 = pnand %p3927_p0, %p3921_p1 }
  0x25   : > { %3931 = shalt.err (!%p3928_p6)
}
  0x26   : > { %s6876_s23 = smov 128   ;;  %s4065_s29 = smov 8  }
  0x27   : > { %3485 = dma.hbm_to_vmem [thread:$0]  (!%p4164_p11), %s6870_s3, 2048, %s4157_s11, [#allocation6], %s6876_s23, %s6876_s23, %s4065_s29  }
  0x28   : > { %s3932_s17 = scalar_lea.hbm %s6872_s5, 2048 }
  0x29   : > { %p3933_p1 = scmp.ne.s32.totalorder %s6872_s5, %s3932_s17  ;;  %p3939_p10 = scmp.lt.u32.totalorder %s3932_s17, %s6872_s5 }
  0x2b   : > { %p3935_p2 = pnand %p3933_p1, %p3906_p13 }
  0x2d   : > { %p3936_p6 = pneg %p3935_p2 }
  0x2f   : > { %p3941_p3 = pnand %p3939_p10, %p3936_p6 }
  0x31   : > { %3944 = shalt.err (!%p3941_p3)
}
  0x32   : > { %s3945_s11 = scalar_lea.vmem %s4168_s14, 2048  ;;  %p3953_p12 = scmp.lt.s32.totalorder %s4168_s14, %s4168_s14 }
  0x33   : > { %p3946_p5 = scmp.ne.s32.totalorder %s4168_s14, %s3945_s11  ;;  %p3954_p0 = scmp.lt.s32.totalorder %s3945_s11, %s3945_s11 }
  0x35   : > { %p3948_p7 = pnand %p3946_p5, %p3906_p13  ;;  %p3955_p1 = por %p3954_p0, %p3953_p12 }
  0x37   : > { %p3949_p9 = pneg %p3948_p7 }
  0x39   : > { %p3956_p2 = pnand %p3955_p1, %p3949_p9 }
  0x3b   : > { %3959 = shalt.err (!%p3956_p2)
}
  0x3c   : > { %s4066_s22 = smov 64   ;;  %s4067_s10 = smov 4  }
  0x3d   : > { %3488 = dma.hbm_to_vmem [thread:$0]  (!%p4164_p11), %s6872_s5, 2048, %s4168_s14, [#allocation6], %s4066_s22, %s4066_s22, %s4067_s10  }
  0x3e   : > { %s4226_s16 = sadd.s32 1, %s4060_s27   ;;  %s31_s18 = sadd.s32 1, %s4056_s26 }
  0x3f   : > { %s28_s17 = ssub.s32 %s4060_s27, %s4226_s16  ;;  %p38_p6 = scmp.ne.s32.totalorder %s4056_s26, %s4052_s25 }
  0x40   : > { %p29_p13 = scmp.eq.s32.totalorder %s28_s17, 0  ;;  %p39_p10 = scmp.eq.s32.totalorder %s4060_s27, 0 }
  0x41   : > { %p6899_p5 = scmp.eq.s32.totalorder %s4134_s28, 1  ;;  %p3499_p9 = scmp.lt.s32.totalorder %s4060_s27, 2 }
  0x42   : > { %s4235_s19 = scalar_select %p29_p13, %s4056_s26, %s31_s18  }
  0x43   : > { %p40_p3 = por %p39_p10, %p38_p6  ;;  %p4239_p7 = por %p6899_p5, %p38_p6 }
  0x44   : > { %s258_s12 = sand.u32 1, %s4056_s26   ;;  %s3356_s14 = sshll.u32 %s4060_s27, 12 }
  0x45   : > { %s6900_s20 = scalar_select %p4239_p7, 1, 0 }
  0x46   : > { %s3308_s21 = sshll.u32 %s258_s12, 8  ;;  %s4249_s10 = scalar_lea.hbm %s6867_s0, %s3356_s14 }
  0x47   : > { %s262_s13 = scalar_lea.vmem [#allocation2], %s3308_s21  ;;  %p4253_p11 = pnand %p3499_p9, %p40_p3 }
  0x48   : > { %s269_s15 = sshll.u32 %s262_s13, 4  ;;  %s4257_s18 = scalar_lea.sflag [#allocation3], %s258_s12  ;;  %s4251_s15 = int_to_ptr.vmem [resolvable:$true] %s269_s15 }
  0x49   : > { %s3960_s23 = scalar_lea.hbm %s4249_s10, 4096  ;;  %p3962_p0 = pneg %p4253_p11 }
  0x4a   : > { %p3961_p12 = scmp.ne.s32.totalorder %s4249_s10, %s3960_s23  ;;  %s3965_s11 = scalar_lea.hbm %s6867_s0, 8192 }
  0x4b   : > { %p3966_p13 = scmp.lt.u32.totalorder %s4249_s10, %s6867_s0  ;;  %p3967_p6 = scmp.lt.u32.totalorder %s3965_s11, %s3960_s23 }
  0x4c   : > { %p3963_p1 = pnand %p3962_p0, %p3961_p12  ;;  %p3969_p3 = scmp.lt.u32.totalorder %s3960_s23, %s4249_s10 }
  0x4d   : > { %p3968_p10 = por %p3967_p6, %p3966_p13 }
  0x4e   : > { %p3964_p2 = pneg %p3963_p1 }
  0x4f   : > { %p3970_p5 = por %p3969_p3, %p3968_p10 }
  0x51   : > { %p3971_p9 = pnand %p3970_p5, %p3964_p2 }
  0x53   : > { %3974 = shalt.err (!%p3971_p9)
}
  0x54   : > { %s3975_s12 = scalar_lea.vmem %s4251_s15, 4096  ;;  %s4068_s21 = smov [#allocation2]  }
  0x55   : > { %p3976_p12 = scmp.ne.s32.totalorder %s4251_s15, %s3975_s12  ;;  %s3980_s14 = sshll.u32 %s4068_s21, 4  ;;  %s3981_s14 = int_to_ptr.vmem [resolvable:$false] %s3980_s14 }
  0x56   : > { %s3982_s22 = scalar_lea.vmem %s3981_s14, 8192  ;;  %p3983_p4 = scmp.lt.s32.totalorder %s4251_s15, %s3981_s14 }
  0x57   : > { %p3978_p1 = pnand %p3976_p12, %p3962_p0  ;;  %p3984_p13 = scmp.lt.s32.totalorder %s3982_s22, %s3975_s12 }
  0x59   : > { %p3979_p7 = pneg %p3978_p1  ;;  %p3985_p6 = por %p3984_p13, %p3983_p4 }
  0x5b   : > { %p3986_p10 = pnand %p3985_p6, %p3979_p7 }
  0x5d   : > { %3989 = shalt.err (!%p3986_p10)
}
  0x5e   : > { %s6902_s23 = smov 128   ;;  %281 = sbr.rel (%p4153_p8) target bundleno = 1200 (0x4b0), region = 48 }
  0x5f   : > { %3492 = dma.hbm_to_vmem [thread:$0]  (!%p4253_p11), %s4249_s10, 4096, %s4251_s15, %s4257_s18, %s6902_s23, %s6902_s23, %s4065_s29  }
  0x65   : > { %s4291_s11 = sand.u32 1, %s4052_s25   ;;  %p6903_p4 = scmp.ne.s32.totalorder %s6895_s30, 0 }
  0x66   : > { %s3312_s13 = sshll.u32 %s4291_s11, 8  ;;  %s284_s12 = scalar_lea.sflag [#allocation3], %s4291_s11 }
  0x67   : > { %s4297_s17 = scalar_lea.vmem [#allocation2], %s3312_s13 }
  0x68   : > { %4035 = dma.done.wait (%p6903_p4), %s284_s12, 4096  }
  0x69   : > { %4037 = vsyncadd (%p6903_p4), %s284_s12, 4294963200  ;;  %p6904_p7 = scmp.eq.s32.totalorder %s4134_s28, 0 }
  0x6b   : > { %4039 = dma.done.wait (%p6904_p7), [#allocation6], 4096   ;;  %p6905_p8 = pmov %p6904_p7 }
  0x6c   : > { %v4308_v0 = vld [vmem:[%s4297_s17] sm:$0xff]  ;;  %v4311_v1 = vld [vmem:[%s4297_s17 + $0x8] sm:$0xff]  ;;  %v4320_v4 = vld [vmem:[%s4297_s17 + $0x10] sm:$0xff]  ;;  %v4069_v41 = vmov 0   ;;  %s6721_s22 = scalar_lea.vmem [#allocation8], %s3312_s13  ;;  %s3357_s23 = sshll.u32 %s4134_s28, 12 }
  0x6d   : > { %4041 = vsyncadd (%p6905_p8), [#allocation6], 4294963200  ;;  %363 = vadd.xlane.f32.xlu0 %v4308_v0  ;;  %v460_v2 = vmul.f32 %v4308_v0, %v4308_v0  ;;  %v461_v3 = vmul.f32 %v4311_v1, %v4311_v1  ;;  %v4323_v5 = vld [vmem:[%s4297_s17 + $0x18] sm:$0xff]  ;;  %v462_v6 = vmul.f32 %v4320_v4, %v4320_v4  ;;  %v3544_v8 = vld [vmem:[#allocation5 + $0x4] ss:$8 sps:$4 sm:$0xff]   ;;  %1012 = vmatprep.mubr.bf16.mxu0 %v4069_v41  ;;  %s3211_s13 = sshll.u32 %s6721_s22, 4  ;;  %s6818_s30 = scalar_lea.hbm %s6874_s7, %s3357_s23  ;;  %s6820_s13 = int_to_ptr.vmem [resolvable:$true] %s3211_s13 }
  0x6e   : > { %v463_v7 = vmul.f32 %v4323_v5, %v4323_v5  ;;  %v4332_v9 = vld [vmem:[%s4297_s17 + $0x20] sm:$0xff]  ;;  %980 = vmatprep.subr.bf16.mxu0 %v3544_v8  ;;  %v4335_v11 = vld [vmem:[%s4297_s17 + $0x28] sm:$0xff]  ;;  %v3547_v12 = vld [vmem:[#allocation5 + $0x14] ss:$8 sps:$4 sm:$0xff]   ;;  %s3198_s28 = scalar_lea.sflag [#allocation4], %s4291_s11  ;;  %s3990_s9 = scalar_lea.vmem %s6820_s13, 4096 }
  0x6f   : > { %492 = vadd.xlane.f32.xlu1 %v460_v2  ;;  %v3546_v10 = vld [vmem:[#allocation5] ss:$8 sps:$4 sm:$0xff]   ;;  %v464_v13 = vmul.f32 %v4332_v9, %v4332_v9  ;;  %v3549_v14 = vld [vmem:[#allocation5 + $0x10] ss:$8 sps:$4 sm:$0xff]   ;;  %v465_v15 = vmul.f32 %v4335_v11, %v4335_v11  ;;  %v3550_v17 = vld [vmem:[#allocation5 + $0x24] ss:$8 sps:$4 sm:$0xff]   ;;  %p3991_p11 = scmp.ne.s32.totalorder %s6820_s13, %s3990_s9 }
  0x70   : > { %981 = vmatpush1.bf16.msra.mxu0 %v3546_v10  ;;  %v4344_v16 = vld [vmem:[%s4297_s17 + $0x30] sm:$0xff]  ;;  %v3552_v18 = vld [vmem:[#allocation5 + $0x20] ss:$8 sps:$4 sm:$0xff]   ;;  %v4347_v19 = vld [vmem:[%s4297_s17 + $0x38] sm:$0xff]  ;;  %p7065_p0 = scmp.ne.s32.totalorder %s6900_s20, 0  ;;  %s4070_s29 = smov [#allocation8]  }
  0x71   : > { %365 = vadd.xlane.f32.xlu0 %v4311_v1  ;;  %982 = vmatprep.subr.bf16.mxu0 %v3547_v12  ;;  %v3553_v20 = vld [vmem:[#allocation5 + $0x34] ss:$8 sps:$4 sm:$0xff]   ;;  %v466_v21 = vmul.f32 %v4344_v16, %v4344_v16  ;;  %v3555_v22 = vld [vmem:[#allocation5 + $0x30] ss:$8 sps:$4 sm:$0xff]   ;;  %v467_v23 = vmul.f32 %v4347_v19, %v4347_v19  ;;  %v3556_v24 = vld [vmem:[#allocation5 + $0x44] ss:$8 sps:$4 sm:$0xff]  }
  0x72   : > { %v3558_v25 = vld [vmem:[#allocation5 + $0x40] ss:$8 sps:$4 sm:$0xff]   ;;  %v3559_v29 = vld [vmem:[#allocation5 + $0x54] ss:$8 sps:$4 sm:$0xff]   ;;  %v3561_v30 = vld [vmem:[#allocation5 + $0x50] ss:$8 sps:$4 sm:$0xff]   ;;  %p3992_p2 = pnand %p3991_p11, %p7065_p0 }
  0x73   : > { %494 = vadd.xlane.f32.xlu1 %v461_v3  ;;  %v4356_v26 = vld [vmem:[%s4297_s17 + $0x40] sm:$0xff]  ;;  %v4359_v27 = vld [vmem:[%s4297_s17 + $0x48] sm:$0xff]  ;;  %v4368_v33 = vld [vmem:[%s4297_s17 + $0x50] sm:$0xff]  ;;  %s3994_s10 = sshll.u32 %s4070_s29, 4  ;;  %s3995_s10 = int_to_ptr.vmem [resolvable:$false] %s3994_s10 }
  0x74   : > { %983 = vmatpush1.bf16.msra.mxu0 %v3549_v14  ;;  %v468_v28 = vmul.f32 %v4356_v26, %v4356_v26  ;;  %v469_v31 = vmul.f32 %v4359_v27, %v4359_v27  ;;  %v3562_v32 = vld [vmem:[#allocation5 + $0x64] ss:$8 sps:$4 sm:$0xff]   ;;  %v3564_v34 = vld [vmem:[#allocation5 + $0x60] ss:$8 sps:$4 sm:$0xff]   ;;  %v4371_v35 = vld [vmem:[%s4297_s17 + $0x58] sm:$0xff]  ;;  %v470_v36 = vmul.f32 %v4368_v33, %v4368_v33  ;;  %p3993_p3 = pneg %p3992_p2  ;;  %s3996_s15 = scalar_lea.vmem %s3995_s10, 8192 }
  0x75   : > { %367 = vadd.xlane.f32.xlu0 %v4320_v4  ;;  %984 = vmatprep.subr.bf16.mxu0 %v3550_v17  ;;  %v3565_v37 = vld [vmem:[#allocation5 + $0x74] ss:$8 sps:$4 sm:$0xff]   ;;  %v3567_v38 = vld [vmem:[#allocation5 + $0x70] ss:$8 sps:$4 sm:$0xff]   ;;  %v471_v39 = vmul.f32 %v4371_v35, %v4371_v35  ;;  %v4380_v40 = vld [vmem:[%s4297_s17 + $0x60] sm:$0xff]  ;;  %p3997_p5 = scmp.lt.s32.totalorder %s6820_s13, %s3995_s10  ;;  %p3998_p9 = scmp.lt.s32.totalorder %s3996_s15, %s3990_s9 }
  0x76   : > { %v4384_v42 = vld [vmem:[%s4297_s17 + $0x68] sm:$0xff]  ;;  %v472_v43 = vmul.f32 %v4380_v40, %v4380_v40  ;;  %v4393_v45 = vld [vmem:[%s4297_s17 + $0x70] sm:$0xff]  ;;  %v4396_v46 = vld [vmem:[%s4297_s17 + $0x78] sm:$0xff] }
  0x77   : > { %369 = vadd.xlane.f32.xlu1 %v4323_v5  ;;  %v473_v44 = vmul.f32 %v4384_v42, %v4384_v42  ;;  %v474_v47 = vmul.f32 %v4393_v45, %v4393_v45  ;;  %v475_v48 = vmul.f32 %v4396_v46, %v4396_v46  ;;  %v4405_v49 = vld [vmem:[%s4297_s17 + $0x80] sm:$0xff]  ;;  %v4408_v50 = vld [vmem:[%s4297_s17 + $0x88] sm:$0xff]  ;;  %v4417_v53 = vld [vmem:[%s4297_s17 + $0x90] sm:$0xff]  ;;  %p3999_p12 = por %p3998_p9, %p3997_p5 }
  0x78   : > { %985 = vmatpush1.bf16.msra.mxu0 %v3552_v18  ;;  %v476_v51 = vmul.f32 %v4405_v49, %v4405_v49  ;;  %v477_v52 = vmul.f32 %v4408_v50, %v4408_v50  ;;  %v4420_v54 = vld [vmem:[%s4297_s17 + $0x98] sm:$0xff]  ;;  %v478_v55 = vmul.f32 %v4417_v53, %v4417_v53  ;;  %v4429_v57 = vld [vmem:[%s4297_s17 + $0xa0] sm:$0xff]  ;;  %v4432_v58 = vld [vmem:[%s4297_s17 + $0xa8] sm:$0xff] }
  0x79   : > { %496 = vadd.xlane.f32.xlu0 %v462_v6  ;;  %986 = vmatprep.subr.bf16.mxu0 %v3553_v20  ;;  %v479_v56 = vmul.f32 %v4420_v54, %v4420_v54  ;;  %v480_v59 = vmul.f32 %v4429_v57, %v4429_v57  ;;  %v481_v60 = vmul.f32 %v4432_v58, %v4432_v58  ;;  %v4441_v61 = vld [vmem:[%s4297_s17 + $0xb0] sm:$0xff]  ;;  %v4444_v62 = vld [vmem:[%s4297_s17 + $0xb8] sm:$0xff]  ;;  %v4453_v3 = vld [vmem:[%s4297_s17 + $0xc0] sm:$0xff]  ;;  %p4000_p1 = pnand %p3999_p12, %p3993_p3 }
  0x7a   : > { %v482_v63 = vmul.f32 %v4441_v61, %v4441_v61  ;;  %v483_v2 = vmul.f32 %v4444_v62, %v4444_v62  ;;  %v4456_v6 = vld [vmem:[%s4297_s17 + $0xc8] sm:$0xff]  ;;  %v4465_v10 = vld [vmem:[%s4297_s17 + $0xd0] sm:$0xff]  ;;  %v4468_v12 = vld [vmem:[%s4297_s17 + $0xd8] sm:$0xff] }
  0x7b   : > { %498 = vadd.xlane.f32.xlu1 %v463_v7  ;;  %v484_v7 = vmul.f32 %v4453_v3, %v4453_v3  ;;  %v485_v8 = vmul.f32 %v4456_v6, %v4456_v6  ;;  %v487_v14 = vmul.f32 %v4468_v12, %v4468_v12  ;;  %v4480_v17 = vld [vmem:[%s4297_s17 + $0xe8] sm:$0xff] }
  0x7c   : > { %987 = vmatpush1.bf16.msra.mxu0 %v3555_v22  ;;  %v489_v20 = vmul.f32 %v4480_v17, %v4480_v17  ;;  %v4492_v22 = vld [vmem:[%s4297_s17 + $0xf8] sm:$0xff] }
  0x7d   : > { %371 = vadd.xlane.f32.xlu0 %v4332_v9  ;;  %988 = vmatprep.subr.bf16.mxu0 %v3556_v24  ;;  %v491_v24 = vmul.f32 %v4492_v22, %v4492_v22 }
  0x7f   : > { %373 = vadd.xlane.f32.xlu1 %v4335_v11 }
  0x80   : > { %989 = vmatpush1.bf16.msra.mxu0 %v3558_v25 }
  0x81   : > { %500 = vadd.xlane.f32.xlu0 %v464_v13  ;;  %990 = vmatprep.subr.bf16.mxu0 %v3559_v29  ;;  %v486_v13 = vmul.f32 %v4465_v10, %v4465_v10 }
  0x83   : > { %502 = vadd.xlane.f32.xlu1 %v465_v15  ;;  %v4477_v15 = vld [vmem:[%s4297_s17 + $0xe0] sm:$0xff] }
  0x84   : > { %991 = vmatpush1.bf16.msra.mxu0 %v3561_v30  ;;  %v488_v18 = vmul.f32 %v4477_v15, %v4477_v15 }
  0x85   : > { %375 = vadd.xlane.f32.xlu0 %v4344_v16  ;;  %992 = vmatprep.subr.bf16.mxu0 %v3562_v32 }
  0x87   : > { %377 = vadd.xlane.f32.xlu1 %v4347_v19 }
  0x88   : > { %993 = vmatpush1.bf16.msra.mxu0 %v3564_v34 }
  0x89   : > { %504 = vadd.xlane.f32.xlu0 %v466_v21  ;;  %994 = vmatprep.subr.bf16.mxu0 %v3565_v37  ;;  %v4489_v21 = vld [vmem:[%s4297_s17 + $0xf0] sm:$0xff] }
  0x8b   : > { %506 = vadd.xlane.f32.xlu1 %v467_v23  ;;  %v490_v23 = vmul.f32 %v4489_v21, %v4489_v21 }
  0x8c   : > { %995 = vmatpush1.bf16.msra.mxu0 %v3567_v38 }
  0x8d   : > { %379 = vadd.xlane.f32.xlu0 %v4356_v26 }
  0x8f   : > { %381 = vadd.xlane.f32.xlu1 %v4359_v27 }
  0x91   : > { %508 = vadd.xlane.f32.xlu0 %v468_v28 }
  0x93   : > { %510 = vadd.xlane.f32.xlu1 %v469_v31 }
  0x95   : > { %383 = vadd.xlane.f32.xlu0 %v4368_v33 }
  0x97   : > { %385 = vadd.xlane.f32.xlu1 %v4371_v35 }
  0x99   : > { %512 = vadd.xlane.f32.xlu0 %v470_v36 }
  0x9b   : > { %514 = vadd.xlane.f32.xlu1 %v471_v39 }
  0x9d   : > { %387 = vadd.xlane.f32.xlu0 %v4380_v40 }
  0x9f   : > { %389 = vadd.xlane.f32.xlu1 %v4384_v42 }
  0xa1   : > { %516 = vadd.xlane.f32.xlu0 %v472_v43 }
  0xa3   : > { %518 = vadd.xlane.f32.xlu1 %v473_v44 }
  0xa5   : > { %391 = vadd.xlane.f32.xlu0 %v4393_v45 }
  0xa7   : > { %393 = vadd.xlane.f32.xlu1 %v4396_v46 }
  0xa9   : > { %520 = vadd.xlane.f32.xlu0 %v474_v47 }
  0xab   : > { %522 = vadd.xlane.f32.xlu1 %v475_v48 }
  0xad   : > { %395 = vadd.xlane.f32.xlu0 %v4405_v49 }
  0xaf   : > { %397 = vadd.xlane.f32.xlu1 %v4408_v50 }
  0xb1   : > { %524 = vadd.xlane.f32.xlu0 %v476_v51 }
  0xb3   : > { %526 = vadd.xlane.f32.xlu1 %v477_v52 }
  0xb5   : > { %399 = vadd.xlane.f32.xlu0 %v4417_v53 }
  0xb7   : > { %401 = vadd.xlane.f32.xlu1 %v4420_v54 }
  0xb9   : > { %528 = vadd.xlane.f32.xlu0 %v478_v55 }
  0xbb   : > { %530 = vadd.xlane.f32.xlu1 %v479_v56 }
  0xbd   : > { %403 = vadd.xlane.f32.xlu0 %v4429_v57 }
  0xbf   : > { %405 = vadd.xlane.f32.xlu1 %v4432_v58 }
  0xc1   : > { %532 = vadd.xlane.f32.xlu0 %v480_v59 }
  0xc3   : > { %534 = vadd.xlane.f32.xlu1 %v481_v60 }
  0xc5   : > { %407 = vadd.xlane.f32.xlu0 %v4441_v61 }
  0xc7   : > { %409 = vadd.xlane.f32.xlu1 %v4444_v62 }
  0xc9   : > { %536 = vadd.xlane.f32.xlu0 %v482_v63 }
  0xcb   : > { %538 = vadd.xlane.f32.xlu1 %v483_v2 }
  0xcd   : > { %411 = vadd.xlane.f32.xlu0 %v4453_v3 }
  0xcf   : > { %413 = vadd.xlane.f32.xlu1 %v4456_v6 }
  0xd1   : > { %540 = vadd.xlane.f32.xlu0 %v484_v7 }
  0xd3   : > { %542 = vadd.xlane.f32.xlu1 %v485_v8 }
  0xd5   : > { %415 = vadd.xlane.f32.xlu0 %v4465_v10 }
  0xd7   : > { %417 = vadd.xlane.f32.xlu1 %v4468_v12 }
  0xd9   : > { %544 = vadd.xlane.f32.xlu0 %v486_v13 }
  0xdb   : > { %546 = vadd.xlane.f32.xlu1 %v487_v14 }
  0xdd   : > { %419 = vadd.xlane.f32.xlu0 %v4477_v15 }
  0xdf   : > { %421 = vadd.xlane.f32.xlu1 %v4480_v17 }
  0xe1   : > { %548 = vadd.xlane.f32.xlu0 %v488_v18 }
  0xe3   : > { %550 = vadd.xlane.f32.xlu1 %v489_v20 }
  0xe5   : > { %423 = vadd.xlane.f32.xlu0 %v4489_v21 }
  0xe7   : > { %425 = vadd.xlane.f32.xlu1 %v4492_v22 }
  0xe9   : > { %552 = vadd.xlane.f32.xlu0 %v490_v23 }
  0xeb   : > { %554 = vadd.xlane.f32.xlu1 %v491_v24 }
  0xfa   : > { %v364_v25 = vpop.xlane.xlu0 %363 }
  0xfb   : > { %v428_v28 = vmul.f32 0.0078125, %v364_v25 }
  0xfc   : > { %v493_v29 = vpop.xlane.xlu1 %492 }
  0xfd   : > { %v588_v30 = vmul.f32 %v428_v28, %v428_v28  ;;  %v556_v31 = vmul.f32 0.0078125, %v493_v29  ;;  %v716_v23 = vsub.f32 %v4308_v0, %v428_v28 }
  0xfe   : > { %v366_v32 = vpop.xlane.xlu0 %365 }
  0xff   : > { %v620_v34 = vsub.f32 %v556_v31, %v588_v30  ;;  %v429_v36 = vmul.f32 0.0078125, %v366_v32 }
 0x100   : > { %v495_v37 = vpop.xlane.xlu1 %494 }
 0x101   : > { %v652_v38 = vadd.f32 1e-05, %v620_v34  ;;  %v589_v39 = vmul.f32 %v429_v36, %v429_v36  ;;  %v557_v43 = vmul.f32 0.0078125, %v495_v37  ;;  %v717_v0 = vsub.f32 %v4311_v1, %v429_v36 }
 0x102   : > { %v368_v44 = vpop.xlane.xlu0 %367 }
 0x103   : > { %3584 = vrsqrt.f32 %v652_v38  ;;  %v621_v47 = vsub.f32 %v557_v43, %v589_v39  ;;  %v430_v48 = vmul.f32 0.0078125, %v368_v44  ;;  %v4510_v38 = vld [vmem:[%s6868_s1] ss:$0 sm:$0xff] }
 0x104   : > { %v370_v51 = vpop.xlane.xlu1 %369 }
 0x105   : > { %v653_v52 = vadd.f32 1e-05, %v621_v47  ;;  %v590_v55 = vmul.f32 %v430_v48, %v430_v48  ;;  %v431_v56 = vmul.f32 0.0078125, %v370_v51 }
 0x106   : > { %v497_v59 = vpop.xlane.xlu0 %496 }
 0x107   : > { %3586 = vrsqrt.f32 %v653_v52  ;;  %v558_v60 = vmul.f32 0.0078125, %v497_v59  ;;  %v591_v2 = vmul.f32 %v431_v56, %v431_v56 }
 0x108   : > { %v499_v63 = vpop.xlane.xlu1 %498 }
 0x109   : > { %v622_v7 = vsub.f32 %v558_v60, %v590_v55  ;;  %v559_v8 = vmul.f32 0.0078125, %v499_v63 }
 0x10a   : > { %v372_v13 = vpop.xlane.xlu0 %371 }
 0x10b   : > { %v654_v14 = vadd.f32 1e-05, %v622_v7  ;;  %v623_v18 = vsub.f32 %v559_v8, %v591_v2  ;;  %v4500_v20 = vmul.f32 0.0078125, %v372_v13  ;;  %v4521_v2 = vld [vmem:[%s6869_s2] ss:$0 sm:$0xff]  ;;  %v718_v13 = vsub.f32 %v4320_v4, %v430_v48 }
 0x10c   : > { %v374_v24 = vpop.xlane.xlu1 %373 }
 0x10d   : > { %v3585_v25 = vpop.eup %3584  ;;  %3588 = vrsqrt.f32 %v654_v14  ;;  %v655_v29 = vadd.f32 1e-05, %v623_v18  ;;  %v592_v30 = vmul.f32 %v4500_v20, %v4500_v20  ;;  %v4505_v31 = vmul.f32 0.0078125, %v374_v24 }
 0x10e   : > { %v501_v32 = vpop.xlane.xlu0 %500  ;;  %v748_v34 = vmul.f32 %v3585_v25, %v716_v23 }
 0x10f   : > { %3590 = vrsqrt.f32 %v655_v29  ;;  %v560_v37 = vmul.f32 0.0078125, %v501_v32  ;;  %v593_v43 = vmul.f32 %v4505_v31, %v4505_v31 }
 0x110   : > { %v503_v28 = vpop.xlane.xlu1 %502  ;;  %v786_v55 = vmul.f32 %v4510_v38, %v748_v34 }
 0x111   : > { %v3587_v39 = vpop.eup %3586  ;;  %v624_v44 = vsub.f32 %v560_v37, %v592_v30  ;;  %v561_v47 = vmul.f32 0.0078125, %v503_v28  ;;  %v719_v30 = vsub.f32 %v4323_v5, %v431_v56 }
 0x112   : > { %v376_v51 = vpop.xlane.xlu0 %375  ;;  %v749_v52 = vmul.f32 %v3587_v39, %v717_v0  ;;  %v824_v23 = vadd.f32 %v4521_v2, %v786_v55 }
 0x113   : > { %v656_v59 = vadd.f32 1e-05, %v624_v44  ;;  %v625_v60 = vsub.f32 %v561_v47, %v593_v43  ;;  %v4516_v63 = vmul.f32 0.0078125, %v376_v51 }
 0x114   : > { %v378_v1 = vpop.xlane.xlu1 %377  ;;  %v787_v36 = vmul.f32 %v4510_v38, %v749_v52 }
 0x115   : > { %3592 = vrsqrt.f32 %v656_v59  ;;  %v657_v7 = vadd.f32 1e-05, %v625_v60  ;;  %v594_v8 = vmul.f32 %v4516_v63, %v4516_v63  ;;  %v4527_v14 = vmul.f32 0.0078125, %v378_v1 }
 0x116   : > { %v505_v18 = vpop.xlane.xlu0 %504  ;;  %v825_v24 = vadd.f32 %v4521_v2, %v787_v36  ;;  %v720_v60 = vsub.f32 %v4332_v9, %v4500_v20 }
 0x117   : > { %v3589_v25 = vpop.eup %3588  ;;  %3594 = vrsqrt.f32 %v657_v7  ;;  %v562_v29 = vmul.f32 0.0078125, %v505_v18  ;;  %v595_v28 = vmul.f32 %v4527_v14, %v4527_v14 }
 0x118   : > { %v507_v32 = vpop.xlane.xlu1 %506  ;;  %v856_v34 = vpack.c.bf16 %v825_v24, %v824_v23  ;;  %v750_v37 = vmul.f32 %v3589_v25, %v718_v13  ;;  %v721_v23 = vsub.f32 %v4335_v11, %v4505_v31 }
 0x119   : > { %v3591_v0 = vpop.eup %3590  ;;  %v626_v4 = vsub.f32 %v562_v29, %v594_v8  ;;  %v563_v48 = vmul.f32 0.0078125, %v507_v32 }
 0x11a   : > { %v380_v39 = vpop.xlane.xlu0 %379  ;;  %1013 = vmatmul.mubr.bf16.vlgmr.msra.gmra.mrb[0].mxu0 %v856_v34  ;;  %v751_v43 = vmul.f32 %v3591_v0, %v719_v30  ;;  %v788_v44 = vmul.f32 %v4510_v38, %v750_v37 }
 0x11b   : > { %v658_v47 = vadd.f32 1e-05, %v626_v4  ;;  %v627_v51 = vsub.f32 %v563_v48, %v595_v28  ;;  %v4535_v52 = vmul.f32 0.0078125, %v380_v39  ;;  %1022 = vmatprep.mubr.bf16.mxu0 %v4069_v41 }
 0x11c   : > { %v382_v5 = vpop.xlane.xlu1 %381  ;;  %v789_v56 = vmul.f32 %v4510_v38, %v751_v43  ;;  %v826_v7 = vadd.f32 %v4521_v2, %v788_v44  ;;  %v722_v44 = vsub.f32 %v4344_v16, %v4516_v63 }
 0x11d   : > { %3596 = vrsqrt.f32 %v658_v47  ;;  %v659_v55 = vadd.f32 1e-05, %v627_v51  ;;  %v596_v59 = vmul.f32 %v4535_v52, %v4535_v52  ;;  %v4543_v1 = vmul.f32 0.0078125, %v382_v5 }
 0x11e   : > { %v509_v36 = vpop.xlane.xlu0 %508  ;;  %v827_v8 = vadd.f32 %v4521_v2, %v789_v56 }
 0x11f   : > { %v3593_v13 = vpop.eup %3592  ;;  %3598 = vrsqrt.f32 %v659_v55  ;;  %v564_v18 = vmul.f32 0.0078125, %v509_v36  ;;  %v597_v9 = vmul.f32 %v4543_v1, %v4543_v1 }
 0x120   : > { %v511_v24 = vpop.xlane.xlu1 %510  ;;  %v857_v25 = vpack.c.bf16 %v827_v8, %v826_v7  ;;  %v752_v29 = vmul.f32 %v3593_v13, %v720_v60  ;;  %v723_v60 = vsub.f32 %v4347_v19, %v4527_v14 }
 0x121   : > { %v3595_v30 = vpop.eup %3594  ;;  %v628_v20 = vsub.f32 %v564_v18, %v596_v59  ;;  %v565_v32 = vmul.f32 0.0078125, %v511_v24 }
 0x122   : > { %v384_v34 = vpop.xlane.xlu0 %383  ;;  %1023 = vmatmul.mubr.bf16.gmra.mrb[4].mxu0 %v857_v25  ;;  %v753_v37 = vmul.f32 %v3595_v30, %v721_v23  ;;  %v790_v0 = vmul.f32 %v4510_v38, %v752_v29 }
 0x123   : > { %v660_v28 = vadd.f32 1e-05, %v628_v20  ;;  %v629_v4 = vsub.f32 %v565_v32, %v597_v9  ;;  %v4552_v48 = vmul.f32 0.0078125, %v384_v34  ;;  %1032 = vmatprep.mubr.bf16.mxu0 %v4069_v41  ;;  %v724_v34 = vsub.f32 %v4356_v26, %v4535_v52 }
 0x124   : > { %v386_v11 = vpop.xlane.xlu1 %385  ;;  %v791_v31 = vmul.f32 %v4510_v38, %v753_v37  ;;  %v828_v5 = vadd.f32 %v4521_v2, %v790_v0 }
 0x125   : > { %3600 = vrsqrt.f32 %v660_v28  ;;  %v661_v39 = vadd.f32 1e-05, %v629_v4  ;;  %v598_v43 = vmul.f32 %v4552_v48, %v4552_v48  ;;  %v4560_v47 = vmul.f32 0.0078125, %v386_v11 }
 0x126   : > { %v513_v51 = vpop.xlane.xlu0 %512  ;;  %v829_v56 = vadd.f32 %v4521_v2, %v791_v31 }
 0x127   : > { %v3597_v55 = vpop.eup %3596  ;;  %3602 = vrsqrt.f32 %v661_v39  ;;  %v566_v59 = vmul.f32 0.0078125, %v513_v51  ;;  %v599_v16 = vmul.f32 %v4560_v47, %v4560_v47  ;;  %v725_v39 = vsub.f32 %v4359_v27, %v4543_v1 }
 0x128   : > { %v515_v36 = vpop.xlane.xlu1 %514  ;;  %v858_v7 = vpack.c.bf16 %v829_v56, %v828_v5  ;;  %v754_v8 = vmul.f32 %v3597_v55, %v722_v44 }
 0x129   : > { %v3599_v13 = vpop.eup %3598  ;;  %v630_v63 = vsub.f32 %v566_v59, %v598_v43  ;;  %v567_v18 = vmul.f32 0.0078125, %v515_v36 }
 0x12a   : > { %v388_v23 = vpop.xlane.xlu0 %387  ;;  %1033 = vmatmul.mubr.bf16.gmra.mrb[8].mxu0 %v858_v7  ;;  %v755_v24 = vmul.f32 %v3599_v13, %v723_v60  ;;  %v792_v25 = vmul.f32 %v4510_v38, %v754_v8 }
 0x12b   : > { %v662_v29 = vadd.f32 1e-05, %v630_v63  ;;  %v631_v30 = vsub.f32 %v567_v18, %v599_v16  ;;  %v4569_v9 = vmul.f32 0.0078125, %v388_v23  ;;  %1042 = vmatprep.mubr.bf16.mxu0 %v4069_v41  ;;  %v726_v63 = vsub.f32 %v4368_v33, %v4552_v48 }
 0x12c   : > { %v390_v19 = vpop.xlane.xlu1 %389  ;;  %v793_v14 = vmul.f32 %v4510_v38, %v755_v24  ;;  %v830_v28 = vadd.f32 %v4521_v2, %v792_v25 }
 0x12d   : > { %3604 = vrsqrt.f32 %v662_v29  ;;  %v663_v20 = vadd.f32 1e-05, %v631_v30  ;;  %v600_v32 = vmul.f32 %v4569_v9, %v4569_v9  ;;  %v4577_v37 = vmul.f32 0.0078125, %v390_v19 }
 0x12e   : > { %v517_v0 = vpop.xlane.xlu0 %516  ;;  %v831_v4 = vadd.f32 %v4521_v2, %v793_v14  ;;  %v727_v19 = vsub.f32 %v4371_v35, %v4560_v47 }
 0x12f   : > { %v3601_v11 = vpop.eup %3600  ;;  %3606 = vrsqrt.f32 %v663_v20  ;;  %v568_v31 = vmul.f32 0.0078125, %v517_v0  ;;  %v601_v26 = vmul.f32 %v4577_v37, %v4577_v37 }
 0x130   : > { %v519_v43 = vpop.xlane.xlu1 %518  ;;  %v859_v44 = vpack.c.bf16 %v831_v4, %v830_v28  ;;  %v756_v51 = vmul.f32 %v3601_v11, %v724_v34 }
 0x131   : > { %v3603_v5 = vpop.eup %3602  ;;  %v632_v52 = vsub.f32 %v568_v31, %v600_v32  ;;  %v569_v56 = vmul.f32 0.0078125, %v519_v43 }
 0x132   : > { %v392_v55 = vpop.xlane.xlu0 %391  ;;  %1043 = vmatmul.mubr.bf16.gmra.mrb[12].mxu0 %v859_v44  ;;  %v757_v59 = vmul.f32 %v3603_v5, %v725_v39  ;;  %v794_v60 = vmul.f32 %v4510_v38, %v756_v51  ;;  %v728_v5 = vsub.f32 %v4380_v40, %v4569_v9 }
 0x133   : > { %v664_v36 = vadd.f32 1e-05, %v632_v52  ;;  %v633_v7 = vsub.f32 %v569_v56, %v601_v26  ;;  %v4586_v8 = vmul.f32 0.0078125, %v392_v55  ;;  %1052 = vmatprep.mubr.bf16.mxu0 %v4069_v41 }
 0x134   : > { %v394_v27 = vpop.xlane.xlu1 %393  ;;  %v795_v1 = vmul.f32 %v4510_v38, %v757_v59  ;;  %v832_v24 = vadd.f32 %v4521_v2, %v794_v60 }
 0x135   : > { %3608 = vrsqrt.f32 %v664_v36  ;;  %v665_v13 = vadd.f32 1e-05, %v633_v7  ;;  %v602_v16 = vmul.f32 %v4586_v8, %v4586_v8  ;;  %v4594_v18 = vmul.f32 0.0078125, %v394_v27 }
 0x136   : > { %v521_v23 = vpop.xlane.xlu0 %520  ;;  %v833_v25 = vadd.f32 %v4521_v2, %v795_v1  ;;  %v729_v36 = vsub.f32 %v4384_v42, %v4577_v37 }
 0x137   : > { %v3605_v29 = vpop.eup %3604  ;;  %3610 = vrsqrt.f32 %v665_v13  ;;  %v570_v30 = vmul.f32 0.0078125, %v521_v23  ;;  %v603_v33 = vmul.f32 %v4594_v18, %v4594_v18 }
 0x138   : > { %v523_v14 = vpop.xlane.xlu1 %522  ;;  %v860_v20 = vpack.c.bf16 %v833_v25, %v832_v24  ;;  %v758_v32 = vmul.f32 %v3605_v29, %v726_v63 }
 0x139   : > { %v3607_v34 = vpop.eup %3606  ;;  %v634_v48 = vsub.f32 %v570_v30, %v602_v16  ;;  %v571_v0 = vmul.f32 0.0078125, %v523_v14 }
 0x13a   : > { %v396_v28 = vpop.xlane.xlu0 %395  ;;  %1053 = vmatmul.mubr.bf16.gmra.mrb[16].mxu0 %v860_v20  ;;  %v759_v4 = vmul.f32 %v3607_v34, %v727_v19  ;;  %v796_v11 = vmul.f32 %v4510_v38, %v758_v32  ;;  %v730_v20 = vsub.f32 %v4393_v45, %v4586_v8 }
 0x13b   : > { %v666_v31 = vadd.f32 1e-05, %v634_v48  ;;  %v635_v39 = vsub.f32 %v571_v0, %v603_v33  ;;  %v4603_v43 = vmul.f32 0.0078125, %v396_v28  ;;  %1062 = vmatprep.mubr.bf16.mxu0 %v4069_v41 }
 0x13c   : > { %v398_v35 = vpop.xlane.xlu1 %397  ;;  %v797_v47 = vmul.f32 %v4510_v38, %v759_v4  ;;  %v834_v56 = vadd.f32 %v4521_v2, %v796_v11  ;;  %v731_v4 = vsub.f32 %v4396_v46, %v4594_v18 }
 0x13d   : > { %3612 = vrsqrt.f32 %v666_v31  ;;  %v667_v44 = vadd.f32 1e-05, %v635_v39  ;;  %v604_v51 = vmul.f32 %v4603_v43, %v4603_v43  ;;  %v4611_v26 = vmul.f32 0.0078125, %v398_v35 }
 0x13e   : > { %v525_v52 = vpop.xlane.xlu0 %524  ;;  %v835_v55 = vadd.f32 %v4521_v2, %v797_v47 }
 0x13f   : > { %v3609_v59 = vpop.eup %3608  ;;  %3614 = vrsqrt.f32 %v667_v44  ;;  %v572_v60 = vmul.f32 0.0078125, %v525_v52  ;;  %v605_v40 = vmul.f32 %v4611_v26, %v4611_v26 }
 0x140   : > { %v527_v7 = vpop.xlane.xlu1 %526  ;;  %v861_v27 = vpack.c.bf16 %v835_v55, %v834_v56  ;;  %v760_v1 = vmul.f32 %v3609_v59, %v728_v5 }
 0x141   : > { %v3611_v13 = vpop.eup %3610  ;;  %v636_v9 = vsub.f32 %v572_v60, %v604_v51  ;;  %v573_v16 = vmul.f32 0.0078125, %v527_v7 }
 0x142   : > { %v400_v63 = vpop.xlane.xlu0 %399  ;;  %1063 = vmatmul.mubr.bf16.gmra.mrb[20].mxu0 %v861_v27  ;;  %v761_v23 = vmul.f32 %v3611_v13, %v729_v36  ;;  %v798_v24 = vmul.f32 %v4510_v38, %v760_v1  ;;  %v732_v36 = vsub.f32 %v4405_v49, %v4603_v43 }
 0x143   : > { %v668_v25 = vadd.f32 1e-05, %v636_v9  ;;  %v637_v29 = vsub.f32 %v573_v16, %v605_v40  ;;  %v4620_v30 = vmul.f32 0.0078125, %v400_v63  ;;  %1072 = vmatprep.mubr.bf16.mxu0 %v4069_v41  ;;  %v733_v16 = vsub.f32 %v4408_v50, %v4611_v26 }
 0x144   : > { %v402_v42 = vpop.xlane.xlu1 %401  ;;  %v799_v37 = vmul.f32 %v4510_v38, %v761_v23  ;;  %v836_v33 = vadd.f32 %v4521_v2, %v798_v24 }
 0x145   : > { %3616 = vrsqrt.f32 %v668_v25  ;;  %v669_v19 = vadd.f32 1e-05, %v637_v29  ;;  %v606_v14 = vmul.f32 %v4620_v30, %v4620_v30  ;;  %v4628_v32 = vmul.f32 0.0078125, %v402_v42 }
 0x146   : > { %v529_v34 = vpop.xlane.xlu0 %528  ;;  %v837_v48 = vadd.f32 %v4521_v2, %v799_v37 }
 0x147   : > { %v3613_v0 = vpop.eup %3612  ;;  %3618 = vrsqrt.f32 %v669_v19  ;;  %v574_v28 = vmul.f32 0.0078125, %v529_v34  ;;  %v607_v45 = vmul.f32 %v4628_v32, %v4628_v32 }
 0x148   : > { %v531_v11 = vpop.xlane.xlu1 %530  ;;  %v862_v31 = vpack.c.bf16 %v837_v48, %v836_v33  ;;  %v762_v39 = vmul.f32 %v3613_v0, %v730_v20  ;;  %v734_v0 = vsub.f32 %v4417_v53, %v4620_v30 }
 0x149   : > { %v3615_v35 = vpop.eup %3614  ;;  %v638_v8 = vsub.f32 %v574_v28, %v606_v14  ;;  %v575_v47 = vmul.f32 0.0078125, %v531_v11 }
 0x14a   : > { %v404_v44 = vpop.xlane.xlu0 %403  ;;  %1073 = vmatmul.mubr.bf16.gmra.mrb[24].mxu0 %v862_v31  ;;  %v763_v51 = vmul.f32 %v3615_v35, %v731_v4  ;;  %v800_v5 = vmul.f32 %v4510_v38, %v762_v39 }
 0x14b   : > { %v670_v52 = vadd.f32 1e-05, %v638_v8  ;;  %v639_v56 = vsub.f32 %v575_v47, %v607_v45  ;;  %v4637_v55 = vmul.f32 0.0078125, %v404_v44  ;;  %1082 = vmatprep.mubr.bf16.mxu0 %v4069_v41  ;;  %v735_v45 = vsub.f32 %v4420_v54, %v4628_v32 }
 0x14c   : > { %v406_v46 = vpop.xlane.xlu1 %405  ;;  %v801_v18 = vmul.f32 %v4510_v38, %v763_v51  ;;  %v838_v1 = vadd.f32 %v4521_v2, %v800_v5 }
 0x14d   : > { %3620 = vrsqrt.f32 %v670_v52  ;;  %v671_v59 = vadd.f32 1e-05, %v639_v56  ;;  %v608_v60 = vmul.f32 %v4637_v55, %v4637_v55  ;;  %v4645_v7 = vmul.f32 0.0078125, %v406_v46 }
 0x14e   : > { %v533_v27 = vpop.xlane.xlu0 %532  ;;  %v839_v13 = vadd.f32 %v4521_v2, %v801_v18 }
 0x14f   : > { %v3617_v40 = vpop.eup %3616  ;;  %3622 = vrsqrt.f32 %v671_v59  ;;  %v576_v9 = vmul.f32 0.0078125, %v533_v27  ;;  %v609_v49 = vmul.f32 %v4645_v7, %v4645_v7 }
 0x150   : > { %v535_v63 = vpop.xlane.xlu1 %534  ;;  %v863_v23 = vpack.c.bf16 %v839_v13, %v838_v1  ;;  %v764_v24 = vmul.f32 %v3617_v40, %v732_v36  ;;  %v736_v1 = vsub.f32 %v4429_v57, %v4637_v55 }
 0x151   : > { %v3619_v25 = vpop.eup %3618  ;;  %v640_v43 = vsub.f32 %v576_v9, %v608_v60  ;;  %v577_v29 = vmul.f32 0.0078125, %v535_v63 }
 0x152   : > { %v408_v42 = vpop.xlane.xlu0 %407  ;;  %1083 = vmatmul.mubr.bf16.gmra.mrb[28].mxu0 %v863_v23  ;;  %v765_v37 = vmul.f32 %v3619_v25, %v733_v16  ;;  %v802_v19 = vmul.f32 %v4510_v38, %v764_v24  ;;  %v737_v24 = vsub.f32 %v4432_v58, %v4645_v7 }
 0x153   : > { %v672_v14 = vadd.f32 1e-05, %v640_v43  ;;  %v641_v20 = vsub.f32 %v577_v29, %v609_v49  ;;  %v4654_v34 = vmul.f32 0.0078125, %v408_v42  ;;  %1092 = vmatprep.mubr.bf16.mxu0 %v4069_v41 }
 0x154   : > { %v410_v50 = vpop.xlane.xlu1 %409  ;;  %v803_v26 = vmul.f32 %v4510_v38, %v765_v37  ;;  %v840_v11 = vadd.f32 %v4521_v2, %v802_v19 }
 0x155   : > { %3624 = vrsqrt.f32 %v672_v14  ;;  %v673_v33 = vadd.f32 1e-05, %v641_v20  ;;  %v610_v48 = vmul.f32 %v4654_v34, %v4654_v34  ;;  %v4662_v28 = vmul.f32 0.0078125, %v410_v50 }
 0x156   : > { %v537_v4 = vpop.xlane.xlu0 %536  ;;  %v841_v31 = vadd.f32 %v4521_v2, %v803_v26 }
 0x157   : > { %v3621_v39 = vpop.eup %3620  ;;  %3626 = vrsqrt.f32 %v673_v33  ;;  %v578_v35 = vmul.f32 0.0078125, %v537_v4  ;;  %v611_v53 = vmul.f32 %v4662_v28, %v4662_v28 }
 0x158   : > { %v539_v8 = vpop.xlane.xlu1 %538  ;;  %v864_v47 = vpack.c.bf16 %v841_v31, %v840_v11  ;;  %v766_v44 = vmul.f32 %v3621_v39, %v734_v0  ;;  %v738_v0 = vsub.f32 %v4441_v61, %v4654_v34 }
 0x159   : > { %v3623_v51 = vpop.eup %3622  ;;  %v642_v30 = vsub.f32 %v578_v35, %v610_v48  ;;  %v579_v5 = vmul.f32 0.0078125, %v539_v8  ;;  %v739_v8 = vsub.f32 %v4444_v62, %v4662_v28 }
 0x15a   : > { %v412_v52 = vpop.xlane.xlu0 %411  ;;  %1093 = vmatmul.mubr.bf16.gmra.mrb[32].mxu0 %v864_v47  ;;  %v767_v56 = vmul.f32 %v3623_v51, %v735_v45  ;;  %v804_v46 = vmul.f32 %v4510_v38, %v766_v44 }
 0x15b   : > { %v674_v18 = vadd.f32 1e-05, %v642_v30  ;;  %v643_v59 = vsub.f32 %v579_v5, %v611_v53  ;;  %v4671_v60 = vmul.f32 0.0078125, %v412_v52  ;;  %1102 = vmatprep.mubr.bf16.mxu0 %v4069_v41 }
 0x15c   : > { %v414_v54 = vpop.xlane.xlu1 %413  ;;  %v805_v32 = vmul.f32 %v4510_v38, %v767_v56  ;;  %v842_v9 = vadd.f32 %v4521_v2, %v804_v46 }
 0x15d   : > { %3628 = vrsqrt.f32 %v674_v18  ;;  %v675_v36 = vadd.f32 1e-05, %v643_v59  ;;  %v612_v27 = vmul.f32 %v4671_v60, %v4671_v60  ;;  %v4679_v13 = vmul.f32 0.0078125, %v414_v54 }
 0x15e   : > { %v541_v40 = vpop.xlane.xlu0 %540  ;;  %v843_v16 = vadd.f32 %v4521_v2, %v805_v32 }
 0x15f   : > { %v3625_v63 = vpop.eup %3624  ;;  %3630 = vrsqrt.f32 %v675_v36  ;;  %v580_v23 = vmul.f32 0.0078125, %v541_v40  ;;  %v613_v57 = vmul.f32 %v4679_v13, %v4679_v13  ;;  %v740_v36 = vsub.f32 %v4453_v3, %v4671_v60 }
 0x160   : > { %v543_v25 = vpop.xlane.xlu1 %542  ;;  %v865_v49 = vpack.c.bf16 %v843_v16, %v842_v9  ;;  %v768_v43 = vmul.f32 %v3625_v63, %v736_v1 }
 0x161   : > { %v3627_v29 = vpop.eup %3626  ;;  %v644_v55 = vsub.f32 %v580_v23, %v612_v27  ;;  %v581_v42 = vmul.f32 0.0078125, %v543_v25  ;;  %v741_v23 = vsub.f32 %v4456_v6, %v4679_v13 }
 0x162   : > { %v416_v37 = vpop.xlane.xlu0 %415  ;;  %1103 = vmatmul.mubr.bf16.gmra.mrb[36].mxu0 %v865_v49  ;;  %v769_v19 = vmul.f32 %v3627_v29, %v737_v24  ;;  %v806_v14 = vmul.f32 %v4510_v38, %v768_v43 }
 0x163   : > { %v676_v20 = vadd.f32 1e-05, %v644_v55  ;;  %v645_v50 = vsub.f32 %v581_v42, %v613_v57  ;;  %v4688_v26 = vmul.f32 0.0078125, %v416_v37  ;;  %1112 = vmatprep.mubr.bf16.mxu0 %v4069_v41 }
 0x164   : > { %v418_v58 = vpop.xlane.xlu1 %417  ;;  %v807_v7 = vmul.f32 %v4510_v38, %v769_v19  ;;  %v844_v31 = vadd.f32 %v4521_v2, %v806_v14 }
 0x165   : > { %3632 = vrsqrt.f32 %v676_v20  ;;  %v677_v33 = vadd.f32 1e-05, %v645_v50  ;;  %v614_v48 = vmul.f32 %v4688_v26, %v4688_v26  ;;  %v4696_v4 = vmul.f32 0.0078125, %v418_v58 }
 0x166   : > { %v545_v11 = vpop.xlane.xlu0 %544  ;;  %v845_v39 = vadd.f32 %v4521_v2, %v807_v7  ;;  %v742_v58 = vsub.f32 %v4465_v10, %v4688_v26 }
 0x167   : > { %v3629_v35 = vpop.eup %3628  ;;  %3634 = vrsqrt.f32 %v677_v33  ;;  %v582_v45 = vmul.f32 0.0078125, %v545_v11  ;;  %v615_v61 = vmul.f32 %v4696_v4, %v4696_v4 }
 0x168   : > { %v547_v47 = vpop.xlane.xlu1 %546  ;;  %v866_v44 = vpack.c.bf16 %v845_v39, %v844_v31  ;;  %v770_v51 = vmul.f32 %v3629_v35, %v738_v0  ;;  %v743_v39 = vsub.f32 %v4468_v12, %v4696_v4 }
 0x169   : > { %v3631_v53 = vpop.eup %3630  ;;  %v646_v34 = vsub.f32 %v582_v45, %v614_v48  ;;  %v583_v30 = vmul.f32 0.0078125, %v547_v47 }
 0x16a   : > { %v420_v5 = vpop.xlane.xlu0 %419  ;;  %1113 = vmatmul.mubr.bf16.gmra.mrb[40].mxu0 %v866_v44  ;;  %v771_v52 = vmul.f32 %v3631_v53, %v739_v8  ;;  %v808_v56 = vmul.f32 %v4510_v38, %v770_v51 }
 0x16b   : > { %v678_v46 = vadd.f32 1e-05, %v646_v34  ;;  %v647_v18 = vsub.f32 %v583_v30, %v615_v61  ;;  %v4705_v59 = vmul.f32 0.0078125, %v420_v5  ;;  %1122 = vmatprep.mubr.bf16.mxu0 %v4069_v41 }
 0x16c   : > { %v422_v62 = vpop.xlane.xlu1 %421  ;;  %v809_v28 = vmul.f32 %v4510_v38, %v771_v52  ;;  %v846_v40 = vadd.f32 %v4521_v2, %v808_v56 }
 0x16d   : > { %3636 = vrsqrt.f32 %v678_v46  ;;  %v679_v54 = vadd.f32 1e-05, %v647_v18  ;;  %v616_v32 = vmul.f32 %v4705_v59, %v4705_v59  ;;  %v4713_v27 = vmul.f32 0.0078125, %v422_v62 }
 0x16e   : > { %v549_v1 = vpop.xlane.xlu0 %548  ;;  %v847_v9 = vadd.f32 %v4521_v2, %v809_v28  ;;  %v744_v12 = vsub.f32 %v4477_v15, %v4705_v59 }
 0x16f   : > { %v3633_v16 = vpop.eup %3632  ;;  %3638 = vrsqrt.f32 %v679_v54  ;;  %v584_v63 = vmul.f32 0.0078125, %v549_v1  ;;  %v617_v3 = vmul.f32 %v4713_v27, %v4713_v27  ;;  %v745_v46 = vsub.f32 %v4480_v17, %v4713_v27 }
 0x170   : > { %v551_v24 = vpop.xlane.xlu1 %550  ;;  %v867_v25 = vpack.c.bf16 %v847_v9, %v846_v40  ;;  %v772_v49 = vmul.f32 %v3633_v16, %v740_v36 }
 0x171   : > { %v3635_v43 = vpop.eup %3634  ;;  %v648_v60 = vsub.f32 %v584_v63, %v616_v32  ;;  %v585_v29 = vmul.f32 0.0078125, %v551_v24 }
 0x172   : > { %v424_v57 = vpop.xlane.xlu0 %423  ;;  %1123 = vmatmul.mubr.bf16.gmra.mrb[44].mxu0 %v867_v25  ;;  %v773_v55 = vmul.f32 %v3635_v43, %v741_v23  ;;  %v810_v42 = vmul.f32 %v4510_v38, %v772_v49  ;;  %v3568_v43 = vld [vmem:[#allocation7 + $0x40] sm:$0xff]  }
 0x173   : > { %v680_v37 = vadd.f32 1e-05, %v648_v60  ;;  %v649_v19 = vsub.f32 %v585_v29, %v617_v3  ;;  %v458_v14 = vmul.f32 0.0078125, %v424_v57  ;;  %1132 = vmatprep.mubr.bf16.mxu0 %v4069_v41  ;;  %3358 = vmatprep.subr.bf16.mxu1 %v3568_v43  ;;  %v3570_v3 = vld [vmem:[#allocation7 + $0x48] sm:$0xff]   ;;  %v3572_v29 = vld [vmem:[#allocation7 + $0x50] sm:$0xff]  }
 0x174   : > { %v426_v6 = vpop.xlane.xlu1 %425  ;;  %v811_v13 = vmul.f32 %v4510_v38, %v773_v55  ;;  %v848_v48 = vadd.f32 %v4521_v2, %v810_v42  ;;  %v3571_v60 = vld [vmem:[#allocation7 + $0x8] sm:$0xff]   ;;  %v3573_v57 = vld [vmem:[#allocation7 + $0x10] sm:$0xff]   ;;  %v890_v55 = vlaneseq }
 0x175   : > { %3640 = vrsqrt.f32 %v680_v37  ;;  %v681_v20 = vadd.f32 1e-05, %v649_v19  ;;  %v618_v50 = vmul.f32 %v458_v14, %v458_v14  ;;  %v459_v7 = vmul.f32 0.0078125, %v426_v6  ;;  %v3576_v37 = vld [vmem:[#allocation7 + $0x60] sm:$0xff]  }
 0x176   : > { %v553_v33 = vpop.xlane.xlu0 %552  ;;  %v849_v0 = vadd.f32 %v4521_v2, %v811_v13  ;;  %v746_v59 = vsub.f32 %v4489_v21, %v458_v14  ;;  %v888_v19 = vld [vmem:[%s6871_s4] sm:$0x3] }
 0x177   : > { %v3637_v11 = vpop.eup %3636  ;;  %3642 = vrsqrt.f32 %v681_v20  ;;  %v586_v31 = vmul.f32 0.0078125, %v553_v33  ;;  %v619_v44 = vmul.f32 %v459_v7, %v459_v7  ;;  %v747_v17 = vsub.f32 %v4492_v22, %v459_v7  ;;  %v3569_v22 = vld [vmem:[#allocation7] sm:$0xff]  }
 0x178   : > { %v555_v35 = vpop.xlane.xlu1 %554  ;;  %v868_v45 = vpack.c.bf16 %v849_v0, %v848_v48  ;;  %v774_v8 = vmul.f32 %v3637_v11, %v742_v58  ;;  %3359 = vmatpush3.bf16.msra.mxu1 %v3569_v22  ;;  %v3577_v6 = vld [vmem:[#allocation7 + $0x20] sm:$0xff]  }
 0x179   : > { %v3639_v47 = vpop.eup %3638  ;;  %v650_v51 = vsub.f32 %v586_v31, %v618_v50  ;;  %v587_v53 = vmul.f32 0.0078125, %v555_v35  ;;  %3360 = vmatprep.subr.bf16.mxu1 %v3570_v3 }
 0x17a   : > { %1133 = vmatmul.mubr.bf16.gmra.mrb[48].mxu0 %v868_v45  ;;  %v775_v10 = vmul.f32 %v3639_v47, %v743_v39  ;;  %v812_v26 = vmul.f32 %v4510_v38, %v774_v8 }
 0x17b   : > { %v682_v61 = vadd.f32 1e-05, %v650_v51  ;;  %v651_v34 = vsub.f32 %v587_v53, %v619_v44  ;;  %1142 = vmatprep.mubr.bf16.mxu0 %v4069_v41  ;;  %v3578_v44 = vld [vmem:[#allocation7 + $0x68] sm:$0xff]  }
 0x17c   : > { %v813_v30 = vmul.f32 %v4510_v38, %v775_v10  ;;  %v850_v4 = vadd.f32 %v4521_v2, %v812_v26  ;;  %3361 = vmatpush3.bf16.msra.mxu1 %v3571_v60  ;;  %v3579_v53 = vld [vmem:[#allocation7 + $0x28] sm:$0xff]  }
 0x17d   : > { %3644 = vrsqrt.f32 %v682_v61  ;;  %v683_v5 = vadd.f32 1e-05, %v651_v34  ;;  %3362 = vmatprep.subr.bf16.mxu1 %v3572_v29 }
 0x17e   : > { %v851_v52 = vadd.f32 %v4521_v2, %v813_v30 }
 0x17f   : > { %v3641_v56 = vpop.eup %3640  ;;  %3646 = vrsqrt.f32 %v683_v5 }
 0x180   : > { %v869_v18 = vpack.c.bf16 %v851_v52, %v850_v4  ;;  %v776_v62 = vmul.f32 %v3641_v56, %v744_v12  ;;  %3363 = vmatpush3.bf16.msra.mxu1 %v3573_v57  ;;  %v3580_v12 = vld [vmem:[#allocation7 + $0x70] sm:$0xff]  }
 0x181   : > { %v3643_v28 = vpop.eup %3642 }
 0x182   : > { %1143 = vmatmul.mubr.bf16.gmra.mrb[52].mxu0 %v869_v18  ;;  %v777_v54 = vmul.f32 %v3643_v28, %v745_v46  ;;  %v814_v32 = vmul.f32 %v4510_v38, %v776_v62 }
 0x183   : > { %1152 = vmatprep.mubr.bf16.mxu0 %v4069_v41 }
 0x184   : > { %v815_v15 = vmul.f32 %v4510_v38, %v777_v54  ;;  %v852_v36 = vadd.f32 %v4521_v2, %v814_v32 }
 0x186   : > { %v853_v1 = vadd.f32 %v4521_v2, %v815_v15 }
 0x187   : > { %v3645_v40 = vpop.eup %3644 }
 0x188   : > { %v870_v27 = vpack.c.bf16 %v853_v1, %v852_v36  ;;  %v778_v9 = vmul.f32 %v3645_v40, %v746_v59 }
 0x189   : > { %v3647_v16 = vpop.eup %3646 }
 0x18a   : > { %1153 = vmatmul.mubr.bf16.gmra.mrb[56].mxu0 %v870_v27  ;;  %v779_v63 = vmul.f32 %v3647_v16, %v747_v17  ;;  %v816_v23 = vmul.f32 %v4510_v38, %v778_v9 }
 0x18b   : > { %1162 = vmatprep.mubr.bf16.mxu0 %v4069_v41  ;;  %v3574_v41 = vld [vmem:[#allocation7 + $0x58] sm:$0xff]  }
 0x18c   : > { %v817_v24 = vmul.f32 %v4510_v38, %v779_v63  ;;  %v854_v21 = vadd.f32 %v4521_v2, %v816_v23  ;;  %v3575_v38 = vld [vmem:[#allocation7 + $0x18] sm:$0xff]   ;;  %3364 = vmatprep.subr.bf16.mxu1 %v3574_v41  ;;  %v3581_v23 = vld [vmem:[#allocation7 + $0x30] sm:$0xff]  }
 0x18d   : > { %3365 = vmatpush3.bf16.msra.mxu1 %v3575_v38 }
 0x18e   : > { %v855_v25 = vadd.f32 %v4521_v2, %v817_v24  ;;  %v891_v2 = vshrl.u32 %v890_v55, 7  ;;  %3366 = vmatprep.subr.bf16.mxu1 %v3576_v37 }
 0x190   : > { %v871_v49 = vpack.c.bf16 %v855_v25, %v854_v21  ;;  %v892_v42 = vsub.s32 0, %v891_v2  ;;  %v896_v39 = vsub.s32 1, %v891_v2 }
 0x191   : > { %3367 = vmatpush3.bf16.msra.mxu1 %v3577_v6  ;;  %v3582_v6 = vld [vmem:[#allocation7 + $0x78] sm:$0xff]  }
 0x192   : > { %1163 = vmatmul.mubr.bf16.gmra.mrb[60].mxu0 %v871_v49  ;;  %v4754_v14 = vrot.slane %v888_v19, %v892_v42  ;;  %v4776_v10 = vrot.slane %v888_v19, %v896_v39  ;;  %3368 = vmatprep.subr.bf16.mxu1 %v3578_v44 }
 0x195   : > { %3369 = vmatpush3.bf16.msra.mxu1 %v3579_v53 }
 0x196   : > { %3370 = vmatprep.subr.bf16.mxu1 %v3580_v12 }
 0x199   : > { %3371 = vmatpush3.bf16.msra.mxu1 %v3581_v23 }
 0x19a   : > { %3372 = vmatprep.subr.bf16.mxu1 %v3582_v6 }
 0x1ed   : > { %v1014_v13 = vpop.f32.mrb[0].mxu0 }
 0x1ee   : > { %v4757_v20 = vadd.f32 %v1014_v13, %v4754_v14  ;;  %v1016_v50 = vpop.f32.mrb[1].mxu0 }
 0x1ef   : > { %v1018_v58 = vpop.f32.mrb[2].mxu0  ;;  %v1017_v3 = vadd.f32 %v1016_v50, %v4776_v10 }
 0x1f0   : > { %v4760_v7 = vmul.f32 0.70710677, %v4757_v20  ;;  %v4763_v33 = vadd.f32 %v1018_v58, %v4754_v14  ;;  %v1020_v48 = vpop.f32.mrb[3].mxu0  ;;  %v3583_v58 = vld [vmem:[#allocation7 + $0x38] sm:$0xff]  }
 0x1f1   : > { %v4834_v41 = vadd.f32 %v1020_v48, %v4776_v10  ;;  %v4847_v13 = vmul.f32 0.70710677, %v1017_v3  ;;  %3373 = vmatpush3.bf16.msra.mxu1 %v3583_v58 }
 0x1f2   : > { %v4766_v0 = vand.u32 2147483647, %v4760_v7  ;;  %v4769_v11 = vmul.f32 0.70710677, %v4763_v33  ;;  %vm2517_vm0 = vcmp.lt.f32.partialorder %v4760_v7, 0.0 }
 0x1f3   : > { %6908 = vst [vmem:[#allocation14_spill] sm:$0xff] %v4847_v13  ;;  %v4853_v48 = vmul.f32 0.70710677, %v4834_v41 }
 0x1f4   : > { %v1365_v31 = vmul.f32 0.3275911, %v4766_v0  ;;  %v4773_v35 = vand.u32 2147483647, %v4769_v11  ;;  %v2133_v23 = vsub.f32 0.0, %v4766_v0  ;;  %vm2519_vm1 = vcmp.lt.f32.partialorder %v4769_v11, 0.0 }
 0x1f5   : > { %v1024_v47 = vpop.f32.mrb[4].mxu0  ;;  %6909 = vst [vmem:[#allocation15_spill] sm:$0xff] %v4853_v48 }
 0x1f6   : > { %v1429_v45 = vadd.f32 1.0, %v1365_v31  ;;  %v1367_v8 = vmul.f32 0.3275911, %v4773_v35  ;;  %v1026_v51 = vpop.f32.mrb[5].mxu0  ;;  %v4779_v30 = vadd.f32 %v1024_v47, %v4754_v14 }
 0x1f7   : > { %v1028_v61 = vpop.f32.mrb[6].mxu0  ;;  %v4782_v5 = vadd.f32 %v1026_v51, %v4776_v10  ;;  %v1302_v51 = vand.u32 2147483647, %v4847_v13  ;;  %v4897_v13 = vmul.f32 0.5, %v1017_v3 }
 0x1f8   : > { %3648 = vrcp.f32 %v1429_v45  ;;  %v1431_v26 = vadd.f32 1.0, %v1367_v8  ;;  %v1030_v34 = vpop.f32.mrb[7].mxu0  ;;  %v4785_v4 = vadd.f32 %v1028_v61, %v4754_v14  ;;  %v4788_v52 = vmul.f32 0.70710677, %v4779_v30 }
 0x1f9   : > { %v4791_v56 = vadd.f32 %v1030_v34, %v4776_v10  ;;  %v4794_v46 = vmul.f32 0.70710677, %v4782_v5  ;;  %v1304_v34 = vand.u32 2147483647, %v4853_v48  ;;  %6914 = vst [vmem:[#allocation20_spill] sm:$0xff] %v4897_v13 }
 0x1fa   : > { %3650 = vrcp.f32 %v1431_v26  ;;  %v4797_v18 = vmul.f32 0.70710677, %v4785_v4  ;;  %v4800_v28 = vand.u32 2147483647, %v4788_v52  ;;  %vm2521_vm2 = vcmp.lt.f32.partialorder %v4788_v52, 0.0 }
 0x1fb   : > { %v4803_v32 = vand.u32 2147483647, %v4794_v46  ;;  %v4810_v1 = vmul.f32 0.70710677, %v4791_v56  ;;  %v2136_v6 = vsub.f32 0.0, %v1304_v34  ;;  %vm2522_vm3 = vcmp.lt.f32.partialorder %v4794_v46, 0.0 }
 0x1fc   : > { %v4806_v15 = vand.u32 2147483647, %v4797_v18  ;;  %v1369_v36 = vmul.f32 0.3275911, %v4800_v28  ;;  %vm2523_vm4 = vcmp.lt.f32.partialorder %v4797_v18, 0.0 }
 0x1fd   : > { %v1034_v62 = vpop.f32.mrb[8].mxu0  ;;  %6906 = vst [vmem:[#allocation12_spill] sm:$0xff] %v4810_v1  ;;  %v1370_v40 = vmul.f32 0.3275911, %v4803_v32  ;;  %v4817_v16 = vand.u32 2147483647, %v4810_v1  ;;  %v2200_v1 = vmul.f32 %v2136_v6, %v1304_v34 }
 0x1fe   : > { %v1036_v54 = vpop.f32.mrb[9].mxu0  ;;  %v1371_v17 = vmul.f32 0.3275911, %v4806_v15  ;;  %v1433_v9 = vadd.f32 1.0, %v1369_v36  ;;  %v4829_v60 = vadd.f32 %v1034_v62, %v4754_v14 }
 0x1ff   : > { %v1038_v59 = vpop.f32.mrb[10].mxu0  ;;  %v1434_v21 = vadd.f32 1.0, %v1370_v40  ;;  %v1372_v49 = vmul.f32 0.3275911, %v4817_v16  ;;  %v4843_v37 = vadd.f32 %v1036_v54, %v4776_v10 }
 0x200   : > { %v4819_v63 = vpop.f32.mrb[11].mxu0  ;;  %3652 = vrcp.f32 %v1433_v9  ;;  %v1435_v25 = vadd.f32 1.0, %v1371_v17  ;;  %v4840_v42 = vmul.f32 0.70710677, %v4829_v60  ;;  %v4877_v17 = vadd.f32 %v1038_v59, %v4754_v14 }
 0x201   : > { %3654 = vrcp.f32 %v1434_v21  ;;  %v1436_v38 = vadd.f32 1.0, %v1372_v49  ;;  %v4856_v31 = vmul.f32 0.70710677, %v4843_v37  ;;  %v1366_v49 = vmul.f32 0.3275911, %v1302_v51 }
 0x202   : > { %v4814_v27 = vpop.eup %3648  ;;  %3656 = vrcp.f32 %v1435_v25  ;;  %6907 = vst [vmem:[#allocation13_spill] sm:$0xff] %v4840_v42  ;;  %v4850_v50 = vand.u32 2147483647, %v4840_v42  ;;  %v4886_v25 = vmul.f32 0.5, %v4757_v20  ;;  %v2135_v59 = vsub.f32 0.0, %v4773_v35 }
 0x203   : > { %v1557_v24 = vmul.f32 1.0614054, %v4814_v27  ;;  %6910 = vst [vmem:[#allocation16_spill] sm:$0xff] %v4856_v31  ;;  %3658 = vrcp.f32 %v1436_v38  ;;  %v4861_v47 = vand.u32 2147483647, %v4856_v31  ;;  %v2197_v20 = vmul.f32 %v2133_v23, %v4766_v0 }
 0x204   : > { %v4825_v22 = vpop.eup %3650  ;;  %v1373_v8 = vmul.f32 0.3275911, %v4850_v50  ;;  %v4894_v48 = vmul.f32 0.70710677, %v4877_v17  ;;  %v1368_v42 = vmul.f32 0.3275911, %v1304_v34 }
 0x205   : > { %v4823_v43 = vpop.f32.mrb[12].mxu0  ;;  %v1621_v57 = vadd.f32 -1.4531521, %v1557_v24  ;;  %v1559_v2 = vmul.f32 1.0614054, %v4825_v22 }
 0x206   : > { %v4831_v29 = vpop.f32.mrb[13].mxu0  ;;  %v1437_v53 = vadd.f32 1.0, %v1373_v8  ;;  %v1374_v12 = vmul.f32 0.3275911, %v4861_v47  ;;  %6913 = vst [vmem:[#allocation19_spill] sm:$0xff] %v4894_v48 }
 0x207   : > { %v4836_v55 = vpop.f32.mrb[14].mxu0  ;;  %v1685_v39 = vmul.f32 %v4814_v27, %v1621_v57  ;;  %v1623_v45 = vadd.f32 -1.4531521, %v1559_v2  ;;  %v2134_v2 = vsub.f32 0.0, %v1302_v51 }
 0x208   : > { %v4845_v19 = vpop.f32.mrb[15].mxu0  ;;  %3660 = vrcp.f32 %v1437_v53  ;;  %v1438_v57 = vadd.f32 1.0, %v1374_v12 }
 0x209   : > { %v1749_v54 = vadd.f32 1.4214138, %v1685_v39  ;;  %v1687_v36 = vmul.f32 %v4825_v22, %v1623_v45 }
 0x20a   : > { %v4863_v44 = vpop.eup %3652  ;;  %3662 = vrcp.f32 %v1438_v57  ;;  %v2261_v57 = vmul.f32 1.442695, %v2197_v20  ;;  %v2138_v20 = vsub.f32 0.0, %v4803_v32 }
 0x20b   : > { %v4868_v61 = vpop.eup %3654  ;;  %v1561_v40 = vmul.f32 1.0614054, %v4863_v44  ;;  %v1813_v39 = vmul.f32 %v4814_v27, %v1749_v54  ;;  %v1751_v45 = vadd.f32 1.4214138, %v1687_v36  ;;  %v4905_v54 = vand.u32 2147483647, %v4894_v48 }
 0x20c   : > { %v1562_v24 = vmul.f32 1.0614054, %v4868_v61  ;;  %v4883_v21 = vpop.eup %3656  ;;  %v2198_v36 = vmul.f32 %v2134_v2, %v1302_v51  ;;  %v2137_v2 = vsub.f32 0.0, %v4800_v28 }
 0x20d   : > { %v4866_v26 = vpop.f32.mrb[16].mxu0  ;;  %v1563_v58 = vmul.f32 1.0614054, %v4883_v21  ;;  %v1625_v8 = vadd.f32 -1.4531521, %v1561_v40  ;;  %v4899_v12 = vpop.eup %3658  ;;  %v2199_v40 = vmul.f32 %v2135_v59, %v4773_v35  ;;  %v1815_v23 = vmul.f32 %v4825_v22, %v1751_v45 }
 0x20e   : > { %v4872_v62 = vpop.f32.mrb[17].mxu0  ;;  %v1626_v53 = vadd.f32 -1.4531521, %v1562_v24  ;;  %v1877_v3 = vadd.f32 -0.28449672, %v1813_v39 }
 0x20f   : > { %v4879_v9 = vpop.f32.mrb[18].mxu0  ;;  %v1627_v31 = vadd.f32 -1.4531521, %v1563_v58  ;;  %v1689_v24 = vmul.f32 %v4863_v44, %v1625_v8  ;;  %v4916_v58 = vmul.f32 0.5, %v4834_v41  ;;  %v1564_v35 = vmul.f32 1.0614054, %v4899_v12 }
 0x210   : > { %6911 = vst [vmem:[#allocation17_spill] sm:$0xff] %v4879_v9  ;;  %v4888_v38 = vpop.f32.mrb[19].mxu0  ;;  %v4902_v9 = vmul.f32 0.5, %v4763_v33  ;;  %v1690_v51 = vmul.f32 %v4868_v61, %v1626_v53  ;;  %v2263_v45 = vmul.f32 1.442695, %v2198_v36  ;;  %v2139_v41 = vsub.f32 0.0, %v4806_v15 }
 0x211   : > { %6912 = vst [vmem:[#allocation18_spill] sm:$0xff] %v4888_v38  ;;  %v1430_v38 = vadd.f32 1.0, %v1366_v49  ;;  %v1375_v49 = vmul.f32 0.3275911, %v4905_v54  ;;  %6917 = vst [vmem:[#allocation23_spill] sm:$0xff] %v4916_v58  ;;  %v1691_v59 = vmul.f32 %v4883_v21, %v1627_v31  ;;  %v1941_v53 = vmul.f32 %v4814_v27, %v1877_v3 }
 0x212   : > { %v2265_v8 = vmul.f32 1.442695, %v2199_v40  ;;  %v4928_v58 = vpop.eup %3660  ;;  %v1879_v13 = vadd.f32 -0.28449672, %v1815_v23  ;;  %v1754_v31 = vadd.f32 1.4214138, %v1690_v51  ;;  %v2201_v40 = vmul.f32 %v2137_v2, %v4800_v28 }
 0x213   : > { %3664 = vrcp.f32 %v1430_v38  ;;  %v1439_v6 = vadd.f32 1.0, %v1375_v49  ;;  %v1753_v38 = vadd.f32 1.4214138, %v1689_v24  ;;  %v1628_v49 = vadd.f32 -1.4531521, %v1564_v35 }
 0x214   : > { %3666 = vpow2.f32 %v2261_v57  ;;  %v4936_v36 = vmul.f32 0.5, %v4779_v30  ;;  %v4941_v3 = vpop.eup %3662  ;;  %v2203_v23 = vmul.f32 %v2139_v41, %v4806_v15  ;;  %v1565_v24 = vmul.f32 1.0614054, %v4928_v58 }
 0x215   : > { %v4908_v0 = vpop.f32.mrb[20].mxu0  ;;  %3668 = vrcp.f32 %v1439_v6  ;;  %v2005_v30 = vadd.f32 0.2548296, %v1941_v53  ;;  %v1943_v28 = vmul.f32 %v4825_v22, %v1879_v13  ;;  %v1817_v51 = vmul.f32 %v4863_v44, %v1753_v38 }
 0x216   : > { %6915 = vst [vmem:[#allocation21_spill] sm:$0xff] %v4908_v0  ;;  %v4913_v33 = vpop.f32.mrb[21].mxu0  ;;  %3670 = vpow2.f32 %v2265_v8  ;;  %v1818_v2 = vmul.f32 %v4868_v61, %v1754_v31  ;;  %v2140_v15 = vsub.f32 0.0, %v4817_v16  ;;  %v4965_v13 = vadd.f32 %v4819_v63, %v4776_v10 }
 0x217   : > { %6916 = vst [vmem:[#allocation22_spill] sm:$0xff] %v4913_v33  ;;  %v4920_v34 = vpop.f32.mrb[22].mxu0  ;;  %v1432_v33 = vadd.f32 1.0, %v1368_v42  ;;  %v2202_v42 = vmul.f32 %v2138_v20, %v4803_v32  ;;  %v1692_v32 = vmul.f32 %v4899_v12, %v1628_v49  ;;  %v1566_v20 = vmul.f32 1.0614054, %v4941_v3 }
 0x218   : > { %6918 = vst [vmem:[#allocation24_spill] sm:$0xff] %v4920_v34  ;;  %v4924_v39 = vpop.f32.mrb[23].mxu0  ;;  %v4931_v34 = vmul.f32 1.442695, %v2200_v1  ;;  %v4944_v1 = vmul.f32 0.5, %v4782_v5  ;;  %v4957_v5 = vmul.f32 0.5, %v4785_v4  ;;  %3672 = vpow2.f32 %v2263_v45 }
 0x219   : > { %6919 = vst [vmem:[#allocation25_spill] sm:$0xff] %v4924_v39  ;;  %v1755_v39 = vadd.f32 1.4214138, %v1691_v59  ;;  %v2269_v59 = vmul.f32 1.442695, %v2201_v40  ;;  %v2069_v4 = vmul.f32 %v4814_v27, %v2005_v30  ;;  %v2141_v40 = vsub.f32 0.0, %v4850_v50 }
 0x21a   : > { %v2271_v8 = vmul.f32 1.442695, %v2202_v42  ;;  %v2273_v41 = vmul.f32 1.442695, %v2203_v23  ;;  %v1629_v53 = vadd.f32 -1.4531521, %v1565_v24  ;;  %3674 = vrcp.f32 %v1432_v33 }
 0x21b   : > { %v1819_v6 = vmul.f32 %v4883_v21, %v1755_v39  ;;  %v2007_v31 = vadd.f32 0.2548296, %v1943_v28  ;;  %v1881_v49 = vadd.f32 -0.28449672, %v1817_v51  ;;  %v1882_v39 = vadd.f32 -0.28449672, %v1818_v2 }
 0x21c   : > { %3676 = vpow2.f32 %v2269_v59  ;;  %v1630_v45 = vadd.f32 -1.4531521, %v1566_v20  ;;  %v4975_v42 = vmul.f32 0.70710677, %v4965_v13  ;;  %v4978_v27 = vmul.f32 0.5, %v4791_v56 }
 0x21d   : > { %v4933_v0 = vpop.f32.mrb[24].mxu0  ;;  %v4967_v38 = vpop.eup %3664  ;;  %v1883_v63 = vadd.f32 -0.28449672, %v1819_v6  ;;  %3678 = vpow2.f32 %v2271_v8  ;;  %v4981_v24 = vmul.f32 0.5, %v4829_v60  ;;  %v1693_v33 = vmul.f32 %v4928_v58, %v1629_v53 }
 0x21e   : > { %v4939_v48 = vpop.f32.mrb[25].mxu0  ;;  %6923 = vst [vmem:[#allocation29_spill] sm:$0xff] %v4967_v38  ;;  %v3667_v23 = vpop.eup %3666  ;;  %v2071_v28 = vmul.f32 %v4825_v22, %v2007_v31  ;;  %3680 = vpow2.f32 %v2273_v41  ;;  %v2205_v51 = vmul.f32 %v2141_v40, %v4850_v50  ;;  %v1945_v2 = vmul.f32 %v4863_v44, %v1881_v49 }
 0x21f   : > { %6920 = vst [vmem:[#allocation26_spill] sm:$0xff] %v4939_v48  ;;  %v4949_v57 = vpop.f32.mrb[26].mxu0  ;;  %v4984_v30 = vpop.eup %3668  ;;  %v1947_v60 = vmul.f32 %v4883_v21, %v1883_v63  ;;  %v4993_v6 = vmul.f32 0.5, %v4843_v37  ;;  %v1694_v20 = vmul.f32 %v4941_v3, %v1630_v45  ;;  %v4997_v22 = vand.u32 2147483647, %v4975_v42 }
 0x220   : > { %6921 = vst [vmem:[#allocation27_spill] sm:$0xff] %v4949_v57  ;;  %v4953_v35 = vpop.f32.mrb[27].mxu0  ;;  %v2204_v57 = vmul.f32 %v2140_v15, %v4817_v16  ;;  %v2389_v16 = vmul.f32 %v3667_v23, %v2069_v4  ;;  %v3671_v59 = vpop.eup %3670  ;;  %v1757_v50 = vadd.f32 1.4214138, %v1693_v33  ;;  %v2142_v8 = vsub.f32 0.0, %v4861_v47 }
 0x221   : > { %6922 = vst [vmem:[#allocation28_spill] sm:$0xff] %v4953_v35  ;;  %v1756_v35 = vadd.f32 1.4214138, %v1692_v32  ;;  %v1946_v32 = vmul.f32 %v4868_v61, %v1882_v39  ;;  %v1567_v41 = vmul.f32 1.0614054, %v4984_v30  ;;  %v5006_v53 = vmul.f32 %v3671_v59, %v2071_v28 }
 0x222   : > { %v2275_v15 = vmul.f32 1.442695, %v2204_v57  ;;  %v5004_v57 = vadd.f32 %v4823_v43, %v4754_v14  ;;  %v2277_v37 = vmul.f32 1.442695, %v2205_v51  ;;  %v1376_v4 = vmul.f32 0.3275911, %v4997_v22  ;;  %v5009_v31 = vpop.eup %3672 }
 0x223   : > { %v1820_v56 = vmul.f32 %v4899_v12, %v1756_v35  ;;  %v2453_v35 = vsub.f32 1.0, %v2389_v16  ;;  %6925 = vst [vmem:[#allocation31_spill] sm:$0xff] %v5009_v31  ;;  %3682 = vpow2.f32 %v4931_v34  ;;  %v2009_v49 = vadd.f32 0.2548296, %v1945_v2 }
 0x224   : > { %v2010_v40 = vadd.f32 0.2548296, %v1946_v32  ;;  %v2011_v63 = vadd.f32 0.2548296, %v1947_v60  ;;  %v1758_v45 = vadd.f32 1.4214138, %v1694_v20  ;;  %v5014_v43 = vadd.f32 %v4831_v29, %v4776_v10  ;;  %v5016_v33 = vpop.eup %3674 }
 0x225   : > { %v4972_v48 = vpop.f32.mrb[28].mxu0  ;;  %v1884_v39 = vadd.f32 -0.28449672, %v1820_v56  ;;  %v1440_v23 = vadd.f32 1.0, %v1376_v4  ;;  %6926 = vst [vmem:[#allocation32_spill] sm:$0xff] %v5016_v33  ;;  %3684 = vpow2.f32 %v2275_v15  ;;  %v1821_v16 = vmul.f32 %v4928_v58, %v1757_v50 }
 0x226   : > { %6924 = vst [vmem:[#allocation30_spill] sm:$0xff] %v4972_v48  ;;  %v2206_v28 = vmul.f32 %v2142_v8, %v4861_v47  ;;  %v1631_v51 = vadd.f32 -1.4531521, %v1567_v41  ;;  %v3677_v59 = vpop.eup %3676  ;;  %v2581_v34 = vsub.f32 0.0, %v2453_v35  ;;  %v2455_v2 = vsub.f32 1.0, %v5006_v53 }
 0x227   : > { %3686 = vrcp.f32 %v1440_v23  ;;  %v5022_v32 = vmul.f32 0.70710677, %v5004_v57  ;;  %v3679_v56 = vpop.eup %3678  ;;  %v2073_v29 = vmul.f32 %v4863_v44, %v2009_v49  ;;  %v2074_v15 = vmul.f32 %v4868_v61, %v2010_v40 }
 0x228   : > { %v1948_v60 = vmul.f32 %v4899_v12, %v1884_v39  ;;  %3688 = vpow2.f32 %v2277_v37  ;;  %v3681_v47 = vpop.eup %3680  ;;  %v2075_v20 = vmul.f32 %v4883_v21, %v2011_v63  ;;  %v1822_v50 = vmul.f32 %v4941_v3, %v1758_v45 }
 0x229   : > { %v5031_v8 = vand.u32 2147483647, %v5022_v32  ;;  %v5034_v41 = vmul.f32 0.70710677, %v5014_v43  ;;  %v1885_v53 = vadd.f32 -0.28449672, %v1821_v16  ;;  %v1695_v44 = vmul.f32 %v4984_v30, %v1631_v51 }
 0x22a   : > { %v2279_v4 = vmul.f32 1.442695, %v2206_v28  ;;  %v2143_v61 = vsub.f32 0.0, %v4905_v54  ;;  %v2645_v37 = vsel %vm2517_vm0, %v2581_v34, %v2453_v35  ;;  %v2583_v49 = vsub.f32 0.0, %v2455_v2 }
 0x22b   : > { %v1377_v21 = vmul.f32 0.3275911, %v5031_v8  ;;  %v5042_v40 = vand.u32 2147483647, %v5034_v41  ;;  %v2393_v39 = vmul.f32 %v3677_v59, %v2073_v29  ;;  %v5044_v63 = vmul.f32 %v3679_v56, %v2074_v15 }
 0x22c   : > { %v2012_v45 = vadd.f32 0.2548296, %v1948_v60  ;;  %v5048_v23 = vadd.f32 %v4836_v55, %v4754_v14  ;;  %v5050_v16 = vmul.f32 %v3681_v47, %v2075_v20  ;;  %v1886_v28 = vadd.f32 -0.28449672, %v1822_v50 }
 0x22d   : > { %v1441_v51 = vadd.f32 1.0, %v1377_v21  ;;  %v1378_v7 = vmul.f32 0.3275911, %v5042_v40  ;;  %v5053_v35 = vpop.eup %3682  ;;  %v1949_v34 = vmul.f32 %v4928_v58, %v1885_v53  ;;  %3690 = vpow2.f32 %v2279_v4 }
 0x22e   : > { %6927 = vst [vmem:[#allocation33_spill] sm:$0xff] %v5053_v35  ;;  %v5057_v59 = vmul.f32 0.5, %v4877_v17  ;;  %v1759_v56 = vadd.f32 1.4214138, %v1695_v44  ;;  %v2709_v29 = vadd.f32 1.0, %v2645_v37  ;;  %v2207_v55 = vmul.f32 %v2143_v61, %v4905_v54 }
 0x22f   : > { %3692 = vrcp.f32 %v1441_v51  ;;  %v1442_v15 = vadd.f32 1.0, %v1378_v7  ;;  %v3685_v60 = vpop.eup %3684  ;;  %v2457_v47 = vsub.f32 1.0, %v2393_v39  ;;  %v2458_v20 = vsub.f32 1.0, %v5044_v63 }
 0x230   : > { %v5063_v50 = vmul.f32 0.70710677, %v5048_v23  ;;  %v5067_v53 = vadd.f32 %v4845_v19, %v4776_v10  ;;  %v2647_v4 = vsel %vm2519_vm1, %v2583_v49, %v2455_v2  ;;  %v2459_v54 = vsub.f32 1.0, %v5050_v16 }
 0x231   : > { %v5069_v17 = vpop.eup %3686  ;;  %v2076_v44 = vmul.f32 %v4899_v12, %v2012_v45  ;;  %v1950_v61 = vmul.f32 %v4941_v3, %v1886_v28  ;;  %v2013_v21 = vadd.f32 0.2548296, %v1949_v34  ;;  %v1823_v19 = vmul.f32 %v4984_v30, %v1759_v56 }
 0x232   : > { %v3689_v37 = vpop.eup %3688  ;;  %3694 = vrcp.f32 %v1442_v15  ;;  %v5081_v39 = vadd.f32 %v4866_v26, %v4754_v14  ;;  %v5084_v11 = vmul.f32 %v2709_v29, %v4886_v25  ;;  %v1568_v2 = vmul.f32 1.0614054, %v5069_v17 }
 0x233   : > { %v5088_v12 = vand.u32 2147483647, %v5063_v50  ;;  %v5091_v49 = vmul.f32 0.70710677, %v5067_v53  ;;  %v2711_v63 = vadd.f32 1.0, %v2647_v4  ;;  %v2585_v45 = vsub.f32 0.0, %v2457_v47 }
 0x234   : > { %6928 = vst [vmem:[#allocation34_spill] sm:$0xff] %v5084_v11  ;;  %v2586_v16 = vsub.f32 0.0, %v2458_v20  ;;  %v2281_v28 = vmul.f32 1.442695, %v2207_v55  ;;  %v2396_v51 = vmul.f32 %v3685_v60, %v2076_v44  ;;  %v2014_v7 = vadd.f32 0.2548296, %v1950_v61 }
 0x235   : > { %v1379_v26 = vmul.f32 0.3275911, %v5088_v12  ;;  %v5095_v34 = vand.u32 2147483647, %v5091_v49  ;;  %v2587_v25 = vsub.f32 0.0, %v2459_v54  ;;  %v2077_v56 = vmul.f32 %v4928_v58, %v2013_v21  ;;  %v5106_v60 = vpop.f32.mrb[29].mxu0 }
 0x236   : > { %v1887_v29 = vadd.f32 -0.28449672, %v1823_v19  ;;  %v5099_v15 = vmul.f32 0.70710677, %v5081_v39  ;;  %v1632_v35 = vadd.f32 -1.4531521, %v1568_v2  ;;  %v5104_v55 = vadd.f32 %v4872_v62, %v4776_v10 }
 0x237   : > { %v1443_v31 = vadd.f32 1.0, %v1379_v26  ;;  %v1380_v4 = vmul.f32 0.3275911, %v5095_v34  ;;  %6929 = vst [vmem:[#allocation35_spill] sm:$0xff] %v5106_v60  ;;  %v3691_v44 = vpop.eup %3690  ;;  %v5109_v61 = vmul.f32 %v2711_v63, %v4902_v9  ;;  %v2649_v58 = vsel %vm2521_vm2, %v2585_v45, %v2457_v47  ;;  %v6931_v21 = vld [vmem:[#allocation12_spill] sm:$0xff]  ;;  %v5117_v2 = vpop.f32.mrb[30].mxu0 }
 0x238   : > { %vm2524_vm5 = vcmp.lt.f32.partialorder %v6931_v21, 0.0  ;;  %3696 = vpow2.f32 %v2281_v28  ;;  %v5115_v19 = vand.u32 2147483647, %v5099_v15  ;;  %6932 = vst [vmem:[#allocation12_spill] sm:$0xff] %v5117_v2  ;;  %v2460_v62 = vsub.f32 1.0, %v2396_v51  ;;  %v5122_v9 = vpop.f32.mrb[31].mxu0 }
 0x239   : > { %6930 = vst [vmem:[#allocation36_spill] sm:$0xff] %v5109_v61  ;;  %v5119_v26 = vpop.eup %3692  ;;  %v2078_v11 = vmul.f32 %v4941_v3, %v2014_v7  ;;  %3698 = vrcp.f32 %v1443_v31  ;;  %v1444_v60 = vadd.f32 1.0, %v1380_v4  ;;  %6933 = vst [vmem:[#allocation37_spill] sm:$0xff] %v5122_v9  ;;  %v2650_v52 = vsel %vm2522_vm3, %v2586_v16, %v2458_v20  ;;  %v6934_v16 = vld [vmem:[#allocation13_spill] sm:$0xff] }
 0x23a   : > { %v2397_v47 = vmul.f32 %v3689_v37, %v2077_v56  ;;  %v5127_v63 = vmul.f32 0.5, %v4965_v13  ;;  %v1381_v45 = vmul.f32 0.3275911, %v5115_v19  ;;  %v2651_v28 = vsel %vm2523_vm4, %v2587_v25, %v2459_v54 }
 0x23b   : > { %v1951_v51 = vmul.f32 %v4984_v30, %v1887_v29  ;;  %v1696_v3 = vmul.f32 %v5069_v17, %v1632_v35  ;;  %v5135_v31 = vmul.f32 0.70710677, %v5104_v55  ;;  %v2713_v46 = vadd.f32 1.0, %v2649_v58  ;;  %v5148_v58 = vpop.f32.mrb[32].mxu0 }
 0x23c   : > { %v5137_v7 = vpop.eup %3694  ;;  %v5140_v20 = vmul.f32 0.5, %v5004_v57  ;;  %v1569_v13 = vmul.f32 1.0614054, %v5119_v26  ;;  %3700 = vrcp.f32 %v1444_v60  ;;  %v2588_v37 = vsub.f32 0.0, %v2460_v62  ;;  %6935 = vst [vmem:[#allocation13_spill] sm:$0xff] %v5148_v58  ;;  %v6940_v58 = vld [vmem:[#allocation18_spill] sm:$0xff] }
 0x23d   : > { %vm2525_vm6 = vcmp.lt.f32.partialorder %v6934_v16, 0.0  ;;  %v2398_v18 = vmul.f32 %v3691_v44, %v2078_v11  ;;  %v1445_v54 = vadd.f32 1.0, %v1381_v45  ;;  %v5145_v25 = vand.u32 2147483647, %v5135_v31  ;;  %v6937_v11 = vld [vmem:[#allocation16_spill] sm:$0xff] }
 0x23e   : > { %v2714_v35 = vadd.f32 1.0, %v2650_v52  ;;  %v2715_v56 = vadd.f32 1.0, %v2651_v28  ;;  %v2461_v29 = vsub.f32 1.0, %v2397_v47  ;;  %v1570_v4 = vmul.f32 1.0614054, %v5137_v7  ;;  %v6938_v52 = vld [vmem:[#allocation17_spill] sm:$0xff] }
 0x23f   : > { %v2015_v57 = vadd.f32 0.2548296, %v1951_v51  ;;  %v1760_v9 = vadd.f32 1.4214138, %v1696_v3  ;;  %3702 = vrcp.f32 %v1445_v54  ;;  %v1382_v60 = vmul.f32 0.3275911, %v5145_v25 }
 0x240   : > { %v5152_v2 = vmul.f32 %v2713_v46, %v4936_v36  ;;  %vm2526_vm7 = vcmp.lt.f32.partialorder %v6937_v11, 0.0  ;;  %v2144_v44 = vsub.f32 0.0, %v4997_v22  ;;  %v1633_v45 = vadd.f32 -1.4531521, %v1569_v13  ;;  %v5160_v28 = vpop.f32.mrb[33].mxu0 }
 0x241   : > { %v5158_v47 = vadd.f32 %v6938_v52, %v4754_v14  ;;  %6939 = vst [vmem:[#allocation16_spill] sm:$0xff] %v5160_v28  ;;  %v2652_v51 = vsel %vm2524_vm5, %v2588_v37, %v2460_v62  ;;  %v2462_v3 = vsub.f32 1.0, %v2398_v18  ;;  %v1446_v54 = vadd.f32 1.0, %v1382_v60  ;;  %v5168_v46 = vpop.f32.mrb[34].mxu0 }
 0x242   : > { %6936 = vst [vmem:[#allocation38_spill] sm:$0xff] %v5152_v2  ;;  %v5166_v36 = vadd.f32 %v6940_v58, %v4776_v10  ;;  %6941 = vst [vmem:[#allocation17_spill] sm:$0xff] %v5168_v46  ;;  %v3697_v2 = vpop.eup %3696  ;;  %v5171_v13 = vmul.f32 %v2714_v35, %v4944_v1  ;;  %v5174_v52 = vmul.f32 %v2715_v56, %v4957_v5  ;;  %v2589_v61 = vsub.f32 0.0, %v2461_v29  ;;  %v5176_v33 = vpop.f32.mrb[35].mxu0 }
 0x243   : > { %v1634_v28 = vadd.f32 -1.4531521, %v1570_v4  ;;  %6944 = vst [vmem:[#allocation40_spill] sm:$0xff] %v5176_v33  ;;  %v5178_v21 = vpop.eup %3698  ;;  %v2079_v62 = vmul.f32 %v4984_v30, %v2015_v57  ;;  %v1824_v37 = vmul.f32 %v5069_v17, %v1760_v9  ;;  %3704 = vrcp.f32 %v1446_v54 }
 0x244   : > { %6942 = vst [vmem:[#allocation18_spill] sm:$0xff] %v5171_v13  ;;  %6943 = vst [vmem:[#allocation39_spill] sm:$0xff] %v5174_v52  ;;  %v5183_v18 = vmul.f32 0.70710677, %v5158_v47  ;;  %v2716_v58 = vadd.f32 1.0, %v2652_v51  ;;  %v2208_v1 = vmul.f32 %v2144_v44, %v4997_v22  ;;  %v1697_v5 = vmul.f32 %v5119_v26, %v1633_v45  ;;  %v5203_v51 = vpop.f32.mrb[36].mxu0 }
 0x245   : > { %v1571_v35 = vmul.f32 1.0614054, %v5178_v21  ;;  %v2590_v56 = vsub.f32 0.0, %v2462_v3  ;;  %v5189_v4 = vmul.f32 0.5, %v5014_v43  ;;  %v5195_v30 = vmul.f32 0.70710677, %v5166_v36 }
 0x246   : > { %v5192_v60 = vand.u32 2147483647, %v5183_v18  ;;  %v5197_v9 = vpop.eup %3700  ;;  %v2653_v57 = vsel %vm2525_vm6, %v2589_v61, %v2461_v29  ;;  %v2145_v22 = vsub.f32 0.0, %v5031_v8  ;;  %v1698_v44 = vmul.f32 %v5137_v7, %v1634_v28  ;;  %6945 = vst [vmem:[#allocation41_spill] sm:$0xff] %v5203_v51  ;;  %v6947_v51 = vld [vmem:[#allocation19_spill] sm:$0xff] }
 0x247   : > { %v1635_v45 = vadd.f32 -1.4531521, %v1571_v35  ;;  %v2399_v43 = vmul.f32 %v3697_v2, %v2079_v62  ;;  %v1888_v54 = vadd.f32 -0.28449672, %v1824_v37  ;;  %v1572_v33 = vmul.f32 1.0614054, %v5197_v9 }
 0x248   : > { %v1383_v46 = vmul.f32 0.3275911, %v5192_v60  ;;  %v2283_v52 = vmul.f32 1.442695, %v2208_v1  ;;  %v1761_v13 = vadd.f32 1.4214138, %v1697_v5  ;;  %v2654_v29 = vsel %vm2526_vm7, %v2590_v56, %v2462_v3 }
 0x249   : > { %v2146_v38 = vsub.f32 0.0, %v5042_v40  ;;  %v1699_v16 = vmul.f32 %v5178_v21, %v1635_v45  ;;  %v5209_v61 = vpop.eup %3702  ;;  %v1636_v28 = vadd.f32 -1.4531521, %v1572_v33  ;;  %v5214_v2 = vand.u32 2147483647, %v5195_v30  ;;  %v5216_v62 = vpop.f32.mrb[37].mxu0 }
 0x24a   : > { %v1447_v35 = vadd.f32 1.0, %v1383_v46  ;;  %6946 = vst [vmem:[#allocation42_spill] sm:$0xff] %v5216_v62  ;;  %v2717_v37 = vadd.f32 1.0, %v2653_v57  ;;  %vm2527_vm8 = vcmp.lt.f32.partialorder %v6947_v51, 0.0  ;;  %v2209_v1 = vmul.f32 %v2145_v22, %v5031_v8  ;;  %v6949_v51 = vld [vmem:[#allocation21_spill] sm:$0xff] }
 0x24b   : > { %v1762_v5 = vadd.f32 1.4214138, %v1698_v44  ;;  %v1573_v45 = vmul.f32 1.0614054, %v5209_v61  ;;  %v5222_v48 = vmul.f32 %v2716_v58, %v4978_v27  ;;  %v2463_v11 = vsub.f32 1.0, %v2399_v43 }
 0x24c   : > { %v1952_v33 = vmul.f32 %v5069_v17, %v1888_v54  ;;  %3706 = vrcp.f32 %v1447_v35  ;;  %v2718_v3 = vadd.f32 1.0, %v2654_v29  ;;  %v1825_v46 = vmul.f32 %v5119_v26, %v1761_v13 }
 0x24d   : > { %3708 = vpow2.f32 %v2283_v52  ;;  %v1763_v56 = vadd.f32 1.4214138, %v1699_v16  ;;  %v5226_v57 = vpop.eup %3704  ;;  %v2210_v62 = vmul.f32 %v2146_v38, %v5042_v40  ;;  %v2147_v8 = vsub.f32 0.0, %v5088_v12 }
 0x24e   : > { %v1700_v22 = vmul.f32 %v5197_v9, %v1636_v28  ;;  %v1384_v27 = vmul.f32 0.3275911, %v5214_v2  ;;  %v5233_v58 = vmul.f32 %v2717_v37, %v4981_v24  ;;  %v2285_v44 = vmul.f32 1.442695, %v2209_v1 }
 0x24f   : > { %v1826_v43 = vmul.f32 %v5137_v7, %v1762_v5  ;;  %v1637_v52 = vadd.f32 -1.4531521, %v1573_v45  ;;  %v2591_v54 = vsub.f32 0.0, %v2463_v11  ;;  %v2016_v13 = vadd.f32 0.2548296, %v1952_v33 }
 0x250   : > { %6948 = vst [vmem:[#allocation19_spill] sm:$0xff] %v5233_v58  ;;  %v5237_v16 = vmul.f32 0.5, %v5048_v23  ;;  %v1448_v29 = vadd.f32 1.0, %v1384_v27  ;;  %v1889_v38 = vadd.f32 -0.28449672, %v1825_v46  ;;  %v1827_v40 = vmul.f32 %v5178_v21, %v1763_v56 }
 0x251   : > { %v2148_v28 = vsub.f32 0.0, %v5095_v34  ;;  %v1574_v35 = vmul.f32 1.0614054, %v5226_v57  ;;  %v5243_v24 = vmul.f32 %v2718_v3, %v4993_v6  ;;  %v2287_v37 = vmul.f32 1.442695, %v2210_v62 }
 0x252   : > { %v2211_v1 = vmul.f32 %v2147_v8, %v5088_v12  ;;  %v1764_v5 = vadd.f32 1.4214138, %v1700_v22  ;;  %3710 = vpow2.f32 %v2285_v44  ;;  %v1890_v45 = vadd.f32 -0.28449672, %v1826_v43 }
 0x253   : > { %v1701_v23 = vmul.f32 %v5209_v61, %v1637_v52  ;;  %v2149_v33 = vsub.f32 0.0, %v5115_v19  ;;  %v2655_v46 = vsel %vm2527_vm8, %v2591_v54, %v2463_v11  ;;  %v2080_v56 = vmul.f32 %v5069_v17, %v2016_v13  ;;  %v5263_v17 = vpop.f32.mrb[38].mxu0 }
 0x254   : > { %v5252_v27 = vmul.f32 0.5, %v5067_v53  ;;  %3712 = vrcp.f32 %v1448_v29  ;;  %v1953_v6 = vmul.f32 %v5119_v26, %v1889_v38  ;;  %v1891_v62 = vadd.f32 -0.28449672, %v1827_v40  ;;  %6950 = vst [vmem:[#allocation21_spill] sm:$0xff] %v5263_v17 }
 0x255   : > { %v2212_v12 = vmul.f32 %v2148_v28, %v5095_v34  ;;  %v1638_v3 = vadd.f32 -1.4531521, %v1574_v35  ;;  %3714 = vpow2.f32 %v2287_v37  ;;  %v2289_v22 = vmul.f32 1.442695, %v2211_v1 }
 0x256   : > { %v5256_v8 = vpop.eup %3706  ;;  %v1828_v44 = vmul.f32 %v5197_v9, %v1764_v5  ;;  %v5261_v11 = vadd.f32 %v6949_v51, %v4754_v14  ;;  %v1954_v43 = vmul.f32 %v5137_v7, %v1890_v45  ;;  %v5267_v52 = vmul.f32 0.5, %v5081_v39 }
 0x257   : > { %v3709_v53 = vpop.eup %3708  ;;  %v1765_v34 = vadd.f32 1.4214138, %v1701_v23  ;;  %v2213_v54 = vmul.f32 %v2149_v33, %v5115_v19  ;;  %v2719_v13 = vadd.f32 1.0, %v2655_v46  ;;  %v2150_v38 = vsub.f32 0.0, %v5145_v25 }
 0x258   : > { %v2400_v29 = vmul.f32 %v3709_v53, %v2080_v56  ;;  %v1575_v40 = vmul.f32 1.0614054, %v5256_v8  ;;  %v2017_v28 = vadd.f32 0.2548296, %v1953_v6  ;;  %v1955_v35 = vmul.f32 %v5178_v21, %v1891_v62 }
 0x259   : > { %v2291_v37 = vmul.f32 1.442695, %v2212_v12  ;;  %v1702_v1 = vmul.f32 %v5226_v57, %v1638_v3  ;;  %3716 = vpow2.f32 %v2289_v22  ;;  %v1892_v5 = vadd.f32 -0.28449672, %v1828_v44  ;;  %v5289_v3 = vpop.f32.mrb[39].mxu0 }
 0x25a   : > { %v1639_v45 = vadd.f32 -1.4531521, %v1575_v40  ;;  %v5275_v39 = vmul.f32 0.70710677, %v5261_v11  ;;  %vm2528_vm9 = vcmp.lt.f32.partialorder %v4975_v42, 0.0  ;;  %v1829_v23 = vmul.f32 %v5209_v61, %v1765_v34  ;;  %6952 = vst [vmem:[#allocation44_spill] sm:$0xff] %v5289_v3 }
 0x25b   : > { %v2018_v19 = vadd.f32 0.2548296, %v1954_v43  ;;  %v2293_v33 = vmul.f32 1.442695, %v2213_v54  ;;  %v5280_v46 = vmul.f32 0.5, %v5104_v55  ;;  %v5283_v56 = vmul.f32 %v2719_v13, %v5057_v59 }
 0x25c   : > { %v2464_v6 = vsub.f32 1.0, %v2400_v29  ;;  %v2214_v62 = vmul.f32 %v2150_v38, %v5145_v25  ;;  %v5287_v12 = vand.u32 2147483647, %v5275_v39  ;;  %v3711_v22 = vpop.eup %3710  ;;  %v2081_v44 = vmul.f32 %v5119_v26, %v2017_v28  ;;  %v6953_v25 = vld [vmem:[#allocation22_spill] sm:$0xff] }
 0x25d   : > { %6951 = vst [vmem:[#allocation43_spill] sm:$0xff] %v5283_v56  ;;  %v2019_v51 = vadd.f32 0.2548296, %v1955_v35  ;;  %3718 = vpow2.f32 %v2291_v37  ;;  %v1766_v53 = vadd.f32 1.4214138, %v1702_v1  ;;  %v1956_v55 = vmul.f32 %v5197_v9, %v1892_v5 }
 0x25e   : > { %v5292_v43 = vpop.eup %3712  ;;  %v1703_v59 = vmul.f32 %v5256_v8, %v1639_v45  ;;  %v1385_v34 = vmul.f32 0.3275911, %v5287_v12  ;;  %v5299_v54 = vadd.f32 %v6953_v25, %v4776_v10  ;;  %v2082_v13 = vmul.f32 %v5137_v7, %v2018_v19 }
 0x25f   : > { %v1893_v29 = vadd.f32 -0.28449672, %v1829_v23  ;;  %3720 = vpow2.f32 %v2293_v33  ;;  %v1576_v26 = vmul.f32 1.0614054, %v5292_v43  ;;  %v3715_v38 = vpop.eup %3714  ;;  %v2592_v40 = vsub.f32 0.0, %v2464_v6 }
 0x260   : > { %v2295_v28 = vmul.f32 1.442695, %v2214_v62  ;;  %v2151_v35 = vsub.f32 0.0, %v5192_v60  ;;  %v1449_v37 = vadd.f32 1.0, %v1385_v34  ;;  %v2401_v1 = vmul.f32 %v3711_v22, %v2081_v44  ;;  %v6954_v34 = vld [vmem:[#allocation24_spill] sm:$0xff] }
 0x261   : > { %v2083_v5 = vmul.f32 %v5178_v21, %v2019_v51  ;;  %v1830_v45 = vmul.f32 %v5226_v57, %v1766_v53  ;;  %v1640_v3 = vadd.f32 -1.4531521, %v1576_v26  ;;  %v2020_v25 = vadd.f32 0.2548296, %v1956_v55 }
 0x262   : > { %v1767_v17 = vadd.f32 1.4214138, %v1703_v59  ;;  %3722 = vrcp.f32 %v1449_v37  ;;  %v5307_v7 = vmul.f32 0.70710677, %v5299_v54  ;;  %v5309_v19 = vmul.f32 %v3715_v38, %v2082_v13 }
 0x263   : > { %v1957_v23 = vmul.f32 %v5209_v61, %v1893_v29  ;;  %v5313_v33 = vmul.f32 0.5, %v5158_v47  ;;  %v1704_v62 = vmul.f32 %v5292_v43, %v1640_v3  ;;  %v3717_v22 = vpop.eup %3716  ;;  %v2656_v21 = vsel %vm2528_vm9, %v2592_v40, %v2464_v6 }
 0x264   : > { %vm2529_vm10 = vcmp.lt.f32.partialorder %v5022_v32, 0.0  ;;  %v2215_v44 = vmul.f32 %v2151_v35, %v5192_v60  ;;  %v2152_v51 = vsub.f32 0.0, %v5214_v2  ;;  %v5322_v53 = vand.u32 2147483647, %v5307_v7 }
 0x265   : > { %v2465_v55 = vsub.f32 1.0, %v2401_v1  ;;  %v5324_v59 = vmul.f32 %v3717_v22, %v2083_v5  ;;  %v1894_v47 = vadd.f32 -0.28449672, %v1830_v45  ;;  %v5328_v3 = vadd.f32 %v6954_v34, %v4754_v14 }
 0x266   : > { %v2084_v42 = vmul.f32 %v5197_v9, %v2020_v25  ;;  %3724 = vpow2.f32 %v2295_v28  ;;  %v1831_v6 = vmul.f32 %v5256_v8, %v1767_v17  ;;  %v1386_v60 = vmul.f32 0.3275911, %v5322_v53  ;;  %v5339_v9 = vpop.f32.mrb[40].mxu0 }
 0x267   : > { %v3719_v13 = vpop.eup %3718  ;;  %v2720_v29 = vadd.f32 1.0, %v2656_v21  ;;  %v2466_v26 = vsub.f32 1.0, %v5309_v19  ;;  %v2021_v38 = vadd.f32 0.2548296, %v1957_v23  ;;  %v1768_v40 = vadd.f32 1.4214138, %v1704_v62 }
 0x268   : > { %vm2530_vm11 = vcmp.lt.f32.partialorder %v5034_v41, 0.0  ;;  %v2297_v35 = vmul.f32 1.442695, %v2215_v44  ;;  %v2216_v37 = vmul.f32 %v2152_v51, %v5214_v2  ;;  %v1450_v1 = vadd.f32 1.0, %v1386_v60  ;;  %6955 = vst [vmem:[#allocation22_spill] sm:$0xff] %v5339_v9  ;;  %v6956_v19 = vld [vmem:[#allocation25_spill] sm:$0xff] }
 0x269   : > { %v5337_v5 = vmul.f32 0.70710677, %v5328_v3  ;;  %v3721_v17 = vpop.eup %3720  ;;  %v2593_v28 = vsub.f32 0.0, %v2465_v55  ;;  %v2467_v45 = vsub.f32 1.0, %v5324_v59  ;;  %v1958_v25 = vmul.f32 %v5226_v57, %v1894_v47 }
 0x26a   : > { %v5345_v23 = vadd.f32 %v6956_v19, %v4776_v10  ;;  %vm2531_vm12 = vcmp.lt.f32.partialorder %v5063_v50, 0.0  ;;  %v5348_v62 = vmul.f32 %v3719_v13, %v2084_v42  ;;  %v1895_v2 = vadd.f32 -0.28449672, %v1831_v6 }
 0x26b   : > { %3726 = vrcp.f32 %v1450_v1  ;;  %v5351_v22 = vand.u32 2147483647, %v5337_v5  ;;  %v2594_v21 = vsub.f32 0.0, %v2466_v26  ;;  %v2085_v44 = vmul.f32 %v5209_v61, %v2021_v38 }
 0x26c   : > { %v1832_v51 = vmul.f32 %v5292_v43, %v1768_v40  ;;  %v5357_v59 = vadd.f32 %v4933_v0, %v4754_v14  ;;  %v5359_v47 = vpop.eup %3722  ;;  %3728 = vpow2.f32 %v2297_v35  ;;  %v2299_v34 = vmul.f32 1.442695, %v2216_v37  ;;  %v5368_v40 = vpop.f32.mrb[41].mxu0 }
 0x26d   : > { %v1387_v42 = vmul.f32 0.3275911, %v5351_v22  ;;  %v5363_v6 = vmul.f32 0.70710677, %v5345_v23  ;;  %v2657_v60 = vsel %vm2529_vm10, %v2593_v28, %v2465_v55  ;;  %v2595_v13 = vsub.f32 0.0, %v2467_v45  ;;  %6957 = vst [vmem:[#allocation24_spill] sm:$0xff] %v5368_v40 }
 0x26e   : > { %v2022_v61 = vadd.f32 0.2548296, %v1958_v25  ;;  %v1577_v38 = vmul.f32 1.0614054, %v5359_v47  ;;  %v2468_v0 = vsub.f32 1.0, %v5348_v62  ;;  %vm2532_vm13 = vcmp.lt.f32.partialorder %v5091_v49, 0.0 }
 0x26f   : > { %v1959_v35 = vmul.f32 %v5256_v8, %v1895_v2  ;;  %v1451_v37 = vadd.f32 1.0, %v1387_v42  ;;  %v5374_v1 = vand.u32 2147483647, %v5363_v6  ;;  %v5376_v19 = vmul.f32 %v3721_v17, %v2085_v44  ;;  %v6962_v49 = vld [vmem:[#allocation27_spill] sm:$0xff] }
 0x270   : > { %v1896_v32 = vadd.f32 -0.28449672, %v1832_v51  ;;  %v1641_v55 = vadd.f32 -1.4531521, %v1577_v38  ;;  %v5379_v28 = vmul.f32 0.70710677, %v5357_v59  ;;  %v3725_v25 = vpop.eup %3724  ;;  %v5382_v40 = vmul.f32 %v2720_v29, %v5127_v63 }
 0x271   : > { %v5385_v62 = vmul.f32 0.5, %v5166_v36  ;;  %3730 = vrcp.f32 %v1451_v37  ;;  %v1388_v2 = vmul.f32 0.3275911, %v5374_v1  ;;  %v2721_v42 = vadd.f32 1.0, %v2657_v60  ;;  %v5395_v29 = vpop.f32.mrb[42].mxu0 }
 0x272   : > { %v2658_v17 = vsel %vm2530_vm11, %v2594_v21, %v2466_v26  ;;  %v2086_v44 = vmul.f32 %v5226_v57, %v2022_v61  ;;  %v1705_v51 = vmul.f32 %v5359_v47, %v1641_v55  ;;  %v2023_v38 = vadd.f32 0.2548296, %v1959_v35  ;;  %6958 = vst [vmem:[#allocation25_spill] sm:$0xff] %v5395_v29  ;;  %v5401_v26 = vpop.f32.mrb[43].mxu0  ;;  %v6960_v61 = vld [vmem:[#allocation26_spill] sm:$0xff] }
 0x273   : > { %3732 = vpow2.f32 %v2299_v34  ;;  %v1452_v9 = vadd.f32 1.0, %v1388_v2  ;;  %v5393_v63 = vand.u32 2147483647, %v5379_v28  ;;  %v2659_v36 = vsel %vm2531_vm12, %v2595_v13, %v2467_v45  ;;  %6959 = vst [vmem:[#allocation45_spill] sm:$0xff] %v5401_v26 }
 0x274   : > { %v2596_v37 = vsub.f32 0.0, %v2468_v0  ;;  %v2469_v60 = vsub.f32 1.0, %v5376_v19  ;;  %v1960_v41 = vmul.f32 %v5292_v43, %v1896_v32  ;;  %vm2533_vm14 = vcmp.lt.f32.partialorder %v5099_v15, 0.0 }
 0x275   : > { %v5403_v57 = vpop.eup %3726  ;;  %v1769_v21 = vadd.f32 1.4214138, %v1705_v51  ;;  %3734 = vrcp.f32 %v1452_v9  ;;  %v1389_v34 = vmul.f32 0.3275911, %v5393_v63  ;;  %v5409_v35 = vadd.f32 %v6960_v61, %v4776_v10 }
 0x276   : > { %v5412_v50 = vmul.f32 %v2721_v42, %v5140_v20  ;;  %v2406_v45 = vmul.f32 %v3725_v25, %v2086_v44  ;;  %v2153_v13 = vsub.f32 0.0, %v5287_v12  ;;  %v1578_v19 = vmul.f32 1.0614054, %v5403_v57  ;;  %v3729_v32 = vpop.eup %3728 }
 0x277   : > { %v2722_v55 = vadd.f32 1.0, %v2658_v17  ;;  %v2087_v2 = vmul.f32 %v5256_v8, %v2023_v38  ;;  %v1453_v51 = vadd.f32 1.0, %v1389_v34  ;;  %v5418_v9 = vmul.f32 0.70710677, %v5409_v35  ;;  %v5444_v34 = vpop.f32.mrb[44].mxu0 }
 0x278   : > { %6961 = vst [vmem:[#allocation26_spill] sm:$0xff] %v5412_v50  ;;  %v2723_v26 = vadd.f32 1.0, %v2659_v36  ;;  %v2660_v61 = vsel %vm2532_vm13, %v2596_v37, %v2468_v0  ;;  %v2024_v29 = vadd.f32 0.2548296, %v1960_v41  ;;  %v5423_v20 = vmul.f32 0.5, %v5261_v11  ;;  %6964 = vst [vmem:[#allocation46_spill] sm:$0xff] %v5444_v34 }
 0x279   : > { %v2597_v25 = vsub.f32 0.0, %v2469_v60  ;;  %vm2534_vm15 = vcmp.lt.f32.partialorder %v5135_v31, 0.0  ;;  %v1833_v42 = vmul.f32 %v5359_v47, %v1769_v21  ;;  %3736 = vrcp.f32 %v1453_v51 }
 0x27a   : > { %v5428_v8 = vand.u32 2147483647, %v5418_v9  ;;  %v2470_v17 = vsub.f32 1.0, %v2406_v45  ;;  %v2217_v44 = vmul.f32 %v2153_v13, %v5287_v12  ;;  %v1642_v38 = vadd.f32 -1.4531521, %v1578_v19 }
 0x27b   : > { %v5433_v0 = vadd.f32 %v6962_v49, %v4754_v14  ;;  %v5435_v36 = vpop.eup %3730  ;;  %v5438_v11 = vmul.f32 %v2722_v55, %v5189_v4  ;;  %v2407_v37 = vmul.f32 %v3729_v32, %v2087_v2  ;;  %v5441_v41 = vmul.f32 0.5, %v5299_v54  ;;  %v6966_v54 = vld [vmem:[#allocation28_spill] sm:$0xff] }
 0x27c   : > { %v1390_v21 = vmul.f32 0.3275911, %v5428_v8  ;;  %v5447_v12 = vmul.f32 %v2723_v26, %v5237_v16  ;;  %v2724_v45 = vadd.f32 1.0, %v2660_v61  ;;  %v2088_v13 = vmul.f32 %v5292_v43, %v2024_v29 }
 0x27d   : > { %6963 = vst [vmem:[#allocation27_spill] sm:$0xff] %v5438_v11  ;;  %v1579_v19 = vmul.f32 1.0614054, %v5435_v36  ;;  %v3733_v51 = vpop.eup %3732  ;;  %v1897_v49 = vadd.f32 -0.28449672, %v1833_v42  ;;  %v5456_v55 = vadd.f32 %v6966_v54, %v4776_v10  ;;  %v2661_v2 = vsel %vm2533_vm14, %v2597_v25, %v2469_v60 }
 0x27e   : > { %6965 = vst [vmem:[#allocation47_spill] sm:$0xff] %v5447_v12  ;;  %v1454_v4 = vadd.f32 1.0, %v1390_v21  ;;  %v5452_v32 = vmul.f32 0.70710677, %v5433_v0  ;;  %v2598_v16 = vsub.f32 0.0, %v2470_v17  ;;  %vm2535_vm0 = vcmp.lt.f32.partialorder %v5183_v18, 0.0 }
 0x27f   : > { %v2301_v26 = vmul.f32 1.442695, %v2217_v44  ;;  %v1706_v43 = vmul.f32 %v5403_v57, %v1642_v38  ;;  %v5462_v29 = vpop.eup %3734  ;;  %v2471_v61 = vsub.f32 1.0, %v2407_v37  ;;  %v1643_v42 = vadd.f32 -1.4531521, %v1579_v19  ;;  %v6969_v18 = vld [vmem:[#allocation30_spill] sm:$0xff] }
 0x280   : > { %3738 = vrcp.f32 %v1454_v4  ;;  %v5465_v21 = vand.u32 2147483647, %v5452_v32  ;;  %v2408_v34 = vmul.f32 %v3733_v51, %v2088_v13  ;;  %v2154_v54 = vsub.f32 0.0, %v5322_v53 }
 0x281   : > { %v2155_v15 = vsub.f32 0.0, %v5351_v22  ;;  %v1580_v60 = vmul.f32 1.0614054, %v5462_v29  ;;  %v2725_v25 = vadd.f32 1.0, %v2661_v2  ;;  %v1961_v44 = vmul.f32 %v5359_v47, %v1897_v49  ;;  %v5483_v49 = vpop.f32.mrb[45].mxu0 }
 0x282   : > { %v1391_v38 = vmul.f32 0.3275911, %v5465_v21  ;;  %v5473_v12 = vmul.f32 0.70710677, %v5456_v55  ;;  %v2662_v37 = vsel %vm2534_vm15, %v2598_v16, %v2470_v17  ;;  %3740 = vpow2.f32 %v2301_v26  ;;  %6967 = vst [vmem:[#allocation28_spill] sm:$0xff] %v5483_v49 }
 0x283   : > { %v1770_v19 = vadd.f32 1.4214138, %v1706_v43  ;;  %v1644_v13 = vadd.f32 -1.4531521, %v1580_v60  ;;  %v5477_v51 = vpop.eup %3736  ;;  %v2599_v4 = vsub.f32 0.0, %v2471_v61  ;;  %v1707_v50 = vmul.f32 %v5435_v36, %v1643_v42 }
 0x284   : > { %v1455_v11 = vadd.f32 1.0, %v1391_v38  ;;  %v5481_v2 = vand.u32 2147483647, %v5473_v12  ;;  %v5486_v56 = vmul.f32 %v2724_v45, %v5252_v27  ;;  %v2472_v58 = vsub.f32 1.0, %v2408_v34 }
 0x285   : > { %vm2536_vm1 = vcmp.lt.f32.partialorder %v5195_v30, 0.0  ;;  %v2218_v31 = vmul.f32 %v2154_v54, %v5322_v53  ;;  %v2219_v17 = vmul.f32 %v2155_v15, %v5351_v22  ;;  %v2025_v16 = vadd.f32 0.2548296, %v1961_v44 }
 0x286   : > { %v1581_v26 = vmul.f32 1.0614054, %v5477_v51  ;;  %3742 = vrcp.f32 %v1455_v11  ;;  %v1392_v43 = vmul.f32 0.3275911, %v5481_v2  ;;  %v5494_v42 = vmul.f32 %v2725_v25, %v5267_v52 }
 0x287   : > { %v2726_v60 = vadd.f32 1.0, %v2662_v37  ;;  %v1834_v27 = vmul.f32 %v5403_v57, %v1770_v19  ;;  %v1708_v34 = vmul.f32 %v5462_v29, %v1644_v13  ;;  %v2663_v45 = vsel %vm2535_vm0, %v2599_v4, %v2471_v61 }
 0x288   : > { %6968 = vst [vmem:[#allocation48_spill] sm:$0xff] %v5494_v42  ;;  %v1771_v53 = vadd.f32 1.4214138, %v1707_v50  ;;  %v2156_v22 = vsub.f32 0.0, %v5374_v1  ;;  %v1456_v54 = vadd.f32 1.0, %v1392_v43  ;;  %v5502_v11 = vmul.f32 0.5, %v5328_v3 }
 0x289   : > { %v2303_v15 = vmul.f32 1.442695, %v2218_v31  ;;  %v1645_v44 = vadd.f32 -1.4531521, %v1581_v26  ;;  %v2157_v52 = vsub.f32 0.0, %v5393_v63  ;;  %v2600_v38 = vsub.f32 0.0, %v2472_v58 }
 0x28a   : > { %v5505_v25 = vpop.eup %3738  ;;  %v2089_v37 = vmul.f32 %v5359_v47, %v2025_v16  ;;  %v2305_v19 = vmul.f32 1.442695, %v2219_v17  ;;  %v5510_v61 = vadd.f32 %v6969_v18, %v4754_v14  ;;  %v5513_v50 = vmul.f32 %v2726_v60, %v5280_v46  ;;  %v5518_v42 = vpop.f32.mrb[46].mxu0 }
 0x28b   : > { %v2727_v13 = vadd.f32 1.0, %v2663_v45  ;;  %v1898_v4 = vadd.f32 -0.28449672, %v1834_v27  ;;  %v1772_v3 = vadd.f32 1.4214138, %v1708_v34  ;;  %v1835_v31 = vmul.f32 %v5435_v36, %v1771_v53  ;;  %6971 = vst [vmem:[#allocation49_spill] sm:$0xff] %v5518_v42 }
 0x28c   : > { %6970 = vst [vmem:[#allocation30_spill] sm:$0xff] %v5513_v50  ;;  %v2220_v26 = vmul.f32 %v2156_v22, %v5374_v1  ;;  %v1582_v43 = vmul.f32 1.0614054, %v5505_v25  ;;  %3744 = vrcp.f32 %v1456_v54  ;;  %v3741_v47 = vpop.eup %3740  ;;  %v5521_v17 = vmul.f32 0.5, %v5345_v23 }
 0x28d   : > { %3746 = vpow2.f32 %v2303_v15  ;;  %v1709_v46 = vmul.f32 %v5477_v51, %v1645_v44  ;;  %v2221_v16 = vmul.f32 %v2157_v52, %v5393_v63  ;;  %v2664_v60 = vsel %vm2536_vm1, %v2600_v38, %v2472_v58 }
 0x28e   : > { %v2409_v27 = vmul.f32 %v3741_v47, %v2089_v37  ;;  %v1646_v34 = vadd.f32 -1.4531521, %v1582_v43  ;;  %v5528_v1 = vmul.f32 0.70710677, %v5510_v61  ;;  %v1962_v45 = vmul.f32 %v5403_v57, %v1898_v4  ;;  %v6973_v47 = vld [vmem:[#allocation29_spill] sm:$0xff] }
 0x28f   : > { %3748 = vpow2.f32 %v2305_v19  ;;  %v1836_v53 = vmul.f32 %v5462_v29, %v1772_v3  ;;  %v5533_v23 = vmul.f32 0.5, %v5357_v59  ;;  %v5538_v63 = vmul.f32 %v2727_v13, %v5313_v33 }
 0x290   : > { %v5535_v22 = vpop.eup %3742  ;;  %v1899_v30 = vadd.f32 -0.28449672, %v1835_v31  ;;  %v2307_v58 = vmul.f32 1.442695, %v2220_v26  ;;  %v5541_v54 = vand.u32 2147483647, %v5528_v1  ;;  %v1710_v52 = vmul.f32 %v5505_v25, %v1646_v34 }
 0x291   : > { %6972 = vst [vmem:[#allocation50_spill] sm:$0xff] %v5538_v63  ;;  %v2728_v15 = vadd.f32 1.0, %v2664_v60  ;;  %vm2537_vm2 = vcmp.lt.f32.partialorder %v5275_v39, 0.0  ;;  %v1773_v44 = vadd.f32 1.4214138, %v1709_v46  ;;  %v2473_v59 = vsub.f32 1.0, %v2409_v27 }
 0x292   : > { %v1583_v38 = vmul.f32 1.0614054, %v5535_v22  ;;  %v2309_v37 = vmul.f32 1.442695, %v2221_v16  ;;  %v2158_v19 = vsub.f32 0.0, %v5428_v8  ;;  %v5549_v4 = vmul.f32 0.5, %v5409_v35 }
 0x293   : > { %v1393_v33 = vmul.f32 0.3275911, %v5541_v54  ;;  %v2026_v18 = vadd.f32 0.2548296, %v1962_v45  ;;  %v1900_v13 = vadd.f32 -0.28449672, %v1836_v53  ;;  %v1963_v31 = vmul.f32 %v5435_v36, %v1899_v30 }
 0x294   : > { %v2159_v3 = vsub.f32 0.0, %v5465_v21  ;;  %v1647_v26 = vadd.f32 -1.4531521, %v1583_v38  ;;  %v1558_v46 = vmul.f32 1.0614054, %v6973_v47  ;;  %v5555_v60 = vmul.f32 %v2728_v15, %v5385_v62  ;;  %v6975_v53 = vld [vmem:[#allocation32_spill] sm:$0xff] }
 0x295   : > { %v1457_v43 = vadd.f32 1.0, %v1393_v33  ;;  %3750 = vpow2.f32 %v2307_v58  ;;  %v1837_v16 = vmul.f32 %v5477_v51, %v1773_v44  ;;  %v1774_v27 = vadd.f32 1.4214138, %v1710_v52  ;;  %v5567_v58 = vpop.f32.mrb[47].mxu0 }
 0x296   : > { %6974 = vst [vmem:[#allocation29_spill] sm:$0xff] %v5555_v60  ;;  %v5558_v34 = vpop.eup %3744  ;;  %v2601_v45 = vsub.f32 0.0, %v2473_v59  ;;  %v2222_v35 = vmul.f32 %v2158_v19, %v5428_v8  ;;  %v1560_v42 = vmul.f32 1.0614054, %v6975_v53  ;;  %v2090_v38 = vmul.f32 %v5403_v57, %v2026_v18  ;;  %6976 = vst [vmem:[#allocation32_spill] sm:$0xff] %v5567_v58 }
 0x297   : > { %3752 = vrcp.f32 %v1457_v43  ;;  %v3747_v30 = vpop.eup %3746  ;;  %v1964_v33 = vmul.f32 %v5462_v29, %v1900_v13  ;;  %v5565_v62 = vmul.f32 0.5, %v5433_v0  ;;  %v2027_v15 = vadd.f32 0.2548296, %v1963_v31  ;;  %v6977_v31 = vld [vmem:[#allocation35_spill] sm:$0xff] }
 0x298   : > { %3754 = vpow2.f32 %v2309_v37  ;;  %v1711_v44 = vmul.f32 %v5535_v22, %v1647_v26  ;;  %v2223_v52 = vmul.f32 %v2159_v3, %v5465_v21  ;;  %v1622_v8 = vadd.f32 -1.4531521, %v1558_v46 }
 0x299   : > { %v3749_v19 = vpop.eup %3748  ;;  %v1901_v43 = vadd.f32 -0.28449672, %v1837_v16  ;;  %v1838_v63 = vmul.f32 %v5505_v25, %v1774_v27  ;;  %v5573_v57 = vmul.f32 0.5, %v5456_v55  ;;  %v1584_v37 = vmul.f32 1.0614054, %v5558_v34 }
 0x29a   : > { %v2665_v0 = vsel %vm2537_vm2, %v2601_v45, %v2473_v59  ;;  %v2311_v18 = vmul.f32 1.442695, %v2222_v35  ;;  %v1624_v13 = vadd.f32 -1.4531521, %v1560_v42  ;;  %v5580_v26 = vadd.f32 %v6977_v31, %v4776_v10 }
 0x29b   : > { %v2410_v21 = vmul.f32 %v3747_v30, %v2090_v38  ;;  %v2028_v3 = vadd.f32 0.2548296, %v1964_v33  ;;  %v2160_v46 = vsub.f32 0.0, %v5481_v2  ;;  %v1686_v16 = vmul.f32 %v6973_v47, %v1622_v8 }
 0x29c   : > { %v2091_v55 = vmul.f32 %v5435_v36, %v2027_v15  ;;  %v1775_v27 = vadd.f32 1.4214138, %v1711_v44  ;;  %v2313_v58 = vmul.f32 1.442695, %v2223_v52  ;;  %v1688_v49 = vmul.f32 %v6975_v53, %v1624_v13 }
 0x29d   : > { %v1965_v39 = vmul.f32 %v5477_v51, %v1901_v43  ;;  %v1902_v59 = vadd.f32 -0.28449672, %v1838_v63  ;;  %v1648_v42 = vadd.f32 -1.4531521, %v1584_v37  ;;  %v1750_v45 = vadd.f32 1.4214138, %v1686_v16 }
 0x29e   : > { %v2729_v35 = vadd.f32 1.0, %v2665_v0  ;;  %vm2538_vm3 = vcmp.lt.f32.partialorder %v5307_v7, 0.0  ;;  %3756 = vpow2.f32 %v2311_v18  ;;  %v1752_v30 = vadd.f32 1.4214138, %v1688_v49  ;;  %v5603_v0 = vpop.f32.mrb[48].mxu0  ;;  %v6985_v7 = vld [vmem:[#allocation12_spill] sm:$0xff] }
 0x29f   : > { %v5589_v38 = vmul.f32 0.70710677, %v5580_v26  ;;  %v3751_v33 = vpop.eup %3750  ;;  %v2474_v8 = vsub.f32 1.0, %v2410_v21  ;;  %v2092_v36 = vmul.f32 %v5462_v29, %v2028_v3  ;;  %v2224_v15 = vmul.f32 %v2160_v46, %v5481_v2  ;;  %6978 = vst [vmem:[#allocation35_spill] sm:$0xff] %v5603_v0 }
 0x2a0   : > { %v1814_v44 = vmul.f32 %v6973_v47, %v1750_v45  ;;  %v5596_v63 = vmul.f32 %v3749_v19, %v2091_v55  ;;  %v1839_v43 = vmul.f32 %v5535_v22, %v1775_v27  ;;  %v1816_v37 = vmul.f32 %v6975_v53, %v1752_v30 }
 0x2a1   : > { %v5594_v52 = vpop.eup %3752  ;;  %v5601_v49 = vand.u32 2147483647, %v5589_v38  ;;  %v2029_v13 = vadd.f32 0.2548296, %v1965_v39  ;;  %v1966_v29 = vmul.f32 %v5505_v25, %v1902_v59  ;;  %v1712_v2 = vmul.f32 %v5558_v34, %v1648_v42 }
 0x2a2   : > { %v3755_v18 = vpop.eup %3754  ;;  %v1585_v31 = vmul.f32 1.0614054, %v5594_v52  ;;  %v5609_v19 = vmul.f32 %v2729_v35, %v5423_v20  ;;  %3758 = vpow2.f32 %v2313_v58  ;;  %v1878_v21 = vadd.f32 -0.28449672, %v1814_v44  ;;  %v5617_v44 = vpop.f32.mrb[49].mxu0 }
 0x2a3   : > { %v1880_v3 = vadd.f32 -0.28449672, %v1816_v37  ;;  %v2602_v46 = vsub.f32 0.0, %v2474_v8  ;;  %v2412_v16 = vmul.f32 %v3751_v33, %v2092_v36  ;;  %v1394_v27 = vmul.f32 0.3275911, %v5601_v49  ;;  %6980 = vst [vmem:[#allocation52_spill] sm:$0xff] %v5617_v44 }
 0x2a4   : > { %6979 = vst [vmem:[#allocation51_spill] sm:$0xff] %v5609_v19  ;;  %v1649_v55 = vadd.f32 -1.4531521, %v1585_v31  ;;  %vm2539_vm4 = vcmp.lt.f32.partialorder %v5337_v5, 0.0  ;;  %v1903_v39 = vadd.f32 -0.28449672, %v1839_v43  ;;  %v1942_v59 = vmul.f32 %v6973_v47, %v1878_v21 }
 0x2a5   : > { %v2315_v45 = vmul.f32 1.442695, %v2224_v15  ;;  %v1944_v42 = vmul.f32 %v6975_v53, %v1880_v3  ;;  %v2475_v30 = vsub.f32 1.0, %v5596_v63  ;;  %v2093_v20 = vmul.f32 %v5477_v51, %v2029_v13  ;;  %v6981_v31 = vld [vmem:[#allocation34_spill] sm:$0xff]  ;;  %v6982_v43 = vld [vmem:[#allocation36_spill] sm:$0xff]  ;;  %v6984_v21 = vld [vmem:[#allocation15_spill] sm:$0xff] }
 0x2a6   : > { %v2030_v58 = vadd.f32 0.2548296, %v1966_v29  ;;  %v1776_v35 = vadd.f32 1.4214138, %v1712_v2  ;;  %vm2540_vm5 = vcmp.lt.f32.partialorder %v5363_v6, 0.0  ;;  %v1458_v37 = vadd.f32 1.0, %v1394_v27 }
 0x2a7   : > { %v2006_v33 = vadd.f32 0.2548296, %v1942_v59  ;;  %v2008_v36 = vadd.f32 0.2548296, %v1944_v42  ;;  %v6983_v19 = vld [vmem:[#allocation14_spill] sm:$0xff]  ;;  %vm2520_vm7 = vcmp.lt.f32.partialorder %v6984_v21, 0.0  ;;  %v2666_v63 = vsel %vm2538_vm3, %v2602_v46, %v2474_v8 }
 0x2a8   : > { %vm2518_vm6 = vcmp.lt.f32.partialorder %v6983_v19, 0.0  ;;  %v2476_v51 = vsub.f32 1.0, %v2412_v16  ;;  %v5627_v13 = vmul.f32 0.5, %v5510_v61  ;;  %v1713_v29 = vmul.f32 %v5594_v52, %v1649_v55  ;;  %v3757_v2 = vpop.eup %3756  ;;  %v6986_v16 = vld [vmem:[#allocation31_spill] sm:$0xff] }
 0x2a9   : > { %v1967_v3 = vmul.f32 %v5535_v22, %v1903_v39  ;;  %v2070_v27 = vmul.f32 %v6973_v47, %v2006_v33  ;;  %v2072_v59 = vmul.f32 %v6975_v53, %v2008_v36  ;;  %3760 = vrcp.f32 %v1458_v37  ;;  %v6987_v39 = vld [vmem:[#allocation33_spill] sm:$0xff] }
 0x2aa   : > { %v2603_v42 = vsub.f32 0.0, %v2475_v30  ;;  %v5633_v15 = vmul.f32 %v3755_v18, %v2093_v20  ;;  %3762 = vpow2.f32 %v2315_v45  ;;  %v5637_v8 = vadd.f32 %v6985_v7, %v4754_v14  ;;  %v6988_v7 = vld [vmem:[#allocation37_spill] sm:$0xff] }
 0x2ab   : > { %v2094_v61 = vmul.f32 %v5505_v25, %v2030_v58  ;;  %v1840_v46 = vmul.f32 %v5558_v34, %v1776_v35  ;;  %v2390_v55 = vmul.f32 %v6986_v16, %v2070_v27  ;;  %v2392_v44 = vmul.f32 %v6987_v39, %v2072_v59 }
 0x2ac   : > { %v2604_v47 = vsub.f32 0.0, %v2476_v51  ;;  %v1777_v33 = vadd.f32 1.4214138, %v1713_v29  ;;  %v2161_v53 = vsub.f32 0.0, %v5541_v54  ;;  %v5645_v18 = vmul.f32 0.70710677, %v5637_v8  ;;  %v3759_v45 = vpop.eup %3758 }
 0x2ad   : > { %v2031_v20 = vadd.f32 0.2548296, %v1967_v3  ;;  %v2454_v36 = vsub.f32 1.0, %v2390_v55  ;;  %v2456_v37 = vsub.f32 1.0, %v2392_v44  ;;  %v5649_v25 = vadd.f32 %v6988_v7, %v4776_v10  ;;  %v6992_v7 = vld [vmem:[#allocation20_spill] sm:$0xff] }
 0x2ae   : > { %v5651_v58 = vadd.f32 1.0, %v2666_v63  ;;  %v2667_v35 = vsel %vm2539_vm4, %v2603_v42, %v2475_v30  ;;  %v2477_v29 = vsub.f32 1.0, %v5633_v15  ;;  %v5657_v27 = vand.u32 2147483647, %v5645_v18  ;;  %v5667_v15 = vpop.f32.mrb[50].mxu0 }
 0x2af   : > { %vm2541_vm8 = vcmp.lt.f32.partialorder %v5379_v28, 0.0  ;;  %v5660_v59 = vmul.f32 %v3757_v2, %v2094_v61  ;;  %v1904_v3 = vadd.f32 -0.28449672, %v1840_v46  ;;  %v2582_v44 = vsub.f32 0.0, %v2454_v36  ;;  %6989 = vst [vmem:[#allocation34_spill] sm:$0xff] %v5667_v15  ;;  %v5677_v6 = vpop.f32.mrb[51].mxu0 }
 0x2b0   : > { %v2584_v16 = vsub.f32 0.0, %v2456_v37  ;;  %v2668_v55 = vsel %vm2540_vm5, %v2604_v47, %v2476_v51  ;;  %v1841_v63 = vmul.f32 %v5594_v52, %v1777_v33  ;;  %v2225_v5 = vmul.f32 %v2161_v53, %v5541_v54  ;;  %6990 = vst [vmem:[#allocation36_spill] sm:$0xff] %v5677_v6  ;;  %v6991_v47 = vld [vmem:[#allocation13_spill] sm:$0xff]  ;;  %v5698_v60 = vpop.f32.mrb[52].mxu0 }
 0x2b1   : > { %v1395_v30 = vmul.f32 0.3275911, %v5657_v27  ;;  %v2095_v42 = vmul.f32 %v5535_v22, %v2031_v20  ;;  %v2646_v2 = vsel %vm2518_vm6, %v2582_v44, %v2454_v36  ;;  %v5675_v46 = vmul.f32 0.70710677, %v5649_v25 }
 0x2b2   : > { %v2648_v61 = vsel %vm2520_vm7, %v2584_v16, %v2456_v37  ;;  %v2710_v51 = vadd.f32 1.0, %v2646_v2  ;;  %v5681_v33 = vadd.f32 %v6991_v47, %v4754_v14  ;;  %v2605_v22 = vsub.f32 0.0, %v2477_v29  ;;  %v6993_v16 = vld [vmem:[#allocation23_spill] sm:$0xff] }
 0x2b3   : > { %v2712_v39 = vadd.f32 1.0, %v2648_v61  ;;  %v1459_v54 = vadd.f32 1.0, %v1395_v30  ;;  %v5683_v53 = vpop.eup %3760  ;;  %v2478_v19 = vsub.f32 1.0, %v5660_v59  ;;  %vm2542_vm9 = vcmp.lt.f32.partialorder %v5418_v9, 0.0 }
 0x2b4   : > { %v1968_v21 = vmul.f32 %v5558_v34, %v1904_v3  ;;  %v5689_v20 = vand.u32 2147483647, %v5675_v46  ;;  %v3763_v36 = vpop.eup %3762  ;;  %v1905_v37 = vadd.f32 -0.28449672, %v1841_v63  ;;  %v2774_v44 = vmul.f32 %v2710_v51, %v6992_v7  ;;  %v6994_v7 = vld [vmem:[#allocation18_spill] sm:$0xff] }
 0x2b5   : > { %v2776_v30 = vmul.f32 %v2712_v39, %v6993_v16  ;;  %v1586_v2 = vmul.f32 1.0614054, %v5683_v53  ;;  %v2731_v61 = vadd.f32 1.0, %v2667_v35  ;;  %v2317_v47 = vmul.f32 1.442695, %v2225_v5 }
 0x2b6   : > { %3764 = vrcp.f32 %v1459_v54  ;;  %v1396_v59 = vmul.f32 0.3275911, %v5689_v20  ;;  %v2415_v6 = vmul.f32 %v3759_v45, %v2095_v42  ;;  %v5696_v3 = vmul.f32 0.70710677, %v5681_v33 }
 0x2b7   : > { %v2838_v15 = vpack.c.bf16 %v2776_v30, %v2774_v44  ;;  %v1650_v0 = vadd.f32 -1.4531521, %v1586_v2  ;;  %v2732_v63 = vadd.f32 1.0, %v2668_v55  ;;  %v2032_v50 = vadd.f32 0.2548296, %v1968_v21 }
 0x2b8   : > { %v1460_v51 = vadd.f32 1.0, %v1396_v59  ;;  %v2840_v39 = vpack.c.bf16 %v5222_v48, %v6994_v7  ;;  %v2669_v35 = vsel %vm2541_vm8, %v2605_v22, %v2477_v29  ;;  %v2606_v5 = vsub.f32 0.0, %v2478_v19  ;;  %v6996_v48 = vld [vmem:[#allocation16_spill] sm:$0xff]  ;;  %v6997_v29 = vld [vmem:[#allocation38_spill] sm:$0xff]  ;;  %v6998_v22 = vld [vmem:[#allocation39_spill] sm:$0xff] }
 0x2b9   : > { %v1969_v54 = vmul.f32 %v5594_v52, %v1905_v37  ;;  %3036 = vmatprep.mubr.bf16.mxu1 %v2838_v15  ;;  %v5706_v45 = vand.u32 2147483647, %v5696_v3  ;;  %vm2543_vm10 = vcmp.lt.f32.partialorder %v5452_v32, 0.0  ;;  %v1714_v42 = vmul.f32 %v5683_v53, %v1650_v0 }
 0x2ba   : > { %v6995_v55 = vpack.c.bf16 %v6982_v43, %v6981_v31  ;;  %3766 = vrcp.f32 %v1460_v51  ;;  %v5715_v28 = vadd.f32 %v6996_v48, %v4776_v10  ;;  %v2839_v21 = vpack.c.bf16 %v6998_v22, %v6997_v29 }
 0x2bb   : > { %v2479_v15 = vsub.f32 1.0, %v2415_v6  ;;  %3768 = vpow2.f32 %v2317_v47  ;;  %v2162_v37 = vsub.f32 0.0, %v5601_v49  ;;  %v1397_v44 = vmul.f32 0.3275911, %v5706_v45  ;;  %v6999_v47 = vld [vmem:[#allocation17_spill] sm:$0xff] }
 0x2bc   : > { %3037 = vmatmul.mubr.bf16.vlgmr.msra.gmra.mrb[0].mxu1 %v6995_v55  ;;  %v5723_v0 = vmul.f32 %v5651_v58, %v5441_v41  ;;  %v5726_v31 = vmul.f32 %v2731_v61, %v5502_v11  ;;  %v2096_v43 = vmul.f32 %v5558_v34, %v2032_v50  ;;  %v5730_v16 = vmul.f32 0.70710677, %v5715_v28  ;;  %v7000_v11 = vld [vmem:[#allocation40_spill] sm:$0xff] }
 0x2bd   : > { %3044 = vmatprep.mubr.bf16.mxu1 %v2840_v39  ;;  %v2733_v30 = vadd.f32 1.0, %v2669_v35  ;;  %v2670_v6 = vsel %vm2542_vm9, %v2606_v5, %v2478_v19  ;;  %v1461_v2 = vadd.f32 1.0, %v1397_v44  ;;  %v5736_v59 = vadd.f32 %v6999_v47, %v4754_v14  ;;  %v5749_v19 = vpop.f32.mrb[53].mxu0 }
 0x2be   : > { %v2033_v51 = vadd.f32 0.2548296, %v1969_v54  ;;  %v1778_v41 = vadd.f32 1.4214138, %v1714_v42  ;;  %v5739_v58 = vand.u32 2147483647, %v5730_v16  ;;  %v5743_v50 = vadd.f32 %v7000_v11, %v4776_v10 }
 0x2bf   : > { %v5746_v34 = vmul.f32 %v2732_v63, %v5521_v17  ;;  %v2607_v61 = vsub.f32 0.0, %v2479_v15  ;;  %v2226_v9 = vmul.f32 %v2162_v37, %v5601_v49  ;;  %3770 = vrcp.f32 %v1461_v2 }
 0x2c0   : > { %v5751_v7 = vpop.eup %3764  ;;  %v2416_v39 = vmul.f32 %v3763_v36, %v2096_v43  ;;  %v5754_v35 = vmul.f32 0.5, %v5580_v26  ;;  %v1398_v5 = vmul.f32 0.3275911, %v5739_v58  ;;  %v5758_v54 = vmul.f32 0.70710677, %v5736_v59 }
 0x2c1   : > { %v5761_v17 = vmul.f32 %v2733_v30, %v5533_v23  ;;  %v2734_v63 = vadd.f32 1.0, %v2670_v6  ;;  %v1587_v49 = vmul.f32 1.0614054, %v5751_v7  ;;  %v5765_v42 = vmul.f32 0.70710677, %v5743_v50 }
 0x2c2   : > { %v2097_v55 = vmul.f32 %v5594_v52, %v2033_v51  ;;  %v1842_v36 = vmul.f32 %v5683_v53, %v1778_v41  ;;  %v1462_v26 = vadd.f32 1.0, %v1398_v5  ;;  %v5770_v48 = vand.u32 2147483647, %v5758_v54 }
 0x2c3   : > { %7001 = vst [vmem:[#allocation14_spill] sm:$0xff] %v5761_v17  ;;  %v2671_v29 = vsel %vm2543_vm10, %v2607_v61, %v2479_v15  ;;  %vm2544_vm11 = vcmp.lt.f32.partialorder %v5473_v12, 0.0  ;;  %v2319_v23 = vmul.f32 1.442695, %v2226_v9  ;;  %v1651_v22 = vadd.f32 -1.4531521, %v1587_v49 }
 0x2c4   : > { %3045 = vmatmul.mubr.bf16.gmra.mrb[4].mxu1 %v2839_v21  ;;  %v5776_v37 = vand.u32 2147483647, %v5765_v42  ;;  %v5778_v44 = vpop.eup %3766  ;;  %v2480_v52 = vsub.f32 1.0, %v2416_v39  ;;  %v2163_v43 = vsub.f32 0.0, %v5657_v27  ;;  %3772 = vrcp.f32 %v1462_v26  ;;  %v5788_v61 = vpop.f32.mrb[54].mxu0 }
 0x2c5   : > { %v1399_v21 = vmul.f32 0.3275911, %v5770_v48  ;;  %v3769_v30 = vpop.eup %3768  ;;  %v5783_v6 = vmul.f32 %v2734_v63, %v5549_v4  ;;  %v1715_v32 = vmul.f32 %v5751_v7, %v1651_v22  ;;  %v1588_v15 = vmul.f32 1.0614054, %v5778_v44  ;;  %7002 = vst [vmem:[#allocation15_spill] sm:$0xff] %v5788_v61  ;;  %v7003_v63 = vld [vmem:[#allocation41_spill] sm:$0xff] }
 0x2c6   : > { %v1400_v2 = vmul.f32 0.3275911, %v5776_v37  ;;  %v2735_v47 = vadd.f32 1.0, %v2671_v29  ;;  %v2417_v51 = vmul.f32 %v3769_v30, %v2097_v55  ;;  %v1906_v41 = vadd.f32 -0.28449672, %v1842_v36  ;;  %v5795_v22 = vpop.f32.mrb[55].mxu0 }
 0x2c7   : > { %v1463_v11 = vadd.f32 1.0, %v1399_v21  ;;  %3774 = vpow2.f32 %v2319_v23  ;;  %v1779_v9 = vadd.f32 1.4214138, %v1715_v32  ;;  %v1652_v39 = vadd.f32 -1.4531521, %v1588_v15  ;;  %7004 = vst [vmem:[#allocation12_spill] sm:$0xff] %v5795_v22 }
 0x2c8   : > { %v1464_v5 = vadd.f32 1.0, %v1400_v2  ;;  %v2608_v49 = vsub.f32 0.0, %v2480_v52  ;;  %v2227_v4 = vmul.f32 %v2163_v43, %v5657_v27  ;;  %v5793_v26 = vadd.f32 %v7003_v63, %v4754_v14  ;;  %v7007_v63 = vld [vmem:[#allocation43_spill] sm:$0xff]  ;;  %v5857_v17 = vpop.f32.mrb[56].mxu0 }
 0x2c9   : > { %3776 = vrcp.f32 %v1463_v11  ;;  %v5797_v29 = vpop.eup %3770  ;;  %vm2545_vm12 = vcmp.lt.f32.partialorder %v5528_v1, 0.0  ;;  %v1843_v55 = vmul.f32 %v5751_v7, %v1779_v9  ;;  %v1716_v36 = vmul.f32 %v5778_v44, %v1652_v39  ;;  %7009 = vst [vmem:[#allocation33_spill] sm:$0xff] %v5857_v17 }
 0x2ca   : > { %v2164_v23 = vsub.f32 0.0, %v5689_v20  ;;  %3778 = vrcp.f32 %v1464_v5  ;;  %v5804_v27 = vmul.f32 %v2735_v47, %v5565_v62  ;;  %v2481_v43 = vsub.f32 1.0, %v2417_v51 }
 0x2cb   : > { %v5807_v21 = vmul.f32 0.5, %v5637_v8  ;;  %v1589_v30 = vmul.f32 1.0614054, %v5797_v29  ;;  %v1970_v32 = vmul.f32 %v5683_v53, %v1906_v41  ;;  %v1780_v15 = vadd.f32 1.4214138, %v1716_v36  ;;  %v7006_v41 = vld [vmem:[#allocation19_spill] sm:$0xff] }
 0x2cc   : > { %7005 = vst [vmem:[#allocation31_spill] sm:$0xff] %v5804_v27  ;;  %v2165_v2 = vsub.f32 0.0, %v5706_v45  ;;  %v2842_v11 = vpack.c.bf16 %v5382_v40, %v5243_v24  ;;  %v2672_v9 = vsel %vm2544_vm11, %v2608_v49, %v2480_v52  ;;  %v1907_v39 = vadd.f32 -0.28449672, %v1843_v55  ;;  %v7008_v52 = vld [vmem:[#allocation42_spill] sm:$0xff] }
 0x2cd   : > { %v1653_v62 = vadd.f32 -1.4531521, %v1589_v30  ;;  %v5817_v47 = vmul.f32 0.70710677, %v5793_v26  ;;  %v2321_v8 = vmul.f32 1.442695, %v2227_v4  ;;  %v1844_v51 = vmul.f32 %v5778_v44, %v1780_v15 }
 0x2ce   : > { %v2228_v5 = vmul.f32 %v2164_v23, %v5689_v20  ;;  %3052 = vmatprep.mubr.bf16.mxu1 %v2842_v11  ;;  %v2841_v36 = vpack.c.bf16 %v7007_v63, %v7006_v41  ;;  %v5823_v22 = vpop.eup %3772  ;;  %v2609_v24 = vsub.f32 0.0, %v2481_v43  ;;  %v5831_v49 = vadd.f32 %v7008_v52, %v4776_v10 }
 0x2cf   : > { %v1717_v40 = vmul.f32 %v5797_v29, %v1653_v62  ;;  %v5827_v12 = vand.u32 2147483647, %v5817_v47  ;;  %v5833_v4 = vadd.f32 1.0, %v2672_v9  ;;  %v2034_v55 = vadd.f32 0.2548296, %v1970_v32 }
 0x2d0   : > { %v1590_v20 = vmul.f32 1.0614054, %v5823_v22  ;;  %v2166_v23 = vsub.f32 0.0, %v5739_v58  ;;  %3053 = vmatmul.mubr.bf16.gmra.mrb[8].mxu1 %v2841_v36  ;;  %v1971_v30 = vmul.f32 %v5751_v7, %v1907_v39  ;;  %v2229_v11 = vmul.f32 %v2165_v2, %v5706_v45 }
 0x2d1   : > { %v1781_v15 = vadd.f32 1.4214138, %v1717_v40  ;;  %v1401_v62 = vmul.f32 0.3275911, %v5827_v12  ;;  %v3775_v41 = vpop.eup %3774  ;;  %3780 = vpow2.f32 %v2321_v8  ;;  %v1908_v63 = vadd.f32 -0.28449672, %v1844_v51 }
 0x2d2   : > { %v2323_v52 = vmul.f32 1.442695, %v2228_v5  ;;  %v1654_v61 = vadd.f32 -1.4531521, %v1590_v20  ;;  %v2673_v32 = vsel %vm2545_vm12, %v2609_v24, %v2481_v43  ;;  %v5846_v39 = vmul.f32 0.70710677, %v5831_v49 }
 0x2d3   : > { %v5840_v9 = vpop.eup %3776  ;;  %v1845_v27 = vmul.f32 %v5797_v29, %v1781_v15  ;;  %v1465_v36 = vadd.f32 1.0, %v1401_v62  ;;  %v2098_v45 = vmul.f32 %v5683_v53, %v2034_v55  ;;  %v2230_v8 = vmul.f32 %v2166_v23, %v5739_v58 }
 0x2d4   : > { %v5848_v40 = vpop.eup %3778  ;;  %v1718_v2 = vmul.f32 %v5823_v22, %v1654_v61  ;;  %v1591_v51 = vmul.f32 1.0614054, %v5840_v9  ;;  %v2035_v5 = vadd.f32 0.2548296, %v1971_v30  ;;  %v2325_v20 = vmul.f32 1.442695, %v2229_v11 }
 0x2d5   : > { %v1592_v1 = vmul.f32 1.0614054, %v5848_v40  ;;  %3782 = vrcp.f32 %v1465_v36  ;;  %v1972_v43 = vmul.f32 %v5778_v44, %v1908_v63  ;;  %v2167_v62 = vsub.f32 0.0, %v5770_v48 }
 0x2d6   : > { %v1782_v24 = vadd.f32 1.4214138, %v1718_v2  ;;  %v1655_v15 = vadd.f32 -1.4531521, %v1591_v51  ;;  %3784 = vpow2.f32 %v2323_v52  ;;  %v1909_v53 = vadd.f32 -0.28449672, %v1845_v27 }
 0x2d7   : > { %v1656_v61 = vadd.f32 -1.4531521, %v1592_v1  ;;  %v5860_v58 = vand.u32 2147483647, %v5846_v39  ;;  %v2418_v55 = vmul.f32 %v3775_v41, %v2098_v45  ;;  %v2327_v30 = vmul.f32 1.442695, %v2230_v8 }
 0x2d8   : > { %v1846_v23 = vmul.f32 %v5823_v22, %v1782_v24  ;;  %v1719_v11 = vmul.f32 %v5840_v9, %v1655_v15  ;;  %v2099_v63 = vmul.f32 %v5751_v7, %v2035_v5  ;;  %v2168_v2 = vsub.f32 0.0, %v5776_v37 }
 0x2d9   : > { %v1720_v36 = vmul.f32 %v5848_v40, %v1656_v61  ;;  %v1402_v51 = vmul.f32 0.3275911, %v5860_v58  ;;  %v2036_v52 = vadd.f32 0.2548296, %v1972_v43  ;;  %3786 = vpow2.f32 %v2325_v20 }
 0x2da   : > { %v1910_v27 = vadd.f32 -0.28449672, %v1846_v23  ;;  %v1783_v1 = vadd.f32 1.4214138, %v1719_v11  ;;  %vm2546_vm13 = vcmp.lt.f32.partialorder %v5589_v38, 0.0  ;;  %v1973_v41 = vmul.f32 %v5797_v29, %v1909_v53 }
 0x2db   : > { %v2231_v45 = vmul.f32 %v2167_v62, %v5770_v48  ;;  %v1784_v8 = vadd.f32 1.4214138, %v1720_v36  ;;  %v1466_v24 = vadd.f32 1.0, %v1402_v51  ;;  %v3781_v15 = vpop.eup %3780  ;;  %v2482_v7 = vsub.f32 1.0, %v2418_v55  ;;  %v7010_v62 = vld [vmem:[#allocation21_spill] sm:$0xff]  ;;  %v5897_v51 = vpop.f32.mrb[57].mxu0 }
 0x2dc   : > { %v5872_v5 = vmul.f32 0.5, %v5649_v25  ;;  %v1974_v61 = vmul.f32 %v5823_v22, %v1910_v27  ;;  %3788 = vpow2.f32 %v2327_v30  ;;  %v2737_v43 = vadd.f32 1.0, %v2673_v32  ;;  %7011 = vst [vmem:[#allocation37_spill] sm:$0xff] %v5897_v51  ;;  %v5944_v51 = vpop.f32.mrb[58].mxu0 }
 0x2dd   : > { %v2419_v20 = vmul.f32 %v3781_v15, %v2099_v63  ;;  %v1847_v23 = vmul.f32 %v5840_v9, %v1783_v1  ;;  %3790 = vrcp.f32 %v1466_v24  ;;  %v2100_v11 = vmul.f32 %v5778_v44, %v2036_v52  ;;  %7015 = vst [vmem:[#allocation20_spill] sm:$0xff] %v5944_v51 }
 0x2de   : > { %v5878_v53 = vmul.f32 0.5, %v5681_v33  ;;  %v2232_v48 = vmul.f32 %v2168_v2, %v5776_v37  ;;  %v5883_v55 = vadd.f32 %v7010_v62, %v4754_v14  ;;  %v2037_v36 = vadd.f32 0.2548296, %v1973_v41 }
 0x2df   : > { %v5885_v25 = vpop.eup %3782  ;;  %v5888_v32 = vmul.f32 0.5, %v5715_v28  ;;  %v2329_v30 = vmul.f32 1.442695, %v2231_v45  ;;  %v1848_v63 = vmul.f32 %v5848_v40, %v1784_v8  ;;  %v5893_v44 = vmul.f32 %v5833_v4, %v5573_v57 }
 0x2e0   : > { %v2610_v33 = vsub.f32 0.0, %v2482_v7  ;;  %vm2547_vm14 = vcmp.lt.f32.partialorder %v5645_v18, 0.0  ;;  %v2038_v37 = vadd.f32 0.2548296, %v1974_v61  ;;  %v1593_v2 = vmul.f32 1.0614054, %v5885_v25  ;;  %v3785_v52 = vpop.eup %3784 }
 0x2e1   : > { %v5900_v27 = vmul.f32 %v2737_v43, %v5627_v13  ;;  %v2483_v28 = vsub.f32 1.0, %v2419_v20  ;;  %v1911_v1 = vadd.f32 -0.28449672, %v1847_v23  ;;  %v2169_v41 = vsub.f32 0.0, %v5827_v12  ;;  %v7013_v23 = vld [vmem:[#allocation44_spill] sm:$0xff] }
 0x2e2   : > { %v2420_v45 = vmul.f32 %v3785_v52, %v2100_v11  ;;  %v2331_v8 = vmul.f32 1.442695, %v2232_v48  ;;  %v1657_v57 = vadd.f32 -1.4531521, %v1593_v2  ;;  %v5904_v4 = vmul.f32 0.70710677, %v5883_v55 }
 0x2e3   : > { %7012 = vst [vmem:[#allocation13_spill] sm:$0xff] %v5900_v27  ;;  %v2101_v24 = vmul.f32 %v5797_v29, %v2037_v36  ;;  %v5908_v15 = vmul.f32 0.5, %v5736_v59  ;;  %3792 = vpow2.f32 %v2329_v30  ;;  %v1912_v61 = vadd.f32 -0.28449672, %v1848_v63  ;;  %v3787_v62 = vpop.eup %3786 }
 0x2e4   : > { %v2674_v13 = vsel %vm2546_vm13, %v2610_v33, %v2482_v7  ;;  %v2102_v43 = vmul.f32 %v5823_v22, %v2038_v37  ;;  %v1721_v20 = vmul.f32 %v5885_v25, %v1657_v57  ;;  %v5916_v11 = vadd.f32 %v7013_v23, %v4776_v10 }
 0x2e5   : > { %v2611_v48 = vsub.f32 0.0, %v2483_v28  ;;  %vm2548_vm15 = vcmp.lt.f32.partialorder %v5675_v46, 0.0  ;;  %v1975_v59 = vmul.f32 %v5840_v9, %v1911_v1  ;;  %v2233_v29 = vmul.f32 %v2169_v41, %v5827_v12 }
 0x2e6   : > { %v5922_v36 = vand.u32 2147483647, %v5904_v4  ;;  %v3789_v38 = vpop.eup %3788  ;;  %v2484_v7 = vsub.f32 1.0, %v2420_v45  ;;  %3794 = vpow2.f32 %v2331_v8  ;;  %v1785_v22 = vadd.f32 1.4214138, %v1721_v20 }
 0x2e7   : > { %v2170_v30 = vsub.f32 0.0, %v5860_v58  ;;  %v5925_v63 = vpop.eup %3790  ;;  %v2738_v33 = vadd.f32 1.0, %v2674_v13  ;;  %v2421_v37 = vmul.f32 %v3787_v62, %v2101_v24  ;;  %v1976_v2 = vmul.f32 %v5848_v40, %v1912_v61 }
 0x2e8   : > { %v1403_v52 = vmul.f32 0.3275911, %v5922_v36  ;;  %v5929_v1 = vmul.f32 %v3789_v38, %v2102_v43  ;;  %v1849_v12 = vmul.f32 %v5885_v25, %v1785_v22  ;;  %v1594_v41 = vmul.f32 1.0614054, %v5925_v63  ;;  %v7014_v22 = vld [vmem:[#allocation22_spill] sm:$0xff] }
 0x2e9   : > { %v5934_v45 = vmul.f32 0.70710677, %v5916_v11  ;;  %v2675_v8 = vsel %vm2547_vm14, %v2611_v48, %v2483_v28  ;;  %v2039_v57 = vadd.f32 0.2548296, %v1975_v59  ;;  %v2333_v20 = vmul.f32 1.442695, %v2233_v29 }
 0x2ea   : > { %v1467_v13 = vadd.f32 1.0, %v1403_v52  ;;  %v2612_v24 = vsub.f32 0.0, %v2484_v7  ;;  %v1913_v62 = vadd.f32 -0.28449672, %v1849_v12  ;;  %v1658_v61 = vadd.f32 -1.4531521, %v1594_v41 }
 0x2eb   : > { %v2234_v23 = vmul.f32 %v2170_v30, %v5860_v58  ;;  %v2485_v43 = vsub.f32 1.0, %v2421_v37  ;;  %vm2549_vm0 = vcmp.lt.f32.partialorder %v5696_v3, 0.0  ;;  %v2040_v38 = vadd.f32 0.2548296, %v1976_v2  ;;  %v5953_v59 = vpop.f32.mrb[59].mxu0  ;;  %v7024_v3 = vld [vmem:[#allocation25_spill] sm:$0xff] }
 0x2ec   : > { %3796 = vrcp.f32 %v1467_v13  ;;  %v5942_v27 = vadd.f32 %v7014_v22, %v4754_v14  ;;  %v2486_v18 = vsub.f32 1.0, %v5929_v1  ;;  %vm2550_vm1 = vcmp.lt.f32.partialorder %v5730_v16, 0.0  ;;  %7016 = vst [vmem:[#allocation23_spill] sm:$0xff] %v5953_v59 }
 0x2ed   : > { %v1977_v28 = vmul.f32 %v5885_v25, %v1913_v62  ;;  %v1722_v48 = vmul.f32 %v5925_v63, %v1658_v61  ;;  %v5951_v58 = vand.u32 2147483647, %v5934_v45  ;;  %v3793_v29 = vpop.eup %3792  ;;  %v2103_v30 = vmul.f32 %v5840_v9, %v2039_v57 }
 0x2ee   : > { %v5957_v37 = vmul.f32 0.5, %v5743_v50  ;;  %v5960_v2 = vmul.f32 0.5, %v5793_v26  ;;  %3798 = vpow2.f32 %v2333_v20  ;;  %v5963_v52 = vmul.f32 %v2738_v33, %v5754_v35  ;;  %v7018_v50 = vld [vmem:[#allocation27_spill] sm:$0xff] }
 0x2ef   : > { %v2739_v1 = vadd.f32 1.0, %v2675_v8  ;;  %v2676_v12 = vsel %vm2548_vm15, %v2612_v24, %v2484_v7  ;;  %v2335_v41 = vmul.f32 1.442695, %v2234_v23  ;;  %v1786_v13 = vadd.f32 1.4214138, %v1722_v48  ;;  %v7019_v7 = vld [vmem:[#allocation24_spill] sm:$0xff] }
 0x2f0   : > { %7017 = vst [vmem:[#allocation18_spill] sm:$0xff] %v5963_v52  ;;  %v1404_v62 = vmul.f32 0.3275911, %v5951_v58  ;;  %v5969_v9 = vmul.f32 0.70710677, %v5942_v27  ;;  %v2844_v57 = vpack.c.bf16 %v5486_v56, %v7018_v50  ;;  %v3795_v26 = vpop.eup %3794  ;;  %v2613_v61 = vsub.f32 0.0, %v2485_v43 }
 0x2f1   : > { %v2614_v20 = vsub.f32 0.0, %v2486_v18  ;;  %v2104_v35 = vmul.f32 %v5848_v40, %v2040_v38  ;;  %v2041_v33 = vadd.f32 0.2548296, %v1977_v28  ;;  %v2423_v8 = vmul.f32 %v3793_v29, %v2103_v30  ;;  %v7020_v56 = vld [vmem:[#allocation26_spill] sm:$0xff]  ;;  %v7021_v50 = vld [vmem:[#allocation47_spill] sm:$0xff]  ;;  %v5986_v40 = vpop.f32.mrb[60].mxu0 }
 0x2f2   : > { %v1468_v22 = vadd.f32 1.0, %v1404_v62  ;;  %v5975_v46 = vand.u32 2147483647, %v5969_v9  ;;  %3060 = vmatprep.mubr.bf16.mxu1 %v2844_v57  ;;  %v5979_v24 = vadd.f32 %v7019_v7, %v4776_v10  ;;  %v2740_v23 = vadd.f32 1.0, %v2676_v12  ;;  %7022 = vst [vmem:[#allocation16_spill] sm:$0xff] %v5986_v40  ;;  %v7033_v40 = vld [vmem:[#allocation30_spill] sm:$0xff] }
 0x2f3   : > { %v5982_v48 = vmul.f32 0.5, %v5831_v49  ;;  %3800 = vpow2.f32 %v2335_v41  ;;  %v2843_v59 = vpack.c.bf16 %v7021_v50, %v7020_v56  ;;  %v5989_v38 = vmul.f32 %v2739_v1, %v5807_v21  ;;  %v7027_v56 = vld [vmem:[#allocation45_spill] sm:$0xff] }
 0x2f4   : > { %v1850_v28 = vmul.f32 %v5925_v63, %v1786_v13  ;;  %3802 = vrcp.f32 %v1468_v22  ;;  %v1405_v29 = vmul.f32 0.3275911, %v5975_v46  ;;  %v2677_v30 = vsel %vm2549_vm0, %v2613_v61, %v2485_v43 }
 0x2f5   : > { %7023 = vst [vmem:[#allocation38_spill] sm:$0xff] %v5989_v38  ;;  %vm2551_vm2 = vcmp.lt.f32.partialorder %v5758_v54, 0.0  ;;  %v5996_v49 = vmul.f32 %v3795_v26, %v2104_v35  ;;  %v2105_v12 = vmul.f32 %v5885_v25, %v2041_v33  ;;  %v6000_v41 = vmul.f32 0.70710677, %v5979_v24  ;;  %3061 = vmatmul.mubr.bf16.gmra.mrb[12].mxu1 %v2843_v59 }
 0x2f6   : > { %v6002_v21 = vpop.eup %3796  ;;  %v2678_v1 = vsel %vm2550_vm1, %v2614_v20, %v2486_v18  ;;  %v2487_v13 = vsub.f32 1.0, %v2423_v8  ;;  %v1469_v62 = vadd.f32 1.0, %v1405_v29  ;;  %v6008_v43 = vadd.f32 %v7024_v3, %v4754_v14 }
 0x2f7   : > { %v6011_v57 = vmul.f32 %v2740_v23, %v5872_v5  ;;  %v6014_v25 = vmul.f32 0.5, %v5883_v55  ;;  %v1595_v26 = vmul.f32 1.0614054, %v6002_v21  ;;  %v2171_v59 = vsub.f32 0.0, %v5922_v36  ;;  %v6025_v55 = vpop.f32.mrb[61].mxu0 }
 0x2f8   : > { %v3799_v61 = vpop.eup %3798  ;;  %v2741_v35 = vadd.f32 1.0, %v2677_v30  ;;  %v1914_v16 = vadd.f32 -0.28449672, %v1850_v28  ;;  %3804 = vrcp.f32 %v1469_v62  ;;  %v6019_v18 = vand.u32 2147483647, %v6000_v41  ;;  %7026 = vst [vmem:[#allocation17_spill] sm:$0xff] %v6025_v55 }
 0x2f9   : > { %7025 = vst [vmem:[#allocation39_spill] sm:$0xff] %v6011_v57  ;;  %v2742_v20 = vadd.f32 1.0, %v2678_v1  ;;  %vm2552_vm3 = vcmp.lt.f32.partialorder %v5765_v42, 0.0  ;;  %v2425_v33 = vmul.f32 %v3799_v61, %v2105_v12  ;;  %v1659_v5 = vadd.f32 -1.4531521, %v1595_v26 }
 0x2fa   : > { %v6023_v8 = vmul.f32 0.70710677, %v6008_v43  ;;  %v2615_v22 = vsub.f32 0.0, %v2487_v13  ;;  %v2488_v7 = vsub.f32 1.0, %v5996_v49  ;;  %v1406_v23 = vmul.f32 0.3275911, %v6019_v18 }
 0x2fb   : > { %v6031_v50 = vadd.f32 %v7027_v56, %v4776_v10  ;;  %v1723_v28 = vmul.f32 %v6002_v21, %v1659_v5  ;;  %v2235_v29 = vmul.f32 %v2171_v59, %v5922_v36  ;;  %v6036_v30 = vmul.f32 0.5, %v5916_v11 }
 0x2fc   : > { %v6039_v12 = vand.u32 2147483647, %v6023_v8  ;;  %v6042_v1 = vmul.f32 %v2741_v35, %v5878_v53  ;;  %vm2553_vm4 = vcmp.lt.f32.partialorder %v5817_v47, 0.0  ;;  %v1978_v49 = vmul.f32 %v5925_v63, %v1914_v16 }
 0x2fd   : > { %v2172_v62 = vsub.f32 0.0, %v5951_v58  ;;  %v1470_v3 = vadd.f32 1.0, %v1406_v23  ;;  %v3801_v26 = vpop.eup %3800  ;;  %v6048_v61 = vmul.f32 %v2742_v20, %v5888_v32  ;;  %v2489_v36 = vsub.f32 1.0, %v2425_v33 }
 0x2fe   : > { %7028 = vst [vmem:[#allocation40_spill] sm:$0xff] %v6042_v1  ;;  %v1787_v11 = vadd.f32 1.4214138, %v1723_v28  ;;  %v1407_v59 = vmul.f32 0.3275911, %v6039_v12  ;;  %v6051_v5 = vpop.eup %3802  ;;  %v2679_v53 = vsel %vm2551_vm2, %v2615_v22, %v2487_v13  ;;  %v2616_v35 = vsub.f32 0.0, %v2488_v7 }
 0x2ff   : > { %7029 = vst [vmem:[#allocation41_spill] sm:$0xff] %v6048_v61  ;;  %3806 = vrcp.f32 %v1470_v3  ;;  %v6056_v16 = vmul.f32 0.70710677, %v6031_v50  ;;  %v2337_v56 = vmul.f32 1.442695, %v2235_v29  ;;  %v2236_v28 = vmul.f32 %v2172_v62, %v5951_v58  ;;  %v6065_v3 = vpop.f32.mrb[62].mxu0 }
 0x300   : > { %v1851_v23 = vmul.f32 %v6002_v21, %v1787_v11  ;;  %v1596_v32 = vmul.f32 1.0614054, %v6051_v5  ;;  %v1471_v20 = vadd.f32 1.0, %v1407_v59  ;;  %v2042_v33 = vadd.f32 0.2548296, %v1978_v49  ;;  %7030 = vst [vmem:[#allocation19_spill] sm:$0xff] %v6065_v3 }
 0x301   : > { %v2173_v1 = vsub.f32 0.0, %v5975_v46  ;;  %v6063_v55 = vand.u32 2147483647, %v6056_v16  ;;  %v2743_v54 = vadd.f32 1.0, %v2679_v53  ;;  %v2617_v13 = vsub.f32 0.0, %v2489_v36  ;;  %v7031_v58 = vld [vmem:[#allocation46_spill] sm:$0xff] }
 0x302   : > { %v1660_v22 = vadd.f32 -1.4531521, %v1596_v32  ;;  %3808 = vrcp.f32 %v1471_v20  ;;  %v6067_v61 = vpop.eup %3804  ;;  %v2680_v29 = vsel %vm2552_vm3, %v2616_v35, %v2488_v7  ;;  %v1915_v11 = vadd.f32 -0.28449672, %v1851_v23  ;;  %v6081_v20 = vpop.f32.mrb[63].mxu0 }
 0x303   : > { %v1408_v49 = vmul.f32 0.3275911, %v6063_v55  ;;  %v6074_v62 = vadd.f32 %v7031_v58, %v4754_v14  ;;  %3810 = vpow2.f32 %v2337_v56  ;;  %v6078_v53 = vmul.f32 0.5, %v5942_v27  ;;  %7032 = vst [vmem:[#allocation43_spill] sm:$0xff] %v6081_v20 }
 0x304   : > { %v1724_v59 = vmul.f32 %v6051_v5, %v1660_v22  ;;  %v1597_v32 = vmul.f32 1.0614054, %v6067_v61  ;;  %v2106_v42 = vmul.f32 %v5925_v63, %v2042_v33  ;;  %v2339_v7 = vmul.f32 1.442695, %v2236_v28  ;;  %v7034_v22 = vld [vmem:[#allocation29_spill] sm:$0xff]  ;;  %v7035_v63 = vld [vmem:[#allocation28_spill] sm:$0xff] }
 0x305   : > { %v2237_v35 = vmul.f32 %v2173_v1, %v5975_v46  ;;  %v1472_v23 = vadd.f32 1.0, %v1408_v49  ;;  %v2681_v58 = vsel %vm2553_vm4, %v2617_v13, %v2489_v36  ;;  %v2846_v51 = vpack.c.bf16 %v7034_v22, %v7033_v40  ;;  %v7036_v36 = vld [vmem:[#allocation48_spill] sm:$0xff]  ;;  %v7037_v28 = vld [vmem:[#allocation50_spill] sm:$0xff] }
 0x306   : > { %v1788_v3 = vadd.f32 1.4214138, %v1724_v59  ;;  %v1661_v56 = vadd.f32 -1.4531521, %v1597_v32  ;;  %v1979_v27 = vmul.f32 %v6002_v21, %v1915_v11  ;;  %v6091_v38 = vmul.f32 0.70710677, %v6074_v62 }
 0x307   : > { %3812 = vrcp.f32 %v1472_v23  ;;  %v6095_v33 = vadd.f32 %v7035_v63, %v4776_v10  ;;  %v2174_v1 = vsub.f32 0.0, %v6019_v18  ;;  %3068 = vmatprep.mubr.bf16.mxu1 %v2846_v51  ;;  %v2845_v40 = vpack.c.bf16 %v7037_v28, %v7036_v36 }
 0x308   : > { %v1852_v46 = vmul.f32 %v6051_v5, %v1788_v3  ;;  %v1725_v47 = vmul.f32 %v6067_v61, %v1661_v56  ;;  %v2744_v11 = vadd.f32 1.0, %v2680_v29  ;;  %v2426_v49 = vmul.f32 %v3801_v26, %v2106_v42 }
 0x309   : > { %v6102_v13 = vpop.eup %3806  ;;  %v2341_v59 = vmul.f32 1.442695, %v2237_v35  ;;  %v6105_v32 = vand.u32 2147483647, %v6091_v38  ;;  %v6108_v23 = vmul.f32 %v2743_v54, %v5908_v15  ;;  %v2745_v3 = vadd.f32 1.0, %v2681_v58  ;;  %3069 = vmatmul.mubr.bf16.gmra.mrb[16].mxu1 %v2845_v40 }
 0x30a   : > { %v1789_v22 = vadd.f32 1.4214138, %v1725_v47  ;;  %v1598_v56 = vmul.f32 1.0614054, %v6102_v13  ;;  %v2043_v51 = vadd.f32 0.2548296, %v1979_v27  ;;  %3814 = vpow2.f32 %v2339_v7 }
 0x30b   : > { %7038 = vst [vmem:[#allocation42_spill] sm:$0xff] %v6108_v23  ;;  %v1409_v63 = vmul.f32 0.3275911, %v6105_v32  ;;  %v6113_v36 = vmul.f32 0.70710677, %v6095_v33  ;;  %vm2554_vm5 = vcmp.lt.f32.partialorder %v5846_v39, 0.0  ;;  %v2238_v42 = vmul.f32 %v2174_v1, %v6019_v18 }
 0x30c   : > { %v6115_v26 = vpop.eup %3808  ;;  %v1916_v29 = vadd.f32 -0.28449672, %v1852_v46  ;;  %v1853_v15 = vmul.f32 %v6067_v61, %v1789_v22  ;;  %v1662_v54 = vadd.f32 -1.4531521, %v1598_v56  ;;  %v2490_v35 = vsub.f32 1.0, %v2426_v49 }
 0x30d   : > { %v1599_v58 = vmul.f32 1.0614054, %v6115_v26  ;;  %v1473_v27 = vadd.f32 1.0, %v1409_v63  ;;  %v6122_v7 = vand.u32 2147483647, %v6113_v36  ;;  %v3811_v47 = vpop.eup %3810  ;;  %v2175_v20 = vsub.f32 0.0, %v6039_v12 }
 0x30e   : > { %v1917_v28 = vadd.f32 -0.28449672, %v1853_v15  ;;  %v1726_v40 = vmul.f32 %v6102_v13, %v1662_v54  ;;  %v2176_v46 = vsub.f32 0.0, %v6063_v55  ;;  %v2107_v22 = vmul.f32 %v6002_v21, %v2043_v51 }
 0x30f   : > { %v1663_v56 = vadd.f32 -1.4531521, %v1599_v58  ;;  %3816 = vrcp.f32 %v1473_v27  ;;  %v1410_v18 = vmul.f32 0.3275911, %v6122_v7  ;;  %v1980_v1 = vmul.f32 %v6051_v5, %v1916_v29 }
 0x310   : > { %3818 = vpow2.f32 %v2341_v59  ;;  %v1790_v49 = vadd.f32 1.4214138, %v1726_v40  ;;  %v2343_v63 = vmul.f32 1.442695, %v2238_v42  ;;  %v2618_v15 = vsub.f32 0.0, %v2490_v35  ;;  %v7039_v42 = vld [vmem:[#allocation49_spill] sm:$0xff] }
 0x311   : > { %v6130_v23 = vpop.eup %3812  ;;  %v1981_v54 = vmul.f32 %v6067_v61, %v1917_v28  ;;  %v1727_v57 = vmul.f32 %v6115_v26, %v1663_v56  ;;  %v1474_v52 = vadd.f32 1.0, %v1410_v18  ;;  %v2239_v21 = vmul.f32 %v2175_v20, %v6039_v12 }
 0x312   : > { %v1854_v17 = vmul.f32 %v6102_v13, %v1790_v49  ;;  %v1600_v51 = vmul.f32 1.0614054, %v6130_v23  ;;  %v2240_v58 = vmul.f32 %v2176_v46, %v6063_v55  ;;  %v6138_v29 = vmul.f32 %v3811_v47, %v2107_v22 }
 0x313   : > { %v1791_v59 = vadd.f32 1.4214138, %v1727_v57  ;;  %3820 = vrcp.f32 %v1474_v52  ;;  %v6142_v27 = vadd.f32 %v7039_v42, %v4754_v14  ;;  %v6145_v28 = vmul.f32 %v2744_v11, %v5957_v37 }
 0x314   : > { %v2044_v40 = vadd.f32 0.2548296, %v1980_v1  ;;  %v1918_v56 = vadd.f32 -0.28449672, %v1854_v17  ;;  %v1664_v18 = vadd.f32 -1.4531521, %v1600_v51  ;;  %v3815_v49 = vpop.eup %3814  ;;  %v2682_v12 = vsel %vm2554_vm5, %v2618_v15, %v2490_v35 }
 0x315   : > { %v2045_v20 = vadd.f32 0.2548296, %v1981_v54  ;;  %v6150_v55 = vmul.f32 0.5, %v5979_v24  ;;  %v1855_v52 = vmul.f32 %v6115_v26, %v1791_v59  ;;  %v2345_v47 = vmul.f32 1.442695, %v2239_v21 }
 0x316   : > { %v1982_v57 = vmul.f32 %v6102_v13, %v1918_v56  ;;  %v1728_v46 = vmul.f32 %v6130_v23, %v1664_v18  ;;  %v2347_v37 = vmul.f32 1.442695, %v2240_v58  ;;  %v2491_v11 = vsub.f32 1.0, %v6138_v29 }
 0x317   : > { %3822 = vpow2.f32 %v2343_v63  ;;  %v1919_v17 = vadd.f32 -0.28449672, %v1855_v52  ;;  %v6157_v22 = vmul.f32 0.70710677, %v6142_v27  ;;  %v6160_v39 = vmul.f32 %v2745_v3, %v5960_v2 }
 0x318   : > { %vm2555_vm6 = vcmp.lt.f32.partialorder %v5904_v4, 0.0  ;;  %v2108_v24 = vmul.f32 %v6051_v5, %v2044_v40  ;;  %v6165_v35 = vmul.f32 0.5, %v6008_v43  ;;  %v1792_v1 = vadd.f32 1.4214138, %v1728_v46  ;;  %v7041_v4 = vld [vmem:[#allocation35_spill] sm:$0xff] }
 0x319   : > { %v6167_v15 = vpop.eup %3816  ;;  %v2746_v54 = vadd.f32 1.0, %v2682_v12  ;;  %v2109_v63 = vmul.f32 %v6067_v61, %v2045_v20  ;;  %v2046_v21 = vadd.f32 0.2548296, %v1982_v57  ;;  %v6171_v51 = vand.u32 2147483647, %v6157_v22  ;;  %v7040_v57 = vld [vmem:[#allocation32_spill] sm:$0xff] }
 0x31a   : > { %v3819_v58 = vpop.eup %3818  ;;  %v1983_v2 = vmul.f32 %v6115_v26, %v1919_v17  ;;  %3824 = vpow2.f32 %v2345_v47  ;;  %v1856_v3 = vmul.f32 %v6130_v23, %v1792_v1  ;;  %v1601_v5 = vmul.f32 1.0614054, %v6167_v15 }
 0x31b   : > { %v2619_v43 = vsub.f32 0.0, %v2491_v11  ;;  %3826 = vpow2.f32 %v2347_v37  ;;  %v2177_v29 = vsub.f32 0.0, %v6105_v32  ;;  %v1411_v59 = vmul.f32 0.3275911, %v6171_v51 }
 0x31c   : > { %v2428_v42 = vmul.f32 %v3815_v49, %v2108_v24  ;;  %v1920_v61 = vadd.f32 -0.28449672, %v1856_v3  ;;  %v1665_v40 = vadd.f32 -1.4531521, %v1601_v5  ;;  %v2178_v56 = vsub.f32 0.0, %v6122_v7 }
 0x31d   : > { %v6179_v18 = vpop.eup %3820  ;;  %v2429_v12 = vmul.f32 %v3819_v58, %v2109_v63  ;;  %v2110_v20 = vmul.f32 %v6102_v13, %v2046_v21  ;;  %v1475_v52 = vadd.f32 1.0, %v1411_v59  ;;  %v6184_v47 = vadd.f32 %v7040_v57, %v4776_v10 }
 0x31e   : > { %v2047_v46 = vadd.f32 0.2548296, %v1983_v2  ;;  %v1984_v37 = vmul.f32 %v6130_v23, %v1920_v61  ;;  %v1729_v17 = vmul.f32 %v6167_v15, %v1665_v40  ;;  %v1602_v49 = vmul.f32 1.0614054, %v6179_v18 }
 0x31f   : > { %vm2556_vm7 = vcmp.lt.f32.partialorder %v5934_v45, 0.0  ;;  %v6191_v24 = vmul.f32 0.5, %v6031_v50  ;;  %v6194_v1 = vmul.f32 0.5, %v6074_v62  ;;  %v2241_v13 = vmul.f32 %v2177_v29, %v6105_v32 }
 0x320   : > { %3828 = vrcp.f32 %v1475_v52  ;;  %v6198_v63 = vmul.f32 %v2746_v54, %v5982_v48  ;;  %v2492_v21 = vsub.f32 1.0, %v2428_v42  ;;  %vm2557_vm8 = vcmp.lt.f32.partialorder %v5969_v9, 0.0 }
 0x321   : > { %v2048_v58 = vadd.f32 0.2548296, %v1984_v37  ;;  %v1793_v2 = vadd.f32 1.4214138, %v1729_v17  ;;  %v3823_v3 = vpop.eup %3822  ;;  %v2683_v5 = vsel %vm2555_vm6, %v2619_v43, %v2491_v11  ;;  %v2493_v50 = vsub.f32 1.0, %v2429_v12 }
 0x322   : > { %v1666_v59 = vadd.f32 -1.4531521, %v1602_v49  ;;  %v2242_v62 = vmul.f32 %v2178_v56, %v6122_v7  ;;  %v2430_v61 = vmul.f32 %v3823_v3, %v2110_v20  ;;  %v2111_v32 = vmul.f32 %v6115_v26, %v2047_v46 }
 0x323   : > { %v1857_v29 = vmul.f32 %v6167_v15, %v1793_v2  ;;  %v6207_v48 = vmul.f32 0.70710677, %v6184_v47  ;;  %v2112_v54 = vmul.f32 %v6130_v23, %v2048_v58  ;;  %v2349_v42 = vmul.f32 1.442695, %v2241_v13 }
 0x324   : > { %v1730_v40 = vmul.f32 %v6179_v18, %v1666_v59  ;;  %v6213_v11 = vadd.f32 %v7041_v4, %v4754_v14  ;;  %v3825_v43 = vpop.eup %3824  ;;  %v2620_v12 = vsub.f32 0.0, %v2492_v21  ;;  %v6216_v56 = vmul.f32 0.5, %v6095_v33 }
 0x325   : > { %v1921_v7 = vadd.f32 -0.28449672, %v1857_v29  ;;  %v6219_v26 = vand.u32 2147483647, %v6207_v48  ;;  %v3827_v20 = vpop.eup %3826  ;;  %v2747_v52 = vadd.f32 1.0, %v2683_v5  ;;  %v2621_v57 = vsub.f32 0.0, %v2493_v50 }
 0x326   : > { %vm2558_vm9 = vcmp.lt.f32.partialorder %v6000_v41, 0.0  ;;  %v1794_v23 = vadd.f32 1.4214138, %v1730_v40  ;;  %v2179_v46 = vsub.f32 0.0, %v6171_v51  ;;  %v2494_v37 = vsub.f32 1.0, %v2430_v61  ;;  %v7044_v41 = vld [vmem:[#allocation34_spill] sm:$0xff] }
 0x327   : > { %v2431_v17 = vmul.f32 %v3825_v43, %v2111_v32  ;;  %v2351_v49 = vmul.f32 1.442695, %v2242_v62  ;;  %v1412_v13 = vmul.f32 0.3275911, %v6219_v26  ;;  %v2432_v58 = vmul.f32 %v3827_v20, %v2112_v54  ;;  %v7042_v43 = vld [vmem:[#allocation52_spill] sm:$0xff] }
 0x328   : > { %v1858_v33 = vmul.f32 %v6179_v18, %v1794_v23  ;;  %v6226_v2 = vmul.f32 0.70710677, %v6213_v11  ;;  %v2848_v3 = vpack.c.bf16 %v5746_v34, %v5723_v0  ;;  %v2684_v5 = vsel %vm2556_vm7, %v2620_v12, %v2492_v21 }
 0x329   : > { %v1985_v59 = vmul.f32 %v6167_v15, %v1921_v7  ;;  %3830 = vpow2.f32 %v2349_v42  ;;  %v1476_v61 = vadd.f32 1.0, %v1412_v13  ;;  %v2685_v62 = vsel %vm2557_vm8, %v2621_v57, %v2493_v50 }
 0x32a   : > { %v6233_v32 = vpop.eup %3828  ;;  %vm2559_vm10 = vcmp.lt.f32.partialorder %v6023_v8, 0.0  ;;  %v1922_v29 = vadd.f32 -0.28449672, %v1858_v33  ;;  %v2243_v54 = vmul.f32 %v2179_v46, %v6171_v51  ;;  %v6240_v40 = vand.u32 2147483647, %v6226_v2  ;;  %3076 = vmatprep.mubr.bf16.mxu1 %v2848_v3 }
 0x32b   : > { %v2622_v0 = vsub.f32 0.0, %v2494_v37  ;;  %v2495_v34 = vsub.f32 1.0, %v2431_v17  ;;  %vm2560_vm11 = vcmp.lt.f32.partialorder %v6056_v16, 0.0  ;;  %v1603_v45 = vmul.f32 1.0614054, %v6233_v32 }
 0x32c   : > { %3832 = vrcp.f32 %v1476_v61  ;;  %v2496_v21 = vsub.f32 1.0, %v2432_v58  ;;  %v1986_v9 = vmul.f32 %v6179_v18, %v1922_v29  ;;  %v1413_v50 = vmul.f32 0.3275911, %v6240_v40 }
 0x32d   : > { %3834 = vpow2.f32 %v2351_v49  ;;  %v6247_v42 = vmul.f32 %v2747_v52, %v6014_v25  ;;  %v2049_v51 = vadd.f32 0.2548296, %v1985_v59  ;;  %v1667_v4 = vadd.f32 -1.4531521, %v1603_v45  ;;  %v7043_v52 = vld [vmem:[#allocation51_spill] sm:$0xff] }
 0x32e   : > { %v6251_v12 = vadd.f32 %v7042_v43, %v4776_v10  ;;  %v2748_v7 = vadd.f32 1.0, %v2684_v5  ;;  %v2749_v20 = vadd.f32 1.0, %v2685_v62  ;;  %v2353_v57 = vmul.f32 1.442695, %v2243_v54 }
 0x32f   : > { %v1477_v23 = vadd.f32 1.0, %v1413_v50  ;;  %v2686_v46 = vsel %vm2558_vm9, %v2622_v0, %v2494_v37  ;;  %v2623_v17 = vsub.f32 0.0, %v2495_v34  ;;  %v2050_v49 = vadd.f32 0.2548296, %v1986_v9  ;;  %v7045_v9 = vld [vmem:[#allocation36_spill] sm:$0xff] }
 0x330   : > { %v1731_v13 = vmul.f32 %v6233_v32, %v1667_v4  ;;  %v2624_v58 = vsub.f32 0.0, %v2496_v21  ;;  %v6257_v25 = vmul.f32 0.70710677, %v6251_v12  ;;  %v2847_v33 = vpack.c.bf16 %v5726_v31, %v7043_v52 }
 0x331   : > { %3836 = vrcp.f32 %v1477_v23  ;;  %v2113_v3 = vmul.f32 %v6167_v15, %v2049_v51  ;;  %v2180_v59 = vsub.f32 0.0, %v6219_v26  ;;  %v6265_v37 = vadd.f32 %v7044_v41, %v4754_v14 }
 0x332   : > { %v1795_v5 = vadd.f32 1.4214138, %v1731_v13  ;;  %v6268_v61 = vmul.f32 %v2748_v7, %v6036_v30  ;;  %v6271_v62 = vmul.f32 %v2749_v20, %v6078_v53  ;;  %v6274_v29 = vmul.f32 0.5, %v6142_v27  ;;  %3077 = vmatmul.mubr.bf16.gmra.mrb[20].mxu1 %v2847_v33 }
 0x333   : > { %v6277_v31 = vand.u32 2147483647, %v6257_v25  ;;  %v3831_v15 = vpop.eup %3830  ;;  %v2750_v54 = vadd.f32 1.0, %v2686_v46  ;;  %v2687_v0 = vsel %vm2559_vm10, %v2623_v17, %v2495_v34  ;;  %v2114_v45 = vmul.f32 %v6179_v18, %v2050_v49 }
 0x334   : > { %3838 = vpow2.f32 %v2353_v57  ;;  %v2688_v30 = vsel %vm2560_vm11, %v2624_v58, %v2496_v21  ;;  %v1859_v53 = vmul.f32 %v6233_v32, %v1795_v5  ;;  %v6288_v50 = vadd.f32 %v7045_v9, %v4776_v10 }
 0x335   : > { %v1414_v27 = vmul.f32 0.3275911, %v6277_v31  ;;  %v2433_v4 = vmul.f32 %v3831_v15, %v2113_v3  ;;  %v2244_v8 = vmul.f32 %v2180_v59, %v6219_v26  ;;  %v2181_v34 = vsub.f32 0.0, %v6240_v40 }
 0x336   : > { %v6290_v51 = vpop.eup %3832  ;;  %v6295_v18 = vmul.f32 0.70710677, %v6265_v37  ;;  %v2751_v21 = vadd.f32 1.0, %v2687_v0  ;;  %v6298_v43 = vmul.f32 0.5, %v6184_v47  ;;  %v6302_v57 = vmul.f32 %v2750_v54, %v6150_v55 }
 0x337   : > { %v3835_v16 = vpop.eup %3834  ;;  %v1604_v7 = vmul.f32 1.0614054, %v6290_v51  ;;  %v1478_v20 = vadd.f32 1.0, %v1414_v27  ;;  %v2752_v23 = vadd.f32 1.0, %v2688_v30  ;;  %vm2561_vm12 = vcmp.lt.f32.partialorder %v6091_v38, 0.0 }
 0x338   : > { %v2434_v46 = vmul.f32 %v3835_v16, %v2114_v45  ;;  %v1351_v26 = vand.u32 2147483647, %v6295_v18  ;;  %v1923_v17 = vadd.f32 -0.28449672, %v1859_v53  ;;  %v6307_v13 = vmul.f32 0.70710677, %v6288_v50 }
 0x339   : > { %v1668_v49 = vadd.f32 -1.4531521, %v1604_v7  ;;  %3840 = vrcp.f32 %v1478_v20  ;;  %v2497_v47 = vsub.f32 1.0, %v2433_v4  ;;  %v2355_v58 = vmul.f32 1.442695, %v2244_v8 }
 0x33a   : > { %v6310_v52 = vmul.f32 0.5, %v6213_v11  ;;  %v2245_v55 = vmul.f32 %v2181_v34, %v6240_v40  ;;  %v6316_v3 = vmul.f32 %v2751_v21, %v6165_v35  ;;  %vm2562_vm13 = vcmp.lt.f32.partialorder %v6113_v36, 0.0  ;;  %v7046_v36 = vld [vmem:[#allocation14_spill] sm:$0xff] }
 0x33b   : > { %v6313_v33 = vpop.eup %3836  ;;  %v1732_v5 = vmul.f32 %v6290_v51, %v1668_v49  ;;  %v1415_v59 = vmul.f32 0.3275911, %v1351_v26  ;;  %v6321_v41 = vand.u32 2147483647, %v6307_v13  ;;  %v6324_v15 = vmul.f32 %v2752_v23, %v6191_v24 }
 0x33c   : > { %v2498_v11 = vsub.f32 1.0, %v2434_v46  ;;  %v1605_v54 = vmul.f32 1.0614054, %v6313_v33  ;;  %v6329_v40 = vadd.f32 %v5698_v60, %v4754_v14  ;;  %v1987_v35 = vmul.f32 %v6233_v32, %v1923_v17 }
 0x33d   : > { %v1796_v0 = vadd.f32 1.4214138, %v1732_v5  ;;  %v1479_v45 = vadd.f32 1.0, %v1415_v59  ;;  %v1416_v30 = vmul.f32 0.3275911, %v6321_v41  ;;  %v2625_v27 = vsub.f32 0.0, %v2497_v47 }
 0x33e   : > { %v3839_v53 = vpop.eup %3838  ;;  %3842 = vpow2.f32 %v2355_v58  ;;  %v1669_v9 = vadd.f32 -1.4531521, %v1605_v54  ;;  %v2357_v4 = vmul.f32 1.442695, %v2245_v55  ;;  %v2182_v8 = vsub.f32 0.0, %v6277_v31 }
 0x33f   : > { %v1860_v24 = vmul.f32 %v6290_v51, %v1796_v0  ;;  %3844 = vrcp.f32 %v1479_v45  ;;  %v1480_v34 = vadd.f32 1.0, %v1416_v30  ;;  %v2626_v16 = vsub.f32 0.0, %v2498_v11 }
 0x340   : > { %v1733_v60 = vmul.f32 %v6313_v33, %v1669_v9  ;;  %v6337_v21 = vmul.f32 0.5, %v6251_v12  ;;  %v6340_v7 = vmul.f32 0.70710677, %v6329_v40  ;;  %v2051_v20 = vadd.f32 0.2548296, %v1987_v35 }
 0x341   : > { %v1924_v23 = vadd.f32 -0.28449672, %v1860_v24  ;;  %v2183_v46 = vsub.f32 0.0, %v1351_v26  ;;  %v2850_v17 = vpack.c.bf16 %v5893_v44, %v5783_v6  ;;  %v2689_v49 = vsel %vm2561_vm12, %v2625_v27, %v2497_v47 }
 0x342   : > { %v1797_v58 = vadd.f32 1.4214138, %v1733_v60  ;;  %3846 = vrcp.f32 %v1480_v34  ;;  %v6348_v55 = vadd.f32 %v5749_v19, %v4776_v10  ;;  %v2246_v59 = vmul.f32 %v2182_v8, %v6277_v31 }
 0x343   : > { %v6350_v12 = vpop.eup %3840  ;;  %v1988_v5 = vmul.f32 %v6290_v51, %v1924_v23  ;;  %3848 = vpow2.f32 %v2357_v4  ;;  %v6355_v54 = vand.u32 2147483647, %v6340_v7  ;;  %3084 = vmatprep.mubr.bf16.mxu1 %v2850_v17  ;;  %v2690_v6 = vsel %vm2562_vm13, %v2626_v16, %v2498_v11  ;;  %v7047_v11 = vld [vmem:[#allocation31_spill] sm:$0xff] }
 0x344   : > { %v1861_v44 = vmul.f32 %v6313_v33, %v1797_v58  ;;  %v1606_v38 = vmul.f32 1.0614054, %v6350_v12  ;;  %v6362_v19 = vmul.f32 0.5, %v6265_v37  ;;  %v2115_v47 = vmul.f32 %v6233_v32, %v2051_v20 }
 0x345   : > { %v2052_v35 = vadd.f32 0.2548296, %v1988_v5  ;;  %v2247_v0 = vmul.f32 %v2183_v46, %v1351_v26  ;;  %v1417_v31 = vmul.f32 0.3275911, %v6355_v54  ;;  %v6367_v27 = vmul.f32 0.70710677, %v6348_v55 }
 0x346   : > { %v1925_v45 = vadd.f32 -0.28449672, %v1861_v44  ;;  %v1670_v30 = vadd.f32 -1.4531521, %v1606_v38  ;;  %v2849_v9 = vpack.c.bf16 %v7047_v11, %v7046_v36  ;;  %v2753_v4 = vadd.f32 1.0, %v2689_v49  ;;  %v7048_v5 = vld [vmem:[#allocation15_spill] sm:$0xff] }
 0x347   : > { %v2754_v24 = vadd.f32 1.0, %v2690_v6  ;;  %v2359_v8 = vmul.f32 1.442695, %v2246_v59  ;;  %v1481_v34 = vadd.f32 1.0, %v1417_v31  ;;  %v2116_v16 = vmul.f32 %v6290_v51, %v2052_v35 }
 0x348   : > { %v3843_v37 = vpop.eup %3842  ;;  %v1989_v32 = vmul.f32 %v6313_v33, %v1925_v45  ;;  %v1734_v26 = vmul.f32 %v6350_v12, %v1670_v30  ;;  %v1354_v60 = vand.u32 2147483647, %v6367_v27  ;;  %3085 = vmatmul.mubr.bf16.gmra.mrb[24].mxu1 %v2849_v9  ;;  %v6377_v23 = vmul.f32 %v3839_v53, %v2115_v47 }
 0x349   : > { %v6375_v20 = vpop.eup %3844  ;;  %v6380_v46 = vmul.f32 0.5, %v6288_v50  ;;  %v2184_v17 = vsub.f32 0.0, %v6321_v41  ;;  %3850 = vrcp.f32 %v1481_v34  ;;  %v2361_v58 = vmul.f32 1.442695, %v2247_v0 }
 0x34a   : > { %v1798_v49 = vadd.f32 1.4214138, %v1734_v26  ;;  %v1607_v51 = vmul.f32 1.0614054, %v6375_v20  ;;  %v6386_v59 = vadd.f32 %v7048_v5, %v4754_v14  ;;  %v6389_v6 = vmul.f32 %v2753_v4, %v6194_v1 }
 0x34b   : > { %v6392_v53 = vmul.f32 %v2754_v24, %v6216_v56  ;;  %3852 = vpow2.f32 %v2359_v8  ;;  %v1418_v50 = vmul.f32 0.3275911, %v1354_v60  ;;  %v2436_v38 = vmul.f32 %v3843_v37, %v2116_v16 }
 0x34c   : > { %v6394_v44 = vpop.eup %3846  ;;  %v2053_v47 = vadd.f32 0.2548296, %v1989_v32  ;;  %v1862_v35 = vmul.f32 %v6350_v12, %v1798_v49  ;;  %v1671_v31 = vadd.f32 -1.4531521, %v1607_v51  ;;  %v2499_v45 = vsub.f32 1.0, %v6377_v23 }
 0x34d   : > { %v3849_v0 = vpop.eup %3848  ;;  %v1608_v30 = vmul.f32 1.0614054, %v6394_v44  ;;  %v2248_v1 = vmul.f32 %v2184_v17, %v6321_v41  ;;  %v1482_v36 = vadd.f32 1.0, %v1418_v50  ;;  %vm2563_vm14 = vcmp.lt.f32.partialorder %v6157_v22, 0.0 }
 0x34e   : > { %v1926_v56 = vadd.f32 -0.28449672, %v1862_v35  ;;  %v1735_v11 = vmul.f32 %v6375_v20, %v1671_v31  ;;  %3854 = vpow2.f32 %v2361_v58  ;;  %v6403_v9 = vmul.f32 0.70710677, %v6386_v59  ;;  %v7049_v58 = vld [vmem:[#allocation12_spill] sm:$0xff] }
 0x34f   : > { %v1672_v4 = vadd.f32 -1.4531521, %v1608_v30  ;;  %v6406_v24 = vmul.f32 0.5, %v6329_v40  ;;  %v2185_v8 = vsub.f32 0.0, %v6355_v54  ;;  %3856 = vrcp.f32 %v1482_v36 }
 0x350   : > { %v2500_v34 = vsub.f32 1.0, %v2436_v38  ;;  %vm2564_vm15 = vcmp.lt.f32.partialorder %v6207_v48, 0.0  ;;  %v2117_v41 = vmul.f32 %v6313_v33, %v2053_v47  ;;  %v1990_v37 = vmul.f32 %v6350_v12, %v1926_v56 }
 0x351   : > { %v1799_v16 = vadd.f32 1.4214138, %v1735_v11  ;;  %v2627_v32 = vsub.f32 0.0, %v2499_v45  ;;  %v1736_v26 = vmul.f32 %v6394_v44, %v1672_v4  ;;  %v2186_v23 = vsub.f32 0.0, %v1354_v60 }
 0x352   : > { %v6414_v17 = vand.u32 2147483647, %v6403_v9  ;;  %v2054_v40 = vadd.f32 0.2548296, %v1990_v37  ;;  %v2363_v51 = vmul.f32 1.442695, %v2248_v1  ;;  %v6419_v5 = vadd.f32 %v7049_v58, %v4776_v10 }
 0x353   : > { %v1863_v49 = vmul.f32 %v6375_v20, %v1799_v16  ;;  %v6421_v50 = vpop.eup %3850  ;;  %v1800_v33 = vadd.f32 1.4214138, %v1736_v26  ;;  %v2249_v38 = vmul.f32 %v2185_v8, %v6355_v54  ;;  %v6425_v47 = vmul.f32 0.5, %v6348_v55 }
 0x354   : > { %v1419_v35 = vmul.f32 0.3275911, %v6414_v17  ;;  %v2628_v31 = vsub.f32 0.0, %v2500_v34  ;;  %v2437_v30 = vmul.f32 %v3849_v0, %v2117_v41  ;;  %v1609_v56 = vmul.f32 1.0614054, %v6421_v50 }
 0x355   : > { %v1927_v36 = vadd.f32 -0.28449672, %v1863_v49  ;;  %v3853_v1 = vpop.eup %3852  ;;  %v2118_v11 = vmul.f32 %v6350_v12, %v2054_v40  ;;  %v1864_v4 = vmul.f32 %v6394_v44, %v1800_v33  ;;  %v2250_v37 = vmul.f32 %v2186_v23, %v1354_v60 }
 0x356   : > { %v1483_v16 = vadd.f32 1.0, %v1419_v35  ;;  %3858 = vpow2.f32 %v2363_v51  ;;  %v1673_v54 = vadd.f32 -1.4531521, %v1609_v56  ;;  %v6433_v55 = vmul.f32 0.70710677, %v6419_v5 }
 0x357   : > { %v1991_v26 = vmul.f32 %v6375_v20, %v1927_v36  ;;  %v2691_v0 = vsel %vm2563_vm14, %v2627_v32, %v2499_v45  ;;  %vm2565_vm0 = vcmp.lt.f32.partialorder %v6226_v2, 0.0  ;;  %v1928_v8 = vadd.f32 -0.28449672, %v1864_v4 }
 0x358   : > { %v2365_v41 = vmul.f32 1.442695, %v2249_v38  ;;  %3860 = vrcp.f32 %v1483_v16  ;;  %v3855_v12 = vpop.eup %3854  ;;  %v2501_v40 = vsub.f32 1.0, %v2437_v30  ;;  %v1737_v60 = vmul.f32 %v6421_v50, %v1673_v54  ;;  %v7050_v30 = vld [vmem:[#allocation33_spill] sm:$0xff] }
 0x359   : > { %v2055_v49 = vadd.f32 0.2548296, %v1991_v26  ;;  %v6440_v23 = vand.u32 2147483647, %v6433_v55  ;;  %v6442_v51 = vpop.eup %3856  ;;  %v2692_v58 = vsel %vm2564_vm15, %v2628_v31, %v2500_v34  ;;  %v2438_v22 = vmul.f32 %v3853_v1, %v2118_v11 }
 0x35a   : > { %v1992_v45 = vmul.f32 %v6394_v44, %v1928_v8  ;;  %v2367_v32 = vmul.f32 1.442695, %v2250_v37  ;;  %v1801_v38 = vadd.f32 1.4214138, %v1737_v60  ;;  %v1610_v35 = vmul.f32 1.0614054, %v6442_v51 }
 0x35b   : > { %v2119_v33 = vmul.f32 %v6375_v20, %v2055_v49  ;;  %v6451_v36 = vadd.f32 %v7050_v30, %v4754_v14  ;;  %v2755_v56 = vadd.f32 1.0, %v2691_v0  ;;  %3862 = vpow2.f32 %v2365_v41 }
 0x35c   : > { %v2056_v4 = vadd.f32 0.2548296, %v1992_v45  ;;  %v1420_v16 = vmul.f32 0.3275911, %v6440_v23  ;;  %v2756_v48 = vadd.f32 1.0, %v2692_v58  ;;  %v2629_v34 = vsub.f32 0.0, %v2501_v40 }
 0x35d   : > { %vm2566_vm1 = vcmp.lt.f32.partialorder %v6257_v25, 0.0  ;;  %v1865_v31 = vmul.f32 %v6421_v50, %v1801_v38  ;;  %v1674_v1 = vadd.f32 -1.4531521, %v1610_v35  ;;  %v2502_v20 = vsub.f32 1.0, %v2438_v22  ;;  %v7051_v38 = vld [vmem:[#allocation18_spill] sm:$0xff]  ;;  %v7052_v35 = vld [vmem:[#allocation39_spill] sm:$0xff] }
 0x35e   : > { %v2439_v11 = vmul.f32 %v3855_v12, %v2119_v33  ;;  %3864 = vpow2.f32 %v2367_v32  ;;  %v1484_v37 = vadd.f32 1.0, %v1420_v16  ;;  %v2187_v0 = vsub.f32 0.0, %v6414_v17 }
 0x35f   : > { %v1929_v26 = vadd.f32 -0.28449672, %v1865_v31  ;;  %v1738_v54 = vmul.f32 %v6442_v51, %v1674_v1  ;;  %v6459_v8 = vmul.f32 0.70710677, %v6451_v36  ;;  %v6462_v41 = vmul.f32 %v2755_v56, %v6274_v29 }
 0x360   : > { %v2120_v49 = vmul.f32 %v6394_v44, %v2056_v4  ;;  %v6466_v60 = vmul.f32 0.5, %v6386_v59  ;;  %3866 = vrcp.f32 %v1484_v37  ;;  %v3859_v12 = vpop.eup %3858  ;;  %v2693_v58 = vsel %vm2565_vm0, %v2629_v34, %v2501_v40  ;;  %v7053_v37 = vld [vmem:[#allocation37_spill] sm:$0xff] }
 0x361   : > { %vm2567_vm2 = vcmp.lt.f32.partialorder %v6295_v18, 0.0  ;;  %v1993_v22 = vmul.f32 %v6421_v50, %v1929_v26  ;;  %v1802_v45 = vadd.f32 1.4214138, %v1738_v54  ;;  %v6473_v32 = vand.u32 2147483647, %v6459_v8  ;;  %v7056_v18 = vld [vmem:[#allocation20_spill] sm:$0xff] }
 0x362   : > { %v6475_v29 = vpop.eup %3860  ;;  %v6478_v44 = vmul.f32 %v2756_v48, %v6298_v43  ;;  %v2630_v59 = vsub.f32 0.0, %v2502_v20  ;;  %v2503_v33 = vsub.f32 1.0, %v2439_v11  ;;  %v2852_v30 = vpack.c.bf16 %v7052_v35, %v7051_v38 }
 0x363   : > { %v2057_v2 = vadd.f32 0.2548296, %v1993_v22  ;;  %v1866_v40 = vmul.f32 %v6442_v51, %v1802_v45  ;;  %v1611_v56 = vmul.f32 1.0614054, %v6475_v29  ;;  %v2251_v4 = vmul.f32 %v2187_v0, %v6414_v17 }
 0x364   : > { %v2757_v16 = vadd.f32 1.0, %v2693_v58  ;;  %v2440_v34 = vmul.f32 %v3859_v12, %v2120_v49  ;;  %v2188_v31 = vsub.f32 0.0, %v6440_v23  ;;  %v1421_v1 = vmul.f32 0.3275911, %v6473_v32  ;;  %3092 = vmatprep.mubr.bf16.mxu1 %v2852_v30 }
 0x365   : > { %v2121_v43 = vmul.f32 %v6421_v50, %v2057_v2  ;;  %v1930_v48 = vadd.f32 -0.28449672, %v1866_v40  ;;  %v1675_v11 = vadd.f32 -1.4531521, %v1611_v56  ;;  %v6490_v26 = vadd.f32 %v7053_v37, %v4776_v10  ;;  %v3863_v54 = vpop.eup %3862 }
 0x366   : > { %v2694_v22 = vsel %vm2566_vm1, %v2630_v59, %v2502_v20  ;;  %v2631_v17 = vsub.f32 0.0, %v2503_v33  ;;  %v6495_v0 = vmul.f32 0.5, %v6419_v5  ;;  %v1485_v49 = vadd.f32 1.0, %v1421_v1 }
 0x367   : > { %vm2568_vm3 = vcmp.lt.f32.partialorder %v6307_v13, 0.0  ;;  %v2441_v12 = vmul.f32 %v3863_v54, %v2121_v43  ;;  %v1994_v50 = vmul.f32 %v6442_v51, %v1930_v48  ;;  %v1739_v58 = vmul.f32 %v6475_v29, %v1675_v11 }
 0x368   : > { %v2369_v45 = vmul.f32 1.442695, %v2251_v4  ;;  %v3865_v38 = vpop.eup %3864  ;;  %v2504_v35 = vsub.f32 1.0, %v2440_v34  ;;  %v2252_v30 = vmul.f32 %v2188_v31, %v6440_v23  ;;  %3868 = vrcp.f32 %v1485_v49  ;;  %v7054_v34 = vld [vmem:[#allocation13_spill] sm:$0xff]  ;;  %v7055_v31 = vld [vmem:[#allocation38_spill] sm:$0xff] }
 0x369   : > { %v6502_v25 = vmul.f32 0.70710677, %v6490_v26  ;;  %v6505_v5 = vmul.f32 %v2757_v16, %v6310_v52  ;;  %v2758_v20 = vadd.f32 1.0, %v2694_v22  ;;  %vm2569_vm4 = vcmp.lt.f32.partialorder %v6340_v7, 0.0 }
 0x36a   : > { %v2058_v59 = vadd.f32 0.2548296, %v1994_v50  ;;  %v1803_v2 = vadd.f32 1.4214138, %v1739_v58  ;;  %v6508_v40 = vpop.eup %3866  ;;  %v2695_v56 = vsel %vm2567_vm2, %v2631_v17, %v2503_v33  ;;  %v2505_v4 = vsub.f32 1.0, %v2441_v12  ;;  %v7057_v58 = vld [vmem:[#allocation23_spill] sm:$0xff] }
 0x36b   : > { %v1358_v23 = vand.u32 2147483647, %v6502_v25  ;;  %v2851_v1 = vpack.c.bf16 %v7055_v31, %v7054_v34  ;;  %v1612_v16 = vmul.f32 1.0614054, %v6508_v40  ;;  %v2189_v48 = vsub.f32 0.0, %v6473_v32 }
 0x36c   : > { %v2122_v43 = vmul.f32 %v6442_v51, %v2058_v59  ;;  %v1867_v52 = vmul.f32 %v6475_v29, %v1803_v2  ;;  %v2632_v11 = vsub.f32 0.0, %v2504_v35  ;;  %v2371_v37 = vmul.f32 1.442695, %v2252_v30 }
 0x36d   : > { %v1422_v54 = vmul.f32 0.3275911, %v1358_v23  ;;  %3093 = vmatmul.mubr.bf16.gmra.mrb[28].mxu1 %v2851_v1  ;;  %v1159_v33 = vadd.f32 %v7056_v18, %v4754_v14  ;;  %v2759_v22 = vadd.f32 1.0, %v2695_v56  ;;  %3870 = vpow2.f32 %v2369_v45 }
 0x36e   : > { %v1931_v17 = vadd.f32 -0.28449672, %v1867_v52  ;;  %v1676_v49 = vadd.f32 -1.4531521, %v1612_v16  ;;  %v2633_v12 = vsub.f32 0.0, %v2505_v4  ;;  %v2442_v50 = vmul.f32 %v3865_v38, %v2122_v43 }
 0x36f   : > { %v1486_v51 = vadd.f32 1.0, %v1422_v54  ;;  %v6523_v59 = vadd.f32 %v7057_v58, %v4776_v10  ;;  %v2253_v34 = vmul.f32 %v2189_v48, %v6473_v32  ;;  %v6528_v31 = vmul.f32 0.70710677, %v1159_v33 }
 0x370   : > { %v1995_v2 = vmul.f32 %v6475_v29, %v1931_v17  ;;  %v1740_v30 = vmul.f32 %v6508_v40, %v1676_v49  ;;  %v6531_v56 = vmul.f32 %v2758_v20, %v6337_v21  ;;  %v2696_v45 = vsel %vm2568_vm3, %v2632_v11, %v2504_v35 }
 0x371   : > { %v6536_v38 = vmul.f32 0.5, %v6451_v36  ;;  %3872 = vrcp.f32 %v1486_v51  ;;  %v6539_v1 = vmul.f32 %v2759_v22, %v6362_v19  ;;  %vm2570_vm5 = vcmp.lt.f32.partialorder %v6367_v27, 0.0  ;;  %v7058_v51 = vld [vmem:[#allocation16_spill] sm:$0xff] }
 0x372   : > { %v2059_v43 = vadd.f32 0.2548296, %v1995_v2  ;;  %v1804_v52 = vadd.f32 1.4214138, %v1740_v30  ;;  %3874 = vpow2.f32 %v2371_v37  ;;  %v6542_v32 = vpop.eup %3868  ;;  %v2697_v21 = vsel %vm2569_vm4, %v2633_v12, %v2505_v4 }
 0x373   : > { %v2506_v20 = vsub.f32 1.0, %v2442_v50  ;;  %v1359_v13 = vand.u32 2147483647, %v6528_v31  ;;  %v6548_v36 = vmul.f32 0.70710677, %v6523_v59  ;;  %v2760_v35 = vadd.f32 1.0, %v2696_v45 }
 0x374   : > { %v1868_v19 = vmul.f32 %v6508_v40, %v1804_v52  ;;  %v1613_v16 = vmul.f32 1.0614054, %v6542_v32  ;;  %v2373_v48 = vmul.f32 1.442695, %v2253_v34  ;;  %v6553_v11 = vmul.f32 0.5, %v6490_v26 }
 0x375   : > { %v2190_v37 = vsub.f32 0.0, %v1358_v23  ;;  %v1423_v54 = vmul.f32 0.3275911, %v1359_v13  ;;  %v1360_v7 = vand.u32 2147483647, %v6548_v36  ;;  %v2761_v4 = vadd.f32 1.0, %v2697_v21 }
 0x376   : > { %v2123_v18 = vmul.f32 %v6475_v29, %v2059_v43  ;;  %v1932_v22 = vadd.f32 -0.28449672, %v1868_v19  ;;  %v1677_v17 = vadd.f32 -1.4531521, %v1613_v16  ;;  %v2634_v49 = vsub.f32 0.0, %v2506_v20 }
 0x377   : > { %v1487_v12 = vadd.f32 1.0, %v1423_v54  ;;  %v1424_v50 = vmul.f32 0.3275911, %v1360_v7  ;;  %v6559_v58 = vadd.f32 %v7058_v51, %v4754_v14  ;;  %v3871_v2 = vpop.eup %3870  ;;  %3876 = vpow2.f32 %v2373_v48 }
 0x378   : > { %v1996_v26 = vmul.f32 %v6508_v40, %v1932_v22  ;;  %v1741_v30 = vmul.f32 %v6542_v32, %v1677_v17  ;;  %v2191_v34 = vsub.f32 0.0, %v1359_v13  ;;  %v6564_v45 = vmul.f32 %v2760_v35, %v6380_v46  ;;  %v7059_v46 = vld [vmem:[#allocation41_spill] sm:$0xff] }
 0x379   : > { %v2254_v29 = vmul.f32 %v2190_v37, %v1358_v23  ;;  %3878 = vrcp.f32 %v1487_v12  ;;  %v1488_v43 = vadd.f32 1.0, %v1424_v50  ;;  %v2443_v52 = vmul.f32 %v3871_v2, %v2123_v18 }
 0x37a   : > { %v2060_v21 = vadd.f32 0.2548296, %v1996_v26  ;;  %v1805_v19 = vadd.f32 1.4214138, %v1741_v30  ;;  %v6566_v16 = vmul.f32 0.5, %v1159_v33  ;;  %v6571_v51 = vmul.f32 %v2761_v4, %v6406_v24 }
 0x37b   : > { %v6568_v54 = vpop.eup %3872  ;;  %v2698_v48 = vsel %vm2570_vm5, %v2634_v49, %v2506_v20  ;;  %v6576_v22 = vmul.f32 0.70710677, %v6559_v58  ;;  %v2854_v23 = vpack.c.bf16 %v6145_v28, %v7059_v46  ;;  %v2255_v17 = vmul.f32 %v2191_v34, %v1359_v13  ;;  %v7060_v20 = vld [vmem:[#allocation17_spill] sm:$0xff]  ;;  %v7061_v46 = vld [vmem:[#allocation40_spill] sm:$0xff] }
 0x37c   : > { %v3875_v35 = vpop.eup %3874  ;;  %v2124_v37 = vmul.f32 %v6508_v40, %v2060_v21  ;;  %v1869_v33 = vmul.f32 %v6542_v32, %v1805_v19  ;;  %v1614_v18 = vmul.f32 1.0614054, %v6568_v54  ;;  %vm2571_vm6 = vcmp.lt.f32.partialorder %v6403_v9, 0.0 }
 0x37d   : > { %v2375_v24 = vmul.f32 1.442695, %v2254_v29  ;;  %3880 = vrcp.f32 %v1488_v43  ;;  %v1361_v27 = vand.u32 2147483647, %v6576_v22  ;;  %3100 = vmatprep.mubr.bf16.mxu1 %v2854_v23  ;;  %v6587_v4 = vadd.f32 %v7060_v20, %v4776_v10 }
 0x37e   : > { %v2507_v28 = vsub.f32 1.0, %v2443_v52  ;;  %v2444_v49 = vmul.f32 %v3875_v35, %v2124_v37  ;;  %v1933_v12 = vadd.f32 -0.28449672, %v1869_v33  ;;  %v1678_v40 = vadd.f32 -1.4531521, %v1614_v18 }
 0x37f   : > { %v2762_v50 = vadd.f32 1.0, %v2698_v48  ;;  %v6590_v2 = vmul.f32 0.5, %v6523_v59  ;;  %v2192_v13 = vsub.f32 0.0, %v1360_v7  ;;  %v1425_v26 = vmul.f32 0.3275911, %v1361_v27  ;;  %v7062_v48 = vld [vmem:[#allocation42_spill] sm:$0xff] }
 0x380   : > { %vm2572_vm7 = vcmp.lt.f32.partialorder %v6433_v55, 0.0  ;;  %v1997_v30 = vmul.f32 %v6542_v32, %v1933_v12  ;;  %v1742_v34 = vmul.f32 %v6568_v54, %v1678_v40  ;;  %v2377_v29 = vmul.f32 1.442695, %v2255_v17 }
 0x381   : > { %v2193_v43 = vsub.f32 0.0, %v1361_v27  ;;  %v2508_v21 = vsub.f32 1.0, %v2444_v49  ;;  %v1489_v19 = vadd.f32 1.0, %v1425_v26  ;;  %v6596_v52 = vmul.f32 0.70710677, %v6587_v4  ;;  %v3877_v59 = vpop.eup %3876  ;;  %v7063_v49 = vld [vmem:[#allocation19_spill] sm:$0xff] }
 0x382   : > { %v2853_v23 = vpack.c.bf16 %v7062_v48, %v7061_v46  ;;  %v2635_v35 = vsub.f32 0.0, %v2507_v28  ;;  %v2061_v37 = vadd.f32 0.2548296, %v1997_v30  ;;  %v1806_v33 = vadd.f32 1.4214138, %v1742_v34 }
 0x383   : > { %3882 = vpow2.f32 %v2375_v24  ;;  %v6600_v18 = vpop.eup %3878  ;;  %v2256_v20 = vmul.f32 %v2192_v13, %v1360_v7  ;;  %v1362_v17 = vand.u32 2147483647, %v6596_v52  ;;  %v6605_v12 = vadd.f32 %v7063_v49, %v4754_v14 }
 0x384   : > { %3884 = vrcp.f32 %v1489_v19  ;;  %3101 = vmatmul.mubr.bf16.gmra.mrb[32].mxu1 %v2853_v23  ;;  %v6608_v40 = vmul.f32 %v2762_v50, %v6425_v47  ;;  %v2125_v26 = vmul.f32 %v6542_v32, %v2061_v37  ;;  %vm2573_vm8 = vcmp.lt.f32.partialorder %v6459_v8, 0.0 }
 0x385   : > { %v1870_v24 = vmul.f32 %v6568_v54, %v1806_v33  ;;  %v1615_v30 = vmul.f32 1.0614054, %v6600_v18  ;;  %v2636_v7 = vsub.f32 0.0, %v2508_v21  ;;  %3886 = vpow2.f32 %v2377_v29 }
 0x386   : > { %v2257_v13 = vmul.f32 %v2193_v43, %v1361_v27  ;;  %v1426_v34 = vmul.f32 0.3275911, %v1362_v17  ;;  %v2699_v19 = vsel %vm2571_vm6, %v2635_v35, %v2507_v28  ;;  %v2445_v14 = vmul.f32 %v3877_v59, %v2125_v26  ;;  %v7064_v26 = vld [vmem:[#allocation43_spill] sm:$0xff] }
 0x387   : > { %v1934_v46 = vadd.f32 -0.28449672, %v1870_v24  ;;  %v1679_v48 = vadd.f32 -1.4531521, %v1615_v30  ;;  %v6616_v47 = vpop.eup %3880  ;;  %v2379_v50 = vmul.f32 1.442695, %v2256_v20  ;;  %v2700_v9 = vsel %vm2572_vm7, %v2636_v7, %v2508_v21 }
 0x388   : > { %v1490_v32 = vadd.f32 1.0, %v1426_v34  ;;  %v2194_v23 = vsub.f32 0.0, %v1362_v17  ;;  %v6619_v37 = vmul.f32 0.70710677, %v6605_v12  ;;  %v2509_v33 = vsub.f32 1.0, %v2445_v14 }
 0x389   : > { %v1998_v49 = vmul.f32 %v6568_v54, %v1934_v46  ;;  %v1743_v27 = vmul.f32 %v6600_v18, %v1679_v48  ;;  %v1616_v29 = vmul.f32 1.0614054, %v6616_v47  ;;  %v2381_v28 = vmul.f32 1.442695, %v2257_v13 }
 0x38a   : > { %3888 = vrcp.f32 %v1490_v32  ;;  %v1363_v43 = vand.u32 2147483647, %v6619_v37  ;;  %v2637_v59 = vsub.f32 0.0, %v2509_v33  ;;  %v6629_v24 = vadd.f32 %v7064_v26, %v4776_v10 }
 0x38b   : > { %v2062_v35 = vadd.f32 0.2548296, %v1998_v49  ;;  %v1807_v20 = vadd.f32 1.4214138, %v1743_v27  ;;  %v2763_v30 = vadd.f32 1.0, %v2699_v19  ;;  %3890 = vpow2.f32 %v2379_v50 }
 0x38c   : > { %v1680_v34 = vadd.f32 -1.4531521, %v1616_v29  ;;  %v1427_v14 = vmul.f32 0.3275911, %v1363_v43  ;;  %v2764_v48 = vadd.f32 1.0, %v2700_v9  ;;  %v2258_v7 = vmul.f32 %v2194_v23, %v1362_v17 }
 0x38d   : > { %v3883_v46 = vpop.eup %3882  ;;  %v2126_v55 = vmul.f32 %v6568_v54, %v2062_v35  ;;  %v1871_v21 = vmul.f32 %v6600_v18, %v1807_v20  ;;  %v2701_v32 = vsel %vm2573_vm8, %v2637_v59, %v2509_v33  ;;  %3892 = vpow2.f32 %v2381_v28 }
 0x38e   : > { %v6633_v13 = vpop.eup %3884  ;;  %v1744_v49 = vmul.f32 %v6616_v47, %v1680_v34  ;;  %v1491_v10 = vadd.f32 1.0, %v1427_v14  ;;  %v6640_v29 = vmul.f32 0.70710677, %v6629_v24  ;;  %v6643_v9 = vmul.f32 %v2763_v30, %v6466_v60 }
 0x38f   : > { %v2446_v19 = vmul.f32 %v3883_v46, %v2126_v55  ;;  %v1935_v27 = vadd.f32 -0.28449672, %v1871_v21  ;;  %v1617_v50 = vmul.f32 1.0614054, %v6633_v13  ;;  %v3887_v54 = vpop.eup %3886  ;;  %v2195_v23 = vsub.f32 0.0, %v1363_v43 }
 0x390   : > { %v1808_v17 = vadd.f32 1.4214138, %v1744_v49  ;;  %3894 = vrcp.f32 %v1491_v10  ;;  %vm2574_vm9 = vcmp.lt.f32.partialorder %v6502_v25, 0.0  ;;  %v2383_v28 = vmul.f32 1.442695, %v2258_v7  ;;  %v3374_v49 = vpop.f32.mrb[0].mxu1 }
 0x391   : > { %v1999_v8 = vmul.f32 %v6600_v18, %v1935_v27  ;;  %v1681_v33 = vadd.f32 -1.4531521, %v1617_v50  ;;  %v6648_v59 = vand.u32 2147483647, %v6640_v29  ;;  %v2765_v35 = vadd.f32 1.0, %v2701_v32 }
 0x392   : > { %v2510_v20 = vsub.f32 1.0, %v2446_v19  ;;  %v1872_v26 = vmul.f32 %v6616_v47, %v1808_v17  ;;  %v2856_v60 = vpack.c.bf16 %v6268_v61, %v6198_v63  ;;  %v6654_v30 = vmul.f32 %v2764_v48, %v6495_v0 }
 0x393   : > { %v2063_v34 = vadd.f32 0.2548296, %v1999_v8  ;;  %v1745_v14 = vmul.f32 %v6633_v13, %v1681_v33  ;;  %v1428_v46 = vmul.f32 0.3275911, %v6648_v59  ;;  %vm2575_vm10 = vcmp.lt.f32.partialorder %v6528_v31, 0.0 }
 0x394   : > { %v6658_v55 = vpop.eup %3888  ;;  %v1936_v21 = vadd.f32 -0.28449672, %v1872_v26  ;;  %v2259_v7 = vmul.f32 %v2195_v23, %v1363_v43  ;;  %3108 = vmatprep.mubr.bf16.mxu1 %v2856_v60  ;;  %v2855_v32 = vpack.c.bf16 %v6247_v42, %v6160_v39  ;;  %v2858_v63 = vpack.c.bf16 %v6324_v15, %v6302_v57  ;;  %v3375_v39 = vpop.f32.mrb[1].mxu1 }
 0x395   : > { %v2127_v61 = vmul.f32 %v6600_v18, %v2063_v34  ;;  %v1809_v0 = vadd.f32 1.4214138, %v1745_v14  ;;  %v1618_v48 = vmul.f32 1.0614054, %v6658_v55  ;;  %3896 = vpow2.f32 %v2383_v28  ;;  %v3891_v10 = vpop.eup %3890  ;;  %v3377_v17 = vpop.f32.mrb[2].mxu1 }
 0x396   : > { %v6668_v19 = vmul.f32 %v2765_v35, %v6536_v38  ;;  %v2638_v27 = vsub.f32 0.0, %v2510_v20  ;;  %v2000_v43 = vmul.f32 %v6616_v47, %v1936_v21  ;;  %v1492_v50 = vadd.f32 1.0, %v1428_v46  ;;  %3109 = vmatmul.mubr.bf16.gmra.mrb[36].mxu1 %v2855_v32  ;;  %v3378_v28 = vpop.f32.mrb[3].mxu1 }
 0x397   : > { %v2447_v42 = vmul.f32 %v3887_v54, %v2127_v61  ;;  %v1873_v57 = vmul.f32 %v6633_v13, %v1809_v0  ;;  %v1682_v15 = vadd.f32 -1.4531521, %v1618_v48  ;;  %3116 = vmatprep.mubr.bf16.mxu1 %v2858_v63  ;;  %v2857_v18 = vpack.c.bf16 %v6316_v3, %v6271_v62  ;;  %v3893_v23 = vpop.eup %3892  ;;  %v3380_v61 = vpop.f32.mrb[4].mxu1 }
 0x398   : > { %v2064_v8 = vadd.f32 0.2548296, %v2000_v43  ;;  %v2385_v33 = vmul.f32 1.442695, %v2259_v7  ;;  %3898 = vrcp.f32 %v1492_v50  ;;  %v2196_v38 = vsub.f32 0.0, %v6648_v59  ;;  %v3381_v43 = vpop.f32.mrb[5].mxu1 }
 0x399   : > { %v2511_v35 = vsub.f32 1.0, %v2447_v42  ;;  %vm2576_vm11 = vcmp.lt.f32.partialorder %v6548_v36, 0.0  ;;  %v1937_v26 = vadd.f32 -0.28449672, %v1873_v57  ;;  %v1746_v54 = vmul.f32 %v6658_v55, %v1682_v15 }
 0x39a   : > { %v2860_v60 = vpack.c.bf16 %v6478_v44, %v6392_v53  ;;  %v6679_v34 = vpop.eup %3894  ;;  %v2702_v62 = vsel %vm2574_vm9, %v2638_v27, %v2510_v20  ;;  %v2128_v3 = vmul.f32 %v6616_v47, %v2064_v8  ;;  %v2859_v14 = vpack.c.bf16 %v6462_v41, %v6389_v6  ;;  %v6699_v6 = vld [vmem:[%s6873_s6] ss:$0 sm:$0xff]  ;;  %v3383_v8 = vpop.f32.mrb[6].mxu1 }
 0x39b   : > { %v2862_v46 = vpack.c.bf16 %v6564_v45, %v6531_v56  ;;  %v2639_v21 = vsub.f32 0.0, %v2511_v35  ;;  %v2001_v7 = vmul.f32 %v6633_v13, %v1937_v26  ;;  %v1810_v32 = vadd.f32 1.4214138, %v1746_v54 }
 0x39c   : > { %v1619_v63 = vmul.f32 1.0614054, %v6679_v34  ;;  %v2448_v53 = vmul.f32 %v3891_v10, %v2128_v3  ;;  %v2861_v44 = vpack.c.bf16 %v6539_v1, %v6505_v5  ;;  %v2864_v25 = vpack.c.bf16 %v6654_v30, %v6608_v40 }
 0x39d   : > { %v2863_v47 = vpack.c.bf16 %v6643_v9, %v6571_v51  ;;  %v2703_v41 = vsel %vm2575_vm10, %v2639_v21, %v2511_v35  ;;  %v2065_v56 = vadd.f32 0.2548296, %v2001_v7  ;;  %v1874_v45 = vmul.f32 %v6658_v55, %v1810_v32 }
 0x39e   : > { %v1683_v20 = vadd.f32 -1.4531521, %v1619_v63  ;;  %v2767_v0 = vadd.f32 1.0, %v2703_v41  ;;  %v2512_v48 = vsub.f32 1.0, %v2448_v53  ;;  %3117 = vmatmul.mubr.bf16.gmra.mrb[40].mxu1 %v2857_v18  ;;  %v3376_v10 = vadd.f32 %v3375_v39, %v3374_v49  ;;  %v3384_v39 = vpop.f32.mrb[7].mxu1 }
 0x39f   : > { %v3379_v27 = vadd.f32 %v3378_v28, %v3377_v17  ;;  %v3897_v50 = vpop.eup %3896  ;;  %v2129_v42 = vmul.f32 %v6633_v13, %v2065_v56  ;;  %v1938_v57 = vadd.f32 -0.28449672, %v1874_v45  ;;  %3124 = vmatprep.mubr.bf16.mxu1 %v2860_v60  ;;  %v3382_v31 = vadd.f32 %v3381_v43, %v3380_v61 }
 0x3a0   : > { %v1747_v15 = vmul.f32 %v6679_v34, %v1683_v20  ;;  %v6707_v35 = vmul.f32 %v2767_v0, %v6566_v16  ;;  %v2640_v26 = vsub.f32 0.0, %v2512_v48  ;;  %v3039_v54 = vadd.f32 %v3376_v10, %v6699_v6 }
 0x3a1   : > { %v3042_v49 = vadd.f32 %v3379_v27, %v6699_v6  ;;  %v2766_v18 = vadd.f32 1.0, %v2702_v62  ;;  %v2002_v17 = vmul.f32 %v6658_v55, %v1938_v57  ;;  %v3047_v28 = vadd.f32 %v3382_v31, %v6699_v6 }
 0x3a2   : > { %v1811_v13 = vadd.f32 1.4214138, %v1747_v15  ;;  %v6713_v3 = vpop.eup %3898  ;;  %v2704_v60 = vsel %vm2576_vm11, %v2640_v26, %v2512_v48  ;;  %3900 = vpow2.f32 %v2385_v33  ;;  %v2865_v16 = vpack.c.bf16 %v6707_v35, %v6668_v19  ;;  %3165 = vst [vmem:[%s6721_s22] sm:$0xff] %v3039_v54 }
 0x3a3   : > { %3166 = vst [vmem:[%s6721_s22 + $0x8] sm:$0xff] %v3042_v49  ;;  %v3385_v62 = vadd.f32 %v3384_v39, %v3383_v8  ;;  %v2768_v21 = vadd.f32 1.0, %v2704_v60  ;;  %v2449_v7 = vmul.f32 %v3893_v23, %v2129_v42  ;;  %v2260_v36 = vmul.f32 %v2196_v38, %v6648_v59  ;;  %3167 = vst [vmem:[%s6721_s22 + $0x10] sm:$0xff] %v3047_v28  ;;  %v3386_v43 = vpop.f32.mrb[8].mxu1 }
 0x3a4   : > { %v1875_v32 = vmul.f32 %v6679_v34, %v1811_v13  ;;  %v2066_v33 = vadd.f32 0.2548296, %v2002_v17  ;;  %v1620_v63 = vmul.f32 1.0614054, %v6713_v3  ;;  %v2830_v41 = vmul.f32 %v2766_v18, %v6553_v11  ;;  %v3387_v42 = vpop.f32.mrb[9].mxu1 }
 0x3a5   : > { %v3050_v53 = vadd.f32 %v3385_v62, %v6699_v6  ;;  %v2832_v56 = vmul.f32 %v2768_v21, %v6590_v2  ;;  %v2513_v61 = vsub.f32 1.0, %v2449_v7  ;;  %v2387_v0 = vmul.f32 1.442695, %v2260_v36 }
 0x3a6   : > { %v1939_v45 = vadd.f32 -0.28449672, %v1875_v32  ;;  %v1684_v20 = vadd.f32 -1.4531521, %v1620_v63  ;;  %3125 = vmatmul.mubr.bf16.gmra.mrb[44].mxu1 %v2859_v14  ;;  %v2130_v38 = vmul.f32 %v6658_v55, %v2066_v33  ;;  %v3388_v31 = vadd.f32 %v3387_v42, %v3386_v43 }
 0x3a7   : > { %3168 = vst [vmem:[%s6721_s22 + $0x18] sm:$0xff] %v3050_v53  ;;  %3132 = vmatprep.mubr.bf16.mxu1 %v2862_v46  ;;  %v2866_v59 = vpack.c.bf16 %v2832_v56, %v2830_v41  ;;  %v2641_v11 = vsub.f32 0.0, %v2513_v61  ;;  %3902 = vpow2.f32 %v2387_v0  ;;  %v3389_v46 = vpop.f32.mrb[10].mxu1  ;;  %vm2577_vm12 = vcmp.lt.f32.partialorder %v6576_v22, 0.0 }
 0x3a8   : > { %v2003_v23 = vmul.f32 %v6679_v34, %v1939_v45  ;;  %v1748_v48 = vmul.f32 %v6713_v3, %v1684_v20  ;;  %v2450_v57 = vmul.f32 %v3897_v50, %v2130_v38  ;;  %v3390_v26 = vpop.f32.mrb[11].mxu1  ;;  %vm2579_vm13 = vcmp.lt.f32.partialorder %v6619_v37, 0.0 }
 0x3a9   : > { %v3391_v54 = vadd.f32 %v3390_v26, %v3389_v46  ;;  %v2705_v49 = vsel %vm2577_vm12, %v2641_v11, %v2513_v61  ;;  %v1233_v1 = vmul.f32 0.5, %v6559_v58  ;;  %v1235_v60 = vmul.f32 0.5, %v6605_v12 }
 0x3aa   : > { %v2067_v10 = vadd.f32 0.2548296, %v2003_v23  ;;  %v1812_v27 = vadd.f32 1.4214138, %v1748_v48  ;;  %v2514_v39 = vsub.f32 1.0, %v2450_v57  ;;  %v2769_v13 = vadd.f32 1.0, %v2705_v49 }
 0x3ab   : > { %v3058_v22 = vadd.f32 %v3391_v54, %v6699_v6  ;;  %vm2578_vm14 = vcmp.lt.f32.partialorder %v6596_v52, 0.0  ;;  %vm2580_vm15 = vcmp.lt.f32.partialorder %v6640_v29, 0.0  ;;  %v1236_v63 = vmul.f32 0.5, %v6629_v24 }
 0x3ac   : > { %v2131_v2 = vmul.f32 %v6679_v34, %v2067_v10  ;;  %v3901_v14 = vpop.eup %3900  ;;  %v1876_v15 = vmul.f32 %v6713_v3, %v1812_v27  ;;  %v3055_v34 = vadd.f32 %v3388_v31, %v6699_v6  ;;  %v2642_v28 = vsub.f32 0.0, %v2514_v39 }
 0x3ad   : > { %3170 = vst [vmem:[%s6721_s22 + $0x28] sm:$0xff] %v3058_v22  ;;  %v2833_v62 = vmul.f32 %v2769_v13, %v1233_v1 }
 0x3ae   : > { %v2451_v8 = vmul.f32 %v3901_v14, %v2131_v2  ;;  %v1940_v55 = vadd.f32 -0.28449672, %v1876_v15  ;;  %3133 = vmatmul.mubr.bf16.gmra.mrb[48].mxu1 %v2861_v44  ;;  %3169 = vst [vmem:[%s6721_s22 + $0x20] sm:$0xff] %v3055_v34  ;;  %v2706_v37 = vsel %vm2578_vm14, %v2642_v28, %v2514_v39 }
 0x3af   : > { %3140 = vmatprep.mubr.bf16.mxu1 %v2864_v25  ;;  %v2770_v33 = vadd.f32 1.0, %v2706_v37 }
 0x3b0   : > { %v2515_v50 = vsub.f32 1.0, %v2451_v8  ;;  %v2004_v18 = vmul.f32 %v6713_v3, %v1940_v55 }
 0x3b1   : > { %v3903_v25 = vpop.eup %3902 }
 0x3b2   : > { %v2643_v17 = vsub.f32 0.0, %v2515_v50  ;;  %v2068_v5 = vadd.f32 0.2548296, %v2004_v18 }
 0x3b4   : > { %v2707_v44 = vsel %vm2579_vm13, %v2643_v17, %v2515_v50  ;;  %v2132_v30 = vmul.f32 %v6713_v3, %v2068_v5  ;;  %v1234_v3 = vmul.f32 0.5, %v6587_v4 }
 0x3b5   : > { %v2771_v40 = vadd.f32 1.0, %v2707_v44 }
 0x3b6   : > { %v2452_v7 = vmul.f32 %v3903_v25, %v2132_v30  ;;  %3141 = vmatmul.mubr.bf16.gmra.mrb[52].mxu1 %v2863_v47  ;;  %v2834_v51 = vmul.f32 %v2770_v33, %v1234_v3 }
 0x3b7   : > { %v2835_v21 = vmul.f32 %v2771_v40, %v1235_v60  ;;  %3148 = vmatprep.mubr.bf16.mxu1 %v2866_v59 }
 0x3b8   : > { %v2516_v58 = vsub.f32 1.0, %v2452_v7 }
 0x3b9   : > { %v2867_v32 = vpack.c.bf16 %v2835_v21, %v2833_v62 }
 0x3ba   : > { %v2644_v36 = vsub.f32 0.0, %v2516_v58 }
 0x3bc   : > { %v2708_v12 = vsel %vm2580_vm15, %v2644_v36, %v2516_v58 }
 0x3bd   : > { %v2772_v53 = vadd.f32 1.0, %v2708_v12 }
 0x3be   : > { %3149 = vmatmul.mubr.bf16.gmra.mrb[56].mxu1 %v2865_v16 }
 0x3bf   : > { %v2836_v52 = vmul.f32 %v2772_v53, %v1236_v63 }
 0x3c1   : > { %v2868_v9 = vpack.c.bf16 %v2836_v52, %v2834_v51 }
 0x3c3   : > { %3156 = vmatprep.mubr.bf16.mxu1 %v2868_v9 }
 0x3c6   : > { %3157 = vmatmul.mubr.bf16.gmra.mrb[60].mxu1 %v2867_v32 }
 0x3c8   : > { %v3392_v47 = vpop.f32.mrb[12].mxu1 }
 0x3c9   : > { %v3393_v41 = vpop.f32.mrb[13].mxu1 }
 0x3ca   : > { %v3394_v29 = vadd.f32 %v3393_v41, %v3392_v47  ;;  %v3395_v56 = vpop.f32.mrb[14].mxu1 }
 0x3cb   : > { %v3396_v4 = vpop.f32.mrb[15].mxu1 }
 0x3cc   : > { %v3063_v24 = vadd.f32 %v3394_v29, %v6699_v6  ;;  %v3397_v45 = vadd.f32 %v3396_v4, %v3395_v56 }
 0x3ce   : > { %3171 = vst [vmem:[%s6721_s22 + $0x30] sm:$0xff] %v3063_v24  ;;  %v3066_v19 = vadd.f32 %v3397_v45, %v6699_v6 }
 0x3d0   : > { %3172 = vst [vmem:[%s6721_s22 + $0x38] sm:$0xff] %v3066_v19 }
 0x3dc   : > { %v3398_v35 = vpop.f32.mrb[16].mxu1 }
 0x3dd   : > { %v3399_v16 = vpop.f32.mrb[17].mxu1 }
 0x3de   : > { %v3400_v20 = vadd.f32 %v3399_v16, %v3398_v35  ;;  %v3401_v61 = vpop.f32.mrb[18].mxu1 }
 0x3df   : > { %v3402_v23 = vpop.f32.mrb[19].mxu1 }
 0x3e0   : > { %v3071_v0 = vadd.f32 %v3400_v20, %v6699_v6  ;;  %v3403_v59 = vadd.f32 %v3402_v23, %v3401_v61 }
 0x3e2   : > { %3173 = vst [vmem:[%s6721_s22 + $0x40] sm:$0xff] %v3071_v0  ;;  %v3074_v38 = vadd.f32 %v3403_v59, %v6699_v6 }
 0x3e4   : > { %3174 = vst [vmem:[%s6721_s22 + $0x48] sm:$0xff] %v3074_v38 }
 0x405   : > { %v3404_v48 = vpop.f32.mrb[20].mxu1 }
 0x406   : > { %v3405_v10 = vpop.f32.mrb[21].mxu1 }
 0x407   : > { %v3406_v27 = vadd.f32 %v3405_v10, %v3404_v48  ;;  %v3407_v43 = vpop.f32.mrb[22].mxu1 }
 0x408   : > { %v3408_v11 = vpop.f32.mrb[23].mxu1 }
 0x409   : > { %v3079_v2 = vadd.f32 %v3406_v27, %v6699_v6  ;;  %v3409_v42 = vadd.f32 %v3408_v11, %v3407_v43 }
 0x40b   : > { %3175 = vst [vmem:[%s6721_s22 + $0x50] sm:$0xff] %v3079_v2  ;;  %v3082_v14 = vadd.f32 %v3409_v42, %v6699_v6 }
 0x40d   : > { %3176 = vst [vmem:[%s6721_s22 + $0x58] sm:$0xff] %v3082_v14 }
 0x41b   : > { %v3410_v57 = vpop.f32.mrb[24].mxu1 }
 0x41c   : > { %v3411_v15 = vpop.f32.mrb[25].mxu1 }
 0x41d   : > { %v3412_v31 = vadd.f32 %v3411_v15, %v3410_v57  ;;  %v3413_v46 = vpop.f32.mrb[26].mxu1 }
 0x41e   : > { %v3414_v8 = vpop.f32.mrb[27].mxu1 }
 0x41f   : > { %v3087_v26 = vadd.f32 %v3412_v31, %v6699_v6  ;;  %v3415_v55 = vadd.f32 %v3414_v8, %v3413_v46 }
 0x421   : > { %3177 = vst [vmem:[%s6721_s22 + $0x60] sm:$0xff] %v3087_v26  ;;  %v3090_v34 = vadd.f32 %v3415_v55, %v6699_v6 }
 0x423   : > { %3178 = vst [vmem:[%s6721_s22 + $0x68] sm:$0xff] %v3090_v34 }
 0x440   : > { %v3416_v54 = vpop.f32.mrb[28].mxu1 }
 0x441   : > { %v3417_v49 = vpop.f32.mrb[29].mxu1 }
 0x442   : > { %v3418_v50 = vadd.f32 %v3417_v49, %v3416_v54  ;;  %v3419_v39 = vpop.f32.mrb[30].mxu1 }
 0x443   : > { %v3420_v18 = vpop.f32.mrb[31].mxu1 }
 0x444   : > { %v3095_v22 = vadd.f32 %v3418_v50, %v6699_v6  ;;  %v3421_v17 = vadd.f32 %v3420_v18, %v3419_v39 }
 0x446   : > { %3179 = vst [vmem:[%s6721_s22 + $0x70] sm:$0xff] %v3095_v22  ;;  %v3098_v13 = vadd.f32 %v3421_v17, %v6699_v6 }
 0x448   : > { %3180 = vst [vmem:[%s6721_s22 + $0x78] sm:$0xff] %v3098_v13 }
 0x457   : > { %v3422_v5 = vpop.f32.mrb[32].mxu1 }
 0x458   : > { %v3423_v1 = vpop.f32.mrb[33].mxu1 }
 0x459   : > { %v3424_v44 = vadd.f32 %v3423_v1, %v3422_v5  ;;  %v3425_v28 = vpop.f32.mrb[34].mxu1 }
 0x45a   : > { %v3426_v60 = vpop.f32.mrb[35].mxu1 }
 0x45b   : > { %v3103_v40 = vadd.f32 %v3424_v44, %v6699_v6  ;;  %v3427_v30 = vadd.f32 %v3426_v60, %v3425_v28 }
 0x45d   : > { %3181 = vst [vmem:[%s6721_s22 + $0x80] sm:$0xff] %v3103_v40  ;;  %v3106_v25 = vadd.f32 %v3427_v30, %v6699_v6 }
 0x45f   : > { %3182 = vst [vmem:[%s6721_s22 + $0x88] sm:$0xff] %v3106_v25 }
 0x469   : > { %v3428_v62 = vpop.f32.mrb[36].mxu1 }
 0x46a   : > { %v3429_v21 = vpop.f32.mrb[37].mxu1 }
 0x46b   : > { %v3430_v7 = vadd.f32 %v3429_v21, %v3428_v62  ;;  %v3431_v37 = vpop.f32.mrb[38].mxu1 }
 0x46c   : > { %v3432_v58 = vpop.f32.mrb[39].mxu1 }
 0x46d   : > { %v3111_v32 = vadd.f32 %v3430_v7, %v6699_v6  ;;  %v3433_v36 = vadd.f32 %v3432_v58, %v3431_v37 }
 0x46f   : > { %3183 = vst [vmem:[%s6721_s22 + $0x90] sm:$0xff] %v3111_v32  ;;  %v3114_v33 = vadd.f32 %v3433_v36, %v6699_v6 }
 0x471   : > { %3184 = vst [vmem:[%s6721_s22 + $0x98] sm:$0xff] %v3114_v33  ;;  %v3434_v12 = vpop.f32.mrb[40].mxu1 }
 0x472   : > { %v3435_v3 = vpop.f32.mrb[41].mxu1 }
 0x473   : > { %v3436_v63 = vadd.f32 %v3435_v3, %v3434_v12  ;;  %v3437_v53 = vpop.f32.mrb[42].mxu1 }
 0x474   : > { %v3438_v51 = vpop.f32.mrb[43].mxu1 }
 0x475   : > { %v3119_v52 = vadd.f32 %v3436_v63, %v6699_v6  ;;  %v3439_v9 = vadd.f32 %v3438_v51, %v3437_v53 }
 0x477   : > { %3185 = vst [vmem:[%s6721_s22 + $0xa0] sm:$0xff] %v3119_v52  ;;  %v3122_v47 = vadd.f32 %v3439_v9, %v6699_v6 }
 0x479   : > { %3186 = vst [vmem:[%s6721_s22 + $0xa8] sm:$0xff] %v3122_v47  ;;  %v3440_v41 = vpop.f32.mrb[44].mxu1 }
 0x47a   : > { %v3441_v29 = vpop.f32.mrb[45].mxu1 }
 0x47b   : > { %v3442_v56 = vadd.f32 %v3441_v29, %v3440_v41  ;;  %v3443_v4 = vpop.f32.mrb[46].mxu1 }
 0x47c   : > { %v3444_v24 = vpop.f32.mrb[47].mxu1 }
 0x47d   : > { %v3127_v45 = vadd.f32 %v3442_v56, %v6699_v6  ;;  %v3445_v19 = vadd.f32 %v3444_v24, %v3443_v4 }
 0x47f   : > { %3187 = vst [vmem:[%s6721_s22 + $0xb0] sm:$0xff] %v3127_v45  ;;  %v3130_v35 = vadd.f32 %v3445_v19, %v6699_v6 }
 0x481   : > { %3188 = vst [vmem:[%s6721_s22 + $0xb8] sm:$0xff] %v3130_v35  ;;  %v3446_v16 = vpop.f32.mrb[48].mxu1 }
 0x482   : > { %v3447_v20 = vpop.f32.mrb[49].mxu1 }
 0x483   : > { %v3448_v61 = vadd.f32 %v3447_v20, %v3446_v16  ;;  %v3449_v23 = vpop.f32.mrb[50].mxu1 }
 0x484   : > { %v3450_v0 = vpop.f32.mrb[51].mxu1 }
 0x485   : > { %v3135_v59 = vadd.f32 %v3448_v61, %v6699_v6  ;;  %v3451_v38 = vadd.f32 %v3450_v0, %v3449_v23 }
 0x487   : > { %3189 = vst [vmem:[%s6721_s22 + $0xc0] sm:$0xff] %v3135_v59  ;;  %v3138_v48 = vadd.f32 %v3451_v38, %v6699_v6 }
 0x489   : > { %3190 = vst [vmem:[%s6721_s22 + $0xc8] sm:$0xff] %v3138_v48  ;;  %v3452_v10 = vpop.f32.mrb[52].mxu1 }
 0x48a   : > { %v3453_v27 = vpop.f32.mrb[53].mxu1 }
 0x48b   : > { %v3454_v43 = vadd.f32 %v3453_v27, %v3452_v10  ;;  %v3455_v11 = vpop.f32.mrb[54].mxu1 }
 0x48c   : > { %v3456_v2 = vpop.f32.mrb[55].mxu1 }
 0x48d   : > { %v3143_v42 = vadd.f32 %v3454_v43, %v6699_v6  ;;  %v3457_v14 = vadd.f32 %v3456_v2, %v3455_v11 }
 0x48f   : > { %3191 = vst [vmem:[%s6721_s22 + $0xd0] sm:$0xff] %v3143_v42  ;;  %v3146_v57 = vadd.f32 %v3457_v14, %v6699_v6 }
 0x491   : > { %3192 = vst [vmem:[%s6721_s22 + $0xd8] sm:$0xff] %v3146_v57  ;;  %v3458_v15 = vpop.f32.mrb[56].mxu1 }
 0x492   : > { %v3459_v31 = vpop.f32.mrb[57].mxu1 }
 0x493   : > { %v3460_v46 = vadd.f32 %v3459_v31, %v3458_v15  ;;  %v3461_v8 = vpop.f32.mrb[58].mxu1 }
 0x494   : > { %v3462_v26 = vpop.f32.mrb[59].mxu1 }
 0x495   : > { %v3151_v55 = vadd.f32 %v3460_v46, %v6699_v6  ;;  %v3463_v34 = vadd.f32 %v3462_v26, %v3461_v8 }
 0x497   : > { %3193 = vst [vmem:[%s6721_s22 + $0xe0] sm:$0xff] %v3151_v55  ;;  %v3154_v54 = vadd.f32 %v3463_v34, %v6699_v6 }
 0x499   : > { %3194 = vst [vmem:[%s6721_s22 + $0xe8] sm:$0xff] %v3154_v54  ;;  %v3464_v49 = vpop.f32.mrb[60].mxu1 }
 0x49a   : > { %v3465_v50 = vpop.f32.mrb[61].mxu1 }
 0x49b   : > { %v3466_v39 = vadd.f32 %v3465_v50, %v3464_v49  ;;  %v3467_v18 = vpop.f32.mrb[62].mxu1 }
 0x49c   : > { %v3468_v22 = vpop.f32.mrb[63].mxu1 }
 0x49d   : > { %v3159_v17 = vadd.f32 %v3466_v39, %v6699_v6  ;;  %v3469_v13 = vadd.f32 %v3468_v22, %v3467_v18 }
 0x49f   : > { %3195 = vst [vmem:[%s6721_s22 + $0xf0] sm:$0xff] %v3159_v17  ;;  %v3162_v5 = vadd.f32 %v3469_v13, %v6699_v6 }
 0x4a1   : > { %3196 = vst [vmem:[%s6721_s22 + $0xf8] sm:$0xff] %v3162_v5 }
 0x4a2   : > { %4003 = shalt.err (!%p4000_p1)
}
 0x4a3   : > { %s4004_s18 = scalar_lea.hbm %s6818_s30, 4096  ;;  %s4008_s22 = scalar_lea.hbm %s6874_s7, 8192 }
 0x4a4   : > { %p4005_p13 = scmp.ne.s32.totalorder %s6818_s30, %s4004_s18  ;;  %p4009_p4 = scmp.lt.u32.totalorder %s6818_s30, %s6874_s7 }
 0x4a5   : > { %p4010_p7 = scmp.lt.u32.totalorder %s4008_s22, %s4004_s18  ;;  %p4012_p11 = scmp.lt.u32.totalorder %s4004_s18, %s6818_s30 }
 0x4a6   : > { %p4006_p6 = pnand %p4005_p13, %p7065_p0 }
 0x4a7   : > { %p4011_p8 = por %p4010_p7, %p4009_p4 }
 0x4a8   : > { %p4007_p10 = pneg %p4006_p6 }
 0x4a9   : > { %p4013_p2 = por %p4012_p11, %p4011_p8 }
 0x4ab   : > { %p4014_p3 = pnand %p4013_p2, %p4007_p10 }
 0x4ad   : > { %4017 = shalt.err (!%p4014_p3)
}
 0x4ae   : > { %s4071_s17 = smov 128   ;;  %s4072_s9 = smov 8  }
 0x4af   : > { %3480 = dma.vmem_to_hbm [thread:$0]  (%p7065_p0), %s6820_s13, 4096, %s6818_s30, %s3198_s28, %s4071_s17, %s4071_s17, %s4072_s9  }
 0x4b0 PF: > { %s3226_s29 = sand.u32 1, %s4048_s24   ;;  %p7066_p5 = scmp.ne.s32.totalorder %s6896_s8, 0 }
 0x4b1   : > { %p7067_p9 = scmp.ge.s32.totalorder %s4060_s27, 2  ;;  %s3227_s10 = scalar_lea.sflag [#allocation4], %s3226_s29 }
 0x4b3   : > { %p3494_p12 = pnand %p7067_p9, %p7066_p5 }
 0x4b5   : > { %4043 = dma.done.wait (!%p3494_p12), %s3227_s10, 4096  }
 0x4b6   : > { %4045 = vsyncadd (!%p3494_p12), %s3227_s10, 4294963200  ;;  %p21_p1 = scmp.ge.s32.totalorder %s4226_s16, 4   ;;  %s7068_s24 = smov %s4052_s25 }
 0x4b7   : > { %s7069_s25 = smov %s4056_s26  ;;  %s7070_s26 = smov %s4235_s19 }
 0x4b8   : > { %s7071_s27 = smov %s4226_s16  ;;  %23 = sbr.rel (!%p21_p1) target bundleno = 6 (0x6), region = 101 }
 0x4bf   :  { %3232 = vsyncpa [#allocation3], 1 }
 0x4c0   :  { %3234 = vsyncpa [#allocation3 + $0x1], 1 }
 0x4c1   :  { %3235 = vsyncpa [#allocation6], 1 }
 0x4c2   :  { %3236 = vsyncpa [#allocation4], 1 }
 0x4c3   :  { %3238 = vsyncpa [#allocation4 + $0x1], 1 }

// kernel: tpu_custom_call.1
= control target key start
LH: loop header
LB: loop body
LE: loop exit
PB: predicated region body
PF: predicated region fallthrough
CT: control target
= control target key end

     0   :  { %12 = vsyncpa [#allocation3], 0  ;;  %s6867_s0 = inlined_call_operand.hbm [shape: f32[512,128], index: 0, kind: input, shape index: {}]   ;;  %s6868_s1 = inlined_call_operand.vmem [shape: f32[1,128], index: 1, kind: input, shape index: {}]   ;;  %s6869_s2 = inlined_call_operand.vmem [shape: f32[1,128], index: 2, kind: input, shape index: {}]   ;;  %s6870_s3 = inlined_call_operand.hbm [shape: bf16[128,256], index: 3, kind: input, shape index: {}]   ;;  %s6871_s4 = inlined_call_operand.vmem [shape: f32[1,256], index: 4, kind: input, shape index: {}]   ;;  %s6872_s5 = inlined_call_operand.hbm [shape: bf16[256,128], index: 5, kind: input, shape index: {}]   ;;  %s6873_s6 = inlined_call_operand.vmem [shape: f32[1,128], index: 6, kind: input, shape index: {}]   ;;  %s6874_s7 = inlined_call_operand.hbm [shape: f32[512,128], index: 7, kind: output, shape index: {}]  }
   0x1   :  { %14 = vsyncpa [#allocation3 + $0x1], 0 }
   0x2   :  { %15 = vsyncpa [#allocation6], 0 }
   0x3   :  { %16 = vsyncpa [#allocation4], 0 }
   0x4   :  { %18 = vsyncpa [#allocation4 + $0x1], 0  ;;  %s4113_s24 = smov 0   ;;  %s4115_s25 = smov 0  }
   0x5   :  { %s4117_s26 = smov 0   ;;  %s4119_s27 = smov 0  }
   0x6 LB: > { %s4134_s28 = sadd.s32 4294967295, %s4060_s27   ;;  %s3303_s29 = sadd.s32 4294967294, %s4060_s27   ;;  %s4060_s27 = sphi %s4119_s27, %s7071_s27   ;;  %s4056_s26 = sphi %s4117_s26, %s7070_s26   ;;  %s4052_s25 = sphi %s4115_s25, %s7069_s25   ;;  %s4048_s24 = sphi %s4113_s24, %s7068_s24  }
   0x7   : > { %p44_p0 = scmp.ne.s32.totalorder %s4052_s25, %s4048_s24  ;;  %p6875_p1 = scmp.eq.s32.totalorder %s4134_s28, 0 }
   0x8   : > { %p200_p3 = scmp.eq.s32.totalorder %s3303_s29, 1  ;;  %p3304_p5 = scmp.ge.s32.totalorder %s4060_s27, 1 }
   0x9   : > { %p4143_p4 = por %p6875_p1, %p44_p0  ;;  %p207_p7 = scmp.lt.s32.totalorder %s4060_s27, 3 }
   0xa   : > { %p4148_p6 = por %p200_p3, %p44_p0  ;;  %s4062_s10 = smov [#allocation5]  }
   0xb   : > { %s6895_s30 = scalar_select %p4143_p4, 1, 0 }
   0xc   : > { %s6896_s8 = scalar_select %p4148_p6, 1, 0 }
   0xd   : > { %p4153_p8 = pnand %p3304_p5, %p207_p7  ;;  %s225_s11 = sshll.u32 %s4062_s10, 4  ;;  %s4157_s11 = int_to_ptr.vmem [resolvable:$true] %s225_s11 }
   0xe   : > { %s4063_s13 = smov [#allocation7]   ;;  %s3904_s17 = scalar_lea.hbm %s6870_s3, 2048 }
   0xf   : > { %p3482_p9 = pneg %p4153_p8  ;;  %s241_s14 = sshll.u32 %s4063_s13, 4  ;;  %s4168_s14 = int_to_ptr.vmem [resolvable:$true] %s241_s14 }
  0x10   : > { %p3905_p12 = scmp.ne.s32.totalorder %s6870_s3, %s3904_s17  ;;  %p3911_p5 = scmp.lt.u32.totalorder %s3904_s17, %s6870_s3 }
  0x11   : > { %p4164_p11 = pnand %p3482_p9, %p6875_p1 }
  0x13   : > { %p3906_p13 = pneg %p4164_p11 }
  0x15   : > { %p3907_p0 = pnand %p3906_p13, %p3905_p12 }
  0x17   : > { %p3908_p3 = pneg %p3907_p0 }
  0x19   : > { %p3913_p7 = pnand %p3911_p5, %p3908_p3 }
  0x1b   : > { %3916 = shalt.err (!%p3913_p7)
}
  0x1c   : > { %s3917_s22 = scalar_lea.vmem %s4157_s11, 2048  ;;  %p3925_p2 = scmp.lt.s32.totalorder %s4157_s11, %s4157_s11 }
  0x1d   : > { %p3918_p9 = scmp.ne.s32.totalorder %s4157_s11, %s3917_s22  ;;  %p3926_p12 = scmp.lt.s32.totalorder %s3917_s22, %s3917_s22 }
  0x1f   : > { %p3920_p10 = pnand %p3918_p9, %p3906_p13  ;;  %p3927_p0 = por %p3926_p12, %p3925_p2 }
  0x21   : > { %p3921_p1 = pneg %p3920_p10 }
  0x23   : > { %p3928_p6 = pnand %p3927_p0, %p3921_p1 }
  0x25   : > { %3931 = shalt.err (!%p3928_p6)
}
  0x26   : > { %s6876_s23 = smov 128   ;;  %s4065_s29 = smov 8  }
  0x27   : > { %3485 = dma.hbm_to_vmem [thread:$0]  (!%p4164_p11), %s6870_s3, 2048, %s4157_s11, [#allocation6], %s6876_s23, %s6876_s23, %s4065_s29  }
  0x28   : > { %s3932_s17 = scalar_lea.hbm %s6872_s5, 2048 }
  0x29   : > { %p3933_p1 = scmp.ne.s32.totalorder %s6872_s5, %s3932_s17  ;;  %p3939_p10 = scmp.lt.u32.totalorder %s3932_s17, %s6872_s5 }
  0x2b   : > { %p3935_p2 = pnand %p3933_p1, %p3906_p13 }
  0x2d   : > { %p3936_p6 = pneg %p3935_p2 }
  0x2f   : > { %p3941_p3 = pnand %p3939_p10, %p3936_p6 }
  0x31   : > { %3944 = shalt.err (!%p3941_p3)
}
  0x32   : > { %s3945_s11 = scalar_lea.vmem %s4168_s14, 2048  ;;  %p3953_p12 = scmp.lt.s32.totalorder %s4168_s14, %s4168_s14 }
  0x33   : > { %p3946_p5 = scmp.ne.s32.totalorder %s4168_s14, %s3945_s11  ;;  %p3954_p0 = scmp.lt.s32.totalorder %s3945_s11, %s3945_s11 }
  0x35   : > { %p3948_p7 = pnand %p3946_p5, %p3906_p13  ;;  %p3955_p1 = por %p3954_p0, %p3953_p12 }
  0x37   : > { %p3949_p9 = pneg %p3948_p7 }
  0x39   : > { %p3956_p2 = pnand %p3955_p1, %p3949_p9 }
  0x3b   : > { %3959 = shalt.err (!%p3956_p2)
}
  0x3c   : > { %s4066_s22 = smov 64   ;;  %s4067_s10 = smov 4  }
  0x3d   : > { %3488 = dma.hbm_to_vmem [thread:$0]  (!%p4164_p11), %s6872_s5, 2048, %s4168_s14, [#allocation6], %s4066_s22, %s4066_s22, %s4067_s10  }
  0x3e   : > { %s4226_s16 = sadd.s32 1, %s4060_s27   ;;  %s31_s18 = sadd.s32 1, %s4056_s26 }
  0x3f   : > { %s28_s17 = ssub.s32 %s4060_s27, %s4226_s16  ;;  %p38_p6 = scmp.ne.s32.totalorder %s4056_s26, %s4052_s25 }
  0x40   : > { %p29_p13 = scmp.eq.s32.totalorder %s28_s17, 0  ;;  %p39_p10 = scmp.eq.s32.totalorder %s4060_s27, 0 }
  0x41   : > { %p6899_p5 = scmp.eq.s32.totalorder %s4134_s28, 1  ;;  %p3499_p9 = scmp.lt.s32.totalorder %s4060_s27, 2 }
  0x42   : > { %s4235_s19 = scalar_select %p29_p13, %s4056_s26, %s31_s18  }
  0x43   : > { %p40_p3 = por %p39_p10, %p38_p6  ;;  %p4239_p7 = por %p6899_p5, %p38_p6 }
  0x44   : > { %s258_s12 = sand.u32 1, %s4056_s26   ;;  %s3356_s14 = sshll.u32 %s4060_s27, 12 }
  0x45   : > { %s6900_s20 = scalar_select %p4239_p7, 1, 0 }
  0x46   : > { %s3308_s21 = sshll.u32 %s258_s12, 8  ;;  %s4249_s10 = scalar_lea.hbm %s6867_s0, %s3356_s14 }
  0x47   : > { %s262_s13 = scalar_lea.vmem [#allocation2], %s3308_s21  ;;  %p4253_p11 = pnand %p3499_p9, %p40_p3 }
  0x48   : > { %s269_s15 = sshll.u32 %s262_s13, 4  ;;  %s4257_s18 = scalar_lea.sflag [#allocation3], %s258_s12  ;;  %s4251_s15 = int_to_ptr.vmem [resolvable:$true] %s269_s15 }
  0x49   : > { %s3960_s23 = scalar_lea.hbm %s4249_s10, 4096  ;;  %p3962_p0 = pneg %p4253_p11 }
  0x4a   : > { %p3961_p12 = scmp.ne.s32.totalorder %s4249_s10, %s3960_s23  ;;  %s3965_s11 = scalar_lea.hbm %s6867_s0, 8192 }
  0x4b   : > { %p3966_p13 = scmp.lt.u32.totalorder %s4249_s10, %s6867_s0  ;;  %p3967_p6 = scmp.lt.u32.totalorder %s3965_s11, %s3960_s23 }
  0x4c   : > { %p3963_p1 = pnand %p3962_p0, %p3961_p12  ;;  %p3969_p3 = scmp.lt.u32.totalorder %s3960_s23, %s4249_s10 }
  0x4d   : > { %p3968_p10 = por %p3967_p6, %p3966_p13 }
  0x4e   : > { %p3964_p2 = pneg %p3963_p1 }
  0x4f   : > { %p3970_p5 = por %p3969_p3, %p3968_p10 }
  0x51   : > { %p3971_p9 = pnand %p3970_p5, %p3964_p2 }
  0x53   : > { %3974 = shalt.err (!%p3971_p9)
}
  0x54   : > { %s3975_s12 = scalar_lea.vmem %s4251_s15, 4096  ;;  %s4068_s21 = smov [#allocation2]  }
  0x55   : > { %p3976_p12 = scmp.ne.s32.totalorder %s4251_s15, %s3975_s12  ;;  %s3980_s14 = sshll.u32 %s4068_s21, 4  ;;  %s3981_s14 = int_to_ptr.vmem [resolvable:$false] %s3980_s14 }
  0x56   : > { %s3982_s22 = scalar_lea.vmem %s3981_s14, 8192  ;;  %p3983_p4 = scmp.lt.s32.totalorder %s4251_s15, %s3981_s14 }
  0x57   : > { %p3978_p1 = pnand %p3976_p12, %p3962_p0  ;;  %p3984_p13 = scmp.lt.s32.totalorder %s3982_s22, %s3975_s12 }
  0x59   : > { %p3979_p7 = pneg %p3978_p1  ;;  %p3985_p6 = por %p3984_p13, %p3983_p4 }
  0x5b   : > { %p3986_p10 = pnand %p3985_p6, %p3979_p7 }
  0x5d   : > { %3989 = shalt.err (!%p3986_p10)
}
  0x5e   : > { %s6902_s23 = smov 128   ;;  %281 = sbr.rel (%p4153_p8) target bundleno = 1200 (0x4b0), region = 48 }
  0x5f   : > { %3492 = dma.hbm_to_vmem [thread:$0]  (!%p4253_p11), %s4249_s10, 4096, %s4251_s15, %s4257_s18, %s6902_s23, %s6902_s23, %s4065_s29  }
  0x65   : > { %s4291_s11 = sand.u32 1, %s4052_s25   ;;  %p6903_p4 = scmp.ne.s32.totalorder %s6895_s30, 0 }
  0x66   : > { %s3312_s13 = sshll.u32 %s4291_s11, 8  ;;  %s284_s12 = scalar_lea.sflag [#allocation3], %s4291_s11 }
  0x67   : > { %s4297_s17 = scalar_lea.vmem [#allocation2], %s3312_s13 }
  0x68   : > { %4035 = dma.done.wait (%p6903_p4), %s284_s12, 4096  }
  0x69   : > { %4037 = vsyncadd (%p6903_p4), %s284_s12, 4294963200  ;;  %p6904_p7 = scmp.eq.s32.totalorder %s4134_s28, 0 }
  0x6b   : > { %4039 = dma.done.wait (%p6904_p7), [#allocation6], 4096   ;;  %p6905_p8 = pmov %p6904_p7 }
  0x6c   : > { %v4308_v0 = vld [vmem:[%s4297_s17] sm:$0xff]  ;;  %v4311_v1 = vld [vmem:[%s4297_s17 + $0x8] sm:$0xff]  ;;  %v4320_v4 = vld [vmem:[%s4297_s17 + $0x10] sm:$0xff]  ;;  %v4069_v41 = vmov 0   ;;  %s6721_s22 = scalar_lea.vmem [#allocation8], %s3312_s13  ;;  %s3357_s23 = sshll.u32 %s4134_s28, 12 }
  0x6d   : > { %4041 = vsyncadd (%p6905_p8), [#allocation6], 4294963200  ;;  %363 = vadd.xlane.f32.xlu0 %v4308_v0  ;;  %v460_v2 = vmul.f32 %v4308_v0, %v4308_v0  ;;  %v461_v3 = vmul.f32 %v4311_v1, %v4311_v1  ;;  %v4323_v5 = vld [vmem:[%s4297_s17 + $0x18] sm:$0xff]  ;;  %v462_v6 = vmul.f32 %v4320_v4, %v4320_v4  ;;  %v3544_v8 = vld [vmem:[#allocation5 + $0x4] ss:$8 sps:$4 sm:$0xff]   ;;  %1012 = vmatprep.mubr.bf16.mxu0 %v4069_v41  ;;  %s3211_s13 = sshll.u32 %s6721_s22, 4  ;;  %s6818_s30 = scalar_lea.hbm %s6874_s7, %s3357_s23  ;;  %s6820_s13 = int_to_ptr.vmem [resolvable:$true] %s3211_s13 }
  0x6e   : > { %v463_v7 = vmul.f32 %v4323_v5, %v4323_v5  ;;  %v4332_v9 = vld [vmem:[%s4297_s17 + $0x20] sm:$0xff]  ;;  %980 = vmatprep.subr.bf16.mxu0 %v3544_v8  ;;  %v4335_v11 = vld [vmem:[%s4297_s17 + $0x28] sm:$0xff]  ;;  %v3547_v12 = vld [vmem:[#allocation5 + $0x14] ss:$8 sps:$4 sm:$0xff]   ;;  %s3198_s28 = scalar_lea.sflag [#allocation4], %s4291_s11  ;;  %s3990_s9 = scalar_lea.vmem %s6820_s13, 4096 }
  0x6f   : > { %492 = vadd.xlane.f32.xlu1 %v460_v2  ;;  %v3546_v10 = vld [vmem:[#allocation5] ss:$8 sps:$4 sm:$0xff]   ;;  %v464_v13 = vmul.f32 %v4332_v9, %v4332_v9  ;;  %v3549_v14 = vld [vmem:[#allocation5 + $0x10] ss:$8 sps:$4 sm:$0xff]   ;;  %v465_v15 = vmul.f32 %v4335_v11, %v4335_v11  ;;  %v3550_v17 = vld [vmem:[#allocation5 + $0x24] ss:$8 sps:$4 sm:$0xff]   ;;  %p3991_p11 = scmp.ne.s32.totalorder %s6820_s13, %s3990_s9 }
  0x70   : > { %981 = vmatpush1.bf16.msra.mxu0 %v3546_v10  ;;  %v4344_v16 = vld [vmem:[%s4297_s17 + $0x30] sm:$0xff]  ;;  %v3552_v18 = vld [vmem:[#allocation5 + $0x20] ss:$8 sps:$4 sm:$0xff]   ;;  %v4347_v19 = vld [vmem:[%s4297_s17 + $0x38] sm:$0xff]  ;;  %p7065_p0 = scmp.ne.s32.totalorder %s6900_s20, 0  ;;  %s4070_s29 = smov [#allocation8]  }
  0x71   : > { %365 = vadd.xlane.f32.xlu0 %v4311_v1  ;;  %982 = vmatprep.subr.bf16.mxu0 %v3547_v12  ;;  %v3553_v20 = vld [vmem:[#allocation5 + $0x34] ss:$8 sps:$4 sm:$0xff]   ;;  %v466_v21 = vmul.f32 %v4344_v16, %v4344_v16  ;;  %v3555_v22 = vld [vmem:[#allocation5 + $0x30] ss:$8 sps:$4 sm:$0xff]   ;;  %v467_v23 = vmul.f32 %v4347_v19, %v4347_v19  ;;  %v3556_v24 = vld [vmem:[#allocation5 + $0x44] ss:$8 sps:$4 sm:$0xff]  }
  0x72   : > { %v3558_v25 = vld [vmem:[#allocation5 + $0x40] ss:$8 sps:$4 sm:$0xff]   ;;  %v3559_v29 = vld [vmem:[#allocation5 + $0x54] ss:$8 sps:$4 sm:$0xff]   ;;  %v3561_v30 = vld [vmem:[#allocation5 + $0x50] ss:$8 sps:$4 sm:$0xff]   ;;  %p3992_p2 = pnand %p3991_p11, %p7065_p0 }
  0x73   : > { %494 = vadd.xlane.f32.xlu1 %v461_v3  ;;  %v4356_v26 = vld [vmem:[%s4297_s17 + $0x40] sm:$0xff]  ;;  %v4359_v27 = vld [vmem:[%s4297_s17 + $0x48] sm:$0xff]  ;;  %v4368_v33 = vld [vmem:[%s4297_s17 + $0x50] sm:$0xff]  ;;  %s3994_s10 = sshll.u32 %s4070_s29, 4  ;;  %s3995_s10 = int_to_ptr.vmem [resolvable:$false] %s3994_s10 }
  0x74   : > { %983 = vmatpush1.bf16.msra.mxu0 %v3549_v14  ;;  %v468_v28 = vmul.f32 %v4356_v26, %v4356_v26  ;;  %v469_v31 = vmul.f32 %v4359_v27, %v4359_v27  ;;  %v3562_v32 = vld [vmem:[#allocation5 + $0x64] ss:$8 sps:$4 sm:$0xff]   ;;  %v3564_v34 = vld [vmem:[#allocation5 + $0x60] ss:$8 sps:$4 sm:$0xff]   ;;  %v4371_v35 = vld [vmem:[%s4297_s17 + $0x58] sm:$0xff]  ;;  %v470_v36 = vmul.f32 %v4368_v33, %v4368_v33  ;;  %p3993_p3 = pneg %p3992_p2  ;;  %s3996_s15 = scalar_lea.vmem %s3995_s10, 8192 }
  0x75   : > { %367 = vadd.xlane.f32.xlu0 %v4320_v4  ;;  %984 = vmatprep.subr.bf16.mxu0 %v3550_v17  ;;  %v3565_v37 = vld [vmem:[#allocation5 + $0x74] ss:$8 sps:$4 sm:$0xff]   ;;  %v3567_v38 = vld [vmem:[#allocation5 + $0x70] ss:$8 sps:$4 sm:$0xff]   ;;  %v471_v39 = vmul.f32 %v4371_v35, %v4371_v35  ;;  %v4380_v40 = vld [vmem:[%s4297_s17 + $0x60] sm:$0xff]  ;;  %p3997_p5 = scmp.lt.s32.totalorder %s6820_s13, %s3995_s10  ;;  %p3998_p9 = scmp.lt.s32.totalorder %s3996_s15, %s3990_s9 }
  0x76   : > { %v4384_v42 = vld [vmem:[%s4297_s17 + $0x68] sm:$0xff]  ;;  %v472_v43 = vmul.f32 %v4380_v40, %v4380_v40  ;;  %v4393_v45 = vld [vmem:[%s4297_s17 + $0x70] sm:$0xff]  ;;  %v4396_v46 = vld [vmem:[%s4297_s17 + $0x78] sm:$0xff] }
  0x77   : > { %369 = vadd.xlane.f32.xlu1 %v4323_v5  ;;  %v473_v44 = vmul.f32 %v4384_v42, %v4384_v42  ;;  %v474_v47 = vmul.f32 %v4393_v45, %v4393_v45  ;;  %v475_v48 = vmul.f32 %v4396_v46, %v4396_v46  ;;  %v4405_v49 = vld [vmem:[%s4297_s17 + $0x80] sm:$0xff]  ;;  %v4408_v50 = vld [vmem:[%s4297_s17 + $0x88] sm:$0xff]  ;;  %v4417_v53 = vld [vmem:[%s4297_s17 + $0x90] sm:$0xff]  ;;  %p3999_p12 = por %p3998_p9, %p3997_p5 }
  0x78   : > { %985 = vmatpush1.bf16.msra.mxu0 %v3552_v18  ;;  %v476_v51 = vmul.f32 %v4405_v49, %v4405_v49  ;;  %v477_v52 = vmul.f32 %v4408_v50, %v4408_v50  ;;  %v4420_v54 = vld [vmem:[%s4297_s17 + $0x98] sm:$0xff]  ;;  %v478_v55 = vmul.f32 %v4417_v53, %v4417_v53  ;;  %v4429_v57 = vld [vmem:[%s4297_s17 + $0xa0] sm:$0xff]  ;;  %v4432_v58 = vld [vmem:[%s4297_s17 + $0xa8] sm:$0xff] }
  0x79   : > { %496 = vadd.xlane.f32.xlu0 %v462_v6  ;;  %986 = vmatprep.subr.bf16.mxu0 %v3553_v20  ;;  %v479_v56 = vmul.f32 %v4420_v54, %v4420_v54  ;;  %v480_v59 = vmul.f32 %v4429_v57, %v4429_v57  ;;  %v481_v60 = vmul.f32 %v4432_v58, %v4432_v58  ;;  %v4441_v61 = vld [vmem:[%s4297_s17 + $0xb0] sm:$0xff]  ;;  %v4444_v62 = vld [vmem:[%s4297_s17 + $0xb8] sm:$0xff]  ;;  %v4453_v3 = vld [vmem:[%s4297_s17 + $0xc0] sm:$0xff]  ;;  %p4000_p1 = pnand %p3999_p12, %p3993_p3 }
  0x7a   : > { %v482_v63 = vmul.f32 %v4441_v61, %v4441_v61  ;;  %v483_v2 = vmul.f32 %v4444_v62, %v4444_v62  ;;  %v4456_v6 = vld [vmem:[%s4297_s17 + $0xc8] sm:$0xff]  ;;  %v4465_v10 = vld [vmem:[%s4297_s17 + $0xd0] sm:$0xff]  ;;  %v4468_v12 = vld [vmem:[%s4297_s17 + $0xd8] sm:$0xff] }
  0x7b   : > { %498 = vadd.xlane.f32.xlu1 %v463_v7  ;;  %v484_v7 = vmul.f32 %v4453_v3, %v4453_v3  ;;  %v485_v8 = vmul.f32 %v4456_v6, %v4456_v6  ;;  %v487_v14 = vmul.f32 %v4468_v12, %v4468_v12  ;;  %v4480_v17 = vld [vmem:[%s4297_s17 + $0xe8] sm:$0xff] }
  0x7c   : > { %987 = vmatpush1.bf16.msra.mxu0 %v3555_v22  ;;  %v489_v20 = vmul.f32 %v4480_v17, %v4480_v17  ;;  %v4492_v22 = vld [vmem:[%s4297_s17 + $0xf8] sm:$0xff] }
  0x7d   : > { %371 = vadd.xlane.f32.xlu0 %v4332_v9  ;;  %988 = vmatprep.subr.bf16.mxu0 %v3556_v24  ;;  %v491_v24 = vmul.f32 %v4492_v22, %v4492_v22 }
  0x7f   : > { %373 = vadd.xlane.f32.xlu1 %v4335_v11 }
  0x80   : > { %989 = vmatpush1.bf16.msra.mxu0 %v3558_v25 }
  0x81   : > { %500 = vadd.xlane.f32.xlu0 %v464_v13  ;;  %990 = vmatprep.subr.bf16.mxu0 %v3559_v29  ;;  %v486_v13 = vmul.f32 %v4465_v10, %v4465_v10 }
  0x83   : > { %502 = vadd.xlane.f32.xlu1 %v465_v15  ;;  %v4477_v15 = vld [vmem:[%s4297_s17 + $0xe0] sm:$0xff] }
  0x84   : > { %991 = vmatpush1.bf16.msra.mxu0 %v3561_v30  ;;  %v488_v18 = vmul.f32 %v4477_v15, %v4477_v15 }
  0x85   : > { %375 = vadd.xlane.f32.xlu0 %v4344_v16  ;;  %992 = vmatprep.subr.bf16.mxu0 %v3562_v32 }
  0x87   : > { %377 = vadd.xlane.f32.xlu1 %v4347_v19 }
  0x88   : > { %993 = vmatpush1.bf16.msra.mxu0 %v3564_v34 }
  0x89   : > { %504 = vadd.xlane.f32.xlu0 %v466_v21  ;;  %994 = vmatprep.subr.bf16.mxu0 %v3565_v37  ;;  %v4489_v21 = vld [vmem:[%s4297_s17 + $0xf0] sm:$0xff] }
  0x8b   : > { %506 = vadd.xlane.f32.xlu1 %v467_v23  ;;  %v490_v23 = vmul.f32 %v4489_v21, %v4489_v21 }
  0x8c   : > { %995 = vmatpush1.bf16.msra.mxu0 %v3567_v38 }
  0x8d   : > { %379 = vadd.xlane.f32.xlu0 %v4356_v26 }
  0x8f   : > { %381 = vadd.xlane.f32.xlu1 %v4359_v27 }
  0x91   : > { %508 = vadd.xlane.f32.xlu0 %v468_v28 }
  0x93   : > { %510 = vadd.xlane.f32.xlu1 %v469_v31 }
  0x95   : > { %383 = vadd.xlane.f32.xlu0 %v4368_v33 }
  0x97   : > { %385 = vadd.xlane.f32.xlu1 %v4371_v35 }
  0x99   : > { %512 = vadd.xlane.f32.xlu0 %v470_v36 }
  0x9b   : > { %514 = vadd.xlane.f32.xlu1 %v471_v39 }
  0x9d   : > { %387 = vadd.xlane.f32.xlu0 %v4380_v40 }
  0x9f   : > { %389 = vadd.xlane.f32.xlu1 %v4384_v42 }
  0xa1   : > { %516 = vadd.xlane.f32.xlu0 %v472_v43 }
  0xa3   : > { %518 = vadd.xlane.f32.xlu1 %v473_v44 }
  0xa5   : > { %391 = vadd.xlane.f32.xlu0 %v4393_v45 }
  0xa7   : > { %393 = vadd.xlane.f32.xlu1 %v4396_v46 }
  0xa9   : > { %520 = vadd.xlane.f32.xlu0 %v474_v47 }
  0xab   : > { %522 = vadd.xlane.f32.xlu1 %v475_v48 }
  0xad   : > { %395 = vadd.xlane.f32.xlu0 %v4405_v49 }
  0xaf   : > { %397 = vadd.xlane.f32.xlu1 %v4408_v50 }
  0xb1   : > { %524 = vadd.xlane.f32.xlu0 %v476_v51 }
  0xb3   : > { %526 = vadd.xlane.f32.xlu1 %v477_v52 }
  0xb5   : > { %399 = vadd.xlane.f32.xlu0 %v4417_v53 }
  0xb7   : > { %401 = vadd.xlane.f32.xlu1 %v4420_v54 }
  0xb9   : > { %528 = vadd.xlane.f32.xlu0 %v478_v55 }
  0xbb   : > { %530 = vadd.xlane.f32.xlu1 %v479_v56 }
  0xbd   : > { %403 = vadd.xlane.f32.xlu0 %v4429_v57 }
  0xbf   : > { %405 = vadd.xlane.f32.xlu1 %v4432_v58 }
  0xc1   : > { %532 = vadd.xlane.f32.xlu0 %v480_v59 }
  0xc3   : > { %534 = vadd.xlane.f32.xlu1 %v481_v60 }
  0xc5   : > { %407 = vadd.xlane.f32.xlu0 %v4441_v61 }
  0xc7   : > { %409 = vadd.xlane.f32.xlu1 %v4444_v62 }
  0xc9   : > { %536 = vadd.xlane.f32.xlu0 %v482_v63 }
  0xcb   : > { %538 = vadd.xlane.f32.xlu1 %v483_v2 }
  0xcd   : > { %411 = vadd.xlane.f32.xlu0 %v4453_v3 }
  0xcf   : > { %413 = vadd.xlane.f32.xlu1 %v4456_v6 }
  0xd1   : > { %540 = vadd.xlane.f32.xlu0 %v484_v7 }
  0xd3   : > { %542 = vadd.xlane.f32.xlu1 %v485_v8 }
  0xd5   : > { %415 = vadd.xlane.f32.xlu0 %v4465_v10 }
  0xd7   : > { %417 = vadd.xlane.f32.xlu1 %v4468_v12 }
  0xd9   : > { %544 = vadd.xlane.f32.xlu0 %v486_v13 }
  0xdb   : > { %546 = vadd.xlane.f32.xlu1 %v487_v14 }
  0xdd   : > { %419 = vadd.xlane.f32.xlu0 %v4477_v15 }
  0xdf   : > { %421 = vadd.xlane.f32.xlu1 %v4480_v17 }
  0xe1   : > { %548 = vadd.xlane.f32.xlu0 %v488_v18 }
  0xe3   : > { %550 = vadd.xlane.f32.xlu1 %v489_v20 }
  0xe5   : > { %423 = vadd.xlane.f32.xlu0 %v4489_v21 }
  0xe7   : > { %425 = vadd.xlane.f32.xlu1 %v4492_v22 }
  0xe9   : > { %552 = vadd.xlane.f32.xlu0 %v490_v23 }
  0xeb   : > { %554 = vadd.xlane.f32.xlu1 %v491_v24 }
  0xfa   : > { %v364_v25 = vpop.xlane.xlu0 %363 }
  0xfb   : > { %v428_v28 = vmul.f32 0.0078125, %v364_v25 }
  0xfc   : > { %v493_v29 = vpop.xlane.xlu1 %492 }
  0xfd   : > { %v588_v30 = vmul.f32 %v428_v28, %v428_v28  ;;  %v556_v31 = vmul.f32 0.0078125, %v493_v29  ;;  %v716_v23 = vsub.f32 %v4308_v0, %v428_v28 }
  0xfe   : > { %v366_v32 = vpop.xlane.xlu0 %365 }
  0xff   : > { %v620_v34 = vsub.f32 %v556_v31, %v588_v30  ;;  %v429_v36 = vmul.f32 0.0078125, %v366_v32 }
 0x100   : > { %v495_v37 = vpop.xlane.xlu1 %494 }
 0x101   : > { %v652_v38 = vadd.f32 1e-05, %v620_v34  ;;  %v589_v39 = vmul.f32 %v429_v36, %v429_v36  ;;  %v557_v43 = vmul.f32 0.0078125, %v495_v37  ;;  %v717_v0 = vsub.f32 %v4311_v1, %v429_v36 }
 0x102   : > { %v368_v44 = vpop.xlane.xlu0 %367 }
 0x103   : > { %3584 = vrsqrt.f32 %v652_v38  ;;  %v621_v47 = vsub.f32 %v557_v43, %v589_v39  ;;  %v430_v48 = vmul.f32 0.0078125, %v368_v44  ;;  %v4510_v38 = vld [vmem:[%s6868_s1] ss:$0 sm:$0xff] }
 0x104   : > { %v370_v51 = vpop.xlane.xlu1 %369 }
 0x105   : > { %v653_v52 = vadd.f32 1e-05, %v621_v47  ;;  %v590_v55 = vmul.f32 %v430_v48, %v430_v48  ;;  %v431_v56 = vmul.f32 0.0078125, %v370_v51 }
 0x106   : > { %v497_v59 = vpop.xlane.xlu0 %496 }
 0x107   : > { %3586 = vrsqrt.f32 %v653_v52  ;;  %v558_v60 = vmul.f32 0.0078125, %v497_v59  ;;  %v591_v2 = vmul.f32 %v431_v56, %v431_v56 }
 0x108   : > { %v499_v63 = vpop.xlane.xlu1 %498 }
 0x109   : > { %v622_v7 = vsub.f32 %v558_v60, %v590_v55  ;;  %v559_v8 = vmul.f32 0.0078125, %v499_v63 }
 0x10a   : > { %v372_v13 = vpop.xlane.xlu0 %371 }
 0x10b   : > { %v654_v14 = vadd.f32 1e-05, %v622_v7  ;;  %v623_v18 = vsub.f32 %v559_v8, %v591_v2  ;;  %v4500_v20 = vmul.f32 0.0078125, %v372_v13  ;;  %v4521_v2 = vld [vmem:[%s6869_s2] ss:$0 sm:$0xff]  ;;  %v718_v13 = vsub.f32 %v4320_v4, %v430_v48 }
 0x10c   : > { %v374_v24 = vpop.xlane.xlu1 %373 }
 0x10d   : > { %v3585_v25 = vpop.eup %3584  ;;  %3588 = vrsqrt.f32 %v654_v14  ;;  %v655_v29 = vadd.f32 1e-05, %v623_v18  ;;  %v592_v30 = vmul.f32 %v4500_v20, %v4500_v20  ;;  %v4505_v31 = vmul.f32 0.0078125, %v374_v24 }
 0x10e   : > { %v501_v32 = vpop.xlane.xlu0 %500  ;;  %v748_v34 = vmul.f32 %v3585_v25, %v716_v23 }
 0x10f   : > { %3590 = vrsqrt.f32 %v655_v29  ;;  %v560_v37 = vmul.f32 0.0078125, %v501_v32  ;;  %v593_v43 = vmul.f32 %v4505_v31, %v4505_v31 }
 0x110   : > { %v503_v28 = vpop.xlane.xlu1 %502  ;;  %v786_v55 = vmul.f32 %v4510_v38, %v748_v34 }
 0x111   : > { %v3587_v39 = vpop.eup %3586  ;;  %v624_v44 = vsub.f32 %v560_v37, %v592_v30  ;;  %v561_v47 = vmul.f32 0.0078125, %v503_v28  ;;  %v719_v30 = vsub.f32 %v4323_v5, %v431_v56 }
 0x112   : > { %v376_v51 = vpop.xlane.xlu0 %375  ;;  %v749_v52 = vmul.f32 %v3587_v39, %v717_v0  ;;  %v824_v23 = vadd.f32 %v4521_v2, %v786_v55 }
 0x113   : > { %v656_v59 = vadd.f32 1e-05, %v624_v44  ;;  %v625_v60 = vsub.f32 %v561_v47, %v593_v43  ;;  %v4516_v63 = vmul.f32 0.0078125, %v376_v51 }
 0x114   : > { %v378_v1 = vpop.xlane.xlu1 %377  ;;  %v787_v36 = vmul.f32 %v4510_v38, %v749_v52 }
 0x115   : > { %3592 = vrsqrt.f32 %v656_v59  ;;  %v657_v7 = vadd.f32 1e-05, %v625_v60  ;;  %v594_v8 = vmul.f32 %v4516_v63, %v4516_v63  ;;  %v4527_v14 = vmul.f32 0.0078125, %v378_v1 }
 0x116   : > { %v505_v18 = vpop.xlane.xlu0 %504  ;;  %v825_v24 = vadd.f32 %v4521_v2, %v787_v36  ;;  %v720_v60 = vsub.f32 %v4332_v9, %v4500_v20 }
 0x117   : > { %v3589_v25 = vpop.eup %3588  ;;  %3594 = vrsqrt.f32 %v657_v7  ;;  %v562_v29 = vmul.f32 0.0078125, %v505_v18  ;;  %v595_v28 = vmul.f32 %v4527_v14, %v4527_v14 }
 0x118   : > { %v507_v32 = vpop.xlane.xlu1 %506  ;;  %v856_v34 = vpack.c.bf16 %v825_v24, %v824_v23  ;;  %v750_v37 = vmul.f32 %v3589_v25, %v718_v13  ;;  %v721_v23 = vsub.f32 %v4335_v11, %v4505_v31 }
 0x119   : > { %v3591_v0 = vpop.eup %3590  ;;  %v626_v4 = vsub.f32 %v562_v29, %v594_v8  ;;  %v563_v48 = vmul.f32 0.0078125, %v507_v32 }
 0x11a   : > { %v380_v39 = vpop.xlane.xlu0 %379  ;;  %1013 = vmatmul.mubr.bf16.vlgmr.msra.gmra.mrb[0].mxu0 %v856_v34  ;;  %v751_v43 = vmul.f32 %v3591_v0, %v719_v30  ;;  %v788_v44 = vmul.f32 %v4510_v38, %v750_v37 }
 0x11b   : > { %v658_v47 = vadd.f32 1e-05, %v626_v4  ;;  %v627_v51 = vsub.f32 %v563_v48, %v595_v28  ;;  %v4535_v52 = vmul.f32 0.0078125, %v380_v39  ;;  %1022 = vmatprep.mubr.bf16.mxu0 %v4069_v41 }
 0x11c   : > { %v382_v5 = vpop.xlane.xlu1 %381  ;;  %v789_v56 = vmul.f32 %v4510_v38, %v751_v43  ;;  %v826_v7 = vadd.f32 %v4521_v2, %v788_v44  ;;  %v722_v44 = vsub.f32 %v4344_v16, %v4516_v63 }
 0x11d   : > { %3596 = vrsqrt.f32 %v658_v47  ;;  %v659_v55 = vadd.f32 1e-05, %v627_v51  ;;  %v596_v59 = vmul.f32 %v4535_v52, %v4535_v52  ;;  %v4543_v1 = vmul.f32 0.0078125, %v382_v5 }
 0x11e   : > { %v509_v36 = vpop.xlane.xlu0 %508  ;;  %v827_v8 = vadd.f32 %v4521_v2, %v789_v56 }
 0x11f   : > { %v3593_v13 = vpop.eup %3592  ;;  %3598 = vrsqrt.f32 %v659_v55  ;;  %v564_v18 = vmul.f32 0.0078125, %v509_v36  ;;  %v597_v9 = vmul.f32 %v4543_v1, %v4543_v1 }
 0x120   : > { %v511_v24 = vpop.xlane.xlu1 %510  ;;  %v857_v25 = vpack.c.bf16 %v827_v8, %v826_v7  ;;  %v752_v29 = vmul.f32 %v3593_v13, %v720_v60  ;;  %v723_v60 = vsub.f32 %v4347_v19, %v4527_v14 }
 0x121   : > { %v3595_v30 = vpop.eup %3594  ;;  %v628_v20 = vsub.f32 %v564_v18, %v596_v59  ;;  %v565_v32 = vmul.f32 0.0078125, %v511_v24 }
 0x122   : > { %v384_v34 = vpop.xlane.xlu0 %383  ;;  %1023 = vmatmul.mubr.bf16.gmra.mrb[4].mxu0 %v857_v25  ;;  %v753_v37 = vmul.f32 %v3595_v30, %v721_v23  ;;  %v790_v0 = vmul.f32 %v4510_v38, %v752_v29 }
 0x123   : > { %v660_v28 = vadd.f32 1e-05, %v628_v20  ;;  %v629_v4 = vsub.f32 %v565_v32, %v597_v9  ;;  %v4552_v48 = vmul.f32 0.0078125, %v384_v34  ;;  %1032 = vmatprep.mubr.bf16.mxu0 %v4069_v41  ;;  %v724_v34 = vsub.f32 %v4356_v26, %v4535_v52 }
 0x124   : > { %v386_v11 = vpop.xlane.xlu1 %385  ;;  %v791_v31 = vmul.f32 %v4510_v38, %v753_v37  ;;  %v828_v5 = vadd.f32 %v4521_v2, %v790_v0 }
 0x125   : > { %3600 = vrsqrt.f32 %v660_v28  ;;  %v661_v39 = vadd.f32 1e-05, %v629_v4  ;;  %v598_v43 = vmul.f32 %v4552_v48, %v4552_v48  ;;  %v4560_v47 = vmul.f32 0.0078125, %v386_v11 }
 0x126   : > { %v513_v51 = vpop.xlane.xlu0 %512  ;;  %v829_v56 = vadd.f32 %v4521_v2, %v791_v31 }
 0x127   : > { %v3597_v55 = vpop.eup %3596  ;;  %3602 = vrsqrt.f32 %v661_v39  ;;  %v566_v59 = vmul.f32 0.0078125, %v513_v51  ;;  %v599_v16 = vmul.f32 %v4560_v47, %v4560_v47  ;;  %v725_v39 = vsub.f32 %v4359_v27, %v4543_v1 }
 0x128   : > { %v515_v36 = vpop.xlane.xlu1 %514  ;;  %v858_v7 = vpack.c.bf16 %v829_v56, %v828_v5  ;;  %v754_v8 = vmul.f32 %v3597_v55, %v722_v44 }
 0x129   : > { %v3599_v13 = vpop.eup %3598  ;;  %v630_v63 = vsub.f32 %v566_v59, %v598_v43  ;;  %v567_v18 = vmul.f32 0.0078125, %v515_v36 }
 0x12a   : > { %v388_v23 = vpop.xlane.xlu0 %387  ;;  %1033 = vmatmul.mubr.bf16.gmra.mrb[8].mxu0 %v858_v7  ;;  %v755_v24 = vmul.f32 %v3599_v13, %v723_v60  ;;  %v792_v25 = vmul.f32 %v4510_v38, %v754_v8 }
 0x12b   : > { %v662_v29 = vadd.f32 1e-05, %v630_v63  ;;  %v631_v30 = vsub.f32 %v567_v18, %v599_v16  ;;  %v4569_v9 = vmul.f32 0.0078125, %v388_v23  ;;  %1042 = vmatprep.mubr.bf16.mxu0 %v4069_v41  ;;  %v726_v63 = vsub.f32 %v4368_v33, %v4552_v48 }
 0x12c   : > { %v390_v19 = vpop.xlane.xlu1 %389  ;;  %v793_v14 = vmul.f32 %v4510_v38, %v755_v24  ;;  %v830_v28 = vadd.f32 %v4521_v2, %v792_v25 }
 0x12d   : > { %3604 = vrsqrt.f32 %v662_v29  ;;  %v663_v20 = vadd.f32 1e-05, %v631_v30  ;;  %v600_v32 = vmul.f32 %v4569_v9, %v4569_v9  ;;  %v4577_v37 = vmul.f32 0.0078125, %v390_v19 }
 0x12e   : > { %v517_v0 = vpop.xlane.xlu0 %516  ;;  %v831_v4 = vadd.f32 %v4521_v2, %v793_v14  ;;  %v727_v19 = vsub.f32 %v4371_v35, %v4560_v47 }
 0x12f   : > { %v3601_v11 = vpop.eup %3600  ;;  %3606 = vrsqrt.f32 %v663_v20  ;;  %v568_v31 = vmul.f32 0.0078125, %v517_v0  ;;  %v601_v26 = vmul.f32 %v4577_v37, %v4577_v37 }
 0x130   : > { %v519_v43 = vpop.xlane.xlu1 %518  ;;  %v859_v44 = vpack.c.bf16 %v831_v4, %v830_v28  ;;  %v756_v51 = vmul.f32 %v3601_v11, %v724_v34 }
 0x131   : > { %v3603_v5 = vpop.eup %3602  ;;  %v632_v52 = vsub.f32 %v568_v31, %v600_v32  ;;  %v569_v56 = vmul.f32 0.0078125, %v519_v43 }
 0x132   : > { %v392_v55 = vpop.xlane.xlu0 %391  ;;  %1043 = vmatmul.mubr.bf16.gmra.mrb[12].mxu0 %v859_v44  ;;  %v757_v59 = vmul.f32 %v3603_v5, %v725_v39  ;;  %v794_v60 = vmul.f32 %v4510_v38, %v756_v51  ;;  %v728_v5 = vsub.f32 %v4380_v40, %v4569_v9 }
 0x133   : > { %v664_v36 = vadd.f32 1e-05, %v632_v52  ;;  %v633_v7 = vsub.f32 %v569_v56, %v601_v26  ;;  %v4586_v8 = vmul.f32 0.0078125, %v392_v55  ;;  %1052 = vmatprep.mubr.bf16.mxu0 %v4069_v41 }
 0x134   : > { %v394_v27 = vpop.xlane.xlu1 %393  ;;  %v795_v1 = vmul.f32 %v4510_v38, %v757_v59  ;;  %v832_v24 = vadd.f32 %v4521_v2, %v794_v60 }
 0x135   : > { %3608 = vrsqrt.f32 %v664_v36  ;;  %v665_v13 = vadd.f32 1e-05, %v633_v7  ;;  %v602_v16 = vmul.f32 %v4586_v8, %v4586_v8  ;;  %v4594_v18 = vmul.f32 0.0078125, %v394_v27 }
 0x136   : > { %v521_v23 = vpop.xlane.xlu0 %520  ;;  %v833_v25 = vadd.f32 %v4521_v2, %v795_v1  ;;  %v729_v36 = vsub.f32 %v4384_v42, %v4577_v37 }
 0x137   : > { %v3605_v29 = vpop.eup %3604  ;;  %3610 = vrsqrt.f32 %v665_v13  ;;  %v570_v30 = vmul.f32 0.0078125, %v521_v23  ;;  %v603_v33 = vmul.f32 %v4594_v18, %v4594_v18 }
 0x138   : > { %v523_v14 = vpop.xlane.xlu1 %522  ;;  %v860_v20 = vpack.c.bf16 %v833_v25, %v832_v24  ;;  %v758_v32 = vmul.f32 %v3605_v29, %v726_v63 }
 0x139   : > { %v3607_v34 = vpop.eup %3606  ;;  %v634_v48 = vsub.f32 %v570_v30, %v602_v16  ;;  %v571_v0 = vmul.f32 0.0078125, %v523_v14 }
 0x13a   : > { %v396_v28 = vpop.xlane.xlu0 %395  ;;  %1053 = vmatmul.mubr.bf16.gmra.mrb[16].mxu0 %v860_v20  ;;  %v759_v4 = vmul.f32 %v3607_v34, %v727_v19  ;;  %v796_v11 = vmul.f32 %v4510_v38, %v758_v32  ;;  %v730_v20 = vsub.f32 %v4393_v45, %v4586_v8 }
 0x13b   : > { %v666_v31 = vadd.f32 1e-05, %v634_v48  ;;  %v635_v39 = vsub.f32 %v571_v0, %v603_v33  ;;  %v4603_v43 = vmul.f32 0.0078125, %v396_v28  ;;  %1062 = vmatprep.mubr.bf16.mxu0 %v4069_v41 }
 0x13c   : > { %v398_v35 = vpop.xlane.xlu1 %397  ;;  %v797_v47 = vmul.f32 %v4510_v38, %v759_v4  ;;  %v834_v56 = vadd.f32 %v4521_v2, %v796_v11  ;;  %v731_v4 = vsub.f32 %v4396_v46, %v4594_v18 }
 0x13d   : > { %3612 = vrsqrt.f32 %v666_v31  ;;  %v667_v44 = vadd.f32 1e-05, %v635_v39  ;;  %v604_v51 = vmul.f32 %v4603_v43, %v4603_v43  ;;  %v4611_v26 = vmul.f32 0.0078125, %v398_v35 }
 0x13e   : > { %v525_v52 = vpop.xlane.xlu0 %524  ;;  %v835_v55 = vadd.f32 %v4521_v2, %v797_v47 }
 0x13f   : > { %v3609_v59 = vpop.eup %3608  ;;  %3614 = vrsqrt.f32 %v667_v44  ;;  %v572_v60 = vmul.f32 0.0078125, %v525_v52  ;;  %v605_v40 = vmul.f32 %v4611_v26, %v4611_v26 }
 0x140   : > { %v527_v7 = vpop.xlane.xlu1 %526  ;;  %v861_v27 = vpack.c.bf16 %v835_v55, %v834_v56  ;;  %v760_v1 = vmul.f32 %v3609_v59, %v728_v5 }
 0x141   : > { %v3611_v13 = vpop.eup %3610  ;;  %v636_v9 = vsub.f32 %v572_v60, %v604_v51  ;;  %v573_v16 = vmul.f32 0.0078125, %v527_v7 }
 0x142   : > { %v400_v63 = vpop.xlane.xlu0 %399  ;;  %1063 = vmatmul.mubr.bf16.gmra.mrb[20].mxu0 %v861_v27  ;;  %v761_v23 = vmul.f32 %v3611_v13, %v729_v36  ;;  %v798_v24 = vmul.f32 %v4510_v38, %v760_v1  ;;  %v732_v36 = vsub.f32 %v4405_v49, %v4603_v43 }
 0x143   : > { %v668_v25 = vadd.f32 1e-05, %v636_v9  ;;  %v637_v29 = vsub.f32 %v573_v16, %v605_v40  ;;  %v4620_v30 = vmul.f32 0.0078125, %v400_v63  ;;  %1072 = vmatprep.mubr.bf16.mxu0 %v4069_v41  ;;  %v733_v16 = vsub.f32 %v4408_v50, %v4611_v26 }
 0x144   : > { %v402_v42 = vpop.xlane.xlu1 %401  ;;  %v799_v37 = vmul.f32 %v4510_v38, %v761_v23  ;;  %v836_v33 = vadd.f32 %v4521_v2, %v798_v24 }
 0x145   : > { %3616 = vrsqrt.f32 %v668_v25  ;;  %v669_v19 = vadd.f32 1e-05, %v637_v29  ;;  %v606_v14 = vmul.f32 %v4620_v30, %v4620_v30  ;;  %v4628_v32 = vmul.f32 0.0078125, %v402_v42 }
 0x146   : > { %v529_v34 = vpop.xlane.xlu0 %528  ;;  %v837_v48 = vadd.f32 %v4521_v2, %v799_v37 }
 0x147   : > { %v3613_v0 = vpop.eup %3612  ;;  %3618 = vrsqrt.f32 %v669_v19  ;;  %v574_v28 = vmul.f32 0.0078125, %v529_v34  ;;  %v607_v45 = vmul.f32 %v4628_v32, %v4628_v32 }
 0x148   : > { %v531_v11 = vpop.xlane.xlu1 %530  ;;  %v862_v31 = vpack.c.bf16 %v837_v48, %v836_v33  ;;  %v762_v39 = vmul.f32 %v3613_v0, %v730_v20  ;;  %v734_v0 = vsub.f32 %v4417_v53, %v4620_v30 }
 0x149   : > { %v3615_v35 = vpop.eup %3614  ;;  %v638_v8 = vsub.f32 %v574_v28, %v606_v14  ;;  %v575_v47 = vmul.f32 0.0078125, %v531_v11 }
 0x14a   : > { %v404_v44 = vpop.xlane.xlu0 %403  ;;  %1073 = vmatmul.mubr.bf16.gmra.mrb[24].mxu0 %v862_v31  ;;  %v763_v51 = vmul.f32 %v3615_v35, %v731_v4  ;;  %v800_v5 = vmul.f32 %v4510_v38, %v762_v39 }
 0x14b   : > { %v670_v52 = vadd.f32 1e-05, %v638_v8  ;;  %v639_v56 = vsub.f32 %v575_v47, %v607_v45  ;;  %v4637_v55 = vmul.f32 0.0078125, %v404_v44  ;;  %1082 = vmatprep.mubr.bf16.mxu0 %v4069_v41  ;;  %v735_v45 = vsub.f32 %v4420_v54, %v4628_v32 }
 0x14c   : > { %v406_v46 = vpop.xlane.xlu1 %405  ;;  %v801_v18 = vmul.f32 %v4510_v38, %v763_v51  ;;  %v838_v1 = vadd.f32 %v4521_v2, %v800_v5 }
 0x14d   : > { %3620 = vrsqrt.f32 %v670_v52  ;;  %v671_v59 = vadd.f32 1e-05, %v639_v56  ;;  %v608_v60 = vmul.f32 %v4637_v55, %v4637_v55  ;;  %v4645_v7 = vmul.f32 0.0078125, %v406_v46 }
 0x14e   : > { %v533_v27 = vpop.xlane.xlu0 %532  ;;  %v839_v13 = vadd.f32 %v4521_v2, %v801_v18 }
 0x14f   : > { %v3617_v40 = vpop.eup %3616  ;;  %3622 = vrsqrt.f32 %v671_v59  ;;  %v576_v9 = vmul.f32 0.0078125, %v533_v27  ;;  %v609_v49 = vmul.f32 %v4645_v7, %v4645_v7 }
 0x150   : > { %v535_v63 = vpop.xlane.xlu1 %534  ;;  %v863_v23 = vpack.c.bf16 %v839_v13, %v838_v1  ;;  %v764_v24 = vmul.f32 %v3617_v40, %v732_v36  ;;  %v736_v1 = vsub.f32 %v4429_v57, %v4637_v55 }
 0x151   : > { %v3619_v25 = vpop.eup %3618  ;;  %v640_v43 = vsub.f32 %v576_v9, %v608_v60  ;;  %v577_v29 = vmul.f32 0.0078125, %v535_v63 }
 0x152   : > { %v408_v42 = vpop.xlane.xlu0 %407  ;;  %1083 = vmatmul.mubr.bf16.gmra.mrb[28].mxu0 %v863_v23  ;;  %v765_v37 = vmul.f32 %v3619_v25, %v733_v16  ;;  %v802_v19 = vmul.f32 %v4510_v38, %v764_v24  ;;  %v737_v24 = vsub.f32 %v4432_v58, %v4645_v7 }
 0x153   : > { %v672_v14 = vadd.f32 1e-05, %v640_v43  ;;  %v641_v20 = vsub.f32 %v577_v29, %v609_v49  ;;  %v4654_v34 = vmul.f32 0.0078125, %v408_v42  ;;  %1092 = vmatprep.mubr.bf16.mxu0 %v4069_v41 }
 0x154   : > { %v410_v50 = vpop.xlane.xlu1 %409  ;;  %v803_v26 = vmul.f32 %v4510_v38, %v765_v37  ;;  %v840_v11 = vadd.f32 %v4521_v2, %v802_v19 }
 0x155   : > { %3624 = vrsqrt.f32 %v672_v14  ;;  %v673_v33 = vadd.f32 1e-05, %v641_v20  ;;  %v610_v48 = vmul.f32 %v4654_v34, %v4654_v34  ;;  %v4662_v28 = vmul.f32 0.0078125, %v410_v50 }
 0x156   : > { %v537_v4 = vpop.xlane.xlu0 %536  ;;  %v841_v31 = vadd.f32 %v4521_v2, %v803_v26 }
 0x157   : > { %v3621_v39 = vpop.eup %3620  ;;  %3626 = vrsqrt.f32 %v673_v33  ;;  %v578_v35 = vmul.f32 0.0078125, %v537_v4  ;;  %v611_v53 = vmul.f32 %v4662_v28, %v4662_v28 }
 0x158   : > { %v539_v8 = vpop.xlane.xlu1 %538  ;;  %v864_v47 = vpack.c.bf16 %v841_v31, %v840_v11  ;;  %v766_v44 = vmul.f32 %v3621_v39, %v734_v0  ;;  %v738_v0 = vsub.f32 %v4441_v61, %v4654_v34 }
 0x159   : > { %v3623_v51 = vpop.eup %3622  ;;  %v642_v30 = vsub.f32 %v578_v35, %v610_v48  ;;  %v579_v5 = vmul.f32 0.0078125, %v539_v8  ;;  %v739_v8 = vsub.f32 %v4444_v62, %v4662_v28 }
 0x15a   : > { %v412_v52 = vpop.xlane.xlu0 %411  ;;  %1093 = vmatmul.mubr.bf16.gmra.mrb[32].mxu0 %v864_v47  ;;  %v767_v56 = vmul.f32 %v3623_v51, %v735_v45  ;;  %v804_v46 = vmul.f32 %v4510_v38, %v766_v44 }
 0x15b   : > { %v674_v18 = vadd.f32 1e-05, %v642_v30  ;;  %v643_v59 = vsub.f32 %v579_v5, %v611_v53  ;;  %v4671_v60 = vmul.f32 0.0078125, %v412_v52  ;;  %1102 = vmatprep.mubr.bf16.mxu0 %v4069_v41 }
 0x15c   : > { %v414_v54 = vpop.xlane.xlu1 %413  ;;  %v805_v32 = vmul.f32 %v4510_v38, %v767_v56  ;;  %v842_v9 = vadd.f32 %v4521_v2, %v804_v46 }
 0x15d   : > { %3628 = vrsqrt.f32 %v674_v18  ;;  %v675_v36 = vadd.f32 1e-05, %v643_v59  ;;  %v612_v27 = vmul.f32 %v4671_v60, %v4671_v60  ;;  %v4679_v13 = vmul.f32 0.0078125, %v414_v54 }
 0x15e   : > { %v541_v40 = vpop.xlane.xlu0 %540  ;;  %v843_v16 = vadd.f32 %v4521_v2, %v805_v32 }
 0x15f   : > { %v3625_v63 = vpop.eup %3624  ;;  %3630 = vrsqrt.f32 %v675_v36  ;;  %v580_v23 = vmul.f32 0.0078125, %v541_v40  ;;  %v613_v57 = vmul.f32 %v4679_v13, %v4679_v13  ;;  %v740_v36 = vsub.f32 %v4453_v3, %v4671_v60 }
 0x160   : > { %v543_v25 = vpop.xlane.xlu1 %542  ;;  %v865_v49 = vpack.c.bf16 %v843_v16, %v842_v9  ;;  %v768_v43 = vmul.f32 %v3625_v63, %v736_v1 }
 0x161   : > { %v3627_v29 = vpop.eup %3626  ;;  %v644_v55 = vsub.f32 %v580_v23, %v612_v27  ;;  %v581_v42 = vmul.f32 0.0078125, %v543_v25  ;;  %v741_v23 = vsub.f32 %v4456_v6, %v4679_v13 }
 0x162   : > { %v416_v37 = vpop.xlane.xlu0 %415  ;;  %1103 = vmatmul.mubr.bf16.gmra.mrb[36].mxu0 %v865_v49  ;;  %v769_v19 = vmul.f32 %v3627_v29, %v737_v24  ;;  %v806_v14 = vmul.f32 %v4510_v38, %v768_v43 }
 0x163   : > { %v676_v20 = vadd.f32 1e-05, %v644_v55  ;;  %v645_v50 = vsub.f32 %v581_v42, %v613_v57  ;;  %v4688_v26 = vmul.f32 0.0078125, %v416_v37  ;;  %1112 = vmatprep.mubr.bf16.mxu0 %v4069_v41 }
 0x164   : > { %v418_v58 = vpop.xlane.xlu1 %417  ;;  %v807_v7 = vmul.f32 %v4510_v38, %v769_v19  ;;  %v844_v31 = vadd.f32 %v4521_v2, %v806_v14 }
 0x165   : > { %3632 = vrsqrt.f32 %v676_v20  ;;  %v677_v33 = vadd.f32 1e-05, %v645_v50  ;;  %v614_v48 = vmul.f32 %v4688_v26, %v4688_v26  ;;  %v4696_v4 = vmul.f32 0.0078125, %v418_v58 }
 0x166   : > { %v545_v11 = vpop.xlane.xlu0 %544  ;;  %v845_v39 = vadd.f32 %v4521_v2, %v807_v7  ;;  %v742_v58 = vsub.f32 %v4465_v10, %v4688_v26 }
 0x167   : > { %v3629_v35 = vpop.eup %3628  ;;  %3634 = vrsqrt.f32 %v677_v33  ;;  %v582_v45 = vmul.f32 0.0078125, %v545_v11  ;;  %v615_v61 = vmul.f32 %v4696_v4, %v4696_v4 }
 0x168   : > { %v547_v47 = vpop.xlane.xlu1 %546  ;;  %v866_v44 = vpack.c.bf16 %v845_v39, %v844_v31  ;;  %v770_v51 = vmul.f32 %v3629_v35, %v738_v0  ;;  %v743_v39 = vsub.f32 %v4468_v12, %v4696_v4 }
 0x169   : > { %v3631_v53 = vpop.eup %3630  ;;  %v646_v34 = vsub.f32 %v582_v45, %v614_v48  ;;  %v583_v30 = vmul.f32 0.0078125, %v547_v47 }
 0x16a   : > { %v420_v5 = vpop.xlane.xlu0 %419  ;;  %1113 = vmatmul.mubr.bf16.gmra.mrb[40].mxu0 %v866_v44  ;;  %v771_v52 = vmul.f32 %v3631_v53, %v739_v8  ;;  %v808_v56 = vmul.f32 %v4510_v38, %v770_v51 }
 0x16b   : > { %v678_v46 = vadd.f32 1e-05, %v646_v34  ;;  %v647_v18 = vsub.f32 %v583_v30, %v615_v61  ;;  %v4705_v59 = vmul.f32 0.0078125, %v420_v5  ;;  %1122 = vmatprep.mubr.bf16.mxu0 %v4069_v41 }
 0x16c   : > { %v422_v62 = vpop.xlane.xlu1 %421  ;;  %v809_v28 = vmul.f32 %v4510_v38, %v771_v52  ;;  %v846_v40 = vadd.f32 %v4521_v2, %v808_v56 }
 0x16d   : > { %3636 = vrsqrt.f32 %v678_v46  ;;  %v679_v54 = vadd.f32 1e-05, %v647_v18  ;;  %v616_v32 = vmul.f32 %v4705_v59, %v4705_v59  ;;  %v4713_v27 = vmul.f32 0.0078125, %v422_v62 }
 0x16e   : > { %v549_v1 = vpop.xlane.xlu0 %548  ;;  %v847_v9 = vadd.f32 %v4521_v2, %v809_v28  ;;  %v744_v12 = vsub.f32 %v4477_v15, %v4705_v59 }
 0x16f   : > { %v3633_v16 = vpop.eup %3632  ;;  %3638 = vrsqrt.f32 %v679_v54  ;;  %v584_v63 = vmul.f32 0.0078125, %v549_v1  ;;  %v617_v3 = vmul.f32 %v4713_v27, %v4713_v27  ;;  %v745_v46 = vsub.f32 %v4480_v17, %v4713_v27 }
 0x170   : > { %v551_v24 = vpop.xlane.xlu1 %550  ;;  %v867_v25 = vpack.c.bf16 %v847_v9, %v846_v40  ;;  %v772_v49 = vmul.f32 %v3633_v16, %v740_v36 }
 0x171   : > { %v3635_v43 = vpop.eup %3634  ;;  %v648_v60 = vsub.f32 %v584_v63, %v616_v32  ;;  %v585_v29 = vmul.f32 0.0078125, %v551_v24 }
 0x172   : > { %v424_v57 = vpop.xlane.xlu0 %423  ;;  %1123 = vmatmul.mubr.bf16.gmra.mrb[44].mxu0 %v867_v25  ;;  %v773_v55 = vmul.f32 %v3635_v43, %v741_v23  ;;  %v810_v42 = vmul.f32 %v4510_v38, %v772_v49  ;;  %v3568_v43 = vld [vmem:[#allocation7 + $0x40] sm:$0xff]  }
 0x173   : > { %v680_v37 = vadd.f32 1e-05, %v648_v60  ;;  %v649_v19 = vsub.f32 %v585_v29, %v617_v3  ;;  %v458_v14 = vmul.f32 0.0078125, %v424_v57  ;;  %1132 = vmatprep.mubr.bf16.mxu0 %v4069_v41  ;;  %3358 = vmatprep.subr.bf16.mxu1 %v3568_v43  ;;  %v3570_v3 = vld [vmem:[#allocation7 + $0x48] sm:$0xff]   ;;  %v3572_v29 = vld [vmem:[#allocation7 + $0x50] sm:$0xff]  }
 0x174   : > { %v426_v6 = vpop.xlane.xlu1 %425  ;;  %v811_v13 = vmul.f32 %v4510_v38, %v773_v55  ;;  %v848_v48 = vadd.f32 %v4521_v2, %v810_v42  ;;  %v3571_v60 = vld [vmem:[#allocation7 + $0x8] sm:$0xff]   ;;  %v3573_v57 = vld [vmem:[#allocation7 + $0x10] sm:$0xff]   ;;  %v890_v55 = vlaneseq }
 0x175   : > { %3640 = vrsqrt.f32 %v680_v37  ;;  %v681_v20 = vadd.f32 1e-05, %v649_v19  ;;  %v618_v50 = vmul.f32 %v458_v14, %v458_v14  ;;  %v459_v7 = vmul.f32 0.0078125, %v426_v6  ;;  %v3576_v37 = vld [vmem:[#allocation7 + $0x60] sm:$0xff]  }
 0x176   : > { %v553_v33 = vpop.xlane.xlu0 %552  ;;  %v849_v0 = vadd.f32 %v4521_v2, %v811_v13  ;;  %v746_v59 = vsub.f32 %v4489_v21, %v458_v14  ;;  %v888_v19 = vld [vmem:[%s6871_s4] sm:$0x3] }
 0x177   : > { %v3637_v11 = vpop.eup %3636  ;;  %3642 = vrsqrt.f32 %v681_v20  ;;  %v586_v31 = vmul.f32 0.0078125, %v553_v33  ;;  %v619_v44 = vmul.f32 %v459_v7, %v459_v7  ;;  %v747_v17 = vsub.f32 %v4492_v22, %v459_v7  ;;  %v3569_v22 = vld [vmem:[#allocation7] sm:$0xff]  }
 0x178   : > { %v555_v35 = vpop.xlane.xlu1 %554  ;;  %v868_v45 = vpack.c.bf16 %v849_v0, %v848_v48  ;;  %v774_v8 = vmul.f32 %v3637_v11, %v742_v58  ;;  %3359 = vmatpush3.bf16.msra.mxu1 %v3569_v22  ;;  %v3577_v6 = vld [vmem:[#allocation7 + $0x20] sm:$0xff]  }
 0x179   : > { %v3639_v47 = vpop.eup %3638  ;;  %v650_v51 = vsub.f32 %v586_v31, %v618_v50  ;;  %v587_v53 = vmul.f32 0.0078125, %v555_v35  ;;  %3360 = vmatprep.subr.bf16.mxu1 %v3570_v3 }
 0x17a   : > { %1133 = vmatmul.mubr.bf16.gmra.mrb[48].mxu0 %v868_v45  ;;  %v775_v10 = vmul.f32 %v3639_v47, %v743_v39  ;;  %v812_v26 = vmul.f32 %v4510_v38, %v774_v8 }
 0x17b   : > { %v682_v61 = vadd.f32 1e-05, %v650_v51  ;;  %v651_v34 = vsub.f32 %v587_v53, %v619_v44  ;;  %1142 = vmatprep.mubr.bf16.mxu0 %v4069_v41  ;;  %v3578_v44 = vld [vmem:[#allocation7 + $0x68] sm:$0xff]  }
 0x17c   : > { %v813_v30 = vmul.f32 %v4510_v38, %v775_v10  ;;  %v850_v4 = vadd.f32 %v4521_v2, %v812_v26  ;;  %3361 = vmatpush3.bf16.msra.mxu1 %v3571_v60  ;;  %v3579_v53 = vld [vmem:[#allocation7 + $0x28] sm:$0xff]  }
 0x17d   : > { %3644 = vrsqrt.f32 %v682_v61  ;;  %v683_v5 = vadd.f32 1e-05, %v651_v34  ;;  %3362 = vmatprep.subr.bf16.mxu1 %v3572_v29 }
 0x17e   : > { %v851_v52 = vadd.f32 %v4521_v2, %v813_v30 }
 0x17f   : > { %v3641_v56 = vpop.eup %3640  ;;  %3646 = vrsqrt.f32 %v683_v5 }
 0x180   : > { %v869_v18 = vpack.c.bf16 %v851_v52, %v850_v4  ;;  %v776_v62 = vmul.f32 %v3641_v56, %v744_v12  ;;  %3363 = vmatpush3.bf16.msra.mxu1 %v3573_v57  ;;  %v3580_v12 = vld [vmem:[#allocation7 + $0x70] sm:$0xff]  }
 0x181   : > { %v3643_v28 = vpop.eup %3642 }
 0x182   : > { %1143 = vmatmul.mubr.bf16.gmra.mrb[52].mxu0 %v869_v18  ;;  %v777_v54 = vmul.f32 %v3643_v28, %v745_v46  ;;  %v814_v32 = vmul.f32 %v4510_v38, %v776_v62 }
 0x183   : > { %1152 = vmatprep.mubr.bf16.mxu0 %v4069_v41 }
 0x184   : > { %v815_v15 = vmul.f32 %v4510_v38, %v777_v54  ;;  %v852_v36 = vadd.f32 %v4521_v2, %v814_v32 }
 0x186   : > { %v853_v1 = vadd.f32 %v4521_v2, %v815_v15 }
 0x187   : > { %v3645_v40 = vpop.eup %3644 }
 0x188   : > { %v870_v27 = vpack.c.bf16 %v853_v1, %v852_v36  ;;  %v778_v9 = vmul.f32 %v3645_v40, %v746_v59 }
 0x189   : > { %v3647_v16 = vpop.eup %3646 }
 0x18a   : > { %1153 = vmatmul.mubr.bf16.gmra.mrb[56].mxu0 %v870_v27  ;;  %v779_v63 = vmul.f32 %v3647_v16, %v747_v17  ;;  %v816_v23 = vmul.f32 %v4510_v38, %v778_v9 }
 0x18b   : > { %1162 = vmatprep.mubr.bf16.mxu0 %v4069_v41  ;;  %v3574_v41 = vld [vmem:[#allocation7 + $0x58] sm:$0xff]  }
 0x18c   : > { %v817_v24 = vmul.f32 %v4510_v38, %v779_v63  ;;  %v854_v21 = vadd.f32 %v4521_v2, %v816_v23  ;;  %v3575_v38 = vld [vmem:[#allocation7 + $0x18] sm:$0xff]   ;;  %3364 = vmatprep.subr.bf16.mxu1 %v3574_v41  ;;  %v3581_v23 = vld [vmem:[#allocation7 + $0x30] sm:$0xff]  }
 0x18d   : > { %3365 = vmatpush3.bf16.msra.mxu1 %v3575_v38 }
 0x18e   : > { %v855_v25 = vadd.f32 %v4521_v2, %v817_v24  ;;  %v891_v2 = vshrl.u32 %v890_v55, 7  ;;  %3366 = vmatprep.subr.bf16.mxu1 %v3576_v37 }
 0x190   : > { %v871_v49 = vpack.c.bf16 %v855_v25, %v854_v21  ;;  %v892_v42 = vsub.s32 0, %v891_v2  ;;  %v896_v39 = vsub.s32 1, %v891_v2 }
 0x191   : > { %3367 = vmatpush3.bf16.msra.mxu1 %v3577_v6  ;;  %v3582_v6 = vld [vmem:[#allocation7 + $0x78] sm:$0xff]  }
 0x192   : > { %1163 = vmatmul.mubr.bf16.gmra.mrb[60].mxu0 %v871_v49  ;;  %v4754_v14 = vrot.slane %v888_v19, %v892_v42  ;;  %v4776_v10 = vrot.slane %v888_v19, %v896_v39  ;;  %3368 = vmatprep.subr.bf16.mxu1 %v3578_v44 }
 0x195   : > { %3369 = vmatpush3.bf16.msra.mxu1 %v3579_v53 }
 0x196   : > { %3370 = vmatprep.subr.bf16.mxu1 %v3580_v12 }
 0x199   : > { %3371 = vmatpush3.bf16.msra.mxu1 %v3581_v23 }
 0x19a   : > { %3372 = vmatprep.subr.bf16.mxu1 %v3582_v6 }
 0x1ed   : > { %v1014_v13 = vpop.f32.mrb[0].mxu0 }
 0x1ee   : > { %v4757_v20 = vadd.f32 %v1014_v13, %v4754_v14  ;;  %v1016_v50 = vpop.f32.mrb[1].mxu0 }
 0x1ef   : > { %v1018_v58 = vpop.f32.mrb[2].mxu0  ;;  %v1017_v3 = vadd.f32 %v1016_v50, %v4776_v10 }
 0x1f0   : > { %v4760_v7 = vmul.f32 0.70710677, %v4757_v20  ;;  %v4763_v33 = vadd.f32 %v1018_v58, %v4754_v14  ;;  %v1020_v48 = vpop.f32.mrb[3].mxu0  ;;  %v3583_v58 = vld [vmem:[#allocation7 + $0x38] sm:$0xff]  }
 0x1f1   : > { %v4834_v41 = vadd.f32 %v1020_v48, %v4776_v10  ;;  %v4847_v13 = vmul.f32 0.70710677, %v1017_v3  ;;  %3373 = vmatpush3.bf16.msra.mxu1 %v3583_v58 }
 0x1f2   : > { %v4766_v0 = vand.u32 2147483647, %v4760_v7  ;;  %v4769_v11 = vmul.f32 0.70710677, %v4763_v33  ;;  %vm2517_vm0 = vcmp.lt.f32.partialorder %v4760_v7, 0.0 }
 0x1f3   : > { %6908 = vst [vmem:[#allocation14_spill] sm:$0xff] %v4847_v13  ;;  %v4853_v48 = vmul.f32 0.70710677, %v4834_v41 }
 0x1f4   : > { %v1365_v31 = vmul.f32 0.3275911, %v4766_v0  ;;  %v4773_v35 = vand.u32 2147483647, %v4769_v11  ;;  %v2133_v23 = vsub.f32 0.0, %v4766_v0  ;;  %vm2519_vm1 = vcmp.lt.f32.partialorder %v4769_v11, 0.0 }
 0x1f5   : > { %v1024_v47 = vpop.f32.mrb[4].mxu0  ;;  %6909 = vst [vmem:[#allocation15_spill] sm:$0xff] %v4853_v48 }
 0x1f6   : > { %v1429_v45 = vadd.f32 1.0, %v1365_v31  ;;  %v1367_v8 = vmul.f32 0.3275911, %v4773_v35  ;;  %v1026_v51 = vpop.f32.mrb[5].mxu0  ;;  %v4779_v30 = vadd.f32 %v1024_v47, %v4754_v14 }
 0x1f7   : > { %v1028_v61 = vpop.f32.mrb[6].mxu0  ;;  %v4782_v5 = vadd.f32 %v1026_v51, %v4776_v10  ;;  %v1302_v51 = vand.u32 2147483647, %v4847_v13  ;;  %v4897_v13 = vmul.f32 0.5, %v1017_v3 }
 0x1f8   : > { %3648 = vrcp.f32 %v1429_v45  ;;  %v1431_v26 = vadd.f32 1.0, %v1367_v8  ;;  %v1030_v34 = vpop.f32.mrb[7].mxu0  ;;  %v4785_v4 = vadd.f32 %v1028_v61, %v4754_v14  ;;  %v4788_v52 = vmul.f32 0.70710677, %v4779_v30 }
 0x1f9   : > { %v4791_v56 = vadd.f32 %v1030_v34, %v4776_v10  ;;  %v4794_v46 = vmul.f32 0.70710677, %v4782_v5  ;;  %v1304_v34 = vand.u32 2147483647, %v4853_v48  ;;  %6914 = vst [vmem:[#allocation20_spill] sm:$0xff] %v4897_v13 }
 0x1fa   : > { %3650 = vrcp.f32 %v1431_v26  ;;  %v4797_v18 = vmul.f32 0.70710677, %v4785_v4  ;;  %v4800_v28 = vand.u32 2147483647, %v4788_v52  ;;  %vm2521_vm2 = vcmp.lt.f32.partialorder %v4788_v52, 0.0 }
 0x1fb   : > { %v4803_v32 = vand.u32 2147483647, %v4794_v46  ;;  %v4810_v1 = vmul.f32 0.70710677, %v4791_v56  ;;  %v2136_v6 = vsub.f32 0.0, %v1304_v34  ;;  %vm2522_vm3 = vcmp.lt.f32.partialorder %v4794_v46, 0.0 }
 0x1fc   : > { %v4806_v15 = vand.u32 2147483647, %v4797_v18  ;;  %v1369_v36 = vmul.f32 0.3275911, %v4800_v28  ;;  %vm2523_vm4 = vcmp.lt.f32.partialorder %v4797_v18, 0.0 }
 0x1fd   : > { %v1034_v62 = vpop.f32.mrb[8].mxu0  ;;  %6906 = vst [vmem:[#allocation12_spill] sm:$0xff] %v4810_v1  ;;  %v1370_v40 = vmul.f32 0.3275911, %v4803_v32  ;;  %v4817_v16 = vand.u32 2147483647, %v4810_v1  ;;  %v2200_v1 = vmul.f32 %v2136_v6, %v1304_v34 }
 0x1fe   : > { %v1036_v54 = vpop.f32.mrb[9].mxu0  ;;  %v1371_v17 = vmul.f32 0.3275911, %v4806_v15  ;;  %v1433_v9 = vadd.f32 1.0, %v1369_v36  ;;  %v4829_v60 = vadd.f32 %v1034_v62, %v4754_v14 }
 0x1ff   : > { %v1038_v59 = vpop.f32.mrb[10].mxu0  ;;  %v1434_v21 = vadd.f32 1.0, %v1370_v40  ;;  %v1372_v49 = vmul.f32 0.3275911, %v4817_v16  ;;  %v4843_v37 = vadd.f32 %v1036_v54, %v4776_v10 }
 0x200   : > { %v4819_v63 = vpop.f32.mrb[11].mxu0  ;;  %3652 = vrcp.f32 %v1433_v9  ;;  %v1435_v25 = vadd.f32 1.0, %v1371_v17  ;;  %v4840_v42 = vmul.f32 0.70710677, %v4829_v60  ;;  %v4877_v17 = vadd.f32 %v1038_v59, %v4754_v14 }
 0x201   : > { %3654 = vrcp.f32 %v1434_v21  ;;  %v1436_v38 = vadd.f32 1.0, %v1372_v49  ;;  %v4856_v31 = vmul.f32 0.70710677, %v4843_v37  ;;  %v1366_v49 = vmul.f32 0.3275911, %v1302_v51 }
 0x202   : > { %v4814_v27 = vpop.eup %3648  ;;  %3656 = vrcp.f32 %v1435_v25  ;;  %6907 = vst [vmem:[#allocation13_spill] sm:$0xff] %v4840_v42  ;;  %v4850_v50 = vand.u32 2147483647, %v4840_v42  ;;  %v4886_v25 = vmul.f32 0.5, %v4757_v20  ;;  %v2135_v59 = vsub.f32 0.0, %v4773_v35 }
 0x203   : > { %v1557_v24 = vmul.f32 1.0614054, %v4814_v27  ;;  %6910 = vst [vmem:[#allocation16_spill] sm:$0xff] %v4856_v31  ;;  %3658 = vrcp.f32 %v1436_v38  ;;  %v4861_v47 = vand.u32 2147483647, %v4856_v31  ;;  %v2197_v20 = vmul.f32 %v2133_v23, %v4766_v0 }
 0x204   : > { %v4825_v22 = vpop.eup %3650  ;;  %v1373_v8 = vmul.f32 0.3275911, %v4850_v50  ;;  %v4894_v48 = vmul.f32 0.70710677, %v4877_v17  ;;  %v1368_v42 = vmul.f32 0.3275911, %v1304_v34 }
 0x205   : > { %v4823_v43 = vpop.f32.mrb[12].mxu0  ;;  %v1621_v57 = vadd.f32 -1.4531521, %v1557_v24  ;;  %v1559_v2 = vmul.f32 1.0614054, %v4825_v22 }
 0x206   : > { %v4831_v29 = vpop.f32.mrb[13].mxu0  ;;  %v1437_v53 = vadd.f32 1.0, %v1373_v8  ;;  %v1374_v12 = vmul.f32 0.3275911, %v4861_v47  ;;  %6913 = vst [vmem:[#allocation19_spill] sm:$0xff] %v4894_v48 }
 0x207   : > { %v4836_v55 = vpop.f32.mrb[14].mxu0  ;;  %v1685_v39 = vmul.f32 %v4814_v27, %v1621_v57  ;;  %v1623_v45 = vadd.f32 -1.4531521, %v1559_v2  ;;  %v2134_v2 = vsub.f32 0.0, %v1302_v51 }
 0x208   : > { %v4845_v19 = vpop.f32.mrb[15].mxu0  ;;  %3660 = vrcp.f32 %v1437_v53  ;;  %v1438_v57 = vadd.f32 1.0, %v1374_v12 }
 0x209   : > { %v1749_v54 = vadd.f32 1.4214138, %v1685_v39  ;;  %v1687_v36 = vmul.f32 %v4825_v22, %v1623_v45 }
 0x20a   : > { %v4863_v44 = vpop.eup %3652  ;;  %3662 = vrcp.f32 %v1438_v57  ;;  %v2261_v57 = vmul.f32 1.442695, %v2197_v20  ;;  %v2138_v20 = vsub.f32 0.0, %v4803_v32 }
 0x20b   : > { %v4868_v61 = vpop.eup %3654  ;;  %v1561_v40 = vmul.f32 1.0614054, %v4863_v44  ;;  %v1813_v39 = vmul.f32 %v4814_v27, %v1749_v54  ;;  %v1751_v45 = vadd.f32 1.4214138, %v1687_v36  ;;  %v4905_v54 = vand.u32 2147483647, %v4894_v48 }
 0x20c   : > { %v1562_v24 = vmul.f32 1.0614054, %v4868_v61  ;;  %v4883_v21 = vpop.eup %3656  ;;  %v2198_v36 = vmul.f32 %v2134_v2, %v1302_v51  ;;  %v2137_v2 = vsub.f32 0.0, %v4800_v28 }
 0x20d   : > { %v4866_v26 = vpop.f32.mrb[16].mxu0  ;;  %v1563_v58 = vmul.f32 1.0614054, %v4883_v21  ;;  %v1625_v8 = vadd.f32 -1.4531521, %v1561_v40  ;;  %v4899_v12 = vpop.eup %3658  ;;  %v2199_v40 = vmul.f32 %v2135_v59, %v4773_v35  ;;  %v1815_v23 = vmul.f32 %v4825_v22, %v1751_v45 }
 0x20e   : > { %v4872_v62 = vpop.f32.mrb[17].mxu0  ;;  %v1626_v53 = vadd.f32 -1.4531521, %v1562_v24  ;;  %v1877_v3 = vadd.f32 -0.28449672, %v1813_v39 }
 0x20f   : > { %v4879_v9 = vpop.f32.mrb[18].mxu0  ;;  %v1627_v31 = vadd.f32 -1.4531521, %v1563_v58  ;;  %v1689_v24 = vmul.f32 %v4863_v44, %v1625_v8  ;;  %v4916_v58 = vmul.f32 0.5, %v4834_v41  ;;  %v1564_v35 = vmul.f32 1.0614054, %v4899_v12 }
 0x210   : > { %6911 = vst [vmem:[#allocation17_spill] sm:$0xff] %v4879_v9  ;;  %v4888_v38 = vpop.f32.mrb[19].mxu0  ;;  %v4902_v9 = vmul.f32 0.5, %v4763_v33  ;;  %v1690_v51 = vmul.f32 %v4868_v61, %v1626_v53  ;;  %v2263_v45 = vmul.f32 1.442695, %v2198_v36  ;;  %v2139_v41 = vsub.f32 0.0, %v4806_v15 }
 0x211   : > { %6912 = vst [vmem:[#allocation18_spill] sm:$0xff] %v4888_v38  ;;  %v1430_v38 = vadd.f32 1.0, %v1366_v49  ;;  %v1375_v49 = vmul.f32 0.3275911, %v4905_v54  ;;  %6917 = vst [vmem:[#allocation23_spill] sm:$0xff] %v4916_v58  ;;  %v1691_v59 = vmul.f32 %v4883_v21, %v1627_v31  ;;  %v1941_v53 = vmul.f32 %v4814_v27, %v1877_v3 }
 0x212   : > { %v2265_v8 = vmul.f32 1.442695, %v2199_v40  ;;  %v4928_v58 = vpop.eup %3660  ;;  %v1879_v13 = vadd.f32 -0.28449672, %v1815_v23  ;;  %v1754_v31 = vadd.f32 1.4214138, %v1690_v51  ;;  %v2201_v40 = vmul.f32 %v2137_v2, %v4800_v28 }
 0x213   : > { %3664 = vrcp.f32 %v1430_v38  ;;  %v1439_v6 = vadd.f32 1.0, %v1375_v49  ;;  %v1753_v38 = vadd.f32 1.4214138, %v1689_v24  ;;  %v1628_v49 = vadd.f32 -1.4531521, %v1564_v35 }
 0x214   : > { %3666 = vpow2.f32 %v2261_v57  ;;  %v4936_v36 = vmul.f32 0.5, %v4779_v30  ;;  %v4941_v3 = vpop.eup %3662  ;;  %v2203_v23 = vmul.f32 %v2139_v41, %v4806_v15  ;;  %v1565_v24 = vmul.f32 1.0614054, %v4928_v58 }
 0x215   : > { %v4908_v0 = vpop.f32.mrb[20].mxu0  ;;  %3668 = vrcp.f32 %v1439_v6  ;;  %v2005_v30 = vadd.f32 0.2548296, %v1941_v53  ;;  %v1943_v28 = vmul.f32 %v4825_v22, %v1879_v13  ;;  %v1817_v51 = vmul.f32 %v4863_v44, %v1753_v38 }
 0x216   : > { %6915 = vst [vmem:[#allocation21_spill] sm:$0xff] %v4908_v0  ;;  %v4913_v33 = vpop.f32.mrb[21].mxu0  ;;  %3670 = vpow2.f32 %v2265_v8  ;;  %v1818_v2 = vmul.f32 %v4868_v61, %v1754_v31  ;;  %v2140_v15 = vsub.f32 0.0, %v4817_v16  ;;  %v4965_v13 = vadd.f32 %v4819_v63, %v4776_v10 }
 0x217   : > { %6916 = vst [vmem:[#allocation22_spill] sm:$0xff] %v4913_v33  ;;  %v4920_v34 = vpop.f32.mrb[22].mxu0  ;;  %v1432_v33 = vadd.f32 1.0, %v1368_v42  ;;  %v2202_v42 = vmul.f32 %v2138_v20, %v4803_v32  ;;  %v1692_v32 = vmul.f32 %v4899_v12, %v1628_v49  ;;  %v1566_v20 = vmul.f32 1.0614054, %v4941_v3 }
 0x218   : > { %6918 = vst [vmem:[#allocation24_spill] sm:$0xff] %v4920_v34  ;;  %v4924_v39 = vpop.f32.mrb[23].mxu0  ;;  %v4931_v34 = vmul.f32 1.442695, %v2200_v1  ;;  %v4944_v1 = vmul.f32 0.5, %v4782_v5  ;;  %v4957_v5 = vmul.f32 0.5, %v4785_v4  ;;  %3672 = vpow2.f32 %v2263_v45 }
 0x219   : > { %6919 = vst [vmem:[#allocation25_spill] sm:$0xff] %v4924_v39  ;;  %v1755_v39 = vadd.f32 1.4214138, %v1691_v59  ;;  %v2269_v59 = vmul.f32 1.442695, %v2201_v40  ;;  %v2069_v4 = vmul.f32 %v4814_v27, %v2005_v30  ;;  %v2141_v40 = vsub.f32 0.0, %v4850_v50 }
 0x21a   : > { %v2271_v8 = vmul.f32 1.442695, %v2202_v42  ;;  %v2273_v41 = vmul.f32 1.442695, %v2203_v23  ;;  %v1629_v53 = vadd.f32 -1.4531521, %v1565_v24  ;;  %3674 = vrcp.f32 %v1432_v33 }
 0x21b   : > { %v1819_v6 = vmul.f32 %v4883_v21, %v1755_v39  ;;  %v2007_v31 = vadd.f32 0.2548296, %v1943_v28  ;;  %v1881_v49 = vadd.f32 -0.28449672, %v1817_v51  ;;  %v1882_v39 = vadd.f32 -0.28449672, %v1818_v2 }
 0x21c   : > { %3676 = vpow2.f32 %v2269_v59  ;;  %v1630_v45 = vadd.f32 -1.4531521, %v1566_v20  ;;  %v4975_v42 = vmul.f32 0.70710677, %v4965_v13  ;;  %v4978_v27 = vmul.f32 0.5, %v4791_v56 }
 0x21d   : > { %v4933_v0 = vpop.f32.mrb[24].mxu0  ;;  %v4967_v38 = vpop.eup %3664  ;;  %v1883_v63 = vadd.f32 -0.28449672, %v1819_v6  ;;  %3678 = vpow2.f32 %v2271_v8  ;;  %v4981_v24 = vmul.f32 0.5, %v4829_v60  ;;  %v1693_v33 = vmul.f32 %v4928_v58, %v1629_v53 }
 0x21e   : > { %v4939_v48 = vpop.f32.mrb[25].mxu0  ;;  %6923 = vst [vmem:[#allocation29_spill] sm:$0xff] %v4967_v38  ;;  %v3667_v23 = vpop.eup %3666  ;;  %v2071_v28 = vmul.f32 %v4825_v22, %v2007_v31  ;;  %3680 = vpow2.f32 %v2273_v41  ;;  %v2205_v51 = vmul.f32 %v2141_v40, %v4850_v50  ;;  %v1945_v2 = vmul.f32 %v4863_v44, %v1881_v49 }
 0x21f   : > { %6920 = vst [vmem:[#allocation26_spill] sm:$0xff] %v4939_v48  ;;  %v4949_v57 = vpop.f32.mrb[26].mxu0  ;;  %v4984_v30 = vpop.eup %3668  ;;  %v1947_v60 = vmul.f32 %v4883_v21, %v1883_v63  ;;  %v4993_v6 = vmul.f32 0.5, %v4843_v37  ;;  %v1694_v20 = vmul.f32 %v4941_v3, %v1630_v45  ;;  %v4997_v22 = vand.u32 2147483647, %v4975_v42 }
 0x220   : > { %6921 = vst [vmem:[#allocation27_spill] sm:$0xff] %v4949_v57  ;;  %v4953_v35 = vpop.f32.mrb[27].mxu0  ;;  %v2204_v57 = vmul.f32 %v2140_v15, %v4817_v16  ;;  %v2389_v16 = vmul.f32 %v3667_v23, %v2069_v4  ;;  %v3671_v59 = vpop.eup %3670  ;;  %v1757_v50 = vadd.f32 1.4214138, %v1693_v33  ;;  %v2142_v8 = vsub.f32 0.0, %v4861_v47 }
 0x221   : > { %6922 = vst [vmem:[#allocation28_spill] sm:$0xff] %v4953_v35  ;;  %v1756_v35 = vadd.f32 1.4214138, %v1692_v32  ;;  %v1946_v32 = vmul.f32 %v4868_v61, %v1882_v39  ;;  %v1567_v41 = vmul.f32 1.0614054, %v4984_v30  ;;  %v5006_v53 = vmul.f32 %v3671_v59, %v2071_v28 }
 0x222   : > { %v2275_v15 = vmul.f32 1.442695, %v2204_v57  ;;  %v5004_v57 = vadd.f32 %v4823_v43, %v4754_v14  ;;  %v2277_v37 = vmul.f32 1.442695, %v2205_v51  ;;  %v1376_v4 = vmul.f32 0.3275911, %v4997_v22  ;;  %v5009_v31 = vpop.eup %3672 }
 0x223   : > { %v1820_v56 = vmul.f32 %v4899_v12, %v1756_v35  ;;  %v2453_v35 = vsub.f32 1.0, %v2389_v16  ;;  %6925 = vst [vmem:[#allocation31_spill] sm:$0xff] %v5009_v31  ;;  %3682 = vpow2.f32 %v4931_v34  ;;  %v2009_v49 = vadd.f32 0.2548296, %v1945_v2 }
 0x224   : > { %v2010_v40 = vadd.f32 0.2548296, %v1946_v32  ;;  %v2011_v63 = vadd.f32 0.2548296, %v1947_v60  ;;  %v1758_v45 = vadd.f32 1.4214138, %v1694_v20  ;;  %v5014_v43 = vadd.f32 %v4831_v29, %v4776_v10  ;;  %v5016_v33 = vpop.eup %3674 }
 0x225   : > { %v4972_v48 = vpop.f32.mrb[28].mxu0  ;;  %v1884_v39 = vadd.f32 -0.28449672, %v1820_v56  ;;  %v1440_v23 = vadd.f32 1.0, %v1376_v4  ;;  %6926 = vst [vmem:[#allocation32_spill] sm:$0xff] %v5016_v33  ;;  %3684 = vpow2.f32 %v2275_v15  ;;  %v1821_v16 = vmul.f32 %v4928_v58, %v1757_v50 }
 0x226   : > { %6924 = vst [vmem:[#allocation30_spill] sm:$0xff] %v4972_v48  ;;  %v2206_v28 = vmul.f32 %v2142_v8, %v4861_v47  ;;  %v1631_v51 = vadd.f32 -1.4531521, %v1567_v41  ;;  %v3677_v59 = vpop.eup %3676  ;;  %v2581_v34 = vsub.f32 0.0, %v2453_v35  ;;  %v2455_v2 = vsub.f32 1.0, %v5006_v53 }
 0x227   : > { %3686 = vrcp.f32 %v1440_v23  ;;  %v5022_v32 = vmul.f32 0.70710677, %v5004_v57  ;;  %v3679_v56 = vpop.eup %3678  ;;  %v2073_v29 = vmul.f32 %v4863_v44, %v2009_v49  ;;  %v2074_v15 = vmul.f32 %v4868_v61, %v2010_v40 }
 0x228   : > { %v1948_v60 = vmul.f32 %v4899_v12, %v1884_v39  ;;  %3688 = vpow2.f32 %v2277_v37  ;;  %v3681_v47 = vpop.eup %3680  ;;  %v2075_v20 = vmul.f32 %v4883_v21, %v2011_v63  ;;  %v1822_v50 = vmul.f32 %v4941_v3, %v1758_v45 }
 0x229   : > { %v5031_v8 = vand.u32 2147483647, %v5022_v32  ;;  %v5034_v41 = vmul.f32 0.70710677, %v5014_v43  ;;  %v1885_v53 = vadd.f32 -0.28449672, %v1821_v16  ;;  %v1695_v44 = vmul.f32 %v4984_v30, %v1631_v51 }
 0x22a   : > { %v2279_v4 = vmul.f32 1.442695, %v2206_v28  ;;  %v2143_v61 = vsub.f32 0.0, %v4905_v54  ;;  %v2645_v37 = vsel %vm2517_vm0, %v2581_v34, %v2453_v35  ;;  %v2583_v49 = vsub.f32 0.0, %v2455_v2 }
 0x22b   : > { %v1377_v21 = vmul.f32 0.3275911, %v5031_v8  ;;  %v5042_v40 = vand.u32 2147483647, %v5034_v41  ;;  %v2393_v39 = vmul.f32 %v3677_v59, %v2073_v29  ;;  %v5044_v63 = vmul.f32 %v3679_v56, %v2074_v15 }
 0x22c   : > { %v2012_v45 = vadd.f32 0.2548296, %v1948_v60  ;;  %v5048_v23 = vadd.f32 %v4836_v55, %v4754_v14  ;;  %v5050_v16 = vmul.f32 %v3681_v47, %v2075_v20  ;;  %v1886_v28 = vadd.f32 -0.28449672, %v1822_v50 }
 0x22d   : > { %v1441_v51 = vadd.f32 1.0, %v1377_v21  ;;  %v1378_v7 = vmul.f32 0.3275911, %v5042_v40  ;;  %v5053_v35 = vpop.eup %3682  ;;  %v1949_v34 = vmul.f32 %v4928_v58, %v1885_v53  ;;  %3690 = vpow2.f32 %v2279_v4 }
 0x22e   : > { %6927 = vst [vmem:[#allocation33_spill] sm:$0xff] %v5053_v35  ;;  %v5057_v59 = vmul.f32 0.5, %v4877_v17  ;;  %v1759_v56 = vadd.f32 1.4214138, %v1695_v44  ;;  %v2709_v29 = vadd.f32 1.0, %v2645_v37  ;;  %v2207_v55 = vmul.f32 %v2143_v61, %v4905_v54 }
 0x22f   : > { %3692 = vrcp.f32 %v1441_v51  ;;  %v1442_v15 = vadd.f32 1.0, %v1378_v7  ;;  %v3685_v60 = vpop.eup %3684  ;;  %v2457_v47 = vsub.f32 1.0, %v2393_v39  ;;  %v2458_v20 = vsub.f32 1.0, %v5044_v63 }
 0x230   : > { %v5063_v50 = vmul.f32 0.70710677, %v5048_v23  ;;  %v5067_v53 = vadd.f32 %v4845_v19, %v4776_v10  ;;  %v2647_v4 = vsel %vm2519_vm1, %v2583_v49, %v2455_v2  ;;  %v2459_v54 = vsub.f32 1.0, %v5050_v16 }
 0x231   : > { %v5069_v17 = vpop.eup %3686  ;;  %v2076_v44 = vmul.f32 %v4899_v12, %v2012_v45  ;;  %v1950_v61 = vmul.f32 %v4941_v3, %v1886_v28  ;;  %v2013_v21 = vadd.f32 0.2548296, %v1949_v34  ;;  %v1823_v19 = vmul.f32 %v4984_v30, %v1759_v56 }
 0x232   : > { %v3689_v37 = vpop.eup %3688  ;;  %3694 = vrcp.f32 %v1442_v15  ;;  %v5081_v39 = vadd.f32 %v4866_v26, %v4754_v14  ;;  %v5084_v11 = vmul.f32 %v2709_v29, %v4886_v25  ;;  %v1568_v2 = vmul.f32 1.0614054, %v5069_v17 }
 0x233   : > { %v5088_v12 = vand.u32 2147483647, %v5063_v50  ;;  %v5091_v49 = vmul.f32 0.70710677, %v5067_v53  ;;  %v2711_v63 = vadd.f32 1.0, %v2647_v4  ;;  %v2585_v45 = vsub.f32 0.0, %v2457_v47 }
 0x234   : > { %6928 = vst [vmem:[#allocation34_spill] sm:$0xff] %v5084_v11  ;;  %v2586_v16 = vsub.f32 0.0, %v2458_v20  ;;  %v2281_v28 = vmul.f32 1.442695, %v2207_v55  ;;  %v2396_v51 = vmul.f32 %v3685_v60, %v2076_v44  ;;  %v2014_v7 = vadd.f32 0.2548296, %v1950_v61 }
 0x235   : > { %v1379_v26 = vmul.f32 0.3275911, %v5088_v12  ;;  %v5095_v34 = vand.u32 2147483647, %v5091_v49  ;;  %v2587_v25 = vsub.f32 0.0, %v2459_v54  ;;  %v2077_v56 = vmul.f32 %v4928_v58, %v2013_v21  ;;  %v5106_v60 = vpop.f32.mrb[29].mxu0 }
 0x236   : > { %v1887_v29 = vadd.f32 -0.28449672, %v1823_v19  ;;  %v5099_v15 = vmul.f32 0.70710677, %v5081_v39  ;;  %v1632_v35 = vadd.f32 -1.4531521, %v1568_v2  ;;  %v5104_v55 = vadd.f32 %v4872_v62, %v4776_v10 }
 0x237   : > { %v1443_v31 = vadd.f32 1.0, %v1379_v26  ;;  %v1380_v4 = vmul.f32 0.3275911, %v5095_v34  ;;  %6929 = vst [vmem:[#allocation35_spill] sm:$0xff] %v5106_v60  ;;  %v3691_v44 = vpop.eup %3690  ;;  %v5109_v61 = vmul.f32 %v2711_v63, %v4902_v9  ;;  %v2649_v58 = vsel %vm2521_vm2, %v2585_v45, %v2457_v47  ;;  %v6931_v21 = vld [vmem:[#allocation12_spill] sm:$0xff]  ;;  %v5117_v2 = vpop.f32.mrb[30].mxu0 }
 0x238   : > { %vm2524_vm5 = vcmp.lt.f32.partialorder %v6931_v21, 0.0  ;;  %3696 = vpow2.f32 %v2281_v28  ;;  %v5115_v19 = vand.u32 2147483647, %v5099_v15  ;;  %6932 = vst [vmem:[#allocation12_spill] sm:$0xff] %v5117_v2  ;;  %v2460_v62 = vsub.f32 1.0, %v2396_v51  ;;  %v5122_v9 = vpop.f32.mrb[31].mxu0 }
 0x239   : > { %6930 = vst [vmem:[#allocation36_spill] sm:$0xff] %v5109_v61  ;;  %v5119_v26 = vpop.eup %3692  ;;  %v2078_v11 = vmul.f32 %v4941_v3, %v2014_v7  ;;  %3698 = vrcp.f32 %v1443_v31  ;;  %v1444_v60 = vadd.f32 1.0, %v1380_v4  ;;  %6933 = vst [vmem:[#allocation37_spill] sm:$0xff] %v5122_v9  ;;  %v2650_v52 = vsel %vm2522_vm3, %v2586_v16, %v2458_v20  ;;  %v6934_v16 = vld [vmem:[#allocation13_spill] sm:$0xff] }
 0x23a   : > { %v2397_v47 = vmul.f32 %v3689_v37, %v2077_v56  ;;  %v5127_v63 = vmul.f32 0.5, %v4965_v13  ;;  %v1381_v45 = vmul.f32 0.3275911, %v5115_v19  ;;  %v2651_v28 = vsel %vm2523_vm4, %v2587_v25, %v2459_v54 }
 0x23b   : > { %v1951_v51 = vmul.f32 %v4984_v30, %v1887_v29  ;;  %v1696_v3 = vmul.f32 %v5069_v17, %v1632_v35  ;;  %v5135_v31 = vmul.f32 0.70710677, %v5104_v55  ;;  %v2713_v46 = vadd.f32 1.0, %v2649_v58  ;;  %v5148_v58 = vpop.f32.mrb[32].mxu0 }
 0x23c   : > { %v5137_v7 = vpop.eup %3694  ;;  %v5140_v20 = vmul.f32 0.5, %v5004_v57  ;;  %v1569_v13 = vmul.f32 1.0614054, %v5119_v26  ;;  %3700 = vrcp.f32 %v1444_v60  ;;  %v2588_v37 = vsub.f32 0.0, %v2460_v62  ;;  %6935 = vst [vmem:[#allocation13_spill] sm:$0xff] %v5148_v58  ;;  %v6940_v58 = vld [vmem:[#allocation18_spill] sm:$0xff] }
 0x23d   : > { %vm2525_vm6 = vcmp.lt.f32.partialorder %v6934_v16, 0.0  ;;  %v2398_v18 = vmul.f32 %v3691_v44, %v2078_v11  ;;  %v1445_v54 = vadd.f32 1.0, %v1381_v45  ;;  %v5145_v25 = vand.u32 2147483647, %v5135_v31  ;;  %v6937_v11 = vld [vmem:[#allocation16_spill] sm:$0xff] }
 0x23e   : > { %v2714_v35 = vadd.f32 1.0, %v2650_v52  ;;  %v2715_v56 = vadd.f32 1.0, %v2651_v28  ;;  %v2461_v29 = vsub.f32 1.0, %v2397_v47  ;;  %v1570_v4 = vmul.f32 1.0614054, %v5137_v7  ;;  %v6938_v52 = vld [vmem:[#allocation17_spill] sm:$0xff] }
 0x23f   : > { %v2015_v57 = vadd.f32 0.2548296, %v1951_v51  ;;  %v1760_v9 = vadd.f32 1.4214138, %v1696_v3  ;;  %3702 = vrcp.f32 %v1445_v54  ;;  %v1382_v60 = vmul.f32 0.3275911, %v5145_v25 }
 0x240   : > { %v5152_v2 = vmul.f32 %v2713_v46, %v4936_v36  ;;  %vm2526_vm7 = vcmp.lt.f32.partialorder %v6937_v11, 0.0  ;;  %v2144_v44 = vsub.f32 0.0, %v4997_v22  ;;  %v1633_v45 = vadd.f32 -1.4531521, %v1569_v13  ;;  %v5160_v28 = vpop.f32.mrb[33].mxu0 }
 0x241   : > { %v5158_v47 = vadd.f32 %v6938_v52, %v4754_v14  ;;  %6939 = vst [vmem:[#allocation16_spill] sm:$0xff] %v5160_v28  ;;  %v2652_v51 = vsel %vm2524_vm5, %v2588_v37, %v2460_v62  ;;  %v2462_v3 = vsub.f32 1.0, %v2398_v18  ;;  %v1446_v54 = vadd.f32 1.0, %v1382_v60  ;;  %v5168_v46 = vpop.f32.mrb[34].mxu0 }
 0x242   : > { %6936 = vst [vmem:[#allocation38_spill] sm:$0xff] %v5152_v2  ;;  %v5166_v36 = vadd.f32 %v6940_v58, %v4776_v10  ;;  %6941 = vst [vmem:[#allocation17_spill] sm:$0xff] %v5168_v46  ;;  %v3697_v2 = vpop.eup %3696  ;;  %v5171_v13 = vmul.f32 %v2714_v35, %v4944_v1  ;;  %v5174_v52 = vmul.f32 %v2715_v56, %v4957_v5  ;;  %v2589_v61 = vsub.f32 0.0, %v2461_v29  ;;  %v5176_v33 = vpop.f32.mrb[35].mxu0 }
 0x243   : > { %v1634_v28 = vadd.f32 -1.4531521, %v1570_v4  ;;  %6944 = vst [vmem:[#allocation40_spill] sm:$0xff] %v5176_v33  ;;  %v5178_v21 = vpop.eup %3698  ;;  %v2079_v62 = vmul.f32 %v4984_v30, %v2015_v57  ;;  %v1824_v37 = vmul.f32 %v5069_v17, %v1760_v9  ;;  %3704 = vrcp.f32 %v1446_v54 }
 0x244   : > { %6942 = vst [vmem:[#allocation18_spill] sm:$0xff] %v5171_v13  ;;  %6943 = vst [vmem:[#allocation39_spill] sm:$0xff] %v5174_v52  ;;  %v5183_v18 = vmul.f32 0.70710677, %v5158_v47  ;;  %v2716_v58 = vadd.f32 1.0, %v2652_v51  ;;  %v2208_v1 = vmul.f32 %v2144_v44, %v4997_v22  ;;  %v1697_v5 = vmul.f32 %v5119_v26, %v1633_v45  ;;  %v5203_v51 = vpop.f32.mrb[36].mxu0 }
 0x245   : > { %v1571_v35 = vmul.f32 1.0614054, %v5178_v21  ;;  %v2590_v56 = vsub.f32 0.0, %v2462_v3  ;;  %v5189_v4 = vmul.f32 0.5, %v5014_v43  ;;  %v5195_v30 = vmul.f32 0.70710677, %v5166_v36 }
 0x246   : > { %v5192_v60 = vand.u32 2147483647, %v5183_v18  ;;  %v5197_v9 = vpop.eup %3700  ;;  %v2653_v57 = vsel %vm2525_vm6, %v2589_v61, %v2461_v29  ;;  %v2145_v22 = vsub.f32 0.0, %v5031_v8  ;;  %v1698_v44 = vmul.f32 %v5137_v7, %v1634_v28  ;;  %6945 = vst [vmem:[#allocation41_spill] sm:$0xff] %v5203_v51  ;;  %v6947_v51 = vld [vmem:[#allocation19_spill] sm:$0xff] }
 0x247   : > { %v1635_v45 = vadd.f32 -1.4531521, %v1571_v35  ;;  %v2399_v43 = vmul.f32 %v3697_v2, %v2079_v62  ;;  %v1888_v54 = vadd.f32 -0.28449672, %v1824_v37  ;;  %v1572_v33 = vmul.f32 1.0614054, %v5197_v9 }
 0x248   : > { %v1383_v46 = vmul.f32 0.3275911, %v5192_v60  ;;  %v2283_v52 = vmul.f32 1.442695, %v2208_v1  ;;  %v1761_v13 = vadd.f32 1.4214138, %v1697_v5  ;;  %v2654_v29 = vsel %vm2526_vm7, %v2590_v56, %v2462_v3 }
 0x249   : > { %v2146_v38 = vsub.f32 0.0, %v5042_v40  ;;  %v1699_v16 = vmul.f32 %v5178_v21, %v1635_v45  ;;  %v5209_v61 = vpop.eup %3702  ;;  %v1636_v28 = vadd.f32 -1.4531521, %v1572_v33  ;;  %v5214_v2 = vand.u32 2147483647, %v5195_v30  ;;  %v5216_v62 = vpop.f32.mrb[37].mxu0 }
 0x24a   : > { %v1447_v35 = vadd.f32 1.0, %v1383_v46  ;;  %6946 = vst [vmem:[#allocation42_spill] sm:$0xff] %v5216_v62  ;;  %v2717_v37 = vadd.f32 1.0, %v2653_v57  ;;  %vm2527_vm8 = vcmp.lt.f32.partialorder %v6947_v51, 0.0  ;;  %v2209_v1 = vmul.f32 %v2145_v22, %v5031_v8  ;;  %v6949_v51 = vld [vmem:[#allocation21_spill] sm:$0xff] }
 0x24b   : > { %v1762_v5 = vadd.f32 1.4214138, %v1698_v44  ;;  %v1573_v45 = vmul.f32 1.0614054, %v5209_v61  ;;  %v5222_v48 = vmul.f32 %v2716_v58, %v4978_v27  ;;  %v2463_v11 = vsub.f32 1.0, %v2399_v43 }
 0x24c   : > { %v1952_v33 = vmul.f32 %v5069_v17, %v1888_v54  ;;  %3706 = vrcp.f32 %v1447_v35  ;;  %v2718_v3 = vadd.f32 1.0, %v2654_v29  ;;  %v1825_v46 = vmul.f32 %v5119_v26, %v1761_v13 }
 0x24d   : > { %3708 = vpow2.f32 %v2283_v52  ;;  %v1763_v56 = vadd.f32 1.4214138, %v1699_v16  ;;  %v5226_v57 = vpop.eup %3704  ;;  %v2210_v62 = vmul.f32 %v2146_v38, %v5042_v40  ;;  %v2147_v8 = vsub.f32 0.0, %v5088_v12 }
 0x24e   : > { %v1700_v22 = vmul.f32 %v5197_v9, %v1636_v28  ;;  %v1384_v27 = vmul.f32 0.3275911, %v5214_v2  ;;  %v5233_v58 = vmul.f32 %v2717_v37, %v4981_v24  ;;  %v2285_v44 = vmul.f32 1.442695, %v2209_v1 }
 0x24f   : > { %v1826_v43 = vmul.f32 %v5137_v7, %v1762_v5  ;;  %v1637_v52 = vadd.f32 -1.4531521, %v1573_v45  ;;  %v2591_v54 = vsub.f32 0.0, %v2463_v11  ;;  %v2016_v13 = vadd.f32 0.2548296, %v1952_v33 }
 0x250   : > { %6948 = vst [vmem:[#allocation19_spill] sm:$0xff] %v5233_v58  ;;  %v5237_v16 = vmul.f32 0.5, %v5048_v23  ;;  %v1448_v29 = vadd.f32 1.0, %v1384_v27  ;;  %v1889_v38 = vadd.f32 -0.28449672, %v1825_v46  ;;  %v1827_v40 = vmul.f32 %v5178_v21, %v1763_v56 }
 0x251   : > { %v2148_v28 = vsub.f32 0.0, %v5095_v34  ;;  %v1574_v35 = vmul.f32 1.0614054, %v5226_v57  ;;  %v5243_v24 = vmul.f32 %v2718_v3, %v4993_v6  ;;  %v2287_v37 = vmul.f32 1.442695, %v2210_v62 }
 0x252   : > { %v2211_v1 = vmul.f32 %v2147_v8, %v5088_v12  ;;  %v1764_v5 = vadd.f32 1.4214138, %v1700_v22  ;;  %3710 = vpow2.f32 %v2285_v44  ;;  %v1890_v45 = vadd.f32 -0.28449672, %v1826_v43 }
 0x253   : > { %v1701_v23 = vmul.f32 %v5209_v61, %v1637_v52  ;;  %v2149_v33 = vsub.f32 0.0, %v5115_v19  ;;  %v2655_v46 = vsel %vm2527_vm8, %v2591_v54, %v2463_v11  ;;  %v2080_v56 = vmul.f32 %v5069_v17, %v2016_v13  ;;  %v5263_v17 = vpop.f32.mrb[38].mxu0 }
 0x254   : > { %v5252_v27 = vmul.f32 0.5, %v5067_v53  ;;  %3712 = vrcp.f32 %v1448_v29  ;;  %v1953_v6 = vmul.f32 %v5119_v26, %v1889_v38  ;;  %v1891_v62 = vadd.f32 -0.28449672, %v1827_v40  ;;  %6950 = vst [vmem:[#allocation21_spill] sm:$0xff] %v5263_v17 }
 0x255   : > { %v2212_v12 = vmul.f32 %v2148_v28, %v5095_v34  ;;  %v1638_v3 = vadd.f32 -1.4531521, %v1574_v35  ;;  %3714 = vpow2.f32 %v2287_v37  ;;  %v2289_v22 = vmul.f32 1.442695, %v2211_v1 }
 0x256   : > { %v5256_v8 = vpop.eup %3706  ;;  %v1828_v44 = vmul.f32 %v5197_v9, %v1764_v5  ;;  %v5261_v11 = vadd.f32 %v6949_v51, %v4754_v14  ;;  %v1954_v43 = vmul.f32 %v5137_v7, %v1890_v45  ;;  %v5267_v52 = vmul.f32 0.5, %v5081_v39 }
 0x257   : > { %v3709_v53 = vpop.eup %3708  ;;  %v1765_v34 = vadd.f32 1.4214138, %v1701_v23  ;;  %v2213_v54 = vmul.f32 %v2149_v33, %v5115_v19  ;;  %v2719_v13 = vadd.f32 1.0, %v2655_v46  ;;  %v2150_v38 = vsub.f32 0.0, %v5145_v25 }
 0x258   : > { %v2400_v29 = vmul.f32 %v3709_v53, %v2080_v56  ;;  %v1575_v40 = vmul.f32 1.0614054, %v5256_v8  ;;  %v2017_v28 = vadd.f32 0.2548296, %v1953_v6  ;;  %v1955_v35 = vmul.f32 %v5178_v21, %v1891_v62 }
 0x259   : > { %v2291_v37 = vmul.f32 1.442695, %v2212_v12  ;;  %v1702_v1 = vmul.f32 %v5226_v57, %v1638_v3  ;;  %3716 = vpow2.f32 %v2289_v22  ;;  %v1892_v5 = vadd.f32 -0.28449672, %v1828_v44  ;;  %v5289_v3 = vpop.f32.mrb[39].mxu0 }
 0x25a   : > { %v1639_v45 = vadd.f32 -1.4531521, %v1575_v40  ;;  %v5275_v39 = vmul.f32 0.70710677, %v5261_v11  ;;  %vm2528_vm9 = vcmp.lt.f32.partialorder %v4975_v42, 0.0  ;;  %v1829_v23 = vmul.f32 %v5209_v61, %v1765_v34  ;;  %6952 = vst [vmem:[#allocation44_spill] sm:$0xff] %v5289_v3 }
 0x25b   : > { %v2018_v19 = vadd.f32 0.2548296, %v1954_v43  ;;  %v2293_v33 = vmul.f32 1.442695, %v2213_v54  ;;  %v5280_v46 = vmul.f32 0.5, %v5104_v55  ;;  %v5283_v56 = vmul.f32 %v2719_v13, %v5057_v59 }
 0x25c   : > { %v2464_v6 = vsub.f32 1.0, %v2400_v29  ;;  %v2214_v62 = vmul.f32 %v2150_v38, %v5145_v25  ;;  %v5287_v12 = vand.u32 2147483647, %v5275_v39  ;;  %v3711_v22 = vpop.eup %3710  ;;  %v2081_v44 = vmul.f32 %v5119_v26, %v2017_v28  ;;  %v6953_v25 = vld [vmem:[#allocation22_spill] sm:$0xff] }
 0x25d   : > { %6951 = vst [vmem:[#allocation43_spill] sm:$0xff] %v5283_v56  ;;  %v2019_v51 = vadd.f32 0.2548296, %v1955_v35  ;;  %3718 = vpow2.f32 %v2291_v37  ;;  %v1766_v53 = vadd.f32 1.4214138, %v1702_v1  ;;  %v1956_v55 = vmul.f32 %v5197_v9, %v1892_v5 }
 0x25e   : > { %v5292_v43 = vpop.eup %3712  ;;  %v1703_v59 = vmul.f32 %v5256_v8, %v1639_v45  ;;  %v1385_v34 = vmul.f32 0.3275911, %v5287_v12  ;;  %v5299_v54 = vadd.f32 %v6953_v25, %v4776_v10  ;;  %v2082_v13 = vmul.f32 %v5137_v7, %v2018_v19 }
 0x25f   : > { %v1893_v29 = vadd.f32 -0.28449672, %v1829_v23  ;;  %3720 = vpow2.f32 %v2293_v33  ;;  %v1576_v26 = vmul.f32 1.0614054, %v5292_v43  ;;  %v3715_v38 = vpop.eup %3714  ;;  %v2592_v40 = vsub.f32 0.0, %v2464_v6 }
 0x260   : > { %v2295_v28 = vmul.f32 1.442695, %v2214_v62  ;;  %v2151_v35 = vsub.f32 0.0, %v5192_v60  ;;  %v1449_v37 = vadd.f32 1.0, %v1385_v34  ;;  %v2401_v1 = vmul.f32 %v3711_v22, %v2081_v44  ;;  %v6954_v34 = vld [vmem:[#allocation24_spill] sm:$0xff] }
 0x261   : > { %v2083_v5 = vmul.f32 %v5178_v21, %v2019_v51  ;;  %v1830_v45 = vmul.f32 %v5226_v57, %v1766_v53  ;;  %v1640_v3 = vadd.f32 -1.4531521, %v1576_v26  ;;  %v2020_v25 = vadd.f32 0.2548296, %v1956_v55 }
 0x262   : > { %v1767_v17 = vadd.f32 1.4214138, %v1703_v59  ;;  %3722 = vrcp.f32 %v1449_v37  ;;  %v5307_v7 = vmul.f32 0.70710677, %v5299_v54  ;;  %v5309_v19 = vmul.f32 %v3715_v38, %v2082_v13 }
 0x263   : > { %v1957_v23 = vmul.f32 %v5209_v61, %v1893_v29  ;;  %v5313_v33 = vmul.f32 0.5, %v5158_v47  ;;  %v1704_v62 = vmul.f32 %v5292_v43, %v1640_v3  ;;  %v3717_v22 = vpop.eup %3716  ;;  %v2656_v21 = vsel %vm2528_vm9, %v2592_v40, %v2464_v6 }
 0x264   : > { %vm2529_vm10 = vcmp.lt.f32.partialorder %v5022_v32, 0.0  ;;  %v2215_v44 = vmul.f32 %v2151_v35, %v5192_v60  ;;  %v2152_v51 = vsub.f32 0.0, %v5214_v2  ;;  %v5322_v53 = vand.u32 2147483647, %v5307_v7 }
 0x265   : > { %v2465_v55 = vsub.f32 1.0, %v2401_v1  ;;  %v5324_v59 = vmul.f32 %v3717_v22, %v2083_v5  ;;  %v1894_v47 = vadd.f32 -0.28449672, %v1830_v45  ;;  %v5328_v3 = vadd.f32 %v6954_v34, %v4754_v14 }
 0x266   : > { %v2084_v42 = vmul.f32 %v5197_v9, %v2020_v25  ;;  %3724 = vpow2.f32 %v2295_v28  ;;  %v1831_v6 = vmul.f32 %v5256_v8, %v1767_v17  ;;  %v1386_v60 = vmul.f32 0.3275911, %v5322_v53  ;;  %v5339_v9 = vpop.f32.mrb[40].mxu0 }
 0x267   : > { %v3719_v13 = vpop.eup %3718  ;;  %v2720_v29 = vadd.f32 1.0, %v2656_v21  ;;  %v2466_v26 = vsub.f32 1.0, %v5309_v19  ;;  %v2021_v38 = vadd.f32 0.2548296, %v1957_v23  ;;  %v1768_v40 = vadd.f32 1.4214138, %v1704_v62 }
 0x268   : > { %vm2530_vm11 = vcmp.lt.f32.partialorder %v5034_v41, 0.0  ;;  %v2297_v35 = vmul.f32 1.442695, %v2215_v44  ;;  %v2216_v37 = vmul.f32 %v2152_v51, %v5214_v2  ;;  %v1450_v1 = vadd.f32 1.0, %v1386_v60  ;;  %6955 = vst [vmem:[#allocation22_spill] sm:$0xff] %v5339_v9  ;;  %v6956_v19 = vld [vmem:[#allocation25_spill] sm:$0xff] }
 0x269   : > { %v5337_v5 = vmul.f32 0.70710677, %v5328_v3  ;;  %v3721_v17 = vpop.eup %3720  ;;  %v2593_v28 = vsub.f32 0.0, %v2465_v55  ;;  %v2467_v45 = vsub.f32 1.0, %v5324_v59  ;;  %v1958_v25 = vmul.f32 %v5226_v57, %v1894_v47 }
 0x26a   : > { %v5345_v23 = vadd.f32 %v6956_v19, %v4776_v10  ;;  %vm2531_vm12 = vcmp.lt.f32.partialorder %v5063_v50, 0.0  ;;  %v5348_v62 = vmul.f32 %v3719_v13, %v2084_v42  ;;  %v1895_v2 = vadd.f32 -0.28449672, %v1831_v6 }
 0x26b   : > { %3726 = vrcp.f32 %v1450_v1  ;;  %v5351_v22 = vand.u32 2147483647, %v5337_v5  ;;  %v2594_v21 = vsub.f32 0.0, %v2466_v26  ;;  %v2085_v44 = vmul.f32 %v5209_v61, %v2021_v38 }
 0x26c   : > { %v1832_v51 = vmul.f32 %v5292_v43, %v1768_v40  ;;  %v5357_v59 = vadd.f32 %v4933_v0, %v4754_v14  ;;  %v5359_v47 = vpop.eup %3722  ;;  %3728 = vpow2.f32 %v2297_v35  ;;  %v2299_v34 = vmul.f32 1.442695, %v2216_v37  ;;  %v5368_v40 = vpop.f32.mrb[41].mxu0 }
 0x26d   : > { %v1387_v42 = vmul.f32 0.3275911, %v5351_v22  ;;  %v5363_v6 = vmul.f32 0.70710677, %v5345_v23  ;;  %v2657_v60 = vsel %vm2529_vm10, %v2593_v28, %v2465_v55  ;;  %v2595_v13 = vsub.f32 0.0, %v2467_v45  ;;  %6957 = vst [vmem:[#allocation24_spill] sm:$0xff] %v5368_v40 }
 0x26e   : > { %v2022_v61 = vadd.f32 0.2548296, %v1958_v25  ;;  %v1577_v38 = vmul.f32 1.0614054, %v5359_v47  ;;  %v2468_v0 = vsub.f32 1.0, %v5348_v62  ;;  %vm2532_vm13 = vcmp.lt.f32.partialorder %v5091_v49, 0.0 }
 0x26f   : > { %v1959_v35 = vmul.f32 %v5256_v8, %v1895_v2  ;;  %v1451_v37 = vadd.f32 1.0, %v1387_v42  ;;  %v5374_v1 = vand.u32 2147483647, %v5363_v6  ;;  %v5376_v19 = vmul.f32 %v3721_v17, %v2085_v44  ;;  %v6962_v49 = vld [vmem:[#allocation27_spill] sm:$0xff] }
 0x270   : > { %v1896_v32 = vadd.f32 -0.28449672, %v1832_v51  ;;  %v1641_v55 = vadd.f32 -1.4531521, %v1577_v38  ;;  %v5379_v28 = vmul.f32 0.70710677, %v5357_v59  ;;  %v3725_v25 = vpop.eup %3724  ;;  %v5382_v40 = vmul.f32 %v2720_v29, %v5127_v63 }
 0x271   : > { %v5385_v62 = vmul.f32 0.5, %v5166_v36  ;;  %3730 = vrcp.f32 %v1451_v37  ;;  %v1388_v2 = vmul.f32 0.3275911, %v5374_v1  ;;  %v2721_v42 = vadd.f32 1.0, %v2657_v60  ;;  %v5395_v29 = vpop.f32.mrb[42].mxu0 }
 0x272   : > { %v2658_v17 = vsel %vm2530_vm11, %v2594_v21, %v2466_v26  ;;  %v2086_v44 = vmul.f32 %v5226_v57, %v2022_v61  ;;  %v1705_v51 = vmul.f32 %v5359_v47, %v1641_v55  ;;  %v2023_v38 = vadd.f32 0.2548296, %v1959_v35  ;;  %6958 = vst [vmem:[#allocation25_spill] sm:$0xff] %v5395_v29  ;;  %v5401_v26 = vpop.f32.mrb[43].mxu0  ;;  %v6960_v61 = vld [vmem:[#allocation26_spill] sm:$0xff] }
 0x273   : > { %3732 = vpow2.f32 %v2299_v34  ;;  %v1452_v9 = vadd.f32 1.0, %v1388_v2  ;;  %v5393_v63 = vand.u32 2147483647, %v5379_v28  ;;  %v2659_v36 = vsel %vm2531_vm12, %v2595_v13, %v2467_v45  ;;  %6959 = vst [vmem:[#allocation45_spill] sm:$0xff] %v5401_v26 }
 0x274   : > { %v2596_v37 = vsub.f32 0.0, %v2468_v0  ;;  %v2469_v60 = vsub.f32 1.0, %v5376_v19  ;;  %v1960_v41 = vmul.f32 %v5292_v43, %v1896_v32  ;;  %vm2533_vm14 = vcmp.lt.f32.partialorder %v5099_v15, 0.0 }
 0x275   : > { %v5403_v57 = vpop.eup %3726  ;;  %v1769_v21 = vadd.f32 1.4214138, %v1705_v51  ;;  %3734 = vrcp.f32 %v1452_v9  ;;  %v1389_v34 = vmul.f32 0.3275911, %v5393_v63  ;;  %v5409_v35 = vadd.f32 %v6960_v61, %v4776_v10 }
 0x276   : > { %v5412_v50 = vmul.f32 %v2721_v42, %v5140_v20  ;;  %v2406_v45 = vmul.f32 %v3725_v25, %v2086_v44  ;;  %v2153_v13 = vsub.f32 0.0, %v5287_v12  ;;  %v1578_v19 = vmul.f32 1.0614054, %v5403_v57  ;;  %v3729_v32 = vpop.eup %3728 }
 0x277   : > { %v2722_v55 = vadd.f32 1.0, %v2658_v17  ;;  %v2087_v2 = vmul.f32 %v5256_v8, %v2023_v38  ;;  %v1453_v51 = vadd.f32 1.0, %v1389_v34  ;;  %v5418_v9 = vmul.f32 0.70710677, %v5409_v35  ;;  %v5444_v34 = vpop.f32.mrb[44].mxu0 }
 0x278   : > { %6961 = vst [vmem:[#allocation26_spill] sm:$0xff] %v5412_v50  ;;  %v2723_v26 = vadd.f32 1.0, %v2659_v36  ;;  %v2660_v61 = vsel %vm2532_vm13, %v2596_v37, %v2468_v0  ;;  %v2024_v29 = vadd.f32 0.2548296, %v1960_v41  ;;  %v5423_v20 = vmul.f32 0.5, %v5261_v11  ;;  %6964 = vst [vmem:[#allocation46_spill] sm:$0xff] %v5444_v34 }
 0x279   : > { %v2597_v25 = vsub.f32 0.0, %v2469_v60  ;;  %vm2534_vm15 = vcmp.lt.f32.partialorder %v5135_v31, 0.0  ;;  %v1833_v42 = vmul.f32 %v5359_v47, %v1769_v21  ;;  %3736 = vrcp.f32 %v1453_v51 }
 0x27a   : > { %v5428_v8 = vand.u32 2147483647, %v5418_v9  ;;  %v2470_v17 = vsub.f32 1.0, %v2406_v45  ;;  %v2217_v44 = vmul.f32 %v2153_v13, %v5287_v12  ;;  %v1642_v38 = vadd.f32 -1.4531521, %v1578_v19 }
 0x27b   : > { %v5433_v0 = vadd.f32 %v6962_v49, %v4754_v14  ;;  %v5435_v36 = vpop.eup %3730  ;;  %v5438_v11 = vmul.f32 %v2722_v55, %v5189_v4  ;;  %v2407_v37 = vmul.f32 %v3729_v32, %v2087_v2  ;;  %v5441_v41 = vmul.f32 0.5, %v5299_v54  ;;  %v6966_v54 = vld [vmem:[#allocation28_spill] sm:$0xff] }
 0x27c   : > { %v1390_v21 = vmul.f32 0.3275911, %v5428_v8  ;;  %v5447_v12 = vmul.f32 %v2723_v26, %v5237_v16  ;;  %v2724_v45 = vadd.f32 1.0, %v2660_v61  ;;  %v2088_v13 = vmul.f32 %v5292_v43, %v2024_v29 }
 0x27d   : > { %6963 = vst [vmem:[#allocation27_spill] sm:$0xff] %v5438_v11  ;;  %v1579_v19 = vmul.f32 1.0614054, %v5435_v36  ;;  %v3733_v51 = vpop.eup %3732  ;;  %v1897_v49 = vadd.f32 -0.28449672, %v1833_v42  ;;  %v5456_v55 = vadd.f32 %v6966_v54, %v4776_v10  ;;  %v2661_v2 = vsel %vm2533_vm14, %v2597_v25, %v2469_v60 }
 0x27e   : > { %6965 = vst [vmem:[#allocation47_spill] sm:$0xff] %v5447_v12  ;;  %v1454_v4 = vadd.f32 1.0, %v1390_v21  ;;  %v5452_v32 = vmul.f32 0.70710677, %v5433_v0  ;;  %v2598_v16 = vsub.f32 0.0, %v2470_v17  ;;  %vm2535_vm0 = vcmp.lt.f32.partialorder %v5183_v18, 0.0 }
 0x27f   : > { %v2301_v26 = vmul.f32 1.442695, %v2217_v44  ;;  %v1706_v43 = vmul.f32 %v5403_v57, %v1642_v38  ;;  %v5462_v29 = vpop.eup %3734  ;;  %v2471_v61 = vsub.f32 1.0, %v2407_v37  ;;  %v1643_v42 = vadd.f32 -1.4531521, %v1579_v19  ;;  %v6969_v18 = vld [vmem:[#allocation30_spill] sm:$0xff] }
 0x280   : > { %3738 = vrcp.f32 %v1454_v4  ;;  %v5465_v21 = vand.u32 2147483647, %v5452_v32  ;;  %v2408_v34 = vmul.f32 %v3733_v51, %v2088_v13  ;;  %v2154_v54 = vsub.f32 0.0, %v5322_v53 }
 0x281   : > { %v2155_v15 = vsub.f32 0.0, %v5351_v22  ;;  %v1580_v60 = vmul.f32 1.0614054, %v5462_v29  ;;  %v2725_v25 = vadd.f32 1.0, %v2661_v2  ;;  %v1961_v44 = vmul.f32 %v5359_v47, %v1897_v49  ;;  %v5483_v49 = vpop.f32.mrb[45].mxu0 }
 0x282   : > { %v1391_v38 = vmul.f32 0.3275911, %v5465_v21  ;;  %v5473_v12 = vmul.f32 0.70710677, %v5456_v55  ;;  %v2662_v37 = vsel %vm2534_vm15, %v2598_v16, %v2470_v17  ;;  %3740 = vpow2.f32 %v2301_v26  ;;  %6967 = vst [vmem:[#allocation28_spill] sm:$0xff] %v5483_v49 }
 0x283   : > { %v1770_v19 = vadd.f32 1.4214138, %v1706_v43  ;;  %v1644_v13 = vadd.f32 -1.4531521, %v1580_v60  ;;  %v5477_v51 = vpop.eup %3736  ;;  %v2599_v4 = vsub.f32 0.0, %v2471_v61  ;;  %v1707_v50 = vmul.f32 %v5435_v36, %v1643_v42 }
 0x284   : > { %v1455_v11 = vadd.f32 1.0, %v1391_v38  ;;  %v5481_v2 = vand.u32 2147483647, %v5473_v12  ;;  %v5486_v56 = vmul.f32 %v2724_v45, %v5252_v27  ;;  %v2472_v58 = vsub.f32 1.0, %v2408_v34 }
 0x285   : > { %vm2536_vm1 = vcmp.lt.f32.partialorder %v5195_v30, 0.0  ;;  %v2218_v31 = vmul.f32 %v2154_v54, %v5322_v53  ;;  %v2219_v17 = vmul.f32 %v2155_v15, %v5351_v22  ;;  %v2025_v16 = vadd.f32 0.2548296, %v1961_v44 }
 0x286   : > { %v1581_v26 = vmul.f32 1.0614054, %v5477_v51  ;;  %3742 = vrcp.f32 %v1455_v11  ;;  %v1392_v43 = vmul.f32 0.3275911, %v5481_v2  ;;  %v5494_v42 = vmul.f32 %v2725_v25, %v5267_v52 }
 0x287   : > { %v2726_v60 = vadd.f32 1.0, %v2662_v37  ;;  %v1834_v27 = vmul.f32 %v5403_v57, %v1770_v19  ;;  %v1708_v34 = vmul.f32 %v5462_v29, %v1644_v13  ;;  %v2663_v45 = vsel %vm2535_vm0, %v2599_v4, %v2471_v61 }
 0x288   : > { %6968 = vst [vmem:[#allocation48_spill] sm:$0xff] %v5494_v42  ;;  %v1771_v53 = vadd.f32 1.4214138, %v1707_v50  ;;  %v2156_v22 = vsub.f32 0.0, %v5374_v1  ;;  %v1456_v54 = vadd.f32 1.0, %v1392_v43  ;;  %v5502_v11 = vmul.f32 0.5, %v5328_v3 }
 0x289   : > { %v2303_v15 = vmul.f32 1.442695, %v2218_v31  ;;  %v1645_v44 = vadd.f32 -1.4531521, %v1581_v26  ;;  %v2157_v52 = vsub.f32 0.0, %v5393_v63  ;;  %v2600_v38 = vsub.f32 0.0, %v2472_v58 }
 0x28a   : > { %v5505_v25 = vpop.eup %3738  ;;  %v2089_v37 = vmul.f32 %v5359_v47, %v2025_v16  ;;  %v2305_v19 = vmul.f32 1.442695, %v2219_v17  ;;  %v5510_v61 = vadd.f32 %v6969_v18, %v4754_v14  ;;  %v5513_v50 = vmul.f32 %v2726_v60, %v5280_v46  ;;  %v5518_v42 = vpop.f32.mrb[46].mxu0 }
 0x28b   : > { %v2727_v13 = vadd.f32 1.0, %v2663_v45  ;;  %v1898_v4 = vadd.f32 -0.28449672, %v1834_v27  ;;  %v1772_v3 = vadd.f32 1.4214138, %v1708_v34  ;;  %v1835_v31 = vmul.f32 %v5435_v36, %v1771_v53  ;;  %6971 = vst [vmem:[#allocation49_spill] sm:$0xff] %v5518_v42 }
 0x28c   : > { %6970 = vst [vmem:[#allocation30_spill] sm:$0xff] %v5513_v50  ;;  %v2220_v26 = vmul.f32 %v2156_v22, %v5374_v1  ;;  %v1582_v43 = vmul.f32 1.0614054, %v5505_v25  ;;  %3744 = vrcp.f32 %v1456_v54  ;;  %v3741_v47 = vpop.eup %3740  ;;  %v5521_v17 = vmul.f32 0.5, %v5345_v23 }
 0x28d   : > { %3746 = vpow2.f32 %v2303_v15  ;;  %v1709_v46 = vmul.f32 %v5477_v51, %v1645_v44  ;;  %v2221_v16 = vmul.f32 %v2157_v52, %v5393_v63  ;;  %v2664_v60 = vsel %vm2536_vm1, %v2600_v38, %v2472_v58 }
 0x28e   : > { %v2409_v27 = vmul.f32 %v3741_v47, %v2089_v37  ;;  %v1646_v34 = vadd.f32 -1.4531521, %v1582_v43  ;;  %v5528_v1 = vmul.f32 0.70710677, %v5510_v61  ;;  %v1962_v45 = vmul.f32 %v5403_v57, %v1898_v4  ;;  %v6973_v47 = vld [vmem:[#allocation29_spill] sm:$0xff] }
 0x28f   : > { %3748 = vpow2.f32 %v2305_v19  ;;  %v1836_v53 = vmul.f32 %v5462_v29, %v1772_v3  ;;  %v5533_v23 = vmul.f32 0.5, %v5357_v59  ;;  %v5538_v63 = vmul.f32 %v2727_v13, %v5313_v33 }
 0x290   : > { %v5535_v22 = vpop.eup %3742  ;;  %v1899_v30 = vadd.f32 -0.28449672, %v1835_v31  ;;  %v2307_v58 = vmul.f32 1.442695, %v2220_v26  ;;  %v5541_v54 = vand.u32 2147483647, %v5528_v1  ;;  %v1710_v52 = vmul.f32 %v5505_v25, %v1646_v34 }
 0x291   : > { %6972 = vst [vmem:[#allocation50_spill] sm:$0xff] %v5538_v63  ;;  %v2728_v15 = vadd.f32 1.0, %v2664_v60  ;;  %vm2537_vm2 = vcmp.lt.f32.partialorder %v5275_v39, 0.0  ;;  %v1773_v44 = vadd.f32 1.4214138, %v1709_v46  ;;  %v2473_v59 = vsub.f32 1.0, %v2409_v27 }
 0x292   : > { %v1583_v38 = vmul.f32 1.0614054, %v5535_v22  ;;  %v2309_v37 = vmul.f32 1.442695, %v2221_v16  ;;  %v2158_v19 = vsub.f32 0.0, %v5428_v8  ;;  %v5549_v4 = vmul.f32 0.5, %v5409_v35 }
 0x293   : > { %v1393_v33 = vmul.f32 0.3275911, %v5541_v54  ;;  %v2026_v18 = vadd.f32 0.2548296, %v1962_v45  ;;  %v1900_v13 = vadd.f32 -0.28449672, %v1836_v53  ;;  %v1963_v31 = vmul.f32 %v5435_v36, %v1899_v30 }
 0x294   : > { %v2159_v3 = vsub.f32 0.0, %v5465_v21  ;;  %v1647_v26 = vadd.f32 -1.4531521, %v1583_v38  ;;  %v1558_v46 = vmul.f32 1.0614054, %v6973_v47  ;;  %v5555_v60 = vmul.f32 %v2728_v15, %v5385_v62  ;;  %v6975_v53 = vld [vmem:[#allocation32_spill] sm:$0xff] }
 0x295   : > { %v1457_v43 = vadd.f32 1.0, %v1393_v33  ;;  %3750 = vpow2.f32 %v2307_v58  ;;  %v1837_v16 = vmul.f32 %v5477_v51, %v1773_v44  ;;  %v1774_v27 = vadd.f32 1.4214138, %v1710_v52  ;;  %v5567_v58 = vpop.f32.mrb[47].mxu0 }
 0x296   : > { %6974 = vst [vmem:[#allocation29_spill] sm:$0xff] %v5555_v60  ;;  %v5558_v34 = vpop.eup %3744  ;;  %v2601_v45 = vsub.f32 0.0, %v2473_v59  ;;  %v2222_v35 = vmul.f32 %v2158_v19, %v5428_v8  ;;  %v1560_v42 = vmul.f32 1.0614054, %v6975_v53  ;;  %v2090_v38 = vmul.f32 %v5403_v57, %v2026_v18  ;;  %6976 = vst [vmem:[#allocation32_spill] sm:$0xff] %v5567_v58 }
 0x297   : > { %3752 = vrcp.f32 %v1457_v43  ;;  %v3747_v30 = vpop.eup %3746  ;;  %v1964_v33 = vmul.f32 %v5462_v29, %v1900_v13  ;;  %v5565_v62 = vmul.f32 0.5, %v5433_v0  ;;  %v2027_v15 = vadd.f32 0.2548296, %v1963_v31  ;;  %v6977_v31 = vld [vmem:[#allocation35_spill] sm:$0xff] }
 0x298   : > { %3754 = vpow2.f32 %v2309_v37  ;;  %v1711_v44 = vmul.f32 %v5535_v22, %v1647_v26  ;;  %v2223_v52 = vmul.f32 %v2159_v3, %v5465_v21  ;;  %v1622_v8 = vadd.f32 -1.4531521, %v1558_v46 }
 0x299   : > { %v3749_v19 = vpop.eup %3748  ;;  %v1901_v43 = vadd.f32 -0.28449672, %v1837_v16  ;;  %v1838_v63 = vmul.f32 %v5505_v25, %v1774_v27  ;;  %v5573_v57 = vmul.f32 0.5, %v5456_v55  ;;  %v1584_v37 = vmul.f32 1.0614054, %v5558_v34 }
 0x29a   : > { %v2665_v0 = vsel %vm2537_vm2, %v2601_v45, %v2473_v59  ;;  %v2311_v18 = vmul.f32 1.442695, %v2222_v35  ;;  %v1624_v13 = vadd.f32 -1.4531521, %v1560_v42  ;;  %v5580_v26 = vadd.f32 %v6977_v31, %v4776_v10 }
 0x29b   : > { %v2410_v21 = vmul.f32 %v3747_v30, %v2090_v38  ;;  %v2028_v3 = vadd.f32 0.2548296, %v1964_v33  ;;  %v2160_v46 = vsub.f32 0.0, %v5481_v2  ;;  %v1686_v16 = vmul.f32 %v6973_v47, %v1622_v8 }
 0x29c   : > { %v2091_v55 = vmul.f32 %v5435_v36, %v2027_v15  ;;  %v1775_v27 = vadd.f32 1.4214138, %v1711_v44  ;;  %v2313_v58 = vmul.f32 1.442695, %v2223_v52  ;;  %v1688_v49 = vmul.f32 %v6975_v53, %v1624_v13 }
 0x29d   : > { %v1965_v39 = vmul.f32 %v5477_v51, %v1901_v43  ;;  %v1902_v59 = vadd.f32 -0.28449672, %v1838_v63  ;;  %v1648_v42 = vadd.f32 -1.4531521, %v1584_v37  ;;  %v1750_v45 = vadd.f32 1.4214138, %v1686_v16 }
 0x29e   : > { %v2729_v35 = vadd.f32 1.0, %v2665_v0  ;;  %vm2538_vm3 = vcmp.lt.f32.partialorder %v5307_v7, 0.0  ;;  %3756 = vpow2.f32 %v2311_v18  ;;  %v1752_v30 = vadd.f32 1.4214138, %v1688_v49  ;;  %v5603_v0 = vpop.f32.mrb[48].mxu0  ;;  %v6985_v7 = vld [vmem:[#allocation12_spill] sm:$0xff] }
 0x29f   : > { %v5589_v38 = vmul.f32 0.70710677, %v5580_v26  ;;  %v3751_v33 = vpop.eup %3750  ;;  %v2474_v8 = vsub.f32 1.0, %v2410_v21  ;;  %v2092_v36 = vmul.f32 %v5462_v29, %v2028_v3  ;;  %v2224_v15 = vmul.f32 %v2160_v46, %v5481_v2  ;;  %6978 = vst [vmem:[#allocation35_spill] sm:$0xff] %v5603_v0 }
 0x2a0   : > { %v1814_v44 = vmul.f32 %v6973_v47, %v1750_v45  ;;  %v5596_v63 = vmul.f32 %v3749_v19, %v2091_v55  ;;  %v1839_v43 = vmul.f32 %v5535_v22, %v1775_v27  ;;  %v1816_v37 = vmul.f32 %v6975_v53, %v1752_v30 }
 0x2a1   : > { %v5594_v52 = vpop.eup %3752  ;;  %v5601_v49 = vand.u32 2147483647, %v5589_v38  ;;  %v2029_v13 = vadd.f32 0.2548296, %v1965_v39  ;;  %v1966_v29 = vmul.f32 %v5505_v25, %v1902_v59  ;;  %v1712_v2 = vmul.f32 %v5558_v34, %v1648_v42 }
 0x2a2   : > { %v3755_v18 = vpop.eup %3754  ;;  %v1585_v31 = vmul.f32 1.0614054, %v5594_v52  ;;  %v5609_v19 = vmul.f32 %v2729_v35, %v5423_v20  ;;  %3758 = vpow2.f32 %v2313_v58  ;;  %v1878_v21 = vadd.f32 -0.28449672, %v1814_v44  ;;  %v5617_v44 = vpop.f32.mrb[49].mxu0 }
 0x2a3   : > { %v1880_v3 = vadd.f32 -0.28449672, %v1816_v37  ;;  %v2602_v46 = vsub.f32 0.0, %v2474_v8  ;;  %v2412_v16 = vmul.f32 %v3751_v33, %v2092_v36  ;;  %v1394_v27 = vmul.f32 0.3275911, %v5601_v49  ;;  %6980 = vst [vmem:[#allocation52_spill] sm:$0xff] %v5617_v44 }
 0x2a4   : > { %6979 = vst [vmem:[#allocation51_spill] sm:$0xff] %v5609_v19  ;;  %v1649_v55 = vadd.f32 -1.4531521, %v1585_v31  ;;  %vm2539_vm4 = vcmp.lt.f32.partialorder %v5337_v5, 0.0  ;;  %v1903_v39 = vadd.f32 -0.28449672, %v1839_v43  ;;  %v1942_v59 = vmul.f32 %v6973_v47, %v1878_v21 }
 0x2a5   : > { %v2315_v45 = vmul.f32 1.442695, %v2224_v15  ;;  %v1944_v42 = vmul.f32 %v6975_v53, %v1880_v3  ;;  %v2475_v30 = vsub.f32 1.0, %v5596_v63  ;;  %v2093_v20 = vmul.f32 %v5477_v51, %v2029_v13  ;;  %v6981_v31 = vld [vmem:[#allocation34_spill] sm:$0xff]  ;;  %v6982_v43 = vld [vmem:[#allocation36_spill] sm:$0xff]  ;;  %v6984_v21 = vld [vmem:[#allocation15_spill] sm:$0xff] }
 0x2a6   : > { %v2030_v58 = vadd.f32 0.2548296, %v1966_v29  ;;  %v1776_v35 = vadd.f32 1.4214138, %v1712_v2  ;;  %vm2540_vm5 = vcmp.lt.f32.partialorder %v5363_v6, 0.0  ;;  %v1458_v37 = vadd.f32 1.0, %v1394_v27 }
 0x2a7   : > { %v2006_v33 = vadd.f32 0.2548296, %v1942_v59  ;;  %v2008_v36 = vadd.f32 0.2548296, %v1944_v42  ;;  %v6983_v19 = vld [vmem:[#allocation14_spill] sm:$0xff]  ;;  %vm2520_vm7 = vcmp.lt.f32.partialorder %v6984_v21, 0.0  ;;  %v2666_v63 = vsel %vm2538_vm3, %v2602_v46, %v2474_v8 }
 0x2a8   : > { %vm2518_vm6 = vcmp.lt.f32.partialorder %v6983_v19, 0.0  ;;  %v2476_v51 = vsub.f32 1.0, %v2412_v16  ;;  %v5627_v13 = vmul.f32 0.5, %v5510_v61  ;;  %v1713_v29 = vmul.f32 %v5594_v52, %v1649_v55  ;;  %v3757_v2 = vpop.eup %3756  ;;  %v6986_v16 = vld [vmem:[#allocation31_spill] sm:$0xff] }
 0x2a9   : > { %v1967_v3 = vmul.f32 %v5535_v22, %v1903_v39  ;;  %v2070_v27 = vmul.f32 %v6973_v47, %v2006_v33  ;;  %v2072_v59 = vmul.f32 %v6975_v53, %v2008_v36  ;;  %3760 = vrcp.f32 %v1458_v37  ;;  %v6987_v39 = vld [vmem:[#allocation33_spill] sm:$0xff] }
 0x2aa   : > { %v2603_v42 = vsub.f32 0.0, %v2475_v30  ;;  %v5633_v15 = vmul.f32 %v3755_v18, %v2093_v20  ;;  %3762 = vpow2.f32 %v2315_v45  ;;  %v5637_v8 = vadd.f32 %v6985_v7, %v4754_v14  ;;  %v6988_v7 = vld [vmem:[#allocation37_spill] sm:$0xff] }
 0x2ab   : > { %v2094_v61 = vmul.f32 %v5505_v25, %v2030_v58  ;;  %v1840_v46 = vmul.f32 %v5558_v34, %v1776_v35  ;;  %v2390_v55 = vmul.f32 %v6986_v16, %v2070_v27  ;;  %v2392_v44 = vmul.f32 %v6987_v39, %v2072_v59 }
 0x2ac   : > { %v2604_v47 = vsub.f32 0.0, %v2476_v51  ;;  %v1777_v33 = vadd.f32 1.4214138, %v1713_v29  ;;  %v2161_v53 = vsub.f32 0.0, %v5541_v54  ;;  %v5645_v18 = vmul.f32 0.70710677, %v5637_v8  ;;  %v3759_v45 = vpop.eup %3758 }
 0x2ad   : > { %v2031_v20 = vadd.f32 0.2548296, %v1967_v3  ;;  %v2454_v36 = vsub.f32 1.0, %v2390_v55  ;;  %v2456_v37 = vsub.f32 1.0, %v2392_v44  ;;  %v5649_v25 = vadd.f32 %v6988_v7, %v4776_v10  ;;  %v6992_v7 = vld [vmem:[#allocation20_spill] sm:$0xff] }
 0x2ae   : > { %v5651_v58 = vadd.f32 1.0, %v2666_v63  ;;  %v2667_v35 = vsel %vm2539_vm4, %v2603_v42, %v2475_v30  ;;  %v2477_v29 = vsub.f32 1.0, %v5633_v15  ;;  %v5657_v27 = vand.u32 2147483647, %v5645_v18  ;;  %v5667_v15 = vpop.f32.mrb[50].mxu0 }
 0x2af   : > { %vm2541_vm8 = vcmp.lt.f32.partialorder %v5379_v28, 0.0  ;;  %v5660_v59 = vmul.f32 %v3757_v2, %v2094_v61  ;;  %v1904_v3 = vadd.f32 -0.28449672, %v1840_v46  ;;  %v2582_v44 = vsub.f32 0.0, %v2454_v36  ;;  %6989 = vst [vmem:[#allocation34_spill] sm:$0xff] %v5667_v15  ;;  %v5677_v6 = vpop.f32.mrb[51].mxu0 }
 0x2b0   : > { %v2584_v16 = vsub.f32 0.0, %v2456_v37  ;;  %v2668_v55 = vsel %vm2540_vm5, %v2604_v47, %v2476_v51  ;;  %v1841_v63 = vmul.f32 %v5594_v52, %v1777_v33  ;;  %v2225_v5 = vmul.f32 %v2161_v53, %v5541_v54  ;;  %6990 = vst [vmem:[#allocation36_spill] sm:$0xff] %v5677_v6  ;;  %v6991_v47 = vld [vmem:[#allocation13_spill] sm:$0xff]  ;;  %v5698_v60 = vpop.f32.mrb[52].mxu0 }
 0x2b1   : > { %v1395_v30 = vmul.f32 0.3275911, %v5657_v27  ;;  %v2095_v42 = vmul.f32 %v5535_v22, %v2031_v20  ;;  %v2646_v2 = vsel %vm2518_vm6, %v2582_v44, %v2454_v36  ;;  %v5675_v46 = vmul.f32 0.70710677, %v5649_v25 }
 0x2b2   : > { %v2648_v61 = vsel %vm2520_vm7, %v2584_v16, %v2456_v37  ;;  %v2710_v51 = vadd.f32 1.0, %v2646_v2  ;;  %v5681_v33 = vadd.f32 %v6991_v47, %v4754_v14  ;;  %v2605_v22 = vsub.f32 0.0, %v2477_v29  ;;  %v6993_v16 = vld [vmem:[#allocation23_spill] sm:$0xff] }
 0x2b3   : > { %v2712_v39 = vadd.f32 1.0, %v2648_v61  ;;  %v1459_v54 = vadd.f32 1.0, %v1395_v30  ;;  %v5683_v53 = vpop.eup %3760  ;;  %v2478_v19 = vsub.f32 1.0, %v5660_v59  ;;  %vm2542_vm9 = vcmp.lt.f32.partialorder %v5418_v9, 0.0 }
 0x2b4   : > { %v1968_v21 = vmul.f32 %v5558_v34, %v1904_v3  ;;  %v5689_v20 = vand.u32 2147483647, %v5675_v46  ;;  %v3763_v36 = vpop.eup %3762  ;;  %v1905_v37 = vadd.f32 -0.28449672, %v1841_v63  ;;  %v2774_v44 = vmul.f32 %v2710_v51, %v6992_v7  ;;  %v6994_v7 = vld [vmem:[#allocation18_spill] sm:$0xff] }
 0x2b5   : > { %v2776_v30 = vmul.f32 %v2712_v39, %v6993_v16  ;;  %v1586_v2 = vmul.f32 1.0614054, %v5683_v53  ;;  %v2731_v61 = vadd.f32 1.0, %v2667_v35  ;;  %v2317_v47 = vmul.f32 1.442695, %v2225_v5 }
 0x2b6   : > { %3764 = vrcp.f32 %v1459_v54  ;;  %v1396_v59 = vmul.f32 0.3275911, %v5689_v20  ;;  %v2415_v6 = vmul.f32 %v3759_v45, %v2095_v42  ;;  %v5696_v3 = vmul.f32 0.70710677, %v5681_v33 }
 0x2b7   : > { %v2838_v15 = vpack.c.bf16 %v2776_v30, %v2774_v44  ;;  %v1650_v0 = vadd.f32 -1.4531521, %v1586_v2  ;;  %v2732_v63 = vadd.f32 1.0, %v2668_v55  ;;  %v2032_v50 = vadd.f32 0.2548296, %v1968_v21 }
 0x2b8   : > { %v1460_v51 = vadd.f32 1.0, %v1396_v59  ;;  %v2840_v39 = vpack.c.bf16 %v5222_v48, %v6994_v7  ;;  %v2669_v35 = vsel %vm2541_vm8, %v2605_v22, %v2477_v29  ;;  %v2606_v5 = vsub.f32 0.0, %v2478_v19  ;;  %v6996_v48 = vld [vmem:[#allocation16_spill] sm:$0xff]  ;;  %v6997_v29 = vld [vmem:[#allocation38_spill] sm:$0xff]  ;;  %v6998_v22 = vld [vmem:[#allocation39_spill] sm:$0xff] }
 0x2b9   : > { %v1969_v54 = vmul.f32 %v5594_v52, %v1905_v37  ;;  %3036 = vmatprep.mubr.bf16.mxu1 %v2838_v15  ;;  %v5706_v45 = vand.u32 2147483647, %v5696_v3  ;;  %vm2543_vm10 = vcmp.lt.f32.partialorder %v5452_v32, 0.0  ;;  %v1714_v42 = vmul.f32 %v5683_v53, %v1650_v0 }
 0x2ba   : > { %v6995_v55 = vpack.c.bf16 %v6982_v43, %v6981_v31  ;;  %3766 = vrcp.f32 %v1460_v51  ;;  %v5715_v28 = vadd.f32 %v6996_v48, %v4776_v10  ;;  %v2839_v21 = vpack.c.bf16 %v6998_v22, %v6997_v29 }
 0x2bb   : > { %v2479_v15 = vsub.f32 1.0, %v2415_v6  ;;  %3768 = vpow2.f32 %v2317_v47  ;;  %v2162_v37 = vsub.f32 0.0, %v5601_v49  ;;  %v1397_v44 = vmul.f32 0.3275911, %v5706_v45  ;;  %v6999_v47 = vld [vmem:[#allocation17_spill] sm:$0xff] }
 0x2bc   : > { %3037 = vmatmul.mubr.bf16.vlgmr.msra.gmra.mrb[0].mxu1 %v6995_v55  ;;  %v5723_v0 = vmul.f32 %v5651_v58, %v5441_v41  ;;  %v5726_v31 = vmul.f32 %v2731_v61, %v5502_v11  ;;  %v2096_v43 = vmul.f32 %v5558_v34, %v2032_v50  ;;  %v5730_v16 = vmul.f32 0.70710677, %v5715_v28  ;;  %v7000_v11 = vld [vmem:[#allocation40_spill] sm:$0xff] }
 0x2bd   : > { %3044 = vmatprep.mubr.bf16.mxu1 %v2840_v39  ;;  %v2733_v30 = vadd.f32 1.0, %v2669_v35  ;;  %v2670_v6 = vsel %vm2542_vm9, %v2606_v5, %v2478_v19  ;;  %v1461_v2 = vadd.f32 1.0, %v1397_v44  ;;  %v5736_v59 = vadd.f32 %v6999_v47, %v4754_v14  ;;  %v5749_v19 = vpop.f32.mrb[53].mxu0 }
 0x2be   : > { %v2033_v51 = vadd.f32 0.2548296, %v1969_v54  ;;  %v1778_v41 = vadd.f32 1.4214138, %v1714_v42  ;;  %v5739_v58 = vand.u32 2147483647, %v5730_v16  ;;  %v5743_v50 = vadd.f32 %v7000_v11, %v4776_v10 }
 0x2bf   : > { %v5746_v34 = vmul.f32 %v2732_v63, %v5521_v17  ;;  %v2607_v61 = vsub.f32 0.0, %v2479_v15  ;;  %v2226_v9 = vmul.f32 %v2162_v37, %v5601_v49  ;;  %3770 = vrcp.f32 %v1461_v2 }
 0x2c0   : > { %v5751_v7 = vpop.eup %3764  ;;  %v2416_v39 = vmul.f32 %v3763_v36, %v2096_v43  ;;  %v5754_v35 = vmul.f32 0.5, %v5580_v26  ;;  %v1398_v5 = vmul.f32 0.3275911, %v5739_v58  ;;  %v5758_v54 = vmul.f32 0.70710677, %v5736_v59 }
 0x2c1   : > { %v5761_v17 = vmul.f32 %v2733_v30, %v5533_v23  ;;  %v2734_v63 = vadd.f32 1.0, %v2670_v6  ;;  %v1587_v49 = vmul.f32 1.0614054, %v5751_v7  ;;  %v5765_v42 = vmul.f32 0.70710677, %v5743_v50 }
 0x2c2   : > { %v2097_v55 = vmul.f32 %v5594_v52, %v2033_v51  ;;  %v1842_v36 = vmul.f32 %v5683_v53, %v1778_v41  ;;  %v1462_v26 = vadd.f32 1.0, %v1398_v5  ;;  %v5770_v48 = vand.u32 2147483647, %v5758_v54 }
 0x2c3   : > { %7001 = vst [vmem:[#allocation14_spill] sm:$0xff] %v5761_v17  ;;  %v2671_v29 = vsel %vm2543_vm10, %v2607_v61, %v2479_v15  ;;  %vm2544_vm11 = vcmp.lt.f32.partialorder %v5473_v12, 0.0  ;;  %v2319_v23 = vmul.f32 1.442695, %v2226_v9  ;;  %v1651_v22 = vadd.f32 -1.4531521, %v1587_v49 }
 0x2c4   : > { %3045 = vmatmul.mubr.bf16.gmra.mrb[4].mxu1 %v2839_v21  ;;  %v5776_v37 = vand.u32 2147483647, %v5765_v42  ;;  %v5778_v44 = vpop.eup %3766  ;;  %v2480_v52 = vsub.f32 1.0, %v2416_v39  ;;  %v2163_v43 = vsub.f32 0.0, %v5657_v27  ;;  %3772 = vrcp.f32 %v1462_v26  ;;  %v5788_v61 = vpop.f32.mrb[54].mxu0 }
 0x2c5   : > { %v1399_v21 = vmul.f32 0.3275911, %v5770_v48  ;;  %v3769_v30 = vpop.eup %3768  ;;  %v5783_v6 = vmul.f32 %v2734_v63, %v5549_v4  ;;  %v1715_v32 = vmul.f32 %v5751_v7, %v1651_v22  ;;  %v1588_v15 = vmul.f32 1.0614054, %v5778_v44  ;;  %7002 = vst [vmem:[#allocation15_spill] sm:$0xff] %v5788_v61  ;;  %v7003_v63 = vld [vmem:[#allocation41_spill] sm:$0xff] }
 0x2c6   : > { %v1400_v2 = vmul.f32 0.3275911, %v5776_v37  ;;  %v2735_v47 = vadd.f32 1.0, %v2671_v29  ;;  %v2417_v51 = vmul.f32 %v3769_v30, %v2097_v55  ;;  %v1906_v41 = vadd.f32 -0.28449672, %v1842_v36  ;;  %v5795_v22 = vpop.f32.mrb[55].mxu0 }
 0x2c7   : > { %v1463_v11 = vadd.f32 1.0, %v1399_v21  ;;  %3774 = vpow2.f32 %v2319_v23  ;;  %v1779_v9 = vadd.f32 1.4214138, %v1715_v32  ;;  %v1652_v39 = vadd.f32 -1.4531521, %v1588_v15  ;;  %7004 = vst [vmem:[#allocation12_spill] sm:$0xff] %v5795_v22 }
 0x2c8   : > { %v1464_v5 = vadd.f32 1.0, %v1400_v2  ;;  %v2608_v49 = vsub.f32 0.0, %v2480_v52  ;;  %v2227_v4 = vmul.f32 %v2163_v43, %v5657_v27  ;;  %v5793_v26 = vadd.f32 %v7003_v63, %v4754_v14  ;;  %v7007_v63 = vld [vmem:[#allocation43_spill] sm:$0xff]  ;;  %v5857_v17 = vpop.f32.mrb[56].mxu0 }
 0x2c9   : > { %3776 = vrcp.f32 %v1463_v11  ;;  %v5797_v29 = vpop.eup %3770  ;;  %vm2545_vm12 = vcmp.lt.f32.partialorder %v5528_v1, 0.0  ;;  %v1843_v55 = vmul.f32 %v5751_v7, %v1779_v9  ;;  %v1716_v36 = vmul.f32 %v5778_v44, %v1652_v39  ;;  %7009 = vst [vmem:[#allocation33_spill] sm:$0xff] %v5857_v17 }
 0x2ca   : > { %v2164_v23 = vsub.f32 0.0, %v5689_v20  ;;  %3778 = vrcp.f32 %v1464_v5  ;;  %v5804_v27 = vmul.f32 %v2735_v47, %v5565_v62  ;;  %v2481_v43 = vsub.f32 1.0, %v2417_v51 }
 0x2cb   : > { %v5807_v21 = vmul.f32 0.5, %v5637_v8  ;;  %v1589_v30 = vmul.f32 1.0614054, %v5797_v29  ;;  %v1970_v32 = vmul.f32 %v5683_v53, %v1906_v41  ;;  %v1780_v15 = vadd.f32 1.4214138, %v1716_v36  ;;  %v7006_v41 = vld [vmem:[#allocation19_spill] sm:$0xff] }
 0x2cc   : > { %7005 = vst [vmem:[#allocation31_spill] sm:$0xff] %v5804_v27  ;;  %v2165_v2 = vsub.f32 0.0, %v5706_v45  ;;  %v2842_v11 = vpack.c.bf16 %v5382_v40, %v5243_v24  ;;  %v2672_v9 = vsel %vm2544_vm11, %v2608_v49, %v2480_v52  ;;  %v1907_v39 = vadd.f32 -0.28449672, %v1843_v55  ;;  %v7008_v52 = vld [vmem:[#allocation42_spill] sm:$0xff] }
 0x2cd   : > { %v1653_v62 = vadd.f32 -1.4531521, %v1589_v30  ;;  %v5817_v47 = vmul.f32 0.70710677, %v5793_v26  ;;  %v2321_v8 = vmul.f32 1.442695, %v2227_v4  ;;  %v1844_v51 = vmul.f32 %v5778_v44, %v1780_v15 }
 0x2ce   : > { %v2228_v5 = vmul.f32 %v2164_v23, %v5689_v20  ;;  %3052 = vmatprep.mubr.bf16.mxu1 %v2842_v11  ;;  %v2841_v36 = vpack.c.bf16 %v7007_v63, %v7006_v41  ;;  %v5823_v22 = vpop.eup %3772  ;;  %v2609_v24 = vsub.f32 0.0, %v2481_v43  ;;  %v5831_v49 = vadd.f32 %v7008_v52, %v4776_v10 }
 0x2cf   : > { %v1717_v40 = vmul.f32 %v5797_v29, %v1653_v62  ;;  %v5827_v12 = vand.u32 2147483647, %v5817_v47  ;;  %v5833_v4 = vadd.f32 1.0, %v2672_v9  ;;  %v2034_v55 = vadd.f32 0.2548296, %v1970_v32 }
 0x2d0   : > { %v1590_v20 = vmul.f32 1.0614054, %v5823_v22  ;;  %v2166_v23 = vsub.f32 0.0, %v5739_v58  ;;  %3053 = vmatmul.mubr.bf16.gmra.mrb[8].mxu1 %v2841_v36  ;;  %v1971_v30 = vmul.f32 %v5751_v7, %v1907_v39  ;;  %v2229_v11 = vmul.f32 %v2165_v2, %v5706_v45 }
 0x2d1   : > { %v1781_v15 = vadd.f32 1.4214138, %v1717_v40  ;;  %v1401_v62 = vmul.f32 0.3275911, %v5827_v12  ;;  %v3775_v41 = vpop.eup %3774  ;;  %3780 = vpow2.f32 %v2321_v8  ;;  %v1908_v63 = vadd.f32 -0.28449672, %v1844_v51 }
 0x2d2   : > { %v2323_v52 = vmul.f32 1.442695, %v2228_v5  ;;  %v1654_v61 = vadd.f32 -1.4531521, %v1590_v20  ;;  %v2673_v32 = vsel %vm2545_vm12, %v2609_v24, %v2481_v43  ;;  %v5846_v39 = vmul.f32 0.70710677, %v5831_v49 }
 0x2d3   : > { %v5840_v9 = vpop.eup %3776  ;;  %v1845_v27 = vmul.f32 %v5797_v29, %v1781_v15  ;;  %v1465_v36 = vadd.f32 1.0, %v1401_v62  ;;  %v2098_v45 = vmul.f32 %v5683_v53, %v2034_v55  ;;  %v2230_v8 = vmul.f32 %v2166_v23, %v5739_v58 }
 0x2d4   : > { %v5848_v40 = vpop.eup %3778  ;;  %v1718_v2 = vmul.f32 %v5823_v22, %v1654_v61  ;;  %v1591_v51 = vmul.f32 1.0614054, %v5840_v9  ;;  %v2035_v5 = vadd.f32 0.2548296, %v1971_v30  ;;  %v2325_v20 = vmul.f32 1.442695, %v2229_v11 }
 0x2d5   : > { %v1592_v1 = vmul.f32 1.0614054, %v5848_v40  ;;  %3782 = vrcp.f32 %v1465_v36  ;;  %v1972_v43 = vmul.f32 %v5778_v44, %v1908_v63  ;;  %v2167_v62 = vsub.f32 0.0, %v5770_v48 }
 0x2d6   : > { %v1782_v24 = vadd.f32 1.4214138, %v1718_v2  ;;  %v1655_v15 = vadd.f32 -1.4531521, %v1591_v51  ;;  %3784 = vpow2.f32 %v2323_v52  ;;  %v1909_v53 = vadd.f32 -0.28449672, %v1845_v27 }
 0x2d7   : > { %v1656_v61 = vadd.f32 -1.4531521, %v1592_v1  ;;  %v5860_v58 = vand.u32 2147483647, %v5846_v39  ;;  %v2418_v55 = vmul.f32 %v3775_v41, %v2098_v45  ;;  %v2327_v30 = vmul.f32 1.442695, %v2230_v8 }
 0x2d8   : > { %v1846_v23 = vmul.f32 %v5823_v22, %v1782_v24  ;;  %v1719_v11 = vmul.f32 %v5840_v9, %v1655_v15  ;;  %v2099_v63 = vmul.f32 %v5751_v7, %v2035_v5  ;;  %v2168_v2 = vsub.f32 0.0, %v5776_v37 }
 0x2d9   : > { %v1720_v36 = vmul.f32 %v5848_v40, %v1656_v61  ;;  %v1402_v51 = vmul.f32 0.3275911, %v5860_v58  ;;  %v2036_v52 = vadd.f32 0.2548296, %v1972_v43  ;;  %3786 = vpow2.f32 %v2325_v20 }
 0x2da   : > { %v1910_v27 = vadd.f32 -0.28449672, %v1846_v23  ;;  %v1783_v1 = vadd.f32 1.4214138, %v1719_v11  ;;  %vm2546_vm13 = vcmp.lt.f32.partialorder %v5589_v38, 0.0  ;;  %v1973_v41 = vmul.f32 %v5797_v29, %v1909_v53 }
 0x2db   : > { %v2231_v45 = vmul.f32 %v2167_v62, %v5770_v48  ;;  %v1784_v8 = vadd.f32 1.4214138, %v1720_v36  ;;  %v1466_v24 = vadd.f32 1.0, %v1402_v51  ;;  %v3781_v15 = vpop.eup %3780  ;;  %v2482_v7 = vsub.f32 1.0, %v2418_v55  ;;  %v7010_v62 = vld [vmem:[#allocation21_spill] sm:$0xff]  ;;  %v5897_v51 = vpop.f32.mrb[57].mxu0 }
 0x2dc   : > { %v5872_v5 = vmul.f32 0.5, %v5649_v25  ;;  %v1974_v61 = vmul.f32 %v5823_v22, %v1910_v27  ;;  %3788 = vpow2.f32 %v2327_v30  ;;  %v2737_v43 = vadd.f32 1.0, %v2673_v32  ;;  %7011 = vst [vmem:[#allocation37_spill] sm:$0xff] %v5897_v51  ;;  %v5944_v51 = vpop.f32.mrb[58].mxu0 }
 0x2dd   : > { %v2419_v20 = vmul.f32 %v3781_v15, %v2099_v63  ;;  %v1847_v23 = vmul.f32 %v5840_v9, %v1783_v1  ;;  %3790 = vrcp.f32 %v1466_v24  ;;  %v2100_v11 = vmul.f32 %v5778_v44, %v2036_v52  ;;  %7015 = vst [vmem:[#allocation20_spill] sm:$0xff] %v5944_v51 }
 0x2de   : > { %v5878_v53 = vmul.f32 0.5, %v5681_v33  ;;  %v2232_v48 = vmul.f32 %v2168_v2, %v5776_v37  ;;  %v5883_v55 = vadd.f32 %v7010_v62, %v4754_v14  ;;  %v2037_v36 = vadd.f32 0.2548296, %v1973_v41 }
 0x2df   : > { %v5885_v25 = vpop.eup %3782  ;;  %v5888_v32 = vmul.f32 0.5, %v5715_v28  ;;  %v2329_v30 = vmul.f32 1.442695, %v2231_v45  ;;  %v1848_v63 = vmul.f32 %v5848_v40, %v1784_v8  ;;  %v5893_v44 = vmul.f32 %v5833_v4, %v5573_v57 }
 0x2e0   : > { %v2610_v33 = vsub.f32 0.0, %v2482_v7  ;;  %vm2547_vm14 = vcmp.lt.f32.partialorder %v5645_v18, 0.0  ;;  %v2038_v37 = vadd.f32 0.2548296, %v1974_v61  ;;  %v1593_v2 = vmul.f32 1.0614054, %v5885_v25  ;;  %v3785_v52 = vpop.eup %3784 }
 0x2e1   : > { %v5900_v27 = vmul.f32 %v2737_v43, %v5627_v13  ;;  %v2483_v28 = vsub.f32 1.0, %v2419_v20  ;;  %v1911_v1 = vadd.f32 -0.28449672, %v1847_v23  ;;  %v2169_v41 = vsub.f32 0.0, %v5827_v12  ;;  %v7013_v23 = vld [vmem:[#allocation44_spill] sm:$0xff] }
 0x2e2   : > { %v2420_v45 = vmul.f32 %v3785_v52, %v2100_v11  ;;  %v2331_v8 = vmul.f32 1.442695, %v2232_v48  ;;  %v1657_v57 = vadd.f32 -1.4531521, %v1593_v2  ;;  %v5904_v4 = vmul.f32 0.70710677, %v5883_v55 }
 0x2e3   : > { %7012 = vst [vmem:[#allocation13_spill] sm:$0xff] %v5900_v27  ;;  %v2101_v24 = vmul.f32 %v5797_v29, %v2037_v36  ;;  %v5908_v15 = vmul.f32 0.5, %v5736_v59  ;;  %3792 = vpow2.f32 %v2329_v30  ;;  %v1912_v61 = vadd.f32 -0.28449672, %v1848_v63  ;;  %v3787_v62 = vpop.eup %3786 }
 0x2e4   : > { %v2674_v13 = vsel %vm2546_vm13, %v2610_v33, %v2482_v7  ;;  %v2102_v43 = vmul.f32 %v5823_v22, %v2038_v37  ;;  %v1721_v20 = vmul.f32 %v5885_v25, %v1657_v57  ;;  %v5916_v11 = vadd.f32 %v7013_v23, %v4776_v10 }
 0x2e5   : > { %v2611_v48 = vsub.f32 0.0, %v2483_v28  ;;  %vm2548_vm15 = vcmp.lt.f32.partialorder %v5675_v46, 0.0  ;;  %v1975_v59 = vmul.f32 %v5840_v9, %v1911_v1  ;;  %v2233_v29 = vmul.f32 %v2169_v41, %v5827_v12 }
 0x2e6   : > { %v5922_v36 = vand.u32 2147483647, %v5904_v4  ;;  %v3789_v38 = vpop.eup %3788  ;;  %v2484_v7 = vsub.f32 1.0, %v2420_v45  ;;  %3794 = vpow2.f32 %v2331_v8  ;;  %v1785_v22 = vadd.f32 1.4214138, %v1721_v20 }
 0x2e7   : > { %v2170_v30 = vsub.f32 0.0, %v5860_v58  ;;  %v5925_v63 = vpop.eup %3790  ;;  %v2738_v33 = vadd.f32 1.0, %v2674_v13  ;;  %v2421_v37 = vmul.f32 %v3787_v62, %v2101_v24  ;;  %v1976_v2 = vmul.f32 %v5848_v40, %v1912_v61 }
 0x2e8   : > { %v1403_v52 = vmul.f32 0.3275911, %v5922_v36  ;;  %v5929_v1 = vmul.f32 %v3789_v38, %v2102_v43  ;;  %v1849_v12 = vmul.f32 %v5885_v25, %v1785_v22  ;;  %v1594_v41 = vmul.f32 1.0614054, %v5925_v63  ;;  %v7014_v22 = vld [vmem:[#allocation22_spill] sm:$0xff] }
 0x2e9   : > { %v5934_v45 = vmul.f32 0.70710677, %v5916_v11  ;;  %v2675_v8 = vsel %vm2547_vm14, %v2611_v48, %v2483_v28  ;;  %v2039_v57 = vadd.f32 0.2548296, %v1975_v59  ;;  %v2333_v20 = vmul.f32 1.442695, %v2233_v29 }
 0x2ea   : > { %v1467_v13 = vadd.f32 1.0, %v1403_v52  ;;  %v2612_v24 = vsub.f32 0.0, %v2484_v7  ;;  %v1913_v62 = vadd.f32 -0.28449672, %v1849_v12  ;;  %v1658_v61 = vadd.f32 -1.4531521, %v1594_v41 }
 0x2eb   : > { %v2234_v23 = vmul.f32 %v2170_v30, %v5860_v58  ;;  %v2485_v43 = vsub.f32 1.0, %v2421_v37  ;;  %vm2549_vm0 = vcmp.lt.f32.partialorder %v5696_v3, 0.0  ;;  %v2040_v38 = vadd.f32 0.2548296, %v1976_v2  ;;  %v5953_v59 = vpop.f32.mrb[59].mxu0  ;;  %v7024_v3 = vld [vmem:[#allocation25_spill] sm:$0xff] }
 0x2ec   : > { %3796 = vrcp.f32 %v1467_v13  ;;  %v5942_v27 = vadd.f32 %v7014_v22, %v4754_v14  ;;  %v2486_v18 = vsub.f32 1.0, %v5929_v1  ;;  %vm2550_vm1 = vcmp.lt.f32.partialorder %v5730_v16, 0.0  ;;  %7016 = vst [vmem:[#allocation23_spill] sm:$0xff] %v5953_v59 }
 0x2ed   : > { %v1977_v28 = vmul.f32 %v5885_v25, %v1913_v62  ;;  %v1722_v48 = vmul.f32 %v5925_v63, %v1658_v61  ;;  %v5951_v58 = vand.u32 2147483647, %v5934_v45  ;;  %v3793_v29 = vpop.eup %3792  ;;  %v2103_v30 = vmul.f32 %v5840_v9, %v2039_v57 }
 0x2ee   : > { %v5957_v37 = vmul.f32 0.5, %v5743_v50  ;;  %v5960_v2 = vmul.f32 0.5, %v5793_v26  ;;  %3798 = vpow2.f32 %v2333_v20  ;;  %v5963_v52 = vmul.f32 %v2738_v33, %v5754_v35  ;;  %v7018_v50 = vld [vmem:[#allocation27_spill] sm:$0xff] }
 0x2ef   : > { %v2739_v1 = vadd.f32 1.0, %v2675_v8  ;;  %v2676_v12 = vsel %vm2548_vm15, %v2612_v24, %v2484_v7  ;;  %v2335_v41 = vmul.f32 1.442695, %v2234_v23  ;;  %v1786_v13 = vadd.f32 1.4214138, %v1722_v48  ;;  %v7019_v7 = vld [vmem:[#allocation24_spill] sm:$0xff] }
 0x2f0   : > { %7017 = vst [vmem:[#allocation18_spill] sm:$0xff] %v5963_v52  ;;  %v1404_v62 = vmul.f32 0.3275911, %v5951_v58  ;;  %v5969_v9 = vmul.f32 0.70710677, %v5942_v27  ;;  %v2844_v57 = vpack.c.bf16 %v5486_v56, %v7018_v50  ;;  %v3795_v26 = vpop.eup %3794  ;;  %v2613_v61 = vsub.f32 0.0, %v2485_v43 }
 0x2f1   : > { %v2614_v20 = vsub.f32 0.0, %v2486_v18  ;;  %v2104_v35 = vmul.f32 %v5848_v40, %v2040_v38  ;;  %v2041_v33 = vadd.f32 0.2548296, %v1977_v28  ;;  %v2423_v8 = vmul.f32 %v3793_v29, %v2103_v30  ;;  %v7020_v56 = vld [vmem:[#allocation26_spill] sm:$0xff]  ;;  %v7021_v50 = vld [vmem:[#allocation47_spill] sm:$0xff]  ;;  %v5986_v40 = vpop.f32.mrb[60].mxu0 }
 0x2f2   : > { %v1468_v22 = vadd.f32 1.0, %v1404_v62  ;;  %v5975_v46 = vand.u32 2147483647, %v5969_v9  ;;  %3060 = vmatprep.mubr.bf16.mxu1 %v2844_v57  ;;  %v5979_v24 = vadd.f32 %v7019_v7, %v4776_v10  ;;  %v2740_v23 = vadd.f32 1.0, %v2676_v12  ;;  %7022 = vst [vmem:[#allocation16_spill] sm:$0xff] %v5986_v40  ;;  %v7033_v40 = vld [vmem:[#allocation30_spill] sm:$0xff] }
 0x2f3   : > { %v5982_v48 = vmul.f32 0.5, %v5831_v49  ;;  %3800 = vpow2.f32 %v2335_v41  ;;  %v2843_v59 = vpack.c.bf16 %v7021_v50, %v7020_v56  ;;  %v5989_v38 = vmul.f32 %v2739_v1, %v5807_v21  ;;  %v7027_v56 = vld [vmem:[#allocation45_spill] sm:$0xff] }
 0x2f4   : > { %v1850_v28 = vmul.f32 %v5925_v63, %v1786_v13  ;;  %3802 = vrcp.f32 %v1468_v22  ;;  %v1405_v29 = vmul.f32 0.3275911, %v5975_v46  ;;  %v2677_v30 = vsel %vm2549_vm0, %v2613_v61, %v2485_v43 }
 0x2f5   : > { %7023 = vst [vmem:[#allocation38_spill] sm:$0xff] %v5989_v38  ;;  %vm2551_vm2 = vcmp.lt.f32.partialorder %v5758_v54, 0.0  ;;  %v5996_v49 = vmul.f32 %v3795_v26, %v2104_v35  ;;  %v2105_v12 = vmul.f32 %v5885_v25, %v2041_v33  ;;  %v6000_v41 = vmul.f32 0.70710677, %v5979_v24  ;;  %3061 = vmatmul.mubr.bf16.gmra.mrb[12].mxu1 %v2843_v59 }
 0x2f6   : > { %v6002_v21 = vpop.eup %3796  ;;  %v2678_v1 = vsel %vm2550_vm1, %v2614_v20, %v2486_v18  ;;  %v2487_v13 = vsub.f32 1.0, %v2423_v8  ;;  %v1469_v62 = vadd.f32 1.0, %v1405_v29  ;;  %v6008_v43 = vadd.f32 %v7024_v3, %v4754_v14 }
 0x2f7   : > { %v6011_v57 = vmul.f32 %v2740_v23, %v5872_v5  ;;  %v6014_v25 = vmul.f32 0.5, %v5883_v55  ;;  %v1595_v26 = vmul.f32 1.0614054, %v6002_v21  ;;  %v2171_v59 = vsub.f32 0.0, %v5922_v36  ;;  %v6025_v55 = vpop.f32.mrb[61].mxu0 }
 0x2f8   : > { %v3799_v61 = vpop.eup %3798  ;;  %v2741_v35 = vadd.f32 1.0, %v2677_v30  ;;  %v1914_v16 = vadd.f32 -0.28449672, %v1850_v28  ;;  %3804 = vrcp.f32 %v1469_v62  ;;  %v6019_v18 = vand.u32 2147483647, %v6000_v41  ;;  %7026 = vst [vmem:[#allocation17_spill] sm:$0xff] %v6025_v55 }
 0x2f9   : > { %7025 = vst [vmem:[#allocation39_spill] sm:$0xff] %v6011_v57  ;;  %v2742_v20 = vadd.f32 1.0, %v2678_v1  ;;  %vm2552_vm3 = vcmp.lt.f32.partialorder %v5765_v42, 0.0  ;;  %v2425_v33 = vmul.f32 %v3799_v61, %v2105_v12  ;;  %v1659_v5 = vadd.f32 -1.4531521, %v1595_v26 }
 0x2fa   : > { %v6023_v8 = vmul.f32 0.70710677, %v6008_v43  ;;  %v2615_v22 = vsub.f32 0.0, %v2487_v13  ;;  %v2488_v7 = vsub.f32 1.0, %v5996_v49  ;;  %v1406_v23 = vmul.f32 0.3275911, %v6019_v18 }
 0x2fb   : > { %v6031_v50 = vadd.f32 %v7027_v56, %v4776_v10  ;;  %v1723_v28 = vmul.f32 %v6002_v21, %v1659_v5  ;;  %v2235_v29 = vmul.f32 %v2171_v59, %v5922_v36  ;;  %v6036_v30 = vmul.f32 0.5, %v5916_v11 }
 0x2fc   : > { %v6039_v12 = vand.u32 2147483647, %v6023_v8  ;;  %v6042_v1 = vmul.f32 %v2741_v35, %v5878_v53  ;;  %vm2553_vm4 = vcmp.lt.f32.partialorder %v5817_v47, 0.0  ;;  %v1978_v49 = vmul.f32 %v5925_v63, %v1914_v16 }
 0x2fd   : > { %v2172_v62 = vsub.f32 0.0, %v5951_v58  ;;  %v1470_v3 = vadd.f32 1.0, %v1406_v23  ;;  %v3801_v26 = vpop.eup %3800  ;;  %v6048_v61 = vmul.f32 %v2742_v20, %v5888_v32  ;;  %v2489_v36 = vsub.f32 1.0, %v2425_v33 }
 0x2fe   : > { %7028 = vst [vmem:[#allocation40_spill] sm:$0xff] %v6042_v1  ;;  %v1787_v11 = vadd.f32 1.4214138, %v1723_v28  ;;  %v1407_v59 = vmul.f32 0.3275911, %v6039_v12  ;;  %v6051_v5 = vpop.eup %3802  ;;  %v2679_v53 = vsel %vm2551_vm2, %v2615_v22, %v2487_v13  ;;  %v2616_v35 = vsub.f32 0.0, %v2488_v7 }
 0x2ff   : > { %7029 = vst [vmem:[#allocation41_spill] sm:$0xff] %v6048_v61  ;;  %3806 = vrcp.f32 %v1470_v3  ;;  %v6056_v16 = vmul.f32 0.70710677, %v6031_v50  ;;  %v2337_v56 = vmul.f32 1.442695, %v2235_v29  ;;  %v2236_v28 = vmul.f32 %v2172_v62, %v5951_v58  ;;  %v6065_v3 = vpop.f32.mrb[62].mxu0 }
 0x300   : > { %v1851_v23 = vmul.f32 %v6002_v21, %v1787_v11  ;;  %v1596_v32 = vmul.f32 1.0614054, %v6051_v5  ;;  %v1471_v20 = vadd.f32 1.0, %v1407_v59  ;;  %v2042_v33 = vadd.f32 0.2548296, %v1978_v49  ;;  %7030 = vst [vmem:[#allocation19_spill] sm:$0xff] %v6065_v3 }
 0x301   : > { %v2173_v1 = vsub.f32 0.0, %v5975_v46  ;;  %v6063_v55 = vand.u32 2147483647, %v6056_v16  ;;  %v2743_v54 = vadd.f32 1.0, %v2679_v53  ;;  %v2617_v13 = vsub.f32 0.0, %v2489_v36  ;;  %v7031_v58 = vld [vmem:[#allocation46_spill] sm:$0xff] }
 0x302   : > { %v1660_v22 = vadd.f32 -1.4531521, %v1596_v32  ;;  %3808 = vrcp.f32 %v1471_v20  ;;  %v6067_v61 = vpop.eup %3804  ;;  %v2680_v29 = vsel %vm2552_vm3, %v2616_v35, %v2488_v7  ;;  %v1915_v11 = vadd.f32 -0.28449672, %v1851_v23  ;;  %v6081_v20 = vpop.f32.mrb[63].mxu0 }
 0x303   : > { %v1408_v49 = vmul.f32 0.3275911, %v6063_v55  ;;  %v6074_v62 = vadd.f32 %v7031_v58, %v4754_v14  ;;  %3810 = vpow2.f32 %v2337_v56  ;;  %v6078_v53 = vmul.f32 0.5, %v5942_v27  ;;  %7032 = vst [vmem:[#allocation43_spill] sm:$0xff] %v6081_v20 }
 0x304   : > { %v1724_v59 = vmul.f32 %v6051_v5, %v1660_v22  ;;  %v1597_v32 = vmul.f32 1.0614054, %v6067_v61  ;;  %v2106_v42 = vmul.f32 %v5925_v63, %v2042_v33  ;;  %v2339_v7 = vmul.f32 1.442695, %v2236_v28  ;;  %v7034_v22 = vld [vmem:[#allocation29_spill] sm:$0xff]  ;;  %v7035_v63 = vld [vmem:[#allocation28_spill] sm:$0xff] }
 0x305   : > { %v2237_v35 = vmul.f32 %v2173_v1, %v5975_v46  ;;  %v1472_v23 = vadd.f32 1.0, %v1408_v49  ;;  %v2681_v58 = vsel %vm2553_vm4, %v2617_v13, %v2489_v36  ;;  %v2846_v51 = vpack.c.bf16 %v7034_v22, %v7033_v40  ;;  %v7036_v36 = vld [vmem:[#allocation48_spill] sm:$0xff]  ;;  %v7037_v28 = vld [vmem:[#allocation50_spill] sm:$0xff] }
 0x306   : > { %v1788_v3 = vadd.f32 1.4214138, %v1724_v59  ;;  %v1661_v56 = vadd.f32 -1.4531521, %v1597_v32  ;;  %v1979_v27 = vmul.f32 %v6002_v21, %v1915_v11  ;;  %v6091_v38 = vmul.f32 0.70710677, %v6074_v62 }
 0x307   : > { %3812 = vrcp.f32 %v1472_v23  ;;  %v6095_v33 = vadd.f32 %v7035_v63, %v4776_v10  ;;  %v2174_v1 = vsub.f32 0.0, %v6019_v18  ;;  %3068 = vmatprep.mubr.bf16.mxu1 %v2846_v51  ;;  %v2845_v40 = vpack.c.bf16 %v7037_v28, %v7036_v36 }
 0x308   : > { %v1852_v46 = vmul.f32 %v6051_v5, %v1788_v3  ;;  %v1725_v47 = vmul.f32 %v6067_v61, %v1661_v56  ;;  %v2744_v11 = vadd.f32 1.0, %v2680_v29  ;;  %v2426_v49 = vmul.f32 %v3801_v26, %v2106_v42 }
 0x309   : > { %v6102_v13 = vpop.eup %3806  ;;  %v2341_v59 = vmul.f32 1.442695, %v2237_v35  ;;  %v6105_v32 = vand.u32 2147483647, %v6091_v38  ;;  %v6108_v23 = vmul.f32 %v2743_v54, %v5908_v15  ;;  %v2745_v3 = vadd.f32 1.0, %v2681_v58  ;;  %3069 = vmatmul.mubr.bf16.gmra.mrb[16].mxu1 %v2845_v40 }
 0x30a   : > { %v1789_v22 = vadd.f32 1.4214138, %v1725_v47  ;;  %v1598_v56 = vmul.f32 1.0614054, %v6102_v13  ;;  %v2043_v51 = vadd.f32 0.2548296, %v1979_v27  ;;  %3814 = vpow2.f32 %v2339_v7 }
 0x30b   : > { %7038 = vst [vmem:[#allocation42_spill] sm:$0xff] %v6108_v23  ;;  %v1409_v63 = vmul.f32 0.3275911, %v6105_v32  ;;  %v6113_v36 = vmul.f32 0.70710677, %v6095_v33  ;;  %vm2554_vm5 = vcmp.lt.f32.partialorder %v5846_v39, 0.0  ;;  %v2238_v42 = vmul.f32 %v2174_v1, %v6019_v18 }
 0x30c   : > { %v6115_v26 = vpop.eup %3808  ;;  %v1916_v29 = vadd.f32 -0.28449672, %v1852_v46  ;;  %v1853_v15 = vmul.f32 %v6067_v61, %v1789_v22  ;;  %v1662_v54 = vadd.f32 -1.4531521, %v1598_v56  ;;  %v2490_v35 = vsub.f32 1.0, %v2426_v49 }
 0x30d   : > { %v1599_v58 = vmul.f32 1.0614054, %v6115_v26  ;;  %v1473_v27 = vadd.f32 1.0, %v1409_v63  ;;  %v6122_v7 = vand.u32 2147483647, %v6113_v36  ;;  %v3811_v47 = vpop.eup %3810  ;;  %v2175_v20 = vsub.f32 0.0, %v6039_v12 }
 0x30e   : > { %v1917_v28 = vadd.f32 -0.28449672, %v1853_v15  ;;  %v1726_v40 = vmul.f32 %v6102_v13, %v1662_v54  ;;  %v2176_v46 = vsub.f32 0.0, %v6063_v55  ;;  %v2107_v22 = vmul.f32 %v6002_v21, %v2043_v51 }
 0x30f   : > { %v1663_v56 = vadd.f32 -1.4531521, %v1599_v58  ;;  %3816 = vrcp.f32 %v1473_v27  ;;  %v1410_v18 = vmul.f32 0.3275911, %v6122_v7  ;;  %v1980_v1 = vmul.f32 %v6051_v5, %v1916_v29 }
 0x310   : > { %3818 = vpow2.f32 %v2341_v59  ;;  %v1790_v49 = vadd.f32 1.4214138, %v1726_v40  ;;  %v2343_v63 = vmul.f32 1.442695, %v2238_v42  ;;  %v2618_v15 = vsub.f32 0.0, %v2490_v35  ;;  %v7039_v42 = vld [vmem:[#allocation49_spill] sm:$0xff] }
 0x311   : > { %v6130_v23 = vpop.eup %3812  ;;  %v1981_v54 = vmul.f32 %v6067_v61, %v1917_v28  ;;  %v1727_v57 = vmul.f32 %v6115_v26, %v1663_v56  ;;  %v1474_v52 = vadd.f32 1.0, %v1410_v18  ;;  %v2239_v21 = vmul.f32 %v2175_v20, %v6039_v12 }
 0x312   : > { %v1854_v17 = vmul.f32 %v6102_v13, %v1790_v49  ;;  %v1600_v51 = vmul.f32 1.0614054, %v6130_v23  ;;  %v2240_v58 = vmul.f32 %v2176_v46, %v6063_v55  ;;  %v6138_v29 = vmul.f32 %v3811_v47, %v2107_v22 }
 0x313   : > { %v1791_v59 = vadd.f32 1.4214138, %v1727_v57  ;;  %3820 = vrcp.f32 %v1474_v52  ;;  %v6142_v27 = vadd.f32 %v7039_v42, %v4754_v14  ;;  %v6145_v28 = vmul.f32 %v2744_v11, %v5957_v37 }
 0x314   : > { %v2044_v40 = vadd.f32 0.2548296, %v1980_v1  ;;  %v1918_v56 = vadd.f32 -0.28449672, %v1854_v17  ;;  %v1664_v18 = vadd.f32 -1.4531521, %v1600_v51  ;;  %v3815_v49 = vpop.eup %3814  ;;  %v2682_v12 = vsel %vm2554_vm5, %v2618_v15, %v2490_v35 }
 0x315   : > { %v2045_v20 = vadd.f32 0.2548296, %v1981_v54  ;;  %v6150_v55 = vmul.f32 0.5, %v5979_v24  ;;  %v1855_v52 = vmul.f32 %v6115_v26, %v1791_v59  ;;  %v2345_v47 = vmul.f32 1.442695, %v2239_v21 }
 0x316   : > { %v1982_v57 = vmul.f32 %v6102_v13, %v1918_v56  ;;  %v1728_v46 = vmul.f32 %v6130_v23, %v1664_v18  ;;  %v2347_v37 = vmul.f32 1.442695, %v2240_v58  ;;  %v2491_v11 = vsub.f32 1.0, %v6138_v29 }
 0x317   : > { %3822 = vpow2.f32 %v2343_v63  ;;  %v1919_v17 = vadd.f32 -0.28449672, %v1855_v52  ;;  %v6157_v22 = vmul.f32 0.70710677, %v6142_v27  ;;  %v6160_v39 = vmul.f32 %v2745_v3, %v5960_v2 }
 0x318   : > { %vm2555_vm6 = vcmp.lt.f32.partialorder %v5904_v4, 0.0  ;;  %v2108_v24 = vmul.f32 %v6051_v5, %v2044_v40  ;;  %v6165_v35 = vmul.f32 0.5, %v6008_v43  ;;  %v1792_v1 = vadd.f32 1.4214138, %v1728_v46  ;;  %v7041_v4 = vld [vmem:[#allocation35_spill] sm:$0xff] }
 0x319   : > { %v6167_v15 = vpop.eup %3816  ;;  %v2746_v54 = vadd.f32 1.0, %v2682_v12  ;;  %v2109_v63 = vmul.f32 %v6067_v61, %v2045_v20  ;;  %v2046_v21 = vadd.f32 0.2548296, %v1982_v57  ;;  %v6171_v51 = vand.u32 2147483647, %v6157_v22  ;;  %v7040_v57 = vld [vmem:[#allocation32_spill] sm:$0xff] }
 0x31a   : > { %v3819_v58 = vpop.eup %3818  ;;  %v1983_v2 = vmul.f32 %v6115_v26, %v1919_v17  ;;  %3824 = vpow2.f32 %v2345_v47  ;;  %v1856_v3 = vmul.f32 %v6130_v23, %v1792_v1  ;;  %v1601_v5 = vmul.f32 1.0614054, %v6167_v15 }
 0x31b   : > { %v2619_v43 = vsub.f32 0.0, %v2491_v11  ;;  %3826 = vpow2.f32 %v2347_v37  ;;  %v2177_v29 = vsub.f32 0.0, %v6105_v32  ;;  %v1411_v59 = vmul.f32 0.3275911, %v6171_v51 }
 0x31c   : > { %v2428_v42 = vmul.f32 %v3815_v49, %v2108_v24  ;;  %v1920_v61 = vadd.f32 -0.28449672, %v1856_v3  ;;  %v1665_v40 = vadd.f32 -1.4531521, %v1601_v5  ;;  %v2178_v56 = vsub.f32 0.0, %v6122_v7 }
 0x31d   : > { %v6179_v18 = vpop.eup %3820  ;;  %v2429_v12 = vmul.f32 %v3819_v58, %v2109_v63  ;;  %v2110_v20 = vmul.f32 %v6102_v13, %v2046_v21  ;;  %v1475_v52 = vadd.f32 1.0, %v1411_v59  ;;  %v6184_v47 = vadd.f32 %v7040_v57, %v4776_v10 }
 0x31e   : > { %v2047_v46 = vadd.f32 0.2548296, %v1983_v2  ;;  %v1984_v37 = vmul.f32 %v6130_v23, %v1920_v61  ;;  %v1729_v17 = vmul.f32 %v6167_v15, %v1665_v40  ;;  %v1602_v49 = vmul.f32 1.0614054, %v6179_v18 }
 0x31f   : > { %vm2556_vm7 = vcmp.lt.f32.partialorder %v5934_v45, 0.0  ;;  %v6191_v24 = vmul.f32 0.5, %v6031_v50  ;;  %v6194_v1 = vmul.f32 0.5, %v6074_v62  ;;  %v2241_v13 = vmul.f32 %v2177_v29, %v6105_v32 }
 0x320   : > { %3828 = vrcp.f32 %v1475_v52  ;;  %v6198_v63 = vmul.f32 %v2746_v54, %v5982_v48  ;;  %v2492_v21 = vsub.f32 1.0, %v2428_v42  ;;  %vm2557_vm8 = vcmp.lt.f32.partialorder %v5969_v9, 0.0 }
 0x321   : > { %v2048_v58 = vadd.f32 0.2548296, %v1984_v37  ;;  %v1793_v2 = vadd.f32 1.4214138, %v1729_v17  ;;  %v3823_v3 = vpop.eup %3822  ;;  %v2683_v5 = vsel %vm2555_vm6, %v2619_v43, %v2491_v11  ;;  %v2493_v50 = vsub.f32 1.0, %v2429_v12 }
 0x322   : > { %v1666_v59 = vadd.f32 -1.4531521, %v1602_v49  ;;  %v2242_v62 = vmul.f32 %v2178_v56, %v6122_v7  ;;  %v2430_v61 = vmul.f32 %v3823_v3, %v2110_v20  ;;  %v2111_v32 = vmul.f32 %v6115_v26, %v2047_v46 }
 0x323   : > { %v1857_v29 = vmul.f32 %v6167_v15, %v1793_v2  ;;  %v6207_v48 = vmul.f32 0.70710677, %v6184_v47  ;;  %v2112_v54 = vmul.f32 %v6130_v23, %v2048_v58  ;;  %v2349_v42 = vmul.f32 1.442695, %v2241_v13 }
 0x324   : > { %v1730_v40 = vmul.f32 %v6179_v18, %v1666_v59  ;;  %v6213_v11 = vadd.f32 %v7041_v4, %v4754_v14  ;;  %v3825_v43 = vpop.eup %3824  ;;  %v2620_v12 = vsub.f32 0.0, %v2492_v21  ;;  %v6216_v56 = vmul.f32 0.5, %v6095_v33 }
 0x325   : > { %v1921_v7 = vadd.f32 -0.28449672, %v1857_v29  ;;  %v6219_v26 = vand.u32 2147483647, %v6207_v48  ;;  %v3827_v20 = vpop.eup %3826  ;;  %v2747_v52 = vadd.f32 1.0, %v2683_v5  ;;  %v2621_v57 = vsub.f32 0.0, %v2493_v50 }
 0x326   : > { %vm2558_vm9 = vcmp.lt.f32.partialorder %v6000_v41, 0.0  ;;  %v1794_v23 = vadd.f32 1.4214138, %v1730_v40  ;;  %v2179_v46 = vsub.f32 0.0, %v6171_v51  ;;  %v2494_v37 = vsub.f32 1.0, %v2430_v61  ;;  %v7044_v41 = vld [vmem:[#allocation34_spill] sm:$0xff] }
 0x327   : > { %v2431_v17 = vmul.f32 %v3825_v43, %v2111_v32  ;;  %v2351_v49 = vmul.f32 1.442695, %v2242_v62  ;;  %v1412_v13 = vmul.f32 0.3275911, %v6219_v26  ;;  %v2432_v58 = vmul.f32 %v3827_v20, %v2112_v54  ;;  %v7042_v43 = vld [vmem:[#allocation52_spill] sm:$0xff] }
 0x328   : > { %v1858_v33 = vmul.f32 %v6179_v18, %v1794_v23  ;;  %v6226_v2 = vmul.f32 0.70710677, %v6213_v11  ;;  %v2848_v3 = vpack.c.bf16 %v5746_v34, %v5723_v0  ;;  %v2684_v5 = vsel %vm2556_vm7, %v2620_v12, %v2492_v21 }
 0x329   : > { %v1985_v59 = vmul.f32 %v6167_v15, %v1921_v7  ;;  %3830 = vpow2.f32 %v2349_v42  ;;  %v1476_v61 = vadd.f32 1.0, %v1412_v13  ;;  %v2685_v62 = vsel %vm2557_vm8, %v2621_v57, %v2493_v50 }
 0x32a   : > { %v6233_v32 = vpop.eup %3828  ;;  %vm2559_vm10 = vcmp.lt.f32.partialorder %v6023_v8, 0.0  ;;  %v1922_v29 = vadd.f32 -0.28449672, %v1858_v33  ;;  %v2243_v54 = vmul.f32 %v2179_v46, %v6171_v51  ;;  %v6240_v40 = vand.u32 2147483647, %v6226_v2  ;;  %3076 = vmatprep.mubr.bf16.mxu1 %v2848_v3 }
 0x32b   : > { %v2622_v0 = vsub.f32 0.0, %v2494_v37  ;;  %v2495_v34 = vsub.f32 1.0, %v2431_v17  ;;  %vm2560_vm11 = vcmp.lt.f32.partialorder %v6056_v16, 0.0  ;;  %v1603_v45 = vmul.f32 1.0614054, %v6233_v32 }
 0x32c   : > { %3832 = vrcp.f32 %v1476_v61  ;;  %v2496_v21 = vsub.f32 1.0, %v2432_v58  ;;  %v1986_v9 = vmul.f32 %v6179_v18, %v1922_v29  ;;  %v1413_v50 = vmul.f32 0.3275911, %v6240_v40 }
 0x32d   : > { %3834 = vpow2.f32 %v2351_v49  ;;  %v6247_v42 = vmul.f32 %v2747_v52, %v6014_v25  ;;  %v2049_v51 = vadd.f32 0.2548296, %v1985_v59  ;;  %v1667_v4 = vadd.f32 -1.4531521, %v1603_v45  ;;  %v7043_v52 = vld [vmem:[#allocation51_spill] sm:$0xff] }
 0x32e   : > { %v6251_v12 = vadd.f32 %v7042_v43, %v4776_v10  ;;  %v2748_v7 = vadd.f32 1.0, %v2684_v5  ;;  %v2749_v20 = vadd.f32 1.0, %v2685_v62  ;;  %v2353_v57 = vmul.f32 1.442695, %v2243_v54 }
 0x32f   : > { %v1477_v23 = vadd.f32 1.0, %v1413_v50  ;;  %v2686_v46 = vsel %vm2558_vm9, %v2622_v0, %v2494_v37  ;;  %v2623_v17 = vsub.f32 0.0, %v2495_v34  ;;  %v2050_v49 = vadd.f32 0.2548296, %v1986_v9  ;;  %v7045_v9 = vld [vmem:[#allocation36_spill] sm:$0xff] }
 0x330   : > { %v1731_v13 = vmul.f32 %v6233_v32, %v1667_v4  ;;  %v2624_v58 = vsub.f32 0.0, %v2496_v21  ;;  %v6257_v25 = vmul.f32 0.70710677, %v6251_v12  ;;  %v2847_v33 = vpack.c.bf16 %v5726_v31, %v7043_v52 }
 0x331   : > { %3836 = vrcp.f32 %v1477_v23  ;;  %v2113_v3 = vmul.f32 %v6167_v15, %v2049_v51  ;;  %v2180_v59 = vsub.f32 0.0, %v6219_v26  ;;  %v6265_v37 = vadd.f32 %v7044_v41, %v4754_v14 }
 0x332   : > { %v1795_v5 = vadd.f32 1.4214138, %v1731_v13  ;;  %v6268_v61 = vmul.f32 %v2748_v7, %v6036_v30  ;;  %v6271_v62 = vmul.f32 %v2749_v20, %v6078_v53  ;;  %v6274_v29 = vmul.f32 0.5, %v6142_v27  ;;  %3077 = vmatmul.mubr.bf16.gmra.mrb[20].mxu1 %v2847_v33 }
 0x333   : > { %v6277_v31 = vand.u32 2147483647, %v6257_v25  ;;  %v3831_v15 = vpop.eup %3830  ;;  %v2750_v54 = vadd.f32 1.0, %v2686_v46  ;;  %v2687_v0 = vsel %vm2559_vm10, %v2623_v17, %v2495_v34  ;;  %v2114_v45 = vmul.f32 %v6179_v18, %v2050_v49 }
 0x334   : > { %3838 = vpow2.f32 %v2353_v57  ;;  %v2688_v30 = vsel %vm2560_vm11, %v2624_v58, %v2496_v21  ;;  %v1859_v53 = vmul.f32 %v6233_v32, %v1795_v5  ;;  %v6288_v50 = vadd.f32 %v7045_v9, %v4776_v10 }
 0x335   : > { %v1414_v27 = vmul.f32 0.3275911, %v6277_v31  ;;  %v2433_v4 = vmul.f32 %v3831_v15, %v2113_v3  ;;  %v2244_v8 = vmul.f32 %v2180_v59, %v6219_v26  ;;  %v2181_v34 = vsub.f32 0.0, %v6240_v40 }
 0x336   : > { %v6290_v51 = vpop.eup %3832  ;;  %v6295_v18 = vmul.f32 0.70710677, %v6265_v37  ;;  %v2751_v21 = vadd.f32 1.0, %v2687_v0  ;;  %v6298_v43 = vmul.f32 0.5, %v6184_v47  ;;  %v6302_v57 = vmul.f32 %v2750_v54, %v6150_v55 }
 0x337   : > { %v3835_v16 = vpop.eup %3834  ;;  %v1604_v7 = vmul.f32 1.0614054, %v6290_v51  ;;  %v1478_v20 = vadd.f32 1.0, %v1414_v27  ;;  %v2752_v23 = vadd.f32 1.0, %v2688_v30  ;;  %vm2561_vm12 = vcmp.lt.f32.partialorder %v6091_v38, 0.0 }
 0x338   : > { %v2434_v46 = vmul.f32 %v3835_v16, %v2114_v45  ;;  %v1351_v26 = vand.u32 2147483647, %v6295_v18  ;;  %v1923_v17 = vadd.f32 -0.28449672, %v1859_v53  ;;  %v6307_v13 = vmul.f32 0.70710677, %v6288_v50 }
 0x339   : > { %v1668_v49 = vadd.f32 -1.4531521, %v1604_v7  ;;  %3840 = vrcp.f32 %v1478_v20  ;;  %v2497_v47 = vsub.f32 1.0, %v2433_v4  ;;  %v2355_v58 = vmul.f32 1.442695, %v2244_v8 }
 0x33a   : > { %v6310_v52 = vmul.f32 0.5, %v6213_v11  ;;  %v2245_v55 = vmul.f32 %v2181_v34, %v6240_v40  ;;  %v6316_v3 = vmul.f32 %v2751_v21, %v6165_v35  ;;  %vm2562_vm13 = vcmp.lt.f32.partialorder %v6113_v36, 0.0  ;;  %v7046_v36 = vld [vmem:[#allocation14_spill] sm:$0xff] }
 0x33b   : > { %v6313_v33 = vpop.eup %3836  ;;  %v1732_v5 = vmul.f32 %v6290_v51, %v1668_v49  ;;  %v1415_v59 = vmul.f32 0.3275911, %v1351_v26  ;;  %v6321_v41 = vand.u32 2147483647, %v6307_v13  ;;  %v6324_v15 = vmul.f32 %v2752_v23, %v6191_v24 }
 0x33c   : > { %v2498_v11 = vsub.f32 1.0, %v2434_v46  ;;  %v1605_v54 = vmul.f32 1.0614054, %v6313_v33  ;;  %v6329_v40 = vadd.f32 %v5698_v60, %v4754_v14  ;;  %v1987_v35 = vmul.f32 %v6233_v32, %v1923_v17 }
 0x33d   : > { %v1796_v0 = vadd.f32 1.4214138, %v1732_v5  ;;  %v1479_v45 = vadd.f32 1.0, %v1415_v59  ;;  %v1416_v30 = vmul.f32 0.3275911, %v6321_v41  ;;  %v2625_v27 = vsub.f32 0.0, %v2497_v47 }
 0x33e   : > { %v3839_v53 = vpop.eup %3838  ;;  %3842 = vpow2.f32 %v2355_v58  ;;  %v1669_v9 = vadd.f32 -1.4531521, %v1605_v54  ;;  %v2357_v4 = vmul.f32 1.442695, %v2245_v55  ;;  %v2182_v8 = vsub.f32 0.0, %v6277_v31 }
 0x33f   : > { %v1860_v24 = vmul.f32 %v6290_v51, %v1796_v0  ;;  %3844 = vrcp.f32 %v1479_v45  ;;  %v1480_v34 = vadd.f32 1.0, %v1416_v30  ;;  %v2626_v16 = vsub.f32 0.0, %v2498_v11 }
 0x340   : > { %v1733_v60 = vmul.f32 %v6313_v33, %v1669_v9  ;;  %v6337_v21 = vmul.f32 0.5, %v6251_v12  ;;  %v6340_v7 = vmul.f32 0.70710677, %v6329_v40  ;;  %v2051_v20 = vadd.f32 0.2548296, %v1987_v35 }
 0x341   : > { %v1924_v23 = vadd.f32 -0.28449672, %v1860_v24  ;;  %v2183_v46 = vsub.f32 0.0, %v1351_v26  ;;  %v2850_v17 = vpack.c.bf16 %v5893_v44, %v5783_v6  ;;  %v2689_v49 = vsel %vm2561_vm12, %v2625_v27, %v2497_v47 }
 0x342   : > { %v1797_v58 = vadd.f32 1.4214138, %v1733_v60  ;;  %3846 = vrcp.f32 %v1480_v34  ;;  %v6348_v55 = vadd.f32 %v5749_v19, %v4776_v10  ;;  %v2246_v59 = vmul.f32 %v2182_v8, %v6277_v31 }
 0x343   : > { %v6350_v12 = vpop.eup %3840  ;;  %v1988_v5 = vmul.f32 %v6290_v51, %v1924_v23  ;;  %3848 = vpow2.f32 %v2357_v4  ;;  %v6355_v54 = vand.u32 2147483647, %v6340_v7  ;;  %3084 = vmatprep.mubr.bf16.mxu1 %v2850_v17  ;;  %v2690_v6 = vsel %vm2562_vm13, %v2626_v16, %v2498_v11  ;;  %v7047_v11 = vld [vmem:[#allocation31_spill] sm:$0xff] }
 0x344   : > { %v1861_v44 = vmul.f32 %v6313_v33, %v1797_v58  ;;  %v1606_v38 = vmul.f32 1.0614054, %v6350_v12  ;;  %v6362_v19 = vmul.f32 0.5, %v6265_v37  ;;  %v2115_v47 = vmul.f32 %v6233_v32, %v2051_v20 }
 0x345   : > { %v2052_v35 = vadd.f32 0.2548296, %v1988_v5  ;;  %v2247_v0 = vmul.f32 %v2183_v46, %v1351_v26  ;;  %v1417_v31 = vmul.f32 0.3275911, %v6355_v54  ;;  %v6367_v27 = vmul.f32 0.70710677, %v6348_v55 }
 0x346   : > { %v1925_v45 = vadd.f32 -0.28449672, %v1861_v44  ;;  %v1670_v30 = vadd.f32 -1.4531521, %v1606_v38  ;;  %v2849_v9 = vpack.c.bf16 %v7047_v11, %v7046_v36  ;;  %v2753_v4 = vadd.f32 1.0, %v2689_v49  ;;  %v7048_v5 = vld [vmem:[#allocation15_spill] sm:$0xff] }
 0x347   : > { %v2754_v24 = vadd.f32 1.0, %v2690_v6  ;;  %v2359_v8 = vmul.f32 1.442695, %v2246_v59  ;;  %v1481_v34 = vadd.f32 1.0, %v1417_v31  ;;  %v2116_v16 = vmul.f32 %v6290_v51, %v2052_v35 }
 0x348   : > { %v3843_v37 = vpop.eup %3842  ;;  %v1989_v32 = vmul.f32 %v6313_v33, %v1925_v45  ;;  %v1734_v26 = vmul.f32 %v6350_v12, %v1670_v30  ;;  %v1354_v60 = vand.u32 2147483647, %v6367_v27  ;;  %3085 = vmatmul.mubr.bf16.gmra.mrb[24].mxu1 %v2849_v9  ;;  %v6377_v23 = vmul.f32 %v3839_v53, %v2115_v47 }
 0x349   : > { %v6375_v20 = vpop.eup %3844  ;;  %v6380_v46 = vmul.f32 0.5, %v6288_v50  ;;  %v2184_v17 = vsub.f32 0.0, %v6321_v41  ;;  %3850 = vrcp.f32 %v1481_v34  ;;  %v2361_v58 = vmul.f32 1.442695, %v2247_v0 }
 0x34a   : > { %v1798_v49 = vadd.f32 1.4214138, %v1734_v26  ;;  %v1607_v51 = vmul.f32 1.0614054, %v6375_v20  ;;  %v6386_v59 = vadd.f32 %v7048_v5, %v4754_v14  ;;  %v6389_v6 = vmul.f32 %v2753_v4, %v6194_v1 }
 0x34b   : > { %v6392_v53 = vmul.f32 %v2754_v24, %v6216_v56  ;;  %3852 = vpow2.f32 %v2359_v8  ;;  %v1418_v50 = vmul.f32 0.3275911, %v1354_v60  ;;  %v2436_v38 = vmul.f32 %v3843_v37, %v2116_v16 }
 0x34c   : > { %v6394_v44 = vpop.eup %3846  ;;  %v2053_v47 = vadd.f32 0.2548296, %v1989_v32  ;;  %v1862_v35 = vmul.f32 %v6350_v12, %v1798_v49  ;;  %v1671_v31 = vadd.f32 -1.4531521, %v1607_v51  ;;  %v2499_v45 = vsub.f32 1.0, %v6377_v23 }
 0x34d   : > { %v3849_v0 = vpop.eup %3848  ;;  %v1608_v30 = vmul.f32 1.0614054, %v6394_v44  ;;  %v2248_v1 = vmul.f32 %v2184_v17, %v6321_v41  ;;  %v1482_v36 = vadd.f32 1.0, %v1418_v50  ;;  %vm2563_vm14 = vcmp.lt.f32.partialorder %v6157_v22, 0.0 }
 0x34e   : > { %v1926_v56 = vadd.f32 -0.28449672, %v1862_v35  ;;  %v1735_v11 = vmul.f32 %v6375_v20, %v1671_v31  ;;  %3854 = vpow2.f32 %v2361_v58  ;;  %v6403_v9 = vmul.f32 0.70710677, %v6386_v59  ;;  %v7049_v58 = vld [vmem:[#allocation12_spill] sm:$0xff] }
 0x34f   : > { %v1672_v4 = vadd.f32 -1.4531521, %v1608_v30  ;;  %v6406_v24 = vmul.f32 0.5, %v6329_v40  ;;  %v2185_v8 = vsub.f32 0.0, %v6355_v54  ;;  %3856 = vrcp.f32 %v1482_v36 }
 0x350   : > { %v2500_v34 = vsub.f32 1.0, %v2436_v38  ;;  %vm2564_vm15 = vcmp.lt.f32.partialorder %v6207_v48, 0.0  ;;  %v2117_v41 = vmul.f32 %v6313_v33, %v2053_v47  ;;  %v1990_v37 = vmul.f32 %v6350_v12, %v1926_v56 }
 0x351   : > { %v1799_v16 = vadd.f32 1.4214138, %v1735_v11  ;;  %v2627_v32 = vsub.f32 0.0, %v2499_v45  ;;  %v1736_v26 = vmul.f32 %v6394_v44, %v1672_v4  ;;  %v2186_v23 = vsub.f32 0.0, %v1354_v60 }
 0x352   : > { %v6414_v17 = vand.u32 2147483647, %v6403_v9  ;;  %v2054_v40 = vadd.f32 0.2548296, %v1990_v37  ;;  %v2363_v51 = vmul.f32 1.442695, %v2248_v1  ;;  %v6419_v5 = vadd.f32 %v7049_v58, %v4776_v10 }
 0x353   : > { %v1863_v49 = vmul.f32 %v6375_v20, %v1799_v16  ;;  %v6421_v50 = vpop.eup %3850  ;;  %v1800_v33 = vadd.f32 1.4214138, %v1736_v26  ;;  %v2249_v38 = vmul.f32 %v2185_v8, %v6355_v54  ;;  %v6425_v47 = vmul.f32 0.5, %v6348_v55 }
 0x354   : > { %v1419_v35 = vmul.f32 0.3275911, %v6414_v17  ;;  %v2628_v31 = vsub.f32 0.0, %v2500_v34  ;;  %v2437_v30 = vmul.f32 %v3849_v0, %v2117_v41  ;;  %v1609_v56 = vmul.f32 1.0614054, %v6421_v50 }
 0x355   : > { %v1927_v36 = vadd.f32 -0.28449672, %v1863_v49  ;;  %v3853_v1 = vpop.eup %3852  ;;  %v2118_v11 = vmul.f32 %v6350_v12, %v2054_v40  ;;  %v1864_v4 = vmul.f32 %v6394_v44, %v1800_v33  ;;  %v2250_v37 = vmul.f32 %v2186_v23, %v1354_v60 }
 0x356   : > { %v1483_v16 = vadd.f32 1.0, %v1419_v35  ;;  %3858 = vpow2.f32 %v2363_v51  ;;  %v1673_v54 = vadd.f32 -1.4531521, %v1609_v56  ;;  %v6433_v55 = vmul.f32 0.70710677, %v6419_v5 }
 0x357   : > { %v1991_v26 = vmul.f32 %v6375_v20, %v1927_v36  ;;  %v2691_v0 = vsel %vm2563_vm14, %v2627_v32, %v2499_v45  ;;  %vm2565_vm0 = vcmp.lt.f32.partialorder %v6226_v2, 0.0  ;;  %v1928_v8 = vadd.f32 -0.28449672, %v1864_v4 }
 0x358   : > { %v2365_v41 = vmul.f32 1.442695, %v2249_v38  ;;  %3860 = vrcp.f32 %v1483_v16  ;;  %v3855_v12 = vpop.eup %3854  ;;  %v2501_v40 = vsub.f32 1.0, %v2437_v30  ;;  %v1737_v60 = vmul.f32 %v6421_v50, %v1673_v54  ;;  %v7050_v30 = vld [vmem:[#allocation33_spill] sm:$0xff] }
 0x359   : > { %v2055_v49 = vadd.f32 0.2548296, %v1991_v26  ;;  %v6440_v23 = vand.u32 2147483647, %v6433_v55  ;;  %v6442_v51 = vpop.eup %3856  ;;  %v2692_v58 = vsel %vm2564_vm15, %v2628_v31, %v2500_v34  ;;  %v2438_v22 = vmul.f32 %v3853_v1, %v2118_v11 }
 0x35a   : > { %v1992_v45 = vmul.f32 %v6394_v44, %v1928_v8  ;;  %v2367_v32 = vmul.f32 1.442695, %v2250_v37  ;;  %v1801_v38 = vadd.f32 1.4214138, %v1737_v60  ;;  %v1610_v35 = vmul.f32 1.0614054, %v6442_v51 }
 0x35b   : > { %v2119_v33 = vmul.f32 %v6375_v20, %v2055_v49  ;;  %v6451_v36 = vadd.f32 %v7050_v30, %v4754_v14  ;;  %v2755_v56 = vadd.f32 1.0, %v2691_v0  ;;  %3862 = vpow2.f32 %v2365_v41 }
 0x35c   : > { %v2056_v4 = vadd.f32 0.2548296, %v1992_v45  ;;  %v1420_v16 = vmul.f32 0.3275911, %v6440_v23  ;;  %v2756_v48 = vadd.f32 1.0, %v2692_v58  ;;  %v2629_v34 = vsub.f32 0.0, %v2501_v40 }
 0x35d   : > { %vm2566_vm1 = vcmp.lt.f32.partialorder %v6257_v25, 0.0  ;;  %v1865_v31 = vmul.f32 %v6421_v50, %v1801_v38  ;;  %v1674_v1 = vadd.f32 -1.4531521, %v1610_v35  ;;  %v2502_v20 = vsub.f32 1.0, %v2438_v22  ;;  %v7051_v38 = vld [vmem:[#allocation18_spill] sm:$0xff]  ;;  %v7052_v35 = vld [vmem:[#allocation39_spill] sm:$0xff] }
 0x35e   : > { %v2439_v11 = vmul.f32 %v3855_v12, %v2119_v33  ;;  %3864 = vpow2.f32 %v2367_v32  ;;  %v1484_v37 = vadd.f32 1.0, %v1420_v16  ;;  %v2187_v0 = vsub.f32 0.0, %v6414_v17 }
 0x35f   : > { %v1929_v26 = vadd.f32 -0.28449672, %v1865_v31  ;;  %v1738_v54 = vmul.f32 %v6442_v51, %v1674_v1  ;;  %v6459_v8 = vmul.f32 0.70710677, %v6451_v36  ;;  %v6462_v41 = vmul.f32 %v2755_v56, %v6274_v29 }
 0x360   : > { %v2120_v49 = vmul.f32 %v6394_v44, %v2056_v4  ;;  %v6466_v60 = vmul.f32 0.5, %v6386_v59  ;;  %3866 = vrcp.f32 %v1484_v37  ;;  %v3859_v12 = vpop.eup %3858  ;;  %v2693_v58 = vsel %vm2565_vm0, %v2629_v34, %v2501_v40  ;;  %v7053_v37 = vld [vmem:[#allocation37_spill] sm:$0xff] }
 0x361   : > { %vm2567_vm2 = vcmp.lt.f32.partialorder %v6295_v18, 0.0  ;;  %v1993_v22 = vmul.f32 %v6421_v50, %v1929_v26  ;;  %v1802_v45 = vadd.f32 1.4214138, %v1738_v54  ;;  %v6473_v32 = vand.u32 2147483647, %v6459_v8  ;;  %v7056_v18 = vld [vmem:[#allocation20_spill] sm:$0xff] }
 0x362   : > { %v6475_v29 = vpop.eup %3860  ;;  %v6478_v44 = vmul.f32 %v2756_v48, %v6298_v43  ;;  %v2630_v59 = vsub.f32 0.0, %v2502_v20  ;;  %v2503_v33 = vsub.f32 1.0, %v2439_v11  ;;  %v2852_v30 = vpack.c.bf16 %v7052_v35, %v7051_v38 }
 0x363   : > { %v2057_v2 = vadd.f32 0.2548296, %v1993_v22  ;;  %v1866_v40 = vmul.f32 %v6442_v51, %v1802_v45  ;;  %v1611_v56 = vmul.f32 1.0614054, %v6475_v29  ;;  %v2251_v4 = vmul.f32 %v2187_v0, %v6414_v17 }
 0x364   : > { %v2757_v16 = vadd.f32 1.0, %v2693_v58  ;;  %v2440_v34 = vmul.f32 %v3859_v12, %v2120_v49  ;;  %v2188_v31 = vsub.f32 0.0, %v6440_v23  ;;  %v1421_v1 = vmul.f32 0.3275911, %v6473_v32  ;;  %3092 = vmatprep.mubr.bf16.mxu1 %v2852_v30 }
 0x365   : > { %v2121_v43 = vmul.f32 %v6421_v50, %v2057_v2  ;;  %v1930_v48 = vadd.f32 -0.28449672, %v1866_v40  ;;  %v1675_v11 = vadd.f32 -1.4531521, %v1611_v56  ;;  %v6490_v26 = vadd.f32 %v7053_v37, %v4776_v10  ;;  %v3863_v54 = vpop.eup %3862 }
 0x366   : > { %v2694_v22 = vsel %vm2566_vm1, %v2630_v59, %v2502_v20  ;;  %v2631_v17 = vsub.f32 0.0, %v2503_v33  ;;  %v6495_v0 = vmul.f32 0.5, %v6419_v5  ;;  %v1485_v49 = vadd.f32 1.0, %v1421_v1 }
 0x367   : > { %vm2568_vm3 = vcmp.lt.f32.partialorder %v6307_v13, 0.0  ;;  %v2441_v12 = vmul.f32 %v3863_v54, %v2121_v43  ;;  %v1994_v50 = vmul.f32 %v6442_v51, %v1930_v48  ;;  %v1739_v58 = vmul.f32 %v6475_v29, %v1675_v11 }
 0x368   : > { %v2369_v45 = vmul.f32 1.442695, %v2251_v4  ;;  %v3865_v38 = vpop.eup %3864  ;;  %v2504_v35 = vsub.f32 1.0, %v2440_v34  ;;  %v2252_v30 = vmul.f32 %v2188_v31, %v6440_v23  ;;  %3868 = vrcp.f32 %v1485_v49  ;;  %v7054_v34 = vld [vmem:[#allocation13_spill] sm:$0xff]  ;;  %v7055_v31 = vld [vmem:[#allocation38_spill] sm:$0xff] }
 0x369   : > { %v6502_v25 = vmul.f32 0.70710677, %v6490_v26  ;;  %v6505_v5 = vmul.f32 %v2757_v16, %v6310_v52  ;;  %v2758_v20 = vadd.f32 1.0, %v2694_v22  ;;  %vm2569_vm4 = vcmp.lt.f32.partialorder %v6340_v7, 0.0 }
 0x36a   : > { %v2058_v59 = vadd.f32 0.2548296, %v1994_v50  ;;  %v1803_v2 = vadd.f32 1.4214138, %v1739_v58  ;;  %v6508_v40 = vpop.eup %3866  ;;  %v2695_v56 = vsel %vm2567_vm2, %v2631_v17, %v2503_v33  ;;  %v2505_v4 = vsub.f32 1.0, %v2441_v12  ;;  %v7057_v58 = vld [vmem:[#allocation23_spill] sm:$0xff] }
 0x36b   : > { %v1358_v23 = vand.u32 2147483647, %v6502_v25  ;;  %v2851_v1 = vpack.c.bf16 %v7055_v31, %v7054_v34  ;;  %v1612_v16 = vmul.f32 1.0614054, %v6508_v40  ;;  %v2189_v48 = vsub.f32 0.0, %v6473_v32 }
 0x36c   : > { %v2122_v43 = vmul.f32 %v6442_v51, %v2058_v59  ;;  %v1867_v52 = vmul.f32 %v6475_v29, %v1803_v2  ;;  %v2632_v11 = vsub.f32 0.0, %v2504_v35  ;;  %v2371_v37 = vmul.f32 1.442695, %v2252_v30 }
 0x36d   : > { %v1422_v54 = vmul.f32 0.3275911, %v1358_v23  ;;  %3093 = vmatmul.mubr.bf16.gmra.mrb[28].mxu1 %v2851_v1  ;;  %v1159_v33 = vadd.f32 %v7056_v18, %v4754_v14  ;;  %v2759_v22 = vadd.f32 1.0, %v2695_v56  ;;  %3870 = vpow2.f32 %v2369_v45 }
 0x36e   : > { %v1931_v17 = vadd.f32 -0.28449672, %v1867_v52  ;;  %v1676_v49 = vadd.f32 -1.4531521, %v1612_v16  ;;  %v2633_v12 = vsub.f32 0.0, %v2505_v4  ;;  %v2442_v50 = vmul.f32 %v3865_v38, %v2122_v43 }
 0x36f   : > { %v1486_v51 = vadd.f32 1.0, %v1422_v54  ;;  %v6523_v59 = vadd.f32 %v7057_v58, %v4776_v10  ;;  %v2253_v34 = vmul.f32 %v2189_v48, %v6473_v32  ;;  %v6528_v31 = vmul.f32 0.70710677, %v1159_v33 }
 0x370   : > { %v1995_v2 = vmul.f32 %v6475_v29, %v1931_v17  ;;  %v1740_v30 = vmul.f32 %v6508_v40, %v1676_v49  ;;  %v6531_v56 = vmul.f32 %v2758_v20, %v6337_v21  ;;  %v2696_v45 = vsel %vm2568_vm3, %v2632_v11, %v2504_v35 }
 0x371   : > { %v6536_v38 = vmul.f32 0.5, %v6451_v36  ;;  %3872 = vrcp.f32 %v1486_v51  ;;  %v6539_v1 = vmul.f32 %v2759_v22, %v6362_v19  ;;  %vm2570_vm5 = vcmp.lt.f32.partialorder %v6367_v27, 0.0  ;;  %v7058_v51 = vld [vmem:[#allocation16_spill] sm:$0xff] }
 0x372   : > { %v2059_v43 = vadd.f32 0.2548296, %v1995_v2  ;;  %v1804_v52 = vadd.f32 1.4214138, %v1740_v30  ;;  %3874 = vpow2.f32 %v2371_v37  ;;  %v6542_v32 = vpop.eup %3868  ;;  %v2697_v21 = vsel %vm2569_vm4, %v2633_v12, %v2505_v4 }
 0x373   : > { %v2506_v20 = vsub.f32 1.0, %v2442_v50  ;;  %v1359_v13 = vand.u32 2147483647, %v6528_v31  ;;  %v6548_v36 = vmul.f32 0.70710677, %v6523_v59  ;;  %v2760_v35 = vadd.f32 1.0, %v2696_v45 }
 0x374   : > { %v1868_v19 = vmul.f32 %v6508_v40, %v1804_v52  ;;  %v1613_v16 = vmul.f32 1.0614054, %v6542_v32  ;;  %v2373_v48 = vmul.f32 1.442695, %v2253_v34  ;;  %v6553_v11 = vmul.f32 0.5, %v6490_v26 }
 0x375   : > { %v2190_v37 = vsub.f32 0.0, %v1358_v23  ;;  %v1423_v54 = vmul.f32 0.3275911, %v1359_v13  ;;  %v1360_v7 = vand.u32 2147483647, %v6548_v36  ;;  %v2761_v4 = vadd.f32 1.0, %v2697_v21 }
 0x376   : > { %v2123_v18 = vmul.f32 %v6475_v29, %v2059_v43  ;;  %v1932_v22 = vadd.f32 -0.28449672, %v1868_v19  ;;  %v1677_v17 = vadd.f32 -1.4531521, %v1613_v16  ;;  %v2634_v49 = vsub.f32 0.0, %v2506_v20 }
 0x377   : > { %v1487_v12 = vadd.f32 1.0, %v1423_v54  ;;  %v1424_v50 = vmul.f32 0.3275911, %v1360_v7  ;;  %v6559_v58 = vadd.f32 %v7058_v51, %v4754_v14  ;;  %v3871_v2 = vpop.eup %3870  ;;  %3876 = vpow2.f32 %v2373_v48 }
 0x378   : > { %v1996_v26 = vmul.f32 %v6508_v40, %v1932_v22  ;;  %v1741_v30 = vmul.f32 %v6542_v32, %v1677_v17  ;;  %v2191_v34 = vsub.f32 0.0, %v1359_v13  ;;  %v6564_v45 = vmul.f32 %v2760_v35, %v6380_v46  ;;  %v7059_v46 = vld [vmem:[#allocation41_spill] sm:$0xff] }
 0x379   : > { %v2254_v29 = vmul.f32 %v2190_v37, %v1358_v23  ;;  %3878 = vrcp.f32 %v1487_v12  ;;  %v1488_v43 = vadd.f32 1.0, %v1424_v50  ;;  %v2443_v52 = vmul.f32 %v3871_v2, %v2123_v18 }
 0x37a   : > { %v2060_v21 = vadd.f32 0.2548296, %v1996_v26  ;;  %v1805_v19 = vadd.f32 1.4214138, %v1741_v30  ;;  %v6566_v16 = vmul.f32 0.5, %v1159_v33  ;;  %v6571_v51 = vmul.f32 %v2761_v4, %v6406_v24 }
 0x37b   : > { %v6568_v54 = vpop.eup %3872  ;;  %v2698_v48 = vsel %vm2570_vm5, %v2634_v49, %v2506_v20  ;;  %v6576_v22 = vmul.f32 0.70710677, %v6559_v58  ;;  %v2854_v23 = vpack.c.bf16 %v6145_v28, %v7059_v46  ;;  %v2255_v17 = vmul.f32 %v2191_v34, %v1359_v13  ;;  %v7060_v20 = vld [vmem:[#allocation17_spill] sm:$0xff]  ;;  %v7061_v46 = vld [vmem:[#allocation40_spill] sm:$0xff] }
 0x37c   : > { %v3875_v35 = vpop.eup %3874  ;;  %v2124_v37 = vmul.f32 %v6508_v40, %v2060_v21  ;;  %v1869_v33 = vmul.f32 %v6542_v32, %v1805_v19  ;;  %v1614_v18 = vmul.f32 1.0614054, %v6568_v54  ;;  %vm2571_vm6 = vcmp.lt.f32.partialorder %v6403_v9, 0.0 }
 0x37d   : > { %v2375_v24 = vmul.f32 1.442695, %v2254_v29  ;;  %3880 = vrcp.f32 %v1488_v43  ;;  %v1361_v27 = vand.u32 2147483647, %v6576_v22  ;;  %3100 = vmatprep.mubr.bf16.mxu1 %v2854_v23  ;;  %v6587_v4 = vadd.f32 %v7060_v20, %v4776_v10 }
 0x37e   : > { %v2507_v28 = vsub.f32 1.0, %v2443_v52  ;;  %v2444_v49 = vmul.f32 %v3875_v35, %v2124_v37  ;;  %v1933_v12 = vadd.f32 -0.28449672, %v1869_v33  ;;  %v1678_v40 = vadd.f32 -1.4531521, %v1614_v18 }
 0x37f   : > { %v2762_v50 = vadd.f32 1.0, %v2698_v48  ;;  %v6590_v2 = vmul.f32 0.5, %v6523_v59  ;;  %v2192_v13 = vsub.f32 0.0, %v1360_v7  ;;  %v1425_v26 = vmul.f32 0.3275911, %v1361_v27  ;;  %v7062_v48 = vld [vmem:[#allocation42_spill] sm:$0xff] }
 0x380   : > { %vm2572_vm7 = vcmp.lt.f32.partialorder %v6433_v55, 0.0  ;;  %v1997_v30 = vmul.f32 %v6542_v32, %v1933_v12  ;;  %v1742_v34 = vmul.f32 %v6568_v54, %v1678_v40  ;;  %v2377_v29 = vmul.f32 1.442695, %v2255_v17 }
 0x381   : > { %v2193_v43 = vsub.f32 0.0, %v1361_v27  ;;  %v2508_v21 = vsub.f32 1.0, %v2444_v49  ;;  %v1489_v19 = vadd.f32 1.0, %v1425_v26  ;;  %v6596_v52 = vmul.f32 0.70710677, %v6587_v4  ;;  %v3877_v59 = vpop.eup %3876  ;;  %v7063_v49 = vld [vmem:[#allocation19_spill] sm:$0xff] }
 0x382   : > { %v2853_v23 = vpack.c.bf16 %v7062_v48, %v7061_v46  ;;  %v2635_v35 = vsub.f32 0.0, %v2507_v28  ;;  %v2061_v37 = vadd.f32 0.2548296, %v1997_v30  ;;  %v1806_v33 = vadd.f32 1.4214138, %v1742_v34 }
 0x383   : > { %3882 = vpow2.f32 %v2375_v24  ;;  %v6600_v18 = vpop.eup %3878  ;;  %v2256_v20 = vmul.f32 %v2192_v13, %v1360_v7  ;;  %v1362_v17 = vand.u32 2147483647, %v6596_v52  ;;  %v6605_v12 = vadd.f32 %v7063_v49, %v4754_v14 }
 0x384   : > { %3884 = vrcp.f32 %v1489_v19  ;;  %3101 = vmatmul.mubr.bf16.gmra.mrb[32].mxu1 %v2853_v23  ;;  %v6608_v40 = vmul.f32 %v2762_v50, %v6425_v47  ;;  %v2125_v26 = vmul.f32 %v6542_v32, %v2061_v37  ;;  %vm2573_vm8 = vcmp.lt.f32.partialorder %v6459_v8, 0.0 }
 0x385   : > { %v1870_v24 = vmul.f32 %v6568_v54, %v1806_v33  ;;  %v1615_v30 = vmul.f32 1.0614054, %v6600_v18  ;;  %v2636_v7 = vsub.f32 0.0, %v2508_v21  ;;  %3886 = vpow2.f32 %v2377_v29 }
 0x386   : > { %v2257_v13 = vmul.f32 %v2193_v43, %v1361_v27  ;;  %v1426_v34 = vmul.f32 0.3275911, %v1362_v17  ;;  %v2699_v19 = vsel %vm2571_vm6, %v2635_v35, %v2507_v28  ;;  %v2445_v14 = vmul.f32 %v3877_v59, %v2125_v26  ;;  %v7064_v26 = vld [vmem:[#allocation43_spill] sm:$0xff] }
 0x387   : > { %v1934_v46 = vadd.f32 -0.28449672, %v1870_v24  ;;  %v1679_v48 = vadd.f32 -1.4531521, %v1615_v30  ;;  %v6616_v47 = vpop.eup %3880  ;;  %v2379_v50 = vmul.f32 1.442695, %v2256_v20  ;;  %v2700_v9 = vsel %vm2572_vm7, %v2636_v7, %v2508_v21 }
 0x388   : > { %v1490_v32 = vadd.f32 1.0, %v1426_v34  ;;  %v2194_v23 = vsub.f32 0.0, %v1362_v17  ;;  %v6619_v37 = vmul.f32 0.70710677, %v6605_v12  ;;  %v2509_v33 = vsub.f32 1.0, %v2445_v14 }
 0x389   : > { %v1998_v49 = vmul.f32 %v6568_v54, %v1934_v46  ;;  %v1743_v27 = vmul.f32 %v6600_v18, %v1679_v48  ;;  %v1616_v29 = vmul.f32 1.0614054, %v6616_v47  ;;  %v2381_v28 = vmul.f32 1.442695, %v2257_v13 }
 0x38a   : > { %3888 = vrcp.f32 %v1490_v32  ;;  %v1363_v43 = vand.u32 2147483647, %v6619_v37  ;;  %v2637_v59 = vsub.f32 0.0, %v2509_v33  ;;  %v6629_v24 = vadd.f32 %v7064_v26, %v4776_v10 }
 0x38b   : > { %v2062_v35 = vadd.f32 0.2548296, %v1998_v49  ;;  %v1807_v20 = vadd.f32 1.4214138, %v1743_v27  ;;  %v2763_v30 = vadd.f32 1.0, %v2699_v19  ;;  %3890 = vpow2.f32 %v2379_v50 }
 0x38c   : > { %v1680_v34 = vadd.f32 -1.4531521, %v1616_v29  ;;  %v1427_v14 = vmul.f32 0.3275911, %v1363_v43  ;;  %v2764_v48 = vadd.f32 1.0, %v2700_v9  ;;  %v2258_v7 = vmul.f32 %v2194_v23, %v1362_v17 }
 0x38d   : > { %v3883_v46 = vpop.eup %3882  ;;  %v2126_v55 = vmul.f32 %v6568_v54, %v2062_v35  ;;  %v1871_v21 = vmul.f32 %v6600_v18, %v1807_v20  ;;  %v2701_v32 = vsel %vm2573_vm8, %v2637_v59, %v2509_v33  ;;  %3892 = vpow2.f32 %v2381_v28 }
 0x38e   : > { %v6633_v13 = vpop.eup %3884  ;;  %v1744_v49 = vmul.f32 %v6616_v47, %v1680_v34  ;;  %v1491_v10 = vadd.f32 1.0, %v1427_v14  ;;  %v6640_v29 = vmul.f32 0.70710677, %v6629_v24  ;;  %v6643_v9 = vmul.f32 %v2763_v30, %v6466_v60 }
 0x38f   : > { %v2446_v19 = vmul.f32 %v3883_v46, %v2126_v55  ;;  %v1935_v27 = vadd.f32 -0.28449672, %v1871_v21  ;;  %v1617_v50 = vmul.f32 1.0614054, %v6633_v13  ;;  %v3887_v54 = vpop.eup %3886  ;;  %v2195_v23 = vsub.f32 0.0, %v1363_v43 }
 0x390   : > { %v1808_v17 = vadd.f32 1.4214138, %v1744_v49  ;;  %3894 = vrcp.f32 %v1491_v10  ;;  %vm2574_vm9 = vcmp.lt.f32.partialorder %v6502_v25, 0.0  ;;  %v2383_v28 = vmul.f32 1.442695, %v2258_v7  ;;  %v3374_v49 = vpop.f32.mrb[0].mxu1 }
 0x391   : > { %v1999_v8 = vmul.f32 %v6600_v18, %v1935_v27  ;;  %v1681_v33 = vadd.f32 -1.4531521, %v1617_v50  ;;  %v6648_v59 = vand.u32 2147483647, %v6640_v29  ;;  %v2765_v35 = vadd.f32 1.0, %v2701_v32 }
 0x392   : > { %v2510_v20 = vsub.f32 1.0, %v2446_v19  ;;  %v1872_v26 = vmul.f32 %v6616_v47, %v1808_v17  ;;  %v2856_v60 = vpack.c.bf16 %v6268_v61, %v6198_v63  ;;  %v6654_v30 = vmul.f32 %v2764_v48, %v6495_v0 }
 0x393   : > { %v2063_v34 = vadd.f32 0.2548296, %v1999_v8  ;;  %v1745_v14 = vmul.f32 %v6633_v13, %v1681_v33  ;;  %v1428_v46 = vmul.f32 0.3275911, %v6648_v59  ;;  %vm2575_vm10 = vcmp.lt.f32.partialorder %v6528_v31, 0.0 }
 0x394   : > { %v6658_v55 = vpop.eup %3888  ;;  %v1936_v21 = vadd.f32 -0.28449672, %v1872_v26  ;;  %v2259_v7 = vmul.f32 %v2195_v23, %v1363_v43  ;;  %3108 = vmatprep.mubr.bf16.mxu1 %v2856_v60  ;;  %v2855_v32 = vpack.c.bf16 %v6247_v42, %v6160_v39  ;;  %v2858_v63 = vpack.c.bf16 %v6324_v15, %v6302_v57  ;;  %v3375_v39 = vpop.f32.mrb[1].mxu1 }
 0x395   : > { %v2127_v61 = vmul.f32 %v6600_v18, %v2063_v34  ;;  %v1809_v0 = vadd.f32 1.4214138, %v1745_v14  ;;  %v1618_v48 = vmul.f32 1.0614054, %v6658_v55  ;;  %3896 = vpow2.f32 %v2383_v28  ;;  %v3891_v10 = vpop.eup %3890  ;;  %v3377_v17 = vpop.f32.mrb[2].mxu1 }
 0x396   : > { %v6668_v19 = vmul.f32 %v2765_v35, %v6536_v38  ;;  %v2638_v27 = vsub.f32 0.0, %v2510_v20  ;;  %v2000_v43 = vmul.f32 %v6616_v47, %v1936_v21  ;;  %v1492_v50 = vadd.f32 1.0, %v1428_v46  ;;  %3109 = vmatmul.mubr.bf16.gmra.mrb[36].mxu1 %v2855_v32  ;;  %v3378_v28 = vpop.f32.mrb[3].mxu1 }
 0x397   : > { %v2447_v42 = vmul.f32 %v3887_v54, %v2127_v61  ;;  %v1873_v57 = vmul.f32 %v6633_v13, %v1809_v0  ;;  %v1682_v15 = vadd.f32 -1.4531521, %v1618_v48  ;;  %3116 = vmatprep.mubr.bf16.mxu1 %v2858_v63  ;;  %v2857_v18 = vpack.c.bf16 %v6316_v3, %v6271_v62  ;;  %v3893_v23 = vpop.eup %3892  ;;  %v3380_v61 = vpop.f32.mrb[4].mxu1 }
 0x398   : > { %v2064_v8 = vadd.f32 0.2548296, %v2000_v43  ;;  %v2385_v33 = vmul.f32 1.442695, %v2259_v7  ;;  %3898 = vrcp.f32 %v1492_v50  ;;  %v2196_v38 = vsub.f32 0.0, %v6648_v59  ;;  %v3381_v43 = vpop.f32.mrb[5].mxu1 }
 0x399   : > { %v2511_v35 = vsub.f32 1.0, %v2447_v42  ;;  %vm2576_vm11 = vcmp.lt.f32.partialorder %v6548_v36, 0.0  ;;  %v1937_v26 = vadd.f32 -0.28449672, %v1873_v57  ;;  %v1746_v54 = vmul.f32 %v6658_v55, %v1682_v15 }
 0x39a   : > { %v2860_v60 = vpack.c.bf16 %v6478_v44, %v6392_v53  ;;  %v6679_v34 = vpop.eup %3894  ;;  %v2702_v62 = vsel %vm2574_vm9, %v2638_v27, %v2510_v20  ;;  %v2128_v3 = vmul.f32 %v6616_v47, %v2064_v8  ;;  %v2859_v14 = vpack.c.bf16 %v6462_v41, %v6389_v6  ;;  %v6699_v6 = vld [vmem:[%s6873_s6] ss:$0 sm:$0xff]  ;;  %v3383_v8 = vpop.f32.mrb[6].mxu1 }
 0x39b   : > { %v2862_v46 = vpack.c.bf16 %v6564_v45, %v6531_v56  ;;  %v2639_v21 = vsub.f32 0.0, %v2511_v35  ;;  %v2001_v7 = vmul.f32 %v6633_v13, %v1937_v26  ;;  %v1810_v32 = vadd.f32 1.4214138, %v1746_v54 }
 0x39c   : > { %v1619_v63 = vmul.f32 1.0614054, %v6679_v34  ;;  %v2448_v53 = vmul.f32 %v3891_v10, %v2128_v3  ;;  %v2861_v44 = vpack.c.bf16 %v6539_v1, %v6505_v5  ;;  %v2864_v25 = vpack.c.bf16 %v6654_v30, %v6608_v40 }
 0x39d   : > { %v2863_v47 = vpack.c.bf16 %v6643_v9, %v6571_v51  ;;  %v2703_v41 = vsel %vm2575_vm10, %v2639_v21, %v2511_v35  ;;  %v2065_v56 = vadd.f32 0.2548296, %v2001_v7  ;;  %v1874_v45 = vmul.f32 %v6658_v55, %v1810_v32 }
 0x39e   : > { %v1683_v20 = vadd.f32 -1.4531521, %v1619_v63  ;;  %v2767_v0 = vadd.f32 1.0, %v2703_v41  ;;  %v2512_v48 = vsub.f32 1.0, %v2448_v53  ;;  %3117 = vmatmul.mubr.bf16.gmra.mrb[40].mxu1 %v2857_v18  ;;  %v3376_v10 = vadd.f32 %v3375_v39, %v3374_v49  ;;  %v3384_v39 = vpop.f32.mrb[7].mxu1 }
 0x39f   : > { %v3379_v27 = vadd.f32 %v3378_v28, %v3377_v17  ;;  %v3897_v50 = vpop.eup %3896  ;;  %v2129_v42 = vmul.f32 %v6633_v13, %v2065_v56  ;;  %v1938_v57 = vadd.f32 -0.28449672, %v1874_v45  ;;  %3124 = vmatprep.mubr.bf16.mxu1 %v2860_v60  ;;  %v3382_v31 = vadd.f32 %v3381_v43, %v3380_v61 }
 0x3a0   : > { %v1747_v15 = vmul.f32 %v6679_v34, %v1683_v20  ;;  %v6707_v35 = vmul.f32 %v2767_v0, %v6566_v16  ;;  %v2640_v26 = vsub.f32 0.0, %v2512_v48  ;;  %v3039_v54 = vadd.f32 %v3376_v10, %v6699_v6 }
 0x3a1   : > { %v3042_v49 = vadd.f32 %v3379_v27, %v6699_v6  ;;  %v2766_v18 = vadd.f32 1.0, %v2702_v62  ;;  %v2002_v17 = vmul.f32 %v6658_v55, %v1938_v57  ;;  %v3047_v28 = vadd.f32 %v3382_v31, %v6699_v6 }
 0x3a2   : > { %v1811_v13 = vadd.f32 1.4214138, %v1747_v15  ;;  %v6713_v3 = vpop.eup %3898  ;;  %v2704_v60 = vsel %vm2576_vm11, %v2640_v26, %v2512_v48  ;;  %3900 = vpow2.f32 %v2385_v33  ;;  %v2865_v16 = vpack.c.bf16 %v6707_v35, %v6668_v19  ;;  %3165 = vst [vmem:[%s6721_s22] sm:$0xff] %v3039_v54 }
 0x3a3   : > { %3166 = vst [vmem:[%s6721_s22 + $0x8] sm:$0xff] %v3042_v49  ;;  %v3385_v62 = vadd.f32 %v3384_v39, %v3383_v8  ;;  %v2768_v21 = vadd.f32 1.0, %v2704_v60  ;;  %v2449_v7 = vmul.f32 %v3893_v23, %v2129_v42  ;;  %v2260_v36 = vmul.f32 %v2196_v38, %v6648_v59  ;;  %3167 = vst [vmem:[%s6721_s22 + $0x10] sm:$0xff] %v3047_v28  ;;  %v3386_v43 = vpop.f32.mrb[8].mxu1 }
 0x3a4   : > { %v1875_v32 = vmul.f32 %v6679_v34, %v1811_v13  ;;  %v2066_v33 = vadd.f32 0.2548296, %v2002_v17  ;;  %v1620_v63 = vmul.f32 1.0614054, %v6713_v3  ;;  %v2830_v41 = vmul.f32 %v2766_v18, %v6553_v11  ;;  %v3387_v42 = vpop.f32.mrb[9].mxu1 }
 0x3a5   : > { %v3050_v53 = vadd.f32 %v3385_v62, %v6699_v6  ;;  %v2832_v56 = vmul.f32 %v2768_v21, %v6590_v2  ;;  %v2513_v61 = vsub.f32 1.0, %v2449_v7  ;;  %v2387_v0 = vmul.f32 1.442695, %v2260_v36 }
 0x3a6   : > { %v1939_v45 = vadd.f32 -0.28449672, %v1875_v32  ;;  %v1684_v20 = vadd.f32 -1.4531521, %v1620_v63  ;;  %3125 = vmatmul.mubr.bf16.gmra.mrb[44].mxu1 %v2859_v14  ;;  %v2130_v38 = vmul.f32 %v6658_v55, %v2066_v33  ;;  %v3388_v31 = vadd.f32 %v3387_v42, %v3386_v43 }
 0x3a7   : > { %3168 = vst [vmem:[%s6721_s22 + $0x18] sm:$0xff] %v3050_v53  ;;  %3132 = vmatprep.mubr.bf16.mxu1 %v2862_v46  ;;  %v2866_v59 = vpack.c.bf16 %v2832_v56, %v2830_v41  ;;  %v2641_v11 = vsub.f32 0.0, %v2513_v61  ;;  %3902 = vpow2.f32 %v2387_v0  ;;  %v3389_v46 = vpop.f32.mrb[10].mxu1  ;;  %vm2577_vm12 = vcmp.lt.f32.partialorder %v6576_v22, 0.0 }
 0x3a8   : > { %v2003_v23 = vmul.f32 %v6679_v34, %v1939_v45  ;;  %v1748_v48 = vmul.f32 %v6713_v3, %v1684_v20  ;;  %v2450_v57 = vmul.f32 %v3897_v50, %v2130_v38  ;;  %v3390_v26 = vpop.f32.mrb[11].mxu1  ;;  %vm2579_vm13 = vcmp.lt.f32.partialorder %v6619_v37, 0.0 }
 0x3a9   : > { %v3391_v54 = vadd.f32 %v3390_v26, %v3389_v46  ;;  %v2705_v49 = vsel %vm2577_vm12, %v2641_v11, %v2513_v61  ;;  %v1233_v1 = vmul.f32 0.5, %v6559_v58  ;;  %v1235_v60 = vmul.f32 0.5, %v6605_v12 }
 0x3aa   : > { %v2067_v10 = vadd.f32 0.2548296, %v2003_v23  ;;  %v1812_v27 = vadd.f32 1.4214138, %v1748_v48  ;;  %v2514_v39 = vsub.f32 1.0, %v2450_v57  ;;  %v2769_v13 = vadd.f32 1.0, %v2705_v49 }
 0x3ab   : > { %v3058_v22 = vadd.f32 %v3391_v54, %v6699_v6  ;;  %vm2578_vm14 = vcmp.lt.f32.partialorder %v6596_v52, 0.0  ;;  %vm2580_vm15 = vcmp.lt.f32.partialorder %v6640_v29, 0.0  ;;  %v1236_v63 = vmul.f32 0.5, %v6629_v24 }
 0x3ac   : > { %v2131_v2 = vmul.f32 %v6679_v34, %v2067_v10  ;;  %v3901_v14 = vpop.eup %3900  ;;  %v1876_v15 = vmul.f32 %v6713_v3, %v1812_v27  ;;  %v3055_v34 = vadd.f32 %v3388_v31, %v6699_v6  ;;  %v2642_v28 = vsub.f32 0.0, %v2514_v39 }
 0x3ad   : > { %3170 = vst [vmem:[%s6721_s22 + $0x28] sm:$0xff] %v3058_v22  ;;  %v2833_v62 = vmul.f32 %v2769_v13, %v1233_v1 }
 0x3ae   : > { %v2451_v8 = vmul.f32 %v3901_v14, %v2131_v2  ;;  %v1940_v55 = vadd.f32 -0.28449672, %v1876_v15  ;;  %3133 = vmatmul.mubr.bf16.gmra.mrb[48].mxu1 %v2861_v44  ;;  %3169 = vst [vmem:[%s6721_s22 + $0x20] sm:$0xff] %v3055_v34  ;;  %v2706_v37 = vsel %vm2578_vm14, %v2642_v28, %v2514_v39 }
 0x3af   : > { %3140 = vmatprep.mubr.bf16.mxu1 %v2864_v25  ;;  %v2770_v33 = vadd.f32 1.0, %v2706_v37 }
 0x3b0   : > { %v2515_v50 = vsub.f32 1.0, %v2451_v8  ;;  %v2004_v18 = vmul.f32 %v6713_v3, %v1940_v55 }
 0x3b1   : > { %v3903_v25 = vpop.eup %3902 }
 0x3b2   : > { %v2643_v17 = vsub.f32 0.0, %v2515_v50  ;;  %v2068_v5 = vadd.f32 0.2548296, %v2004_v18 }
 0x3b4   : > { %v2707_v44 = vsel %vm2579_vm13, %v2643_v17, %v2515_v50  ;;  %v2132_v30 = vmul.f32 %v6713_v3, %v2068_v5  ;;  %v1234_v3 = vmul.f32 0.5, %v6587_v4 }
 0x3b5   : > { %v2771_v40 = vadd.f32 1.0, %v2707_v44 }
 0x3b6   : > { %v2452_v7 = vmul.f32 %v3903_v25, %v2132_v30  ;;  %3141 = vmatmul.mubr.bf16.gmra.mrb[52].mxu1 %v2863_v47  ;;  %v2834_v51 = vmul.f32 %v2770_v33, %v1234_v3 }
 0x3b7   : > { %v2835_v21 = vmul.f32 %v2771_v40, %v1235_v60  ;;  %3148 = vmatprep.mubr.bf16.mxu1 %v2866_v59 }
 0x3b8   : > { %v2516_v58 = vsub.f32 1.0, %v2452_v7 }
 0x3b9   : > { %v2867_v32 = vpack.c.bf16 %v2835_v21, %v2833_v62 }
 0x3ba   : > { %v2644_v36 = vsub.f32 0.0, %v2516_v58 }
 0x3bc   : > { %v2708_v12 = vsel %vm2580_vm15, %v2644_v36, %v2516_v58 }
 0x3bd   : > { %v2772_v53 = vadd.f32 1.0, %v2708_v12 }
 0x3be   : > { %3149 = vmatmul.mubr.bf16.gmra.mrb[56].mxu1 %v2865_v16 }
 0x3bf   : > { %v2836_v52 = vmul.f32 %v2772_v53, %v1236_v63 }
 0x3c1   : > { %v2868_v9 = vpack.c.bf16 %v2836_v52, %v2834_v51 }
 0x3c3   : > { %3156 = vmatprep.mubr.bf16.mxu1 %v2868_v9 }
 0x3c6   : > { %3157 = vmatmul.mubr.bf16.gmra.mrb[60].mxu1 %v2867_v32 }
 0x3c8   : > { %v3392_v47 = vpop.f32.mrb[12].mxu1 }
 0x3c9   : > { %v3393_v41 = vpop.f32.mrb[13].mxu1 }
 0x3ca   : > { %v3394_v29 = vadd.f32 %v3393_v41, %v3392_v47  ;;  %v3395_v56 = vpop.f32.mrb[14].mxu1 }
 0x3cb   : > { %v3396_v4 = vpop.f32.mrb[15].mxu1 }
 0x3cc   : > { %v3063_v24 = vadd.f32 %v3394_v29, %v6699_v6  ;;  %v3397_v45 = vadd.f32 %v3396_v4, %v3395_v56 }
 0x3ce   : > { %3171 = vst [vmem:[%s6721_s22 + $0x30] sm:$0xff] %v3063_v24  ;;  %v3066_v19 = vadd.f32 %v3397_v45, %v6699_v6 }
 0x3d0   : > { %3172 = vst [vmem:[%s6721_s22 + $0x38] sm:$0xff] %v3066_v19 }
 0x3dc   : > { %v3398_v35 = vpop.f32.mrb[16].mxu1 }
 0x3dd   : > { %v3399_v16 = vpop.f32.mrb[17].mxu1 }
 0x3de   : > { %v3400_v20 = vadd.f32 %v3399_v16, %v3398_v35  ;;  %v3401_v61 = vpop.f32.mrb[18].mxu1 }
 0x3df   : > { %v3402_v23 = vpop.f32.mrb[19].mxu1 }
 0x3e0   : > { %v3071_v0 = vadd.f32 %v3400_v20, %v6699_v6  ;;  %v3403_v59 = vadd.f32 %v3402_v23, %v3401_v61 }
 0x3e2   : > { %3173 = vst [vmem:[%s6721_s22 + $0x40] sm:$0xff] %v3071_v0  ;;  %v3074_v38 = vadd.f32 %v3403_v59, %v6699_v6 }
 0x3e4   : > { %3174 = vst [vmem:[%s6721_s22 + $0x48] sm:$0xff] %v3074_v38 }
 0x405   : > { %v3404_v48 = vpop.f32.mrb[20].mxu1 }
 0x406   : > { %v3405_v10 = vpop.f32.mrb[21].mxu1 }
 0x407   : > { %v3406_v27 = vadd.f32 %v3405_v10, %v3404_v48  ;;  %v3407_v43 = vpop.f32.mrb[22].mxu1 }
 0x408   : > { %v3408_v11 = vpop.f32.mrb[23].mxu1 }
 0x409   : > { %v3079_v2 = vadd.f32 %v3406_v27, %v6699_v6  ;;  %v3409_v42 = vadd.f32 %v3408_v11, %v3407_v43 }
 0x40b   : > { %3175 = vst [vmem:[%s6721_s22 + $0x50] sm:$0xff] %v3079_v2  ;;  %v3082_v14 = vadd.f32 %v3409_v42, %v6699_v6 }
 0x40d   : > { %3176 = vst [vmem:[%s6721_s22 + $0x58] sm:$0xff] %v3082_v14 }
 0x41b   : > { %v3410_v57 = vpop.f32.mrb[24].mxu1 }
 0x41c   : > { %v3411_v15 = vpop.f32.mrb[25].mxu1 }
 0x41d   : > { %v3412_v31 = vadd.f32 %v3411_v15, %v3410_v57  ;;  %v3413_v46 = vpop.f32.mrb[26].mxu1 }
 0x41e   : > { %v3414_v8 = vpop.f32.mrb[27].mxu1 }
 0x41f   : > { %v3087_v26 = vadd.f32 %v3412_v31, %v6699_v6  ;;  %v3415_v55 = vadd.f32 %v3414_v8, %v3413_v46 }
 0x421   : > { %3177 = vst [vmem:[%s6721_s22 + $0x60] sm:$0xff] %v3087_v26  ;;  %v3090_v34 = vadd.f32 %v3415_v55, %v6699_v6 }
 0x423   : > { %3178 = vst [vmem:[%s6721_s22 + $0x68] sm:$0xff] %v3090_v34 }
 0x440   : > { %v3416_v54 = vpop.f32.mrb[28].mxu1 }
 0x441   : > { %v3417_v49 = vpop.f32.mrb[29].mxu1 }
 0x442   : > { %v3418_v50 = vadd.f32 %v3417_v49, %v3416_v54  ;;  %v3419_v39 = vpop.f32.mrb[30].mxu1 }
 0x443   : > { %v3420_v18 = vpop.f32.mrb[31].mxu1 }
 0x444   : > { %v3095_v22 = vadd.f32 %v3418_v50, %v6699_v6  ;;  %v3421_v17 = vadd.f32 %v3420_v18, %v3419_v39 }
 0x446   : > { %3179 = vst [vmem:[%s6721_s22 + $0x70] sm:$0xff] %v3095_v22  ;;  %v3098_v13 = vadd.f32 %v3421_v17, %v6699_v6 }
 0x448   : > { %3180 = vst [vmem:[%s6721_s22 + $0x78] sm:$0xff] %v3098_v13 }
 0x457   : > { %v3422_v5 = vpop.f32.mrb[32].mxu1 }
 0x458   : > { %v3423_v1 = vpop.f32.mrb[33].mxu1 }
 0x459   : > { %v3424_v44 = vadd.f32 %v3423_v1, %v3422_v5  ;;  %v3425_v28 = vpop.f32.mrb[34].mxu1 }
 0x45a   : > { %v3426_v60 = vpop.f32.mrb[35].mxu1 }
 0x45b   : > { %v3103_v40 = vadd.f32 %v3424_v44, %v6699_v6  ;;  %v3427_v30 = vadd.f32 %v3426_v60, %v3425_v28 }
 0x45d   : > { %3181 = vst [vmem:[%s6721_s22 + $0x80] sm:$0xff] %v3103_v40  ;;  %v3106_v25 = vadd.f32 %v3427_v30, %v6699_v6 }
 0x45f   : > { %3182 = vst [vmem:[%s6721_s22 + $0x88] sm:$0xff] %v3106_v25 }
 0x469   : > { %v3428_v62 = vpop.f32.mrb[36].mxu1 }
 0x46a   : > { %v3429_v21 = vpop.f32.mrb[37].mxu1 }
 0x46b   : > { %v3430_v7 = vadd.f32 %v3429_v21, %v3428_v62  ;;  %v3431_v37 = vpop.f32.mrb[38].mxu1 }
 0x46c   : > { %v3432_v58 = vpop.f32.mrb[39].mxu1 }
 0x46d   : > { %v3111_v32 = vadd.f32 %v3430_v7, %v6699_v6  ;;  %v3433_v36 = vadd.f32 %v3432_v58, %v3431_v37 }
 0x46f   : > { %3183 = vst [vmem:[%s6721_s22 + $0x90] sm:$0xff] %v3111_v32  ;;  %v3114_v33 = vadd.f32 %v3433_v36, %v6699_v6 }
 0x471   : > { %3184 = vst [vmem:[%s6721_s22 + $0x98] sm:$0xff] %v3114_v33  ;;  %v3434_v12 = vpop.f32.mrb[40].mxu1 }
 0x472   : > { %v3435_v3 = vpop.f32.mrb[41].mxu1 }
 0x473   : > { %v3436_v63 = vadd.f32 %v3435_v3, %v3434_v12  ;;  %v3437_v53 = vpop.f32.mrb[42].mxu1 }
 0x474   : > { %v3438_v51 = vpop.f32.mrb[43].mxu1 }
 0x475   : > { %v3119_v52 = vadd.f32 %v3436_v63, %v6699_v6  ;;  %v3439_v9 = vadd.f32 %v3438_v51, %v3437_v53 }
 0x477   : > { %3185 = vst [vmem:[%s6721_s22 + $0xa0] sm:$0xff] %v3119_v52  ;;  %v3122_v47 = vadd.f32 %v3439_v9, %v6699_v6 }
 0x479   : > { %3186 = vst [vmem:[%s6721_s22 + $0xa8] sm:$0xff] %v3122_v47  ;;  %v3440_v41 = vpop.f32.mrb[44].mxu1 }
 0x47a   : > { %v3441_v29 = vpop.f32.mrb[45].mxu1 }
 0x47b   : > { %v3442_v56 = vadd.f32 %v3441_v29, %v3440_v41  ;;  %v3443_v4 = vpop.f32.mrb[46].mxu1 }
 0x47c   : > { %v3444_v24 = vpop.f32.mrb[47].mxu1 }
 0x47d   : > { %v3127_v45 = vadd.f32 %v3442_v56, %v6699_v6  ;;  %v3445_v19 = vadd.f32 %v3444_v24, %v3443_v4 }
 0x47f   : > { %3187 = vst [vmem:[%s6721_s22 + $0xb0] sm:$0xff] %v3127_v45  ;;  %v3130_v35 = vadd.f32 %v3445_v19, %v6699_v6 }
 0x481   : > { %3188 = vst [vmem:[%s6721_s22 + $0xb8] sm:$0xff] %v3130_v35  ;;  %v3446_v16 = vpop.f32.mrb[48].mxu1 }
 0x482   : > { %v3447_v20 = vpop.f32.mrb[49].mxu1 }
 0x483   : > { %v3448_v61 = vadd.f32 %v3447_v20, %v3446_v16  ;;  %v3449_v23 = vpop.f32.mrb[50].mxu1 }
 0x484   : > { %v3450_v0 = vpop.f32.mrb[51].mxu1 }
 0x485   : > { %v3135_v59 = vadd.f32 %v3448_v61, %v6699_v6  ;;  %v3451_v38 = vadd.f32 %v3450_v0, %v3449_v23 }
 0x487   : > { %3189 = vst [vmem:[%s6721_s22 + $0xc0] sm:$0xff] %v3135_v59  ;;  %v3138_v48 = vadd.f32 %v3451_v38, %v6699_v6 }
 0x489   : > { %3190 = vst [vmem:[%s6721_s22 + $0xc8] sm:$0xff] %v3138_v48  ;;  %v3452_v10 = vpop.f32.mrb[52].mxu1 }
 0x48a   : > { %v3453_v27 = vpop.f32.mrb[53].mxu1 }
 0x48b   : > { %v3454_v43 = vadd.f32 %v3453_v27, %v3452_v10  ;;  %v3455_v11 = vpop.f32.mrb[54].mxu1 }
 0x48c   : > { %v3456_v2 = vpop.f32.mrb[55].mxu1 }
 0x48d   : > { %v3143_v42 = vadd.f32 %v3454_v43, %v6699_v6  ;;  %v3457_v14 = vadd.f32 %v3456_v2, %v3455_v11 }
 0x48f   : > { %3191 = vst [vmem:[%s6721_s22 + $0xd0] sm:$0xff] %v3143_v42  ;;  %v3146_v57 = vadd.f32 %v3457_v14, %v6699_v6 }
 0x491   : > { %3192 = vst [vmem:[%s6721_s22 + $0xd8] sm:$0xff] %v3146_v57  ;;  %v3458_v15 = vpop.f32.mrb[56].mxu1 }
 0x492   : > { %v3459_v31 = vpop.f32.mrb[57].mxu1 }
 0x493   : > { %v3460_v46 = vadd.f32 %v3459_v31, %v3458_v15  ;;  %v3461_v8 = vpop.f32.mrb[58].mxu1 }
 0x494   : > { %v3462_v26 = vpop.f32.mrb[59].mxu1 }
 0x495   : > { %v3151_v55 = vadd.f32 %v3460_v46, %v6699_v6  ;;  %v3463_v34 = vadd.f32 %v3462_v26, %v3461_v8 }
 0x497   : > { %3193 = vst [vmem:[%s6721_s22 + $0xe0] sm:$0xff] %v3151_v55  ;;  %v3154_v54 = vadd.f32 %v3463_v34, %v6699_v6 }
 0x499   : > { %3194 = vst [vmem:[%s6721_s22 + $0xe8] sm:$0xff] %v3154_v54  ;;  %v3464_v49 = vpop.f32.mrb[60].mxu1 }
 0x49a   : > { %v3465_v50 = vpop.f32.mrb[61].mxu1 }
 0x49b   : > { %v3466_v39 = vadd.f32 %v3465_v50, %v3464_v49  ;;  %v3467_v18 = vpop.f32.mrb[62].mxu1 }
 0x49c   : > { %v3468_v22 = vpop.f32.mrb[63].mxu1 }
 0x49d   : > { %v3159_v17 = vadd.f32 %v3466_v39, %v6699_v6  ;;  %v3469_v13 = vadd.f32 %v3468_v22, %v3467_v18 }
 0x49f   : > { %3195 = vst [vmem:[%s6721_s22 + $0xf0] sm:$0xff] %v3159_v17  ;;  %v3162_v5 = vadd.f32 %v3469_v13, %v6699_v6 }
 0x4a1   : > { %3196 = vst [vmem:[%s6721_s22 + $0xf8] sm:$0xff] %v3162_v5 }
 0x4a2   : > { %4003 = shalt.err (!%p4000_p1)
}
 0x4a3   : > { %s4004_s18 = scalar_lea.hbm %s6818_s30, 4096  ;;  %s4008_s22 = scalar_lea.hbm %s6874_s7, 8192 }
 0x4a4   : > { %p4005_p13 = scmp.ne.s32.totalorder %s6818_s30, %s4004_s18  ;;  %p4009_p4 = scmp.lt.u32.totalorder %s6818_s30, %s6874_s7 }
 0x4a5   : > { %p4010_p7 = scmp.lt.u32.totalorder %s4008_s22, %s4004_s18  ;;  %p4012_p11 = scmp.lt.u32.totalorder %s4004_s18, %s6818_s30 }
 0x4a6   : > { %p4006_p6 = pnand %p4005_p13, %p7065_p0 }
 0x4a7   : > { %p4011_p8 = por %p4010_p7, %p4009_p4 }
 0x4a8   : > { %p4007_p10 = pneg %p4006_p6 }
 0x4a9   : > { %p4013_p2 = por %p4012_p11, %p4011_p8 }
 0x4ab   : > { %p4014_p3 = pnand %p4013_p2, %p4007_p10 }
 0x4ad   : > { %4017 = shalt.err (!%p4014_p3)
}
 0x4ae   : > { %s4071_s17 = smov 128   ;;  %s4072_s9 = smov 8  }
 0x4af   : > { %3480 = dma.vmem_to_hbm [thread:$0]  (%p7065_p0), %s6820_s13, 4096, %s6818_s30, %s3198_s28, %s4071_s17, %s4071_s17, %s4072_s9  }
 0x4b0 PF: > { %s3226_s29 = sand.u32 1, %s4048_s24   ;;  %p7066_p5 = scmp.ne.s32.totalorder %s6896_s8, 0 }
 0x4b1   : > { %p7067_p9 = scmp.ge.s32.totalorder %s4060_s27, 2  ;;  %s3227_s10 = scalar_lea.sflag [#allocation4], %s3226_s29 }
 0x4b3   : > { %p3494_p12 = pnand %p7067_p9, %p7066_p5 }
 0x4b5   : > { %4043 = dma.done.wait (!%p3494_p12), %s3227_s10, 4096  }
 0x4b6   : > { %4045 = vsyncadd (!%p3494_p12), %s3227_s10, 4294963200  ;;  %p21_p1 = scmp.ge.s32.totalorder %s4226_s16, 4   ;;  %s7068_s24 = smov %s4052_s25 }
 0x4b7   : > { %s7069_s25 = smov %s4056_s26  ;;  %s7070_s26 = smov %s4235_s19 }
 0x4b8   : > { %s7071_s27 = smov %s4226_s16  ;;  %23 = sbr.rel (!%p21_p1) target bundleno = 6 (0x6), region = 101 }
 0x4bf   :  { %3232 = vsyncpa [#allocation3], 1 }
 0x4c0   :  { %3234 = vsyncpa [#allocation3 + $0x1], 1 }
 0x4c1   :  { %3235 = vsyncpa [#allocation6], 1 }
 0x4c2   :  { %3236 = vsyncpa [#allocation4], 1 }
 0x4c3   :  { %3238 = vsyncpa [#allocation4 + $0x1], 1 }

</bundles_post_ra>
